<compile_context>
chip_gen: v7x
topology: tpu7x:2x2x1
jax: 0.10.0
libtpu: 0.0.40
codegen_flags: <defaults>
</compile_context>

<pallas_src>
import jax
import jax.numpy as jnp
from jax.experimental import pallas as pl
from jax.experimental.pallas import tpu as pltpu


def _round_up(x, m):
    return (x + m - 1) // m * m


# ---------------------------------------------------------------------------
# Weight packing (done once at init, in bf16):  (O, Ci, kh, kw) -> (kh*kw*Ci_pad, O_pad)
# with taps enumerated kh-major / kw-minor to match the in-kernel lane concatenation.
# ---------------------------------------------------------------------------
def _xavier_uniform(key, shape, fan_in, fan_out):
    limit = (6.0 / (fan_in + fan_out)) ** 0.5
    return jax.random.uniform(key, shape, jnp.float32, -limit, limit)


def _pack_conv(w_oihw, ci_pad=None, co_pad=None):
    o, ci, kh, kw = w_oihw.shape
    ci_pad = ci if ci_pad is None else ci_pad
    co_pad = o if co_pad is None else co_pad
    t = jnp.transpose(w_oihw, (2, 3, 1, 0))                       # (kh, kw, ci, o)
    t = jnp.pad(t, ((0, 0), (0, 0), (0, ci_pad - ci), (0, co_pad - o)))
    return t.reshape(kh * kw * ci_pad, co_pad).astype(jnp.bfloat16)


def _pack_convT(w_iohw, ci_pad=None, co_pad=None):
    # ConvTranspose2d(k, s=1, p) == Conv2d(k, padding=k-1-p) with spatially flipped,
    # in/out-transposed weights.  For k=2, p=1 the equivalent conv padding is 0.
    w_conv = jnp.transpose(w_iohw[:, :, ::-1, ::-1], (1, 0, 2, 3))   # (o, ci, kh, kw)
    return _pack_conv(w_conv, ci_pad=ci_pad, co_pad=co_pad)


def init_params(key, in_channels=1, out_channels=1):
    ks = jax.random.split(key, 5)
    c0 = _round_up(in_channels, 8)               # MXU K pad for the first layer
    oc_mm = _round_up(out_channels, 128)         # MXU N pad for dec2 (sliced before store)

    enc1_w = _xavier_uniform(ks[0], (32, in_channels, 2, 2), in_channels * 4, 32 * 4)
    skip_w = _xavier_uniform(ks[1], (32, 32, 3, 3), 32 * 9, 32 * 9)
    enc2_w = _xavier_uniform(ks[2], (64, 32, 2, 2), 32 * 4, 64 * 4)
    dec1_w = _xavier_uniform(ks[3], (64, 32, 2, 2), 32 * 4, 64 * 4)          # (in,out,kh,kw)
    dec2_w = _xavier_uniform(ks[4], (32, out_channels, 2, 2), out_channels * 4, 32 * 4)

    return {
        "enc1": {"w": _pack_conv(enc1_w, ci_pad=c0), "b": jnp.zeros((1, 32), jnp.float32)},
        "skip": {"w": _pack_conv(skip_w),            "b": jnp.zeros((1, 32), jnp.float32)},
        "enc2": {"w": _pack_conv(enc2_w),            "b": jnp.zeros((1, 64), jnp.float32)},
        "dec1": {"w": _pack_convT(dec1_w),           "b": jnp.zeros((1, 32), jnp.float32)},
        "dec2": {"w": _pack_convT(dec2_w, co_pad=oc_mm),
                 "b": jnp.zeros((1, oc_mm), jnp.float32)},
    }


# ---------------------------------------------------------------------------
# Fused 5-layer kernel (one grid step == one image canvas)
# ---------------------------------------------------------------------------
def _make_fused_kernel(wc, l_rows, e_rows, out_channels):
    off2 = tuple(di * wc + dj for di in range(2) for dj in range(2))
    off3 = tuple(di * wc + dj for di in range(3) for dj in range(3))

    def stage(x, w_ref, b_ref, offsets):
        # Fused, K-packed im2col: concatenate the tap-shifted row windows along lanes
        # and issue ONE bf16 MXU matmul (K = kh*kw*Ci, f32 accumulation).
        pieces = [x[off:off + l_rows, :] for off in offsets]
        lhs = pieces[0] if len(pieces) == 1 else jnp.concatenate(pieces, axis=1)
        y = jnp.dot(lhs, w_ref[...], preferred_element_type=jnp.float32)
        return jnp.maximum(y + b_ref[...], 0.0)               # bias + ReLU epilogue

    def pad_rows(a, c):
        # Append the zero halo so every tap window of the NEXT stage stays in bounds.
        return jnp.concatenate([a, jnp.zeros((e_rows, c), a.dtype)], axis=0)

    def kernel(x_ref, mask_ref,
               w1_ref, b1_ref, ws_ref, bs_ref, w2_ref, b2_ref,
               w3_ref, b3_ref, w4_ref, b4_ref, o_ref):
        x0 = x_ref[0]                                          # (L+E, C0) bf16 canvas
        # encoder1: Conv(k=2, p=1) + ReLU
        a1 = stage(x0, w1_ref, b1_ref, off2)                   # (L, 32) f32
        # Zero everything outside enc1's valid window: the only activation consumed with
        # padding>0 (skip_conv, encoder2), so its ring must be true zero even if bias!=0.
        a1 = (a1 * mask_ref[...]).astype(jnp.bfloat16)
        a1 = pad_rows(a1, 32)                                  # (L+E, 32) bf16
        # skip_conv: Conv(k=3, p=1) + ReLU   (kept f32 for the residual add)
        skip = stage(a1, ws_ref, bs_ref, off3)                 # (L, 32) f32
        # encoder2: Conv(k=2, p=1) + ReLU
        a2 = pad_rows(stage(a1, w2_ref, b2_ref, off2).astype(jnp.bfloat16), 64)
        # decoder1: ConvT(k=2, p=1) == Conv(k=2, p=0) + ReLU, then residual add
        a3 = stage(a2, w3_ref, b3_ref, off2)                   # (L, 32) f32
        s = pad_rows((a3 + skip).astype(jnp.bfloat16), 32)     # (relu(dec1) + relu(skip))
        # decoder2: ConvT(k=2, p=1) == Conv(k=2, p=0) + ReLU
        y = stage(s, w4_ref, b4_ref, off2)                     # (L, oc_mm) f32
        o_ref[0] = y[:, :out_channels]                         # narrow, minimal HBM store

    return kernel


# ---------------------------------------------------------------------------
# Forward pass (mirrors AudioModel.forward)
# ---------------------------------------------------------------------------
def audio_model_forward(params, x_nchw, out_channels=1):
    n, cin, h, w = x_nchw.shape
    c0 = params["enc1"]["w"].shape[0] // 4
    oc_mm = params["dec2"]["w"].shape[1]

    wc = _round_up(w + 3, 8)              # canvas width, multiple of 8 -> aligned row taps
    hc = h + 3                            # canvas height (covers every layer's padding)
    l_rows = hc * wc                      # rows per image canvas
    e_rows = _round_up(2 * wc + 2, 8)     # halo rows (worst tap reach: 3x3 conv)

    # The ONLY host-side layout pass: place the raw input at canvas offset (2, 2) so every
    # layer's implicit zero padding is just surrounding (zero) canvas cells.
    xh = jnp.transpose(x_nchw, (0, 2, 3, 1)).astype(jnp.bfloat16)       # NCHW -> NHWC, bf16
    canvas = jnp.zeros((n, hc, wc, c0), jnp.bfloat16)
    canvas = canvas.at[:, 2:2 + h, 2:2 + w, :cin].set(xh)
    x0 = jnp.pad(canvas.reshape(n, l_rows, c0), ((0, 0), (0, e_rows), (0, 0)))

    # encoder1 valid-window mask (rows 1..h+1, cols 1..w+1 of the canvas).
    ii = jnp.arange(hc, dtype=jnp.int32)[:, None]
    jj = jnp.arange(wc, dtype=jnp.int32)[None, :]
    mask = (((ii >= 1) & (ii <= h + 1)) & ((jj >= 1) & (jj <= w + 1)))
    mask = mask.astype(jnp.float32).reshape(l_rows, 1)

    kernel = _make_fused_kernel(wc, l_rows, e_rows, out_channels)

    def resident(shape):
        return pl.BlockSpec(shape, lambda b: (0,) * len(shape))

    in_specs = [
        pl.BlockSpec((1, l_rows + e_rows, c0), lambda b: (b, 0, 0)),     # per-image canvas
        resident((l_rows, 1)),                                           # enc1 mask
        resident(params["enc1"]["w"].shape), resident(params["enc1"]["b"].shape),
        resident(params["skip"]["w"].shape), resident(params["skip"]["b"].shape),
        resident(params["enc2"]["w"].shape), resident(params["enc2"]["b"].shape),
        resident(params["dec1"]["w"].shape), resident(params["dec1"]["b"].shape),
        resident(params["dec2"]["w"].shape), resident(params["dec2"]["b"].shape),
    ]

    # VMEM budget from the actual buffers (operand blocks are double-buffered by the
    # pipeline; in-kernel values are an upper-bound estimate), clamped for v7x's 64 MiB.
    weight_bytes = sum(p["w"].size * 2 + p["b"].size * 4 for p in params.values())
    block_bytes = ((l_rows + e_rows) * c0 * 2 + l_rows * 4
                   + l_rows * out_channels * 4 + weight_bytes)
    work_bytes = (l_rows + e_rows) * (32 + 64 + 32) * 2 \
        + l_rows * 288 * 2 + l_rows * (32 + 64 + oc_mm) * 4
    vmem_limit = int(min(max(2 * block_bytes + 2 * work_bytes + (8 << 20), 32 << 20),
                         56 << 20))

    out = pl.pallas_call(
        kernel,
        out_shape=jax.ShapeDtypeStruct((n, l_rows, out_channels), jnp.float32),
        grid=(n,),
        in_specs=in_specs,
        out_specs=pl.BlockSpec((1, l_rows, out_channels), lambda b: (b, 0, 0)),
        compiler_params=pltpu.CompilerParams(
            dimension_semantics=("parallel",),
            vmem_limit_bytes=vmem_limit,
        ),
    )(x0, mask,
      params["enc1"]["w"], params["enc1"]["b"],
      params["skip"]["w"], params["skip"]["b"],
      params["enc2"]["w"], params["enc2"]["b"],
      params["dec1"]["w"], params["dec1"]["b"],
      params["dec2"]["w"], params["dec2"]["b"])

    y = out.reshape(n, hc, wc, out_channels)[:, :h, :w, :]
    return jnp.transpose(y, (0, 3, 1, 2))                                # NHWC -> NCHW


# ---------------------------------------------------------------------------
# Plain-JAX f32 reference (same packed params) for a correctness check
# ---------------------------------------------------------------------------
def _ref_conv(x_nhwc, w2d, b, kh, kw, pad):
    k_dim, co = w2d.shape
    ci = k_dim // (kh * kw)
    wt = w2d.astype(jnp.float32).reshape(kh, kw, ci, co)
    n, h, wd, c = x_nhwc.shape
    xp = jnp.pad(x_nhwc, ((0, 0), (pad, pad), (pad, pad), (0, ci - c)))
    ho, wo = h + 2 * pad - kh + 1, wd + 2 * pad - kw + 1
    acc = jnp.zeros((n, ho, wo, co), jnp.float32)
    for di in range(kh):
        for dj in range(kw):
            acc = acc + jnp.einsum("nhwc,co->nhwo",
                                   xp[:, di:di + ho, dj:dj + wo, :], wt[di, dj])
    return jnp.maximum(acc + b.reshape(1, 1, 1, co), 0.0)


def reference_forward(params, x_nchw, out_channels=1):
    x = jnp.transpose(x_nchw, (0, 2, 3, 1)).astype(jnp.bfloat16).astype(jnp.float32)
    a1 = _ref_conv(x, params["enc1"]["w"], params["enc1"]["b"], 2, 2, 1)
    skip = _ref_conv(a1, params["skip"]["w"], params["skip"]["b"], 3, 3, 1)
    a2 = _ref_conv(a1, params["enc2"]["w"], params["enc2"]["b"], 2, 2, 1)
    a3 = _ref_conv(a2, params["dec1"]["w"], params["dec1"]["b"], 2, 2, 0) + skip
    y = _ref_conv(a3, params["dec2"]["w"], params["dec2"]["b"], 2, 2, 0)
    return jnp.transpose(y[..., :out_channels], (0, 3, 1, 2))


if __name__ == "__main__":
    key = jax.random.PRNGKey(0)
    kx, kp = jax.random.split(key)
    x = jax.random.normal(kx, (2, 1, 16, 16), jnp.float32)    # NCHW, like PyTorch
    params = init_params(kp, in_channels=1, out_channels=1)

    fwd = jax.jit(audio_model_forward)
    out = jax.block_until_ready(fwd(params, x))

    assert out.shape == (2, 1, 16, 16), out.shape
    assert out.dtype == jnp.float32

    # Correctness vs a plain-JAX f32 reference (tolerance covers bf16 MXU inputs and
    # bf16 inter-layer activation storage).
    ref = jax.block_until_ready(jax.jit(reference_forward)(params, x))
    err = float(jnp.max(jnp.abs(out - ref)))
    assert err < 1e-1, f"max |out - ref| = {err}"

    print("KERNEL_OK")
</pallas_src>

<mosaic_0001>
module attributes {stable_mosaic.version = 11 : i64} {
  func.func @kernel(%arg0: i32, %arg1: memref<1x512x8xbf16, #tpu.memory_space<vmem>>, %arg2: memref<456x1xf32, #tpu.memory_space<vmem>>, %arg3: memref<32x32xbf16, #tpu.memory_space<vmem>>, %arg4: memref<1x32xf32, #tpu.memory_space<vmem>>, %arg5: memref<288x32xbf16, #tpu.memory_space<vmem>>, %arg6: memref<1x32xf32, #tpu.memory_space<vmem>>, %arg7: memref<128x64xbf16, #tpu.memory_space<vmem>>, %arg8: memref<1x64xf32, #tpu.memory_space<vmem>>, %arg9: memref<256x32xbf16, #tpu.memory_space<vmem>>, %arg10: memref<1x32xf32, #tpu.memory_space<vmem>>, %arg11: memref<128x128xbf16, #tpu.memory_space<vmem>>, %arg12: memref<1x128xf32, #tpu.memory_space<vmem>>, %arg13: memref<1x456x1xf32, #tpu.memory_space<vmem>>) attributes {dimension_semantics = [#tpu.dimension_semantics<parallel>], iteration_bounds = array<i64: 2>, scalar_prefetch = 0 : i64, scratch_operands = 0 : i64, tpu.core_type = #tpu.core_type<tc>, window_params = [{transform_indices = @transform_0, window_bounds = array<i64: 1, 512, 8>}, {pipeline_mode = #tpu.pipeline_mode<synchronous>, transform_indices = @transform_1, window_bounds = array<i64: 456, 1>}, {pipeline_mode = #tpu.pipeline_mode<synchronous>, transform_indices = @transform_2, window_bounds = array<i64: 32, 32>}, {pipeline_mode = #tpu.pipeline_mode<synchronous>, transform_indices = @transform_3, window_bounds = array<i64: 1, 32>}, {pipeline_mode = #tpu.pipeline_mode<synchronous>, transform_indices = @transform_4, window_bounds = array<i64: 288, 32>}, {pipeline_mode = #tpu.pipeline_mode<synchronous>, transform_indices = @transform_5, window_bounds = array<i64: 1, 32>}, {pipeline_mode = #tpu.pipeline_mode<synchronous>, transform_indices = @transform_6, window_bounds = array<i64: 128, 64>}, {pipeline_mode = #tpu.pipeline_mode<synchronous>, transform_indices = @transform_7, window_bounds = array<i64: 1, 64>}, {pipeline_mode = #tpu.pipeline_mode<synchronous>, transform_indices = @transform_8, window_bounds = array<i64: 256, 32>}, {pipeline_mode = #tpu.pipeline_mode<synchronous>, transform_indices = @transform_9, window_bounds = array<i64: 1, 32>}, {pipeline_mode = #tpu.pipeline_mode<synchronous>, transform_indices = @transform_10, window_bounds = array<i64: 128, 128>}, {pipeline_mode = #tpu.pipeline_mode<synchronous>, transform_indices = @transform_11, window_bounds = array<i64: 1, 128>}, {transform_indices = @transform_12, window_bounds = array<i64: 1, 456, 1>}]} {
    %c0 = arith.constant 0 : index
    %c0_0 = arith.constant 0 : index
    %c0_1 = arith.constant 0 : index
    %0 = vector.load %arg1[%c0, %c0_0, %c0_1] : memref<1x512x8xbf16, #tpu.memory_space<vmem>>, vector<1x512x8xbf16>
    %1 = vector.shape_cast %0 : vector<1x512x8xbf16> to vector<512x8xbf16>
    %2 = vector.extract_strided_slice %1 {offsets = [0, 0], sizes = [456, 8], strides = [1, 1]} : vector<512x8xbf16> to vector<456x8xbf16>
    %3 = vector.extract_strided_slice %1 {offsets = [1, 0], sizes = [456, 8], strides = [1, 1]} : vector<512x8xbf16> to vector<456x8xbf16>
    %4 = vector.extract_strided_slice %1 {offsets = [24, 0], sizes = [456, 8], strides = [1, 1]} : vector<512x8xbf16> to vector<456x8xbf16>
    %5 = vector.extract_strided_slice %1 {offsets = [25, 0], sizes = [456, 8], strides = [1, 1]} : vector<512x8xbf16> to vector<456x8xbf16>
    %6 = tpu.concatenate %2, %3, %4, %5 in 1 : vector<456x8xbf16>, vector<456x8xbf16>, vector<456x8xbf16>, vector<456x8xbf16> -> vector<456x32xbf16>
    %c0_2 = arith.constant 0 : index
    %c0_3 = arith.constant 0 : index
    %7 = vector.load %arg3[%c0_2, %c0_3] : memref<32x32xbf16, #tpu.memory_space<vmem>>, vector<32x32xbf16>
    %cst = arith.constant dense<0.000000e+00> : vector<456x32xf32>
    %8 = tpu.matmul %6, %7, %cst {dimension_numbers = #tpu.dot_dimension_numbers<[1], [0], [0], [1], [0, 0, 1, 1], [], []>} : vector<456x32xbf16>, vector<32x32xbf16>, vector<456x32xf32> -> vector<456x32xf32>
    %c0_4 = arith.constant 0 : index
    %c0_5 = arith.constant 0 : index
    %9 = vector.load %arg4[%c0_4, %c0_5] : memref<1x32xf32, #tpu.memory_space<vmem>>, vector<1x32xf32>
    %10 = vector.broadcast %9 : vector<1x32xf32> to vector<456x32xf32>
    %11 = arith.addf %8, %10 : vector<456x32xf32>
    %cst_6 = arith.constant 0.000000e+00 : f32
    %12 = vector.broadcast %cst_6 : f32 to vector<456x32xf32>
    %13 = arith.maximumf %11, %12 : vector<456x32xf32>
    %c0_7 = arith.constant 0 : index
    %c0_8 = arith.constant 0 : index
    %14 = vector.load %arg2[%c0_7, %c0_8] : memref<456x1xf32, #tpu.memory_space<vmem>>, vector<456x1xf32>
    %15 = vector.broadcast %14 : vector<456x1xf32> to vector<456x32xf32>
    %16 = arith.mulf %13, %15 : vector<456x32xf32>
    %17 = arith.truncf %16 : vector<456x32xf32> to vector<456x32xbf16>
    %cst_9 = arith.constant 0.000000e+00 : bf16
    %18 = vector.broadcast %cst_9 : bf16 to vector<56x32xbf16>
    %19 = tpu.concatenate %17, %18 in 0 : vector<456x32xbf16>, vector<56x32xbf16> -> vector<512x32xbf16>
    %20 = vector.extract_strided_slice %19 {offsets = [0, 0], sizes = [456, 32], strides = [1, 1]} : vector<512x32xbf16> to vector<456x32xbf16>
    %21 = vector.extract_strided_slice %19 {offsets = [1, 0], sizes = [456, 32], strides = [1, 1]} : vector<512x32xbf16> to vector<456x32xbf16>
    %22 = vector.extract_strided_slice %19 {offsets = [2, 0], sizes = [456, 32], strides = [1, 1]} : vector<512x32xbf16> to vector<456x32xbf16>
    %23 = vector.extract_strided_slice %19 {offsets = [24, 0], sizes = [456, 32], strides = [1, 1]} : vector<512x32xbf16> to vector<456x32xbf16>
    %24 = vector.extract_strided_slice %19 {offsets = [25, 0], sizes = [456, 32], strides = [1, 1]} : vector<512x32xbf16> to vector<456x32xbf16>
    %25 = vector.extract_strided_slice %19 {offsets = [26, 0], sizes = [456, 32], strides = [1, 1]} : vector<512x32xbf16> to vector<456x32xbf16>
    %26 = vector.extract_strided_slice %19 {offsets = [48, 0], sizes = [456, 32], strides = [1, 1]} : vector<512x32xbf16> to vector<456x32xbf16>
    %27 = vector.extract_strided_slice %19 {offsets = [49, 0], sizes = [456, 32], strides = [1, 1]} : vector<512x32xbf16> to vector<456x32xbf16>
    %28 = vector.extract_strided_slice %19 {offsets = [50, 0], sizes = [456, 32], strides = [1, 1]} : vector<512x32xbf16> to vector<456x32xbf16>
    %29 = tpu.concatenate %20, %21, %22, %23, %24, %25, %26, %27, %28 in 1 : vector<456x32xbf16>, vector<456x32xbf16>, vector<456x32xbf16>, vector<456x32xbf16>, vector<456x32xbf16>, vector<456x32xbf16>, vector<456x32xbf16>, vector<456x32xbf16>, vector<456x32xbf16> -> vector<456x288xbf16>
    %c0_10 = arith.constant 0 : index
    %c0_11 = arith.constant 0 : index
    %30 = vector.load %arg5[%c0_10, %c0_11] : memref<288x32xbf16, #tpu.memory_space<vmem>>, vector<288x32xbf16>
    %cst_12 = arith.constant dense<0.000000e+00> : vector<456x32xf32>
    %31 = tpu.matmul %29, %30, %cst_12 {dimension_numbers = #tpu.dot_dimension_numbers<[1], [0], [0], [1], [0, 0, 1, 1], [], []>} : vector<456x288xbf16>, vector<288x32xbf16>, vector<456x32xf32> -> vector<456x32xf32>
    %c0_13 = arith.constant 0 : index
    %c0_14 = arith.constant 0 : index
    %32 = vector.load %arg6[%c0_13, %c0_14] : memref<1x32xf32, #tpu.memory_space<vmem>>, vector<1x32xf32>
    %33 = vector.broadcast %32 : vector<1x32xf32> to vector<456x32xf32>
    %34 = arith.addf %31, %33 : vector<456x32xf32>
    %cst_15 = arith.constant 0.000000e+00 : f32
    %35 = vector.broadcast %cst_15 : f32 to vector<456x32xf32>
    %36 = arith.maximumf %34, %35 : vector<456x32xf32>
    %37 = vector.extract_strided_slice %19 {offsets = [0, 0], sizes = [456, 32], strides = [1, 1]} : vector<512x32xbf16> to vector<456x32xbf16>
    %38 = vector.extract_strided_slice %19 {offsets = [1, 0], sizes = [456, 32], strides = [1, 1]} : vector<512x32xbf16> to vector<456x32xbf16>
    %39 = vector.extract_strided_slice %19 {offsets = [24, 0], sizes = [456, 32], strides = [1, 1]} : vector<512x32xbf16> to vector<456x32xbf16>
    %40 = vector.extract_strided_slice %19 {offsets = [25, 0], sizes = [456, 32], strides = [1, 1]} : vector<512x32xbf16> to vector<456x32xbf16>
    %41 = tpu.concatenate %37, %38, %39, %40 in 1 : vector<456x32xbf16>, vector<456x32xbf16>, vector<456x32xbf16>, vector<456x32xbf16> -> vector<456x128xbf16>
    %c0_16 = arith.constant 0 : index
    %c0_17 = arith.constant 0 : index
    %42 = vector.load %arg7[%c0_16, %c0_17] : memref<128x64xbf16, #tpu.memory_space<vmem>>, vector<128x64xbf16>
    %cst_18 = arith.constant dense<0.000000e+00> : vector<456x64xf32>
    %43 = tpu.matmul %41, %42, %cst_18 {dimension_numbers = #tpu.dot_dimension_numbers<[1], [0], [0], [1], [0, 0, 1, 1], [], []>} : vector<456x128xbf16>, vector<128x64xbf16>, vector<456x64xf32> -> vector<456x64xf32>
    %c0_19 = arith.constant 0 : index
    %c0_20 = arith.constant 0 : index
    %44 = vector.load %arg8[%c0_19, %c0_20] : memref<1x64xf32, #tpu.memory_space<vmem>>, vector<1x64xf32>
    %45 = vector.broadcast %44 : vector<1x64xf32> to vector<456x64xf32>
    %46 = arith.addf %43, %45 : vector<456x64xf32>
    %cst_21 = arith.constant 0.000000e+00 : f32
    %47 = vector.broadcast %cst_21 : f32 to vector<456x64xf32>
    %48 = arith.maximumf %46, %47 : vector<456x64xf32>
    %49 = arith.truncf %48 : vector<456x64xf32> to vector<456x64xbf16>
    %cst_22 = arith.constant 0.000000e+00 : bf16
    %50 = vector.broadcast %cst_22 : bf16 to vector<56x64xbf16>
    %51 = tpu.concatenate %49, %50 in 0 : vector<456x64xbf16>, vector<56x64xbf16> -> vector<512x64xbf16>
    %52 = vector.extract_strided_slice %51 {offsets = [0, 0], sizes = [456, 64], strides = [1, 1]} : vector<512x64xbf16> to vector<456x64xbf16>
    %53 = vector.extract_strided_slice %51 {offsets = [1, 0], sizes = [456, 64], strides = [1, 1]} : vector<512x64xbf16> to vector<456x64xbf16>
    %54 = vector.extract_strided_slice %51 {offsets = [24, 0], sizes = [456, 64], strides = [1, 1]} : vector<512x64xbf16> to vector<456x64xbf16>
    %55 = vector.extract_strided_slice %51 {offsets = [25, 0], sizes = [456, 64], strides = [1, 1]} : vector<512x64xbf16> to vector<456x64xbf16>
    %56 = tpu.concatenate %52, %53, %54, %55 in 1 : vector<456x64xbf16>, vector<456x64xbf16>, vector<456x64xbf16>, vector<456x64xbf16> -> vector<456x256xbf16>
    %c0_23 = arith.constant 0 : index
    %c0_24 = arith.constant 0 : index
    %57 = vector.load %arg9[%c0_23, %c0_24] : memref<256x32xbf16, #tpu.memory_space<vmem>>, vector<256x32xbf16>
    %cst_25 = arith.constant dense<0.000000e+00> : vector<456x32xf32>
    %58 = tpu.matmul %56, %57, %cst_25 {dimension_numbers = #tpu.dot_dimension_numbers<[1], [0], [0], [1], [0, 0, 1, 1], [], []>} : vector<456x256xbf16>, vector<256x32xbf16>, vector<456x32xf32> -> vector<456x32xf32>
    %c0_26 = arith.constant 0 : index
    %c0_27 = arith.constant 0 : index
    %59 = vector.load %arg10[%c0_26, %c0_27] : memref<1x32xf32, #tpu.memory_space<vmem>>, vector<1x32xf32>
    %60 = vector.broadcast %59 : vector<1x32xf32> to vector<456x32xf32>
    %61 = arith.addf %58, %60 : vector<456x32xf32>
    %cst_28 = arith.constant 0.000000e+00 : f32
    %62 = vector.broadcast %cst_28 : f32 to vector<456x32xf32>
    %63 = arith.maximumf %61, %62 : vector<456x32xf32>
    %64 = arith.addf %63, %36 : vector<456x32xf32>
    %65 = arith.truncf %64 : vector<456x32xf32> to vector<456x32xbf16>
    %cst_29 = arith.constant 0.000000e+00 : bf16
    %66 = vector.broadcast %cst_29 : bf16 to vector<56x32xbf16>
    %67 = tpu.concatenate %65, %66 in 0 : vector<456x32xbf16>, vector<56x32xbf16> -> vector<512x32xbf16>
    %68 = vector.extract_strided_slice %67 {offsets = [0, 0], sizes = [456, 32], strides = [1, 1]} : vector<512x32xbf16> to vector<456x32xbf16>
    %69 = vector.extract_strided_slice %67 {offsets = [1, 0], sizes = [456, 32], strides = [1, 1]} : vector<512x32xbf16> to vector<456x32xbf16>
    %70 = vector.extract_strided_slice %67 {offsets = [24, 0], sizes = [456, 32], strides = [1, 1]} : vector<512x32xbf16> to vector<456x32xbf16>
    %71 = vector.extract_strided_slice %67 {offsets = [25, 0], sizes = [456, 32], strides = [1, 1]} : vector<512x32xbf16> to vector<456x32xbf16>
    %72 = tpu.concatenate %68, %69, %70, %71 in 1 : vector<456x32xbf16>, vector<456x32xbf16>, vector<456x32xbf16>, vector<456x32xbf16> -> vector<456x128xbf16>
    %c0_30 = arith.constant 0 : index
    %c0_31 = arith.constant 0 : index
    %73 = vector.load %arg11[%c0_30, %c0_31] : memref<128x128xbf16, #tpu.memory_space<vmem>>, vector<128x128xbf16>
    %cst_32 = arith.constant dense<0.000000e+00> : vector<456x128xf32>
    %74 = tpu.matmul %72, %73, %cst_32 {dimension_numbers = #tpu.dot_dimension_numbers<[1], [0], [0], [1], [0, 0, 1, 1], [], []>} : vector<456x128xbf16>, vector<128x128xbf16>, vector<456x128xf32> -> vector<456x128xf32>
    %c0_33 = arith.constant 0 : index
    %c0_34 = arith.constant 0 : index
    %75 = vector.load %arg12[%c0_33, %c0_34] : memref<1x128xf32, #tpu.memory_space<vmem>>, vector<1x128xf32>
    %76 = vector.broadcast %75 : vector<1x128xf32> to vector<456x128xf32>
    %77 = arith.addf %74, %76 : vector<456x128xf32>
    %cst_35 = arith.constant 0.000000e+00 : f32
    %78 = vector.broadcast %cst_35 : f32 to vector<456x128xf32>
    %79 = arith.maximumf %77, %78 : vector<456x128xf32>
    %80 = vector.extract_strided_slice %79 {offsets = [0, 0], sizes = [456, 1], strides = [1, 1]} : vector<456x128xf32> to vector<456x1xf32>
    %c0_36 = arith.constant 0 : index
    %c0_37 = arith.constant 0 : index
    %c0_38 = arith.constant 0 : index
    %81 = vector.load %arg13[%c0_36, %c0_37, %c0_38] : memref<1x456x1xf32, #tpu.memory_space<vmem>>, vector<1x456x1xf32>
    %82 = vector.shape_cast %81 : vector<1x456x1xf32> to vector<456x1xf32>
    %83 = vector.shape_cast %80 : vector<456x1xf32> to vector<1x456x1xf32>
    tpu.vector_store %arg13[%c0_36, %c0_37, %c0_38], %83 {strides = array<i32>} : memref<1x456x1xf32, #tpu.memory_space<vmem>>, vector<1x456x1xf32>,
    return
  }
  func.func @transform_0(%arg0: i32) -> (i32, i32, i32) {
    %c0_i32 = arith.constant 0 : i32
    %c0_i32_0 = arith.constant 0 : i32
    %c0_i32_1 = arith.constant 0 : i32
    return %arg0, %c0_i32, %c0_i32_0 : i32, i32, i32
  }
  func.func @transform_1(%arg0: i32) -> (i32, i32) {
    %c0_i32 = arith.constant 0 : i32
    %c0_i32_0 = arith.constant 0 : i32
    %c0_i32_1 = arith.constant 0 : i32
    return %c0_i32, %c0_i32_0 : i32, i32
  }
  func.func @transform_2(%arg0: i32) -> (i32, i32) {
    %c0_i32 = arith.constant 0 : i32
    %c0_i32_0 = arith.constant 0 : i32
    %c0_i32_1 = arith.constant 0 : i32
    return %c0_i32, %c0_i32_0 : i32, i32
  }
  func.func @transform_3(%arg0: i32) -> (i32, i32) {
    %c0_i32 = arith.constant 0 : i32
    %c0_i32_0 = arith.constant 0 : i32
    %c0_i32_1 = arith.constant 0 : i32
    return %c0_i32, %c0_i32_0 : i32, i32
  }
  func.func @transform_4(%arg0: i32) -> (i32, i32) {
    %c0_i32 = arith.constant 0 : i32
    %c0_i32_0 = arith.constant 0 : i32
    %c0_i32_1 = arith.constant 0 : i32
    return %c0_i32, %c0_i32_0 : i32, i32
  }
  func.func @transform_5(%arg0: i32) -> (i32, i32) {
    %c0_i32 = arith.constant 0 : i32
    %c0_i32_0 = arith.constant 0 : i32
    %c0_i32_1 = arith.constant 0 : i32
    return %c0_i32, %c0_i32_0 : i32, i32
  }
  func.func @transform_6(%arg0: i32) -> (i32, i32) {
    %c0_i32 = arith.constant 0 : i32
    %c0_i32_0 = arith.constant 0 : i32
    %c0_i32_1 = arith.constant 0 : i32
    return %c0_i32, %c0_i32_0 : i32, i32
  }
  func.func @transform_7(%arg0: i32) -> (i32, i32) {
    %c0_i32 = arith.constant 0 : i32
    %c0_i32_0 = arith.constant 0 : i32
    %c0_i32_1 = arith.constant 0 : i32
    return %c0_i32, %c0_i32_0 : i32, i32
  }
  func.func @transform_8(%arg0: i32) -> (i32, i32) {
    %c0_i32 = arith.constant 0 : i32
    %c0_i32_0 = arith.constant 0 : i32
    %c0_i32_1 = arith.constant 0 : i32
    return %c0_i32, %c0_i32_0 : i32, i32
  }
  func.func @transform_9(%arg0: i32) -> (i32, i32) {
    %c0_i32 = arith.constant 0 : i32
    %c0_i32_0 = arith.constant 0 : i32
    %c0_i32_1 = arith.constant 0 : i32
    return %c0_i32, %c0_i32_0 : i32, i32
  }
  func.func @transform_10(%arg0: i32) -> (i32, i32) {
    %c0_i32 = arith.constant 0 : i32
    %c0_i32_0 = arith.constant 0 : i32
    %c0_i32_1 = arith.constant 0 : i32
    return %c0_i32, %c0_i32_0 : i32, i32
  }
  func.func @transform_11(%arg0: i32) -> (i32, i32) {
    %c0_i32 = arith.constant 0 : i32
    %c0_i32_0 = arith.constant 0 : i32
    %c0_i32_1 = arith.constant 0 : i32
    return %c0_i32, %c0_i32_0 : i32, i32
  }
  func.func @transform_12(%arg0: i32) -> (i32, i32, i32) {
    %c0_i32 = arith.constant 0 : i32
    %c0_i32_0 = arith.constant 0 : i32
    %c0_i32_1 = arith.constant 0 : i32
    return %arg0, %c0_i32, %c0_i32_0 : i32, i32, i32
  }
}

</mosaic_0001>

<bundles_post_ra>
// kernel: audio_model_forward.1
= control target key start
LH: loop header
LB: loop body
LE: loop exit
PB: predicated region body
PF: predicated region fallthrough
CT: control target
= control target key end

     0   :  { %s8983_s21 = smov 0   ;;  %s13674_s0 = inlined_call_operand.vmem [shape: bf16[2,512,8], index: 0, kind: input, shape index: {}]   ;;  %s13675_s1 = inlined_call_operand.vmem [shape: f32[456,1], index: 1, kind: input, shape index: {}]   ;;  %s13676_s2 = inlined_call_operand.vmem [shape: bf16[32,32], index: 2, kind: input, shape index: {}]   ;;  %s13677_s3 = inlined_call_operand.vmem [shape: f32[1,32], index: 3, kind: input, shape index: {}]   ;;  %s13678_s4 = inlined_call_operand.vmem [shape: bf16[288,32], index: 4, kind: input, shape index: {}]   ;;  %s13679_s5 = inlined_call_operand.vmem [shape: f32[1,32], index: 5, kind: input, shape index: {}]   ;;  %s13680_s6 = inlined_call_operand.vmem [shape: bf16[128,64], index: 6, kind: input, shape index: {}]   ;;  %s13681_s7 = inlined_call_operand.vmem [shape: f32[1,64], index: 7, kind: input, shape index: {}]   ;;  %s13682_s8 = inlined_call_operand.vmem [shape: bf16[256,32], index: 8, kind: input, shape index: {}]   ;;  %s13683_s9 = inlined_call_operand.vmem [shape: f32[1,32], index: 9, kind: input, shape index: {}]   ;;  %s13684_s10 = inlined_call_operand.vmem [shape: bf16[128,128], index: 10, kind: input, shape index: {}]   ;;  %s13685_s11 = inlined_call_operand.vmem [shape: f32[1,128], index: 11, kind: input, shape index: {}]   ;;  %s13686_s12 = inlined_call_operand.vmem [shape: f32[2,456,1], index: 12, kind: output, shape index: {}]  }
   0x1 LB: > { %s7742_s22 = sadd.s32 4294967295, %s8907_s21   ;;  %p7746_p0 = scmp.ge.s32.totalorder %s8907_s21, 1  ;;  %s8907_s21 = sphi %s8983_s21, %s22_s21  }
   0x2   : > { %p362_p1 = scmp.lt.s32.totalorder %s8907_s21, 3 }
   0x4   : > { %p363_p2 = pnand %p7746_p0, %p362_p1 }
   0x6   : > { %366 = sbr.rel (%p363_p2) target bundleno = 1813 (0x715), region = 68 }
   0xd   : > { %p404_p3 = scmp.lt.s32.totalorder %s7742_s22, 1  ;;  %v8823_v0 = vld [vmem:[%s13676_s2] sm:$0xff]   ;;  %v13689_v1 = vmov 0.0   ;;  %v8826_v2 = vld [vmem:[%s13676_s2 + $0x8] sm:$0xff]   ;;  %vm622_vm0 = vsmask.f32 7424 }
   0xe   : > { %8064 = vmatprep.subr.bf16.mxu0 %v13689_v1  ;;  %s8910_s13 = smov 16   ;;  %s8911_s14 = smov 24   ;;  %vm8913_vm1 = vmmov 0   ;;  %vm1295_vm2 = vcmask 64512   ;;  %vm1355_vm3 = vcmask 130048   ;;  %vm1414_vm4 = vcmask 195584  }
   0xf   : > { %s13929_s22 = smov (!%p404_p3, %s7742_s22), 1  ;;  %8065 = vmatpush3.bf16.msra.mxu0 %v8823_v0  ;;  %s8912_s15 = smov 8   ;;  %8068 = vmatprep.mubr.msk.bf16.mxu0 %vm8913_vm1, %v13689_v1  ;;  %vm1496_vm5 = vcmask 261120   ;;  %vm2625_vm6 = vcmask 1046528   ;;  %vm2304_vm7 = vcmask 1043456   ;;  %vm2979_vm8 = vcmask 1042432  }
  0x10   : > { %8066 = vmatprep.subr.bf16.mxu0 %v13689_v1  ;;  %s7927_s27 = sshll.u32 %s13929_s22, 8  ;;  %s8915_s20 = smov 64   ;;  %vm2858_vm9 = vsmask.f32 3328  ;;  %vm3271_vm10 = vcmask 523264   ;;  %vm3330_vm11 = vcmask 785408  }
  0x11   : > { %s9005_s30 = scalar_lea.vmem %s13674_s0, %s7927_s27  ;;  %s8916_s27 = smov 32   ;;  %vm7629_vm12 = vcmask 7168  }
  0x12   : > { %v418_v3 = vld [vmem:[%s9005_s30 + $0xc] sm:$0xf]  ;;  %v419_v4 = vld [vmem:[%s9005_s30 + $0x10] sm:$0xf]  ;;  %v417_v5 = vld [vmem:[%s9005_s30 + $0x8] sm:$0xf] }
  0x13   : > { %8067 = vmatpush3.bf16.msra.mxu0 %v8826_v2  ;;  %v7780_v6 = vcombine.low %v418_v3, %v419_v4  ;;  %v9010_v7 = vcombine.low %v417_v5, %v418_v3  ;;  %v422_v8 = vld [vmem:[%s9005_s30 + $0x1c] sm:$0xf]  ;;  %v423_v9 = vld [vmem:[%s9005_s30 + $0x20] sm:$0xf]  ;;  %v424_v10 = vld [vmem:[%s9005_s30 + $0x24] sm:$0xf] }
  0x14   : > { %8304 = vmatprep.subr.bf16.mxu0 %v13689_v1  ;;  %v425_v11 = vld [vmem:[%s9005_s30 + $0x28] sm:$0xf]  ;;  %v7782_v12 = vcombine.low %v422_v8, %v423_v9  ;;  %v420_v13 = vld [vmem:[%s9005_s30 + $0x14] sm:$0xf]  ;;  %v9019_v15 = vcombine.low %v423_v9, %v424_v10  ;;  %v421_v17 = vld [vmem:[%s9005_s30 + $0x18] sm:$0xf] }
  0x15   : > { %945 = vrot.lane.b32.xlu0 %v7780_v6, %s8910_s13  ;;  %v1009_v14 = vshll.u32 %v7780_v6, 16  ;;  %v9021_v16 = vcombine.low %v424_v10, %v425_v11  ;;  %v9024_v18 = vcombine.low %v419_v4, %v420_v13  ;;  %v9027_v19 = vld [vmem:[%s9005_s30] sm:$0xff]   ;;  %v9030_v20 = vcombine.low %v421_v17, %v422_v8  ;;  %v426_v36 = vld [vmem:[%s9005_s30 + $0x2c] sm:$0xf]  ;;  %v427_v45 = vld [vmem:[%s9005_s30 + $0x30] sm:$0xf] }
  0x16   : > { %949 = vrot.lane.b32.xlu1 %v7782_v12, %s8910_s13  ;;  %v7781_v21 = vcombine.low %v420_v13, %v421_v17  ;;  %v1007_v22 = vshrl.u32 %v7780_v6, 16  ;;  %v631_v23 = vshll.u32 %v9010_v7, 16  ;;  %v624_v25 = vshrl.u32 %v9027_v19, 16  ;;  %v428_v59 = vld [vmem:[%s9005_s30 + $0x34] sm:$0xf] }
  0x17   : > { %v1011_v24 = vrot.slane %v1009_v14, 1  ;;  %v626_v26 = vshll.u32 %v9027_v19, 16  ;;  %v635_v27 = vshrl.u32 %v9010_v7, 16  ;;  %v639_v30 = vshll.u32 %v9024_v18, 16  ;;  %v429_v60 = vld [vmem:[%s9005_s30 + $0x38] sm:$0xf] }
  0x18   : > { %v1014_v28 = vshll.u32 %v7781_v21, 16  ;;  %v633_v29 = vrot.slane %v631_v23, 1  ;;  %v643_v31 = vshrl.u32 %v9024_v18, 16  ;;  %v647_v34 = vshll.u32 %v9030_v20, 16 }
  0x19   : > { %947 = vrot.lane.b32.xlu0 %v7781_v21, %s8910_s13  ;;  %v1012_v32 = vor.u32 %v1011_v24, %v1007_v22  ;;  %v628_v33 = vrot.slane %v626_v26, 1  ;;  %v1018_v35 = vshrl.u32 %v7781_v21, 16  ;;  %v641_v39 = vrot.slane %v639_v30, 1  ;;  %v431_v22 = vld [vmem:[%s9005_s30 + $0x40] sm:$0xf] }
  0x1a   : > { %v1016_v37 = vrot.slane %v1014_v28, 1  ;;  %v637_v38 = vor.u32 %v635_v27, %v633_v29  ;;  %v1022_v40 = vshll.u32 %v7782_v12, 16  ;;  %v649_v42 = vrot.slane %v647_v34, 1 }
  0x1b   : > { %v629_v41 = vor.u32 %v628_v33, %v624_v25  ;;  %v1026_v43 = vshrl.u32 %v7782_v12, 16  ;;  %v1030_v44 = vshll.u32 %v9021_v16, 16  ;;  %v645_v47 = vor.u32 %v643_v31, %v641_v39  ;;  %v430_v12 = vld [vmem:[%s9005_s30 + $0x3c] sm:$0xf]  ;;  %v432_v31 = vld [vmem:[%s9005_s30 + $0x44] sm:$0xf] }
  0x1c   : > { %v1017_v46 = vsel %vm622_vm0, %v1012_v32, %v1016_v37  ;;  %v642_v49 = vsel %vm622_vm0, %v637_v38, %v641_v39  ;;  %v1024_v50 = vrot.slane %v1022_v40, 1  ;;  %v1020_v51 = vor.u32 %v1018_v35, %v1016_v37  ;;  %v433_v32 = vld [vmem:[%s9005_s30 + $0x48] sm:$0xf] }
  0x1d   : > { %1237 = vrot.lane.b32.xlu1 %v1017_v46, %s8911_s14  ;;  %v634_v48 = vsel %vm622_vm0, %v629_v41, %v633_v29  ;;  %v651_v52 = vshrl.u32 %v9030_v20, 16  ;;  %v655_v53 = vshll.u32 %v9019_v15, 16  ;;  %v7784_v54 = vcombine.low %v426_v36, %v427_v45 }
  0x1e   : > { %854 = vrot.lane.b32.xlu0 %v634_v48, %s8912_s15  ;;  %v9050_v55 = vcombine.low %v425_v11, %v426_v36  ;;  %v650_v56 = vsel %vm622_vm0, %v645_v47, %v649_v42  ;;  %v1028_v57 = vor.u32 %v1026_v43, %v1024_v50  ;;  %v1032_v58 = vrot.slane %v1030_v44, 1  ;;  %v434_v44 = vld [vmem:[%s9005_s30 + $0x4c] sm:$0xf] }
  0x1f   : > { %v1034_v61 = vshrl.u32 %v9021_v16, 16  ;;  %v1025_v62 = vsel %vm622_vm0, %v1020_v51, %v1024_v50  ;;  %v653_v63 = vor.u32 %v651_v52, %v649_v42  ;;  %v657_v0 = vrot.slane %v655_v53, 1 }
  0x20   : > { %v1038_v2 = vshll.u32 %v7784_v54, 16  ;;  %v1033_v3 = vsel %vm622_vm0, %v1028_v57, %v1032_v58  ;;  %v659_v4 = vshrl.u32 %v9019_v15, 16  ;;  %v663_v5 = vshll.u32 %v9050_v55, 16 }
  0x21   : > { %856 = vrot.lane.b32.xlu1 %v642_v49, %s8912_s15  ;;  %v7785_v6 = vcombine.low %v428_v59, %v429_v60  ;;  %v658_v8 = vsel %vm622_vm0, %v653_v63, %v657_v0  ;;  %v1036_v9 = vor.u32 %v1034_v61, %v1032_v58  ;;  %v9065_v11 = vcombine.low %v427_v45, %v428_v59  ;;  %v435_v45 = vld [vmem:[%s9005_s30 + $0x50] sm:$0xf]  ;;  %v436_v59 = vld [vmem:[%s9005_s30 + $0x54] sm:$0xf] }
  0x22   : > { %858 = vrot.lane.b32.xlu0 %v650_v56, %s8912_s15  ;;  %v1040_v10 = vrot.slane %v1038_v2, 1  ;;  %v661_v13 = vor.u32 %v659_v4, %v657_v0  ;;  %v665_v14 = vrot.slane %v663_v5, 1  ;;  %v1042_v17 = vshrl.u32 %v7784_v54, 16 }
  0x23   : > { %v1046_v21 = vshll.u32 %v7785_v6, 16  ;;  %v667_v24 = vshrl.u32 %v9050_v55, 16  ;;  %v671_v25 = vshll.u32 %v9065_v11, 16  ;;  %v7786_v26 = vcombine.low %v430_v12, %v431_v22 }
  0x24   : > { %v1041_v23 = vsel %vm622_vm0, %v1036_v9, %v1040_v10  ;;  %v666_v27 = vsel %vm622_vm0, %v661_v13, %v665_v14  ;;  %v1044_v28 = vor.u32 %v1042_v17, %v1040_v10  ;;  %v9076_v30 = vcombine.low %v429_v60, %v430_v12  ;;  %v437_v60 = vld [vmem:[%s9005_s30 + $0x58] sm:$0xf] }
  0x25   : > { %1239 = vrot.lane.b32.xlu1 %v1025_v62, %s8911_s14  ;;  %v1048_v29 = vrot.slane %v1046_v21, 1  ;;  %v673_v33 = vrot.slane %v671_v25, 1  ;;  %v1050_v34 = vshrl.u32 %v7785_v6, 16  ;;  %v1054_v35 = vshll.u32 %v7786_v26, 16 }
  0x26   : > { %1241 = vrot.lane.b32.xlu0 %v1033_v3, %s8911_s14  ;;  %v675_v37 = vshrl.u32 %v9065_v11, 16  ;;  %v679_v38 = vshll.u32 %v9076_v30, 16  ;;  %v7787_v39 = vcombine.low %v432_v31, %v433_v32  ;;  %v9088_v43 = vcombine.low %v431_v22, %v432_v31 }
  0x27   : > { %v1049_v36 = vsel %vm622_vm0, %v1044_v28, %v1048_v29  ;;  %v1052_v41 = vor.u32 %v1050_v34, %v1048_v29  ;;  %v1056_v42 = vrot.slane %v1054_v35, 1  ;;  %v1058_v48 = vshrl.u32 %v7786_v26, 16 }
  0x28   : > { %v677_v46 = vor.u32 %v675_v37, %v673_v33  ;;  %v681_v47 = vrot.slane %v679_v38, 1  ;;  %v1062_v49 = vshll.u32 %v7787_v39, 16  ;;  %v683_v51 = vshrl.u32 %v9076_v30, 16 }
  0x29   : > { %860 = vrot.lane.b32.xlu1 %v658_v8, %s8912_s15  ;;  %v1057_v50 = vsel %vm622_vm0, %v1052_v41, %v1056_v42  ;;  %v687_v52 = vshll.u32 %v9088_v43, 16  ;;  %v7788_v53 = vcombine.low %v434_v44, %v435_v45  ;;  %v1060_v56 = vor.u32 %v1058_v48, %v1056_v42  ;;  %v439_v8 = vld [vmem:[%s9005_s30 + $0x60] sm:$0xf]  ;;  %v442_v42 = vld [vmem:[%s9005_s30 + $0x6c] sm:$0xf] }
  0x2a   : > { %951 = vrot.lane.b32.xlu0 %v9021_v16, %s8910_s13  ;;  %v669_v16 = vor.u32 %v667_v24, %v665_v14  ;;  %v1064_v57 = vrot.slane %v1062_v49, 1  ;;  %v9098_v58 = vcombine.low %v433_v32, %v434_v44  ;;  %v685_v61 = vor.u32 %v683_v51, %v681_v47  ;;  %v440_v32 = vld [vmem:[%s9005_s30 + $0x64] sm:$0xf]  ;;  %v443_v48 = vld [vmem:[%s9005_s30 + $0x70] sm:$0xf] }
  0x2b   : > { %v689_v62 = vrot.slane %v687_v52, 1  ;;  %v1066_v63 = vshrl.u32 %v7787_v39, 16  ;;  %v1070_v0 = vshll.u32 %v7788_v53, 16  ;;  %v691_v3 = vshrl.u32 %v9088_v43, 16 }
  0x2c   : > { %v674_v40 = vsel %vm622_vm0, %v669_v16, %v673_v33  ;;  %v1065_v2 = vsel %vm622_vm0, %v1060_v56, %v1064_v57  ;;  %v695_v4 = vshll.u32 %v9098_v58, 16  ;;  %v7789_v5 = vcombine.low %v436_v59, %v437_v60  ;;  %v441_v16 = vld [vmem:[%s9005_s30 + $0x68] sm:$0xf] }
  0x2d   : > { %1243 = vrot.lane.b32.xlu1 %v1041_v23, %s8911_s14  ;;  %v690_v9 = vsel %vm622_vm0, %v685_v61, %v689_v62  ;;  %v1068_v10 = vor.u32 %v1066_v63, %v1064_v57  ;;  %v1072_v12 = vrot.slane %v1070_v0, 1  ;;  %v9112_v13 = vcombine.low %v435_v45, %v436_v59  ;;  %v445_v63 = vld [vmem:[%s9005_s30 + $0x78] sm:$0xf] }
  0x2e   : > { %862 = vrot.lane.b32.xlu0 %v666_v27, %s8912_s15  ;;  %v693_v14 = vor.u32 %v691_v3, %v689_v62  ;;  %v697_v17 = vrot.slane %v695_v4, 1  ;;  %v1074_v21 = vshrl.u32 %v7788_v53, 16  ;;  %v1078_v22 = vshll.u32 %v7789_v5, 16  ;;  %v444_v62 = vld [vmem:[%s9005_s30 + $0x74] sm:$0xf] }
  0x2f   : > { %v1073_v23 = vsel %vm622_vm0, %v1068_v10, %v1072_v12  ;;  %v699_v24 = vshrl.u32 %v9098_v58, 16  ;;  %v703_v25 = vshll.u32 %v9112_v13, 16  ;;  %v1082_v33 = vshrl.u32 %v7789_v5, 16  ;;  %v446_v10 = vld [vmem:[%s9005_s30 + $0x7c] sm:$0xf] }
  0x30   : > { %v698_v27 = vsel %vm622_vm0, %v693_v14, %v697_v17  ;;  %v1076_v28 = vor.u32 %v1074_v21, %v1072_v12  ;;  %v1080_v29 = vrot.slane %v1078_v22, 1  ;;  %v707_v38 = vshrl.u32 %v9112_v13, 16  ;;  %v447_v12 = vld [vmem:[%s9005_s30 + $0x80] sm:$0xf] }
  0x31   : > { %953 = vrot.lane.b32.xlu1 %v7784_v54, %s8910_s13  ;;  %v682_v54 = vsel %vm622_vm0, %v677_v46, %v681_v47  ;;  %v701_v34 = vor.u32 %v699_v24, %v697_v17  ;;  %v705_v35 = vrot.slane %v703_v25, 1  ;;  %v9133_v47 = vcombine.low %v439_v8, %v440_v32 }
  0x32   : > { %1245 = vrot.lane.b32.xlu0 %v1049_v36, %s8911_s14  ;;  %v1081_v37 = vsel %vm622_vm0, %v1076_v28, %v1080_v29  ;;  %v1084_v41 = vor.u32 %v1082_v33, %v1080_v29  ;;  %v7792_v56 = vcombine.low %v442_v42, %v443_v48  ;;  %v9142_v61 = vcombine.low %v441_v16, %v442_v42 }
  0x33   : > { %v706_v44 = vsel %vm622_vm0, %v701_v34, %v705_v35  ;;  %v709_v49 = vor.u32 %v707_v38, %v705_v35  ;;  %v9158_v22 = vcombine.low %v443_v48, %v444_v62  ;;  %v9166_v35 = vcombine.low %v445_v63, %v446_v10 }
  0x34   : > { %v1102_v4 = vshll.u32 %v7792_v56, 16  ;;  %v1106_v25 = vshrl.u32 %v7792_v56, 16  ;;  %v731_v28 = vshrl.u32 %v9142_v61, 16 }
  0x35   : > { %864 = vrot.lane.b32.xlu1 %v674_v40, %s8912_s15  ;;  %v7791_v40 = vcombine.low %v440_v32, %v441_v16  ;;  %v735_v29 = vshll.u32 %v9158_v22, 16  ;;  %v7794_v32 = vcombine.low %v446_v10, %v447_v12 }
  0x36   : > { %955 = vrot.lane.b32.xlu0 %v7785_v6, %s8910_s13  ;;  %v438_v6 = vld [vmem:[%s9005_s30 + $0x5c] sm:$0xf]  ;;  %v1104_v21 = vrot.slane %v1102_v4, 1 }
  0x37   : > { %v9120_v31 = vcombine.low %v437_v60, %v438_v6  ;;  %v1094_v51 = vshll.u32 %v7791_v40, 16  ;;  %v1098_v0 = vshrl.u32 %v7791_v40, 16 }
  0x38   : > { %v1108_v33 = vor.u32 %v1106_v25, %v1104_v21  ;;  %v13687_v25 = vmov 0  }
  0x39   : > { %1247 = vrot.lane.b32.xlu1 %v1057_v50, %s8911_s14  ;;  %v1096_v60 = vrot.slane %v1094_v51, 1  ;;  %8776 = vset.pattern.permute.xlu0 %v13687_v25 }
  0x3a   : > { %866 = vrot.lane.b32.xlu0 %v682_v54, %s8912_s15  ;;  %v719_v54 = vshll.u32 %v9133_v47, 16  ;;  %8775 = vset.pattern.permute.xlu1 %v13687_v25 }
  0x3b   : > { %v1100_v17 = vor.u32 %v1098_v0, %v1096_v60  ;;  %v747_v0 = vshrl.u32 %v9166_v35, 16  ;;  %3882 = vmatprep.subr.bf16.mxu1 %v13687_v25 }
  0x3c   : > { %v721_v3 = vrot.slane %v719_v54, 1  ;;  %v1122_v54 = vshrl.u32 %v7794_v32, 16 }
  0x3d   : > { %957 = vrot.lane.b32.xlu1 %v7786_v26, %s8910_s13  ;;  %v7790_v26 = vcombine.low %v438_v6, %v439_v8  ;;  %v723_v6 = vshrl.u32 %v9133_v47, 16  ;;  %v727_v8 = vshll.u32 %v9142_v61, 16 }
  0x3e   : > { %1249 = vrot.lane.b32.xlu0 %v1065_v2, %s8911_s14 }
  0x3f   : > { %v1086_v36 = vshll.u32 %v7790_v26, 16  ;;  %v1090_v46 = vshrl.u32 %v7790_v26, 16  ;;  %v729_v24 = vrot.slane %v727_v8, 1  ;;  %v453_v8 = vld [vmem:[%s9005_s30 + $0x98] sm:$0xf] }
  0x41   : > { %868 = vrot.lane.b32.xlu1 %v690_v9, %s8912_s15  ;;  %v1088_v45 = vrot.slane %v1086_v36, 1  ;;  %v7793_v9 = vcombine.low %v444_v62, %v445_v63  ;;  %v448_v36 = vld [vmem:[%s9005_s30 + $0x84] sm:$0xf]  ;;  %v733_v38 = vor.u32 %v731_v28, %v729_v24 }
  0x42   : > { %959 = vrot.lane.b32.xlu0 %v7787_v39, %s8910_s13  ;;  %v711_v39 = vshll.u32 %v9120_v31, 16  ;;  %v9176_v48 = vcombine.low %v447_v12, %v448_v36 }
  0x43   : > { %v1089_v52 = vsel %vm622_vm0, %v1084_v41, %v1088_v45  ;;  %v1092_v59 = vor.u32 %v1090_v46, %v1088_v45  ;;  %v1118_v41 = vshll.u32 %v7794_v32, 16  ;;  %v743_v45 = vshll.u32 %v9166_v35, 16 }
  0x44   : > { %v713_v50 = vrot.slane %v711_v39, 1  ;;  %v737_v39 = vrot.slane %v735_v29, 1 }
  0x45   : > { %1251 = vrot.lane.b32.xlu1 %v1073_v23, %s8911_s14  ;;  %v725_v23 = vor.u32 %v723_v6, %v721_v3  ;;  %v452_v6 = vld [vmem:[%s9005_s30 + $0x94] sm:$0xf] }
  0x46   : > { %870 = vrot.lane.b32.xlu0 %v698_v27, %s8912_s15  ;;  %v714_v57 = vsel %vm622_vm0, %v709_v49, %v713_v50  ;;  %v1110_v27 = vshll.u32 %v7793_v9, 16  ;;  %v450_v49 = vld [vmem:[%s9005_s30 + $0x8c] sm:$0xf]  ;;  %v738_v51 = vsel %vm622_vm0, %v733_v38, %v737_v39 }
  0x47   : > { %v730_v16 = vsel %vm622_vm0, %v725_v23, %v729_v24  ;;  %v7797_v24 = vcombine.low %v452_v6, %v453_v8 }
  0x48   : > { %v1112_v34 = vrot.slane %v1110_v27, 1  ;;  %v454_v27 = vld [vmem:[%s9005_s30 + $0x9c] sm:$0xf] }
  0x49   : > { %961 = vrot.lane.b32.xlu1 %v7788_v53, %s8910_s13  ;;  %v715_v53 = vshrl.u32 %v9120_v31, 16  ;;  %v1142_v38 = vshll.u32 %v7797_v24, 16 }
  0x4a   : > { %1253 = vrot.lane.b32.xlu0 %v1081_v37, %s8911_s14  ;;  %v449_v37 = vld [vmem:[%s9005_s30 + $0x88] sm:$0xf]  ;;  %v1113_v42 = vsel %vm622_vm0, %v1108_v33, %v1112_v34 }
  0x4b   : > { %v717_v2 = vor.u32 %v715_v53, %v713_v50  ;;  %v7795_v46 = vcombine.low %v448_v36, %v449_v37  ;;  %v451_v50 = vld [vmem:[%s9005_s30 + $0x90] sm:$0xf]  ;;  %v1120_v53 = vrot.slane %v1118_v41, 1 }
  0x4c   : > { %v7796_v62 = vcombine.low %v450_v49, %v451_v50  ;;  %v9205_v33 = vcombine.low %v451_v50, %v452_v6  ;;  %v456_v50 = vld [vmem:[%s9005_s30 + $0xa4] sm:$0xf] }
  0x4d   : > { %872 = vrot.lane.b32.xlu1 %v706_v44, %s8912_s15  ;;  %v722_v14 = vsel %vm622_vm0, %v717_v2, %v721_v3  ;;  %v739_v44 = vshrl.u32 %v9158_v22, 16  ;;  %v1124_v3 = vor.u32 %v1122_v54, %v1120_v53  ;;  %v1130_v12 = vshrl.u32 %v7795_v46, 16 }
  0x4e   : > { %963 = vrot.lane.b32.xlu0 %v7789_v5, %s8910_s13  ;;  %v1097_v5 = vsel %vm622_vm0, %v1092_v59, %v1096_v60  ;;  %v745_v59 = vrot.slane %v743_v45, 1  ;;  %v1126_v60 = vshll.u32 %v7795_v46, 16  ;;  %v1144_v45 = vrot.slane %v1142_v38, 1 }
  0x50   : > { %v1128_v4 = vrot.slane %v1126_v60, 1 }
  0x51   : > { %1255 = vrot.lane.b32.xlu1 %v1089_v52, %s8911_s14 }
  0x52   : > { %874 = vrot.lane.b32.xlu0 %v714_v57, %s8912_s15  ;;  %v741_v57 = vor.u32 %v739_v44, %v737_v39  ;;  %v1132_v29 = vor.u32 %v1130_v12, %v1128_v4 }
  0x54   : > { %v746_v2 = vsel %vm622_vm0, %v741_v57, %v745_v59 }
  0x55   : > { %965 = vrot.lane.b32.xlu1 %v7790_v26, %s8910_s13  ;;  %v1105_v26 = vsel %vm622_vm0, %v1100_v17, %v1104_v21  ;;  %v1129_v17 = vsel %vm622_vm0, %v1124_v3, %v1128_v4  ;;  %v755_v21 = vshrl.u32 %v9176_v48, 16  ;;  %v458_v4 = vld [vmem:[%s9005_s30 + $0xac] sm:$0xf] }
  0x56   : > { %1257 = vrot.lane.b32.xlu0 %v1097_v5, %s8911_s14  ;;  %v9188_v5 = vcombine.low %v449_v37, %v450_v49  ;;  %v1138_v37 = vshrl.u32 %v7796_v62, 16  ;;  %v9213_v49 = vcombine.low %v453_v8, %v454_v27 }
  0x58   : > { %v759_v23 = vshll.u32 %v9188_v5, 16  ;;  %v763_v39 = vshrl.u32 %v9188_v5, 16  ;;  %v775_v60 = vshll.u32 %v9213_v49, 16 }
  0x59   : > { %876 = vrot.lane.b32.xlu1 %v722_v14, %s8912_s15  ;;  %v1134_v14 = vshll.u32 %v7796_v62, 16 }
  0x5a   : > { %967 = vrot.lane.b32.xlu0 %v7791_v40, %s8910_s13  ;;  %v1114_v40 = vshrl.u32 %v7793_v9, 16  ;;  %v761_v36 = vrot.slane %v759_v23, 1  ;;  %v777_v8 = vrot.slane %v775_v60, 1 }
  0x5c   : > { %v1116_v52 = vor.u32 %v1114_v40, %v1112_v34  ;;  %v767_v40 = vshll.u32 %v9205_v33, 16 }
  0x5d   : > { %1259 = vrot.lane.b32.xlu1 %v1105_v26, %s8911_s14  ;;  %v455_v26 = vld [vmem:[%s9005_s30 + $0xa0] sm:$0xf] }
  0x5e   : > { %878 = vrot.lane.b32.xlu0 %v730_v16, %s8912_s15  ;;  %v1121_v63 = vsel %vm622_vm0, %v1116_v52, %v1120_v53  ;;  %v1136_v16 = vrot.slane %v1134_v14, 1  ;;  %v7798_v41 = vcombine.low %v454_v27, %v455_v26  ;;  %v769_v52 = vrot.slane %v767_v40, 1  ;;  %v459_v14 = vld [vmem:[%s9005_s30 + $0xb0] sm:$0xf] }
  0x5f   : > { %v1146_v53 = vshrl.u32 %v7797_v24, 16  ;;  %v9225_v3 = vcombine.low %v455_v26, %v456_v50 }
  0x60   : > { %v1140_v44 = vor.u32 %v1138_v37, %v1136_v16  ;;  %v1150_v54 = vshll.u32 %v7798_v41, 16 }
  0x61   : > { %969 = vrot.lane.b32.xlu1 %v7792_v56, %s8910_s13  ;;  %v751_v56 = vshll.u32 %v9176_v48, 16 }
  0x62   : > { %1261 = vrot.lane.b32.xlu0 %v1113_v42, %s8911_s14  ;;  %v1145_v57 = vsel %vm622_vm0, %v1140_v44, %v1144_v45 }
  0x63   : > { %v753_v10 = vrot.slane %v751_v56, 1 }
  0x65   : > { %880 = vrot.lane.b32.xlu1 %v738_v51, %s8912_s15  ;;  %v757_v34 = vor.u32 %v755_v21, %v753_v10  ;;  %v457_v51 = vld [vmem:[%s9005_s30 + $0xa8] sm:$0xf]  ;;  %v7800_v21 = vcombine.low %v458_v4, %v459_v14 }
  0x66   : > { %971 = vrot.lane.b32.xlu0 %v7793_v9, %s8910_s13  ;;  %v749_v9 = vor.u32 %v747_v0, %v745_v59  ;;  %v771_v59 = vshrl.u32 %v9205_v33, 16  ;;  %v7799_v56 = vcombine.low %v456_v50, %v457_v51  ;;  %v1148_v0 = vor.u32 %v1146_v53, %v1144_v45 }
  0x67   : > { %v762_v42 = vsel %vm622_vm0, %v757_v34, %v761_v36  ;;  %v1166_v37 = vshll.u32 %v7800_v21, 16 }
  0x68   : > { %v754_v28 = vsel %vm622_vm0, %v749_v9, %v753_v10  ;;  %v773_v6 = vor.u32 %v771_v59, %v769_v52  ;;  %v1154_v10 = vshrl.u32 %v7798_v41, 16  ;;  %v1158_v12 = vshll.u32 %v7799_v56, 16  ;;  %v463_v59 = vld [vmem:[%s9005_s30 + $0xc0] sm:$0xf] }
  0x69   : > { %1263 = vrot.lane.b32.xlu1 %v1121_v63, %s8911_s14  ;;  %v779_v9 = vshrl.u32 %v9213_v49, 16  ;;  %v1168_v45 = vrot.slane %v1166_v37, 1 }
  0x6a   : > { %882 = vrot.lane.b32.xlu0 %v746_v2, %s8912_s15  ;;  %v1152_v2 = vrot.slane %v1150_v54, 1  ;;  %v778_v23 = vsel %vm622_vm0, %v773_v6, %v777_v8  ;;  %v1160_v26 = vrot.slane %v1158_v12, 1  ;;  %v1170_v54 = vshrl.u32 %v7800_v21, 16  ;;  %v465_v6 = vld [vmem:[%s9005_s30 + $0xc8] sm:$0xf] }
  0x6c   : > { %v1156_v27 = vor.u32 %v1154_v10, %v1152_v2  ;;  %v1172_v12 = vor.u32 %v1170_v54, %v1168_v45 }
  0x6d   : > { %973 = vrot.lane.b32.xlu1 %v7794_v32, %s8910_s13  ;;  %v1137_v32 = vsel %vm622_vm0, %v1132_v29, %v1136_v16  ;;  %v460_v29 = vld [vmem:[%s9005_s30 + $0xb4] sm:$0xf]  ;;  %v461_v16 = vld [vmem:[%s9005_s30 + $0xb8] sm:$0xf] }
  0x6e   : > { %1265 = vrot.lane.b32.xlu0 %v1129_v17, %s8911_s14  ;;  %v783_v17 = vshll.u32 %v9225_v3, 16  ;;  %v1161_v38 = vsel %vm622_vm0, %v1156_v27, %v1160_v26  ;;  %v9244_v40 = vcombine.low %v460_v29, %v461_v16  ;;  %v9249_v50 = vcombine.low %v459_v14, %v460_v29 }
  0x70   : > { %v785_v34 = vrot.slane %v783_v17, 1 }
  0x71   : > { %884 = vrot.lane.b32.xlu1 %v754_v28, %s8912_s15  ;;  %v9235_v28 = vcombine.low %v457_v51, %v458_v4  ;;  %v462_v51 = vld [vmem:[%s9005_s30 + $0xbc] sm:$0xf]  ;;  %v464_v4 = vld [vmem:[%s9005_s30 + $0xc4] sm:$0xf] }
  0x72   : > { %975 = vrot.lane.b32.xlu0 %v7795_v46, %s8910_s13  ;;  %v765_v46 = vor.u32 %v763_v39, %v761_v36  ;;  %v1162_v36 = vshrl.u32 %v7799_v56, 16 }
  0x73   : > { %v791_v39 = vshll.u32 %v9235_v28, 16 }
  0x74   : > { %v770_v63 = vsel %vm622_vm0, %v765_v46, %v769_v52  ;;  %v1164_v44 = vor.u32 %v1162_v36, %v1160_v26 }
  0x75   : > { %1267 = vrot.lane.b32.xlu1 %v1137_v32, %s8911_s14  ;;  %v787_v32 = vshrl.u32 %v9225_v3, 16  ;;  %v793_v53 = vrot.slane %v791_v39, 1 }
  0x76   : > { %886 = vrot.lane.b32.xlu0 %v762_v42, %s8912_s15  ;;  %v1169_v60 = vsel %vm622_vm0, %v1164_v44, %v1168_v45  ;;  %v9284_v44 = vcombine.low %v463_v59, %v464_v4  ;;  %v466_v45 = vld [vmem:[%s9005_s30 + $0xcc] sm:$0xf] }
  0x77   : > { %v789_v52 = vor.u32 %v787_v32, %v785_v34 }
  0x79   : > { %977 = vrot.lane.b32.xlu1 %v7796_v62, %s8910_s13  ;;  %v1153_v62 = vsel %vm622_vm0, %v1148_v0, %v1152_v2  ;;  %v799_v0 = vshll.u32 %v9249_v50, 16  ;;  %v9261_v2 = vcombine.low %v462_v51, %v463_v59  ;;  %v794_v10 = vsel %vm622_vm0, %v789_v52, %v793_v53 }
  0x7a   : > { %1269 = vrot.lane.b32.xlu0 %v1145_v57, %s8911_s14  ;;  %v1174_v57 = vshll.u32 %v9244_v40, 16 }
  0x7b   : > { %v1182_v27 = vshll.u32 %v9261_v2, 16  ;;  %v1186_v54 = vshrl.u32 %v9261_v2, 16 }
  0x7c   : > { %v1176_v14 = vrot.slane %v1174_v57, 1 }
  0x7d   : > { %888 = vrot.lane.b32.xlu1 %v770_v63, %s8912_s15  ;;  %v795_v63 = vshrl.u32 %v9235_v28, 16 }
  0x7e   : > { %979 = vrot.lane.b32.xlu0 %v7797_v24, %s8910_s13  ;;  %v781_v24 = vor.u32 %v779_v9, %v777_v8  ;;  %v9270_v9 = vcombine.low %v464_v4, %v465_v6  ;;  %v1177_v29 = vsel %vm622_vm0, %v1172_v12, %v1176_v14 }
  0x7f   : > { %v797_v17 = vor.u32 %v795_v63, %v793_v53 }
  0x80   : > { %v786_v42 = vsel %vm622_vm0, %v781_v24, %v785_v34 }
  0x81   : > { %1271 = vrot.lane.b32.xlu1 %v1153_v62, %s8911_s14  ;;  %v9266_v62 = vcombine.low %v461_v16, %v462_v51  ;;  %v803_v16 = vshrl.u32 %v9249_v50, 16  ;;  %v467_v51 = vld [vmem:[%s9005_s30 + $0xd0] sm:$0xf] }
  0x82   : > { %890 = vrot.lane.b32.xlu0 %v778_v23, %s8912_s15  ;;  %v801_v23 = vrot.slane %v799_v0, 1  ;;  %v9294_v57 = vcombine.low %v466_v45, %v467_v51  ;;  %v815_v0 = vshll.u32 %v9284_v44, 16 }
  0x83   : > { %v807_v24 = vshll.u32 %v9266_v62, 16  ;;  %v811_v63 = vshrl.u32 %v9266_v62, 16 }
  0x84   : > { %v802_v39 = vsel %vm622_vm0, %v797_v17, %v801_v23  ;;  %v805_v53 = vor.u32 %v803_v16, %v801_v23  ;;  %v468_v17 = vld [vmem:[%s9005_s30 + $0xd4] sm:$0xf]  ;;  %v469_v23 = vld [vmem:[%s9005_s30 + $0xd8] sm:$0xf]  ;;  %v817_v16 = vrot.slane %v815_v0, 1 }
  0x85   : > { %981 = vrot.lane.b32.xlu1 %v7798_v41, %s8910_s13 }
  0x86   : > { %1273 = vrot.lane.b32.xlu0 %v1161_v38, %s8911_s14  ;;  %v1190_v38 = vshll.u32 %v9270_v9, 16 }
  0x87   : > { %v946_v46 = vpop.permute.xlu0 %945 }
  0x88   : > { %v9255_v41 = vpop.permute.xlu1 %949 }
  0x89   : > { %892 = vrot.lane.b32.xlu1 %v786_v42, %s8912_s15  ;;  %v1184_v42 = vrot.slane %v1182_v27, 1 }
  0x8a   : > { %983 = vrot.lane.b32.xlu0 %v7799_v56, %s8910_s13  ;;  %v1178_v56 = vshrl.u32 %v9244_v40, 16 }
  0x8b   : > { %v948_v8 = vpop.permute.xlu0 %947 }
  0x8c   : > { %v1180_v37 = vor.u32 %v1178_v56, %v1176_v14  ;;  %v1188_v14 = vor.u32 %v1186_v54, %v1184_v42  ;;  %v9304_v56 = vcombine.low %v465_v6, %v466_v45 }
  0x8d   : > { %1275 = vrot.lane.b32.xlu1 %v1169_v60, %s8911_s14  ;;  %v1192_v60 = vrot.slane %v1190_v38, 1 }
  0x8e   : > { %894 = vrot.lane.b32.xlu0 %v794_v10, %s8912_s15  ;;  %v1185_v59 = vsel %vm622_vm0, %v1180_v37, %v1184_v42  ;;  %v819_v37 = vshrl.u32 %v9284_v44, 16  ;;  %v823_v38 = vshll.u32 %v9304_v56, 16  ;;  %v1202_v42 = vshrl.u32 %v9294_v57, 16 }
  0x8f   : > { %v1238_v26 = vpop.permute.xlu1 %1237 }
  0x90   : > { %v855_v34 = vpop.permute.xlu0 %854 }
  0x91   : > { %v1297_v36 = vsel %vm1295_vm2, %v9027_v19, %v855_v34  ;;  %985 = vrot.lane.b32.xlu1 %v7800_v21, %s8910_s13  ;;  %v809_v21 = vrot.slane %v807_v24, 1  ;;  %v9313_v24 = vcombine.low %v468_v17, %v469_v23  ;;  %v1193_v34 = vsel %vm622_vm0, %v1188_v14, %v1192_v60 }
  0x92   : > { %v1357_v32 = vsel %vm1355_vm3, %v1297_v36, %v946_v46  ;;  %1277 = vrot.lane.b32.xlu0 %v1177_v29, %s8911_s14 }
  0x93   : > { %v857_v52 = vpop.permute.xlu1 %856  ;;  %v1416_v19 = vsel %vm1414_vm4, %v1357_v32, %v1238_v26  ;;  %v810_v12 = vsel %vm622_vm0, %v805_v53, %v809_v21  ;;  %v1198_v26 = vshll.u32 %v9294_v57, 16 }
  0x94   : > { %8069 = vmatmul.mubr.msk.bf16.vlgmr.msra.gmra.mrb[0].mxu0 %vm1496_vm5, %v1416_v19  ;;  %v859_v46 = vpop.permute.xlu0 %858  ;;  %v1299_v4 = vsel %vm1295_vm2, %v9010_v7, %v857_v52  ;;  %v813_v7 = vor.u32 %v811_v63, %v809_v21  ;;  %v1206_v52 = vshll.u32 %v9313_v24, 16  ;;  %v9328_v19 = vcombine.low %v467_v51, %v468_v17  ;;  %v9334_v63 = vld [vmem:[%s9005_s30 + $0xe0] sm:$0xf] }
  0x95   : > { %896 = vrot.lane.b32.xlu1 %v802_v39, %s8912_s15  ;;  %8072 = vmatprep.mubr.msk.bf16.mxu0 %vm8913_vm1, %v13689_v1  ;;  %v1359_v29 = vsel %vm1355_vm3, %v1299_v4, %v948_v8  ;;  %v1200_v39 = vrot.slane %v1198_v26, 1  ;;  %v1301_v53 = vsel %vm1295_vm2, %v9024_v18, %v859_v46  ;;  %v821_v21 = vor.u32 %v819_v37, %v817_v16 }
  0x96   : > { %987 = vrot.lane.b32.xlu0 %v9244_v40, %s8910_s13  ;;  %v1194_v40 = vshrl.u32 %v9270_v9, 16  ;;  %v818_v45 = vsel %vm622_vm0, %v813_v7, %v817_v16  ;;  %v827_v51 = vshrl.u32 %v9304_v56, 16  ;;  %v1208_v18 = vrot.slane %v1206_v52, 1  ;;  %v473_v7 = vld [vmem:[%s9005_s30 + $0xe8] sm:$0xf] }
  0x97   : > { %v1240_v10 = vpop.permute.xlu1 %1239  ;;  %v1204_v4 = vor.u32 %v1202_v42, %v1200_v39  ;;  %v831_v46 = vshll.u32 %v9328_v19, 16 }
  0x98   : > { %v1242_v27 = vpop.permute.xlu0 %1241  ;;  %v1418_v6 = vsel %vm1414_vm4, %v1359_v29, %v1240_v10  ;;  %v1196_v32 = vor.u32 %v1194_v40, %v1192_v60  ;;  %v1361_v10 = vsel %vm1355_vm3, %v1301_v53, %v9255_v41 }
  0x99   : > { %1279 = vrot.lane.b32.xlu1 %v1185_v59, %s8911_s14  ;;  %v470_v59 = vld [vmem:[%s9005_s30 + $0xdc] sm:$0xf]  ;;  %v1420_v14 = vsel %vm1414_vm4, %v1361_v10, %v1242_v27  ;;  %v1210_v27 = vshrl.u32 %v9313_v24, 16  ;;  %v475_v10 = vld [vmem:[%s9005_s30 + $0xf0] sm:$0xf] }
  0x9a   : > { %898 = vrot.lane.b32.xlu0 %v810_v12, %s8912_s15  ;;  %v1201_v0 = vsel %vm622_vm0, %v1196_v32, %v1200_v39  ;;  %v9345_v12 = vcombine.low %v470_v59, %v9334_v63  ;;  %v9351_v29 = vcombine.low %v469_v23, %v470_v59 }
  0x9b   : > { %v861_v36 = vpop.permute.xlu1 %860  ;;  %v1212_v42 = vor.u32 %v1210_v27, %v1208_v18 }
  0x9c   : > { %8073 = vmatmul.mubr.msk.bf16.gmra.mrb[4].mxu0 %vm1496_vm5, %v1418_v6  ;;  %v952_v8 = vpop.permute.xlu0 %951  ;;  %v1303_v17 = vsel %vm1295_vm2, %v9030_v20, %v861_v36  ;;  %v833_v6 = vrot.slane %v831_v46, 1  ;;  %v1214_v23 = vshll.u32 %v9345_v12, 16  ;;  %v835_v36 = vshrl.u32 %v9328_v19, 16 }
  0x9d   : > { %989 = vrot.lane.b32.xlu1 %v9261_v2, %s8910_s13  ;;  %8076 = vmatprep.mubr.msk.bf16.mxu0 %vm8913_vm1, %v13689_v1  ;;  %v825_v2 = vrot.slane %v823_v38, 1  ;;  %v1363_v20 = vsel %vm1355_vm3, %v1303_v17, %v952_v8  ;;  %v839_v37 = vshll.u32 %v9351_v29, 16  ;;  %v1218_v53 = vshrl.u32 %v9345_v12, 16 }
  0x9e   : > { %1281 = vrot.lane.b32.xlu0 %v1193_v34, %s8911_s14  ;;  %v1209_v34 = vsel %vm622_vm0, %v1204_v4, %v1208_v18  ;;  %v1216_v52 = vrot.slane %v1214_v23, 1  ;;  %v837_v59 = vor.u32 %v835_v36, %v833_v6  ;;  %v843_v18 = vshrl.u32 %v9351_v29, 16 }
  0x9f   : > { %v1244_v54 = vpop.permute.xlu1 %1243  ;;  %v826_v40 = vsel %vm622_vm0, %v821_v21, %v825_v2  ;;  %v829_v16 = vor.u32 %v827_v51, %v825_v2 }
  0xa0   : > { %v863_v60 = vpop.permute.xlu0 %862  ;;  %v1422_v8 = vsel %vm1414_vm4, %v1363_v20, %v1244_v54 }
  0xa1   : > { %900 = vrot.lane.b32.xlu1 %v818_v45, %s8912_s15  ;;  %v834_v45 = vsel %vm622_vm0, %v829_v16, %v833_v6  ;;  %v1305_v2 = vsel %vm1295_vm2, %v9019_v15, %v863_v60  ;;  %v1217_v60 = vsel %vm622_vm0, %v1212_v42, %v1216_v52 }
  0xa2   : > { %991 = vrot.lane.b32.xlu0 %v9270_v9, %s8910_s13  ;;  %v472_v9 = vld [vmem:[%s9005_s30 + $0xe4] sm:$0xf] }
  0xa3   : > { %v954_v26 = vpop.permute.xlu1 %953  ;;  %v7807_v32 = vcombine.low %v472_v9, %v473_v7  ;;  %v7779_v21 = vcombine.low %v9334_v63, %v472_v9 }
  0xa4   : > { %8077 = vmatmul.mubr.msk.bf16.gmra.mrb[8].mxu0 %vm1496_vm5, %v1420_v14  ;;  %v1246_v41 = vpop.permute.xlu0 %1245  ;;  %v1365_v15 = vsel %vm1355_vm3, %v1305_v2, %v954_v26 }
  0xa5   : > { %1283 = vrot.lane.b32.xlu1 %v1201_v0, %s8911_s14  ;;  %8080 = vmatprep.mubr.msk.bf16.mxu0 %vm8913_vm1, %v13689_v1  ;;  %v841_v0 = vrot.slane %v839_v37, 1  ;;  %v1222_v4 = vshll.u32 %v7807_v32, 16  ;;  %v847_v46 = vshll.u32 %v7779_v21, 16  ;;  %v1424_v20 = vsel %vm1414_vm4, %v1365_v15, %v1246_v41 }
  0xa6   : > { %902 = vrot.lane.b32.xlu0 %v826_v40, %s8912_s15  ;;  %v1220_v40 = vor.u32 %v1218_v53, %v1216_v52  ;;  %v1226_v6 = vshrl.u32 %v7807_v32, 16  ;;  %v851_v41 = vshrl.u32 %v7779_v21, 16 }
  0xa7   : > { %v865_v38 = vpop.permute.xlu1 %864  ;;  %v842_v17 = vsel %vm622_vm0, %v837_v59, %v841_v0  ;;  %v1224_v9 = vrot.slane %v1222_v4, 1  ;;  %v845_v16 = vor.u32 %v843_v18, %v841_v0 }
  0xa8   : > { %v956_v39 = vpop.permute.xlu0 %955  ;;  %v1307_v23 = vsel %vm1295_vm2, %v9050_v55, %v865_v38 }
  0xa9   : > { %993 = vrot.lane.b32.xlu1 %v9294_v57, %s8910_s13  ;;  %v474_v57 = vld [vmem:[%s9005_s30 + $0xec] sm:$0xf]  ;;  %v1228_v55 = vor.u32 %v1226_v6, %v1224_v9  ;;  %s8917_s30 = smov 96  }
  0xaa   : > { %1285 = vrot.lane.b32.xlu0 %v1209_v34, %s8911_s14  ;;  %v7809_v14 = vcombine.low %v474_v57, %v475_v10  ;;  %v1225_v34 = vsel %vm622_vm0, %v1220_v40, %v1224_v9  ;;  %v7808_v4 = vcombine.low %v474_v57, %v474_v57 }
  0xab   : > { %v1248_v51 = vpop.permute.xlu1 %1247 }
  0xac   : > { %8081 = vmatmul.mubr.msk.bf16.gmra.mrb[12].mxu0 %vm1496_vm5, %v1422_v8  ;;  %v867_v54 = vpop.permute.xlu0 %866  ;;  %v1230_v26 = vshll.u32 %v7809_v14, 16  ;;  %v1367_v8 = vsel %vm1355_vm3, %v1307_v23, %v956_v39  ;;  %v1234_v21 = vshrl.u32 %v7809_v14, 16  ;;  %v1881_v23 = vld [vmem:[%s13675_s1 + $0x28] sm:$0xff] }
  0xad   : > { %904 = vrot.lane.b32.xlu1 %v834_v45, %s8912_s15  ;;  %8084 = vmatprep.mubr.msk.bf16.mxu0 %vm8913_vm1, %v13689_v1  ;;  %v1426_v53 = vsel %vm1414_vm4, %v1367_v8, %v1248_v51  ;;  %v1309_v39 = vsel %vm1295_vm2, %v9065_v11, %v867_v54  ;;  %v1876_v11 = vld [vmem:[%s13675_s1] sm:$0xff]  ;;  %v1877_v54 = vld [vmem:[%s13675_s1 + $0x8] sm:$0xff] }
  0xae   : > { %995 = vrot.lane.b32.xlu0 %v9313_v24, %s8910_s13  ;;  %v849_v24 = vrot.slane %v847_v46, 1  ;;  %v1232_v38 = vrot.slane %v1230_v26, 1 }
  0xaf   : > { %v958_v7 = vpop.permute.xlu1 %957 }
  0xb0   : > { %v1250_v27 = vpop.permute.xlu0 %1249  ;;  %v850_v42 = vsel %vm622_vm0, %v845_v16, %v849_v24  ;;  %v853_v2 = vor.u32 %v851_v41, %v849_v24  ;;  %v1369_v51 = vsel %vm1355_vm3, %v1309_v39, %v958_v7  ;;  %v1882_v16 = vld [vmem:[%s13675_s1 + $0x30] sm:$0xff]  ;;  %v1883_v41 = vld [vmem:[%s13675_s1 + $0x38] sm:$0xff] }
  0xb1   : > { %1287 = vrot.lane.b32.xlu1 %v1217_v60, %s8911_s14  ;;  %v1428_v15 = vsel %vm1414_vm4, %v1369_v51, %v1250_v27  ;;  %v1879_v27 = vld [vmem:[%s13675_s1 + $0x18] sm:$0xff] }
  0xb2   : > { %906 = vrot.lane.b32.xlu0 %v842_v17, %s8912_s15  ;;  %v1878_v17 = vld [vmem:[%s13675_s1 + $0x10] sm:$0xff] }
  0xb3   : > { %v869_v36 = vpop.permute.xlu1 %868 }
  0xb4   : > { %8085 = vmatmul.mubr.msk.bf16.gmra.mrb[16].mxu0 %vm1496_vm5, %v1424_v20  ;;  %v960_v37 = vpop.permute.xlu0 %959  ;;  %v1311_v57 = vsel %vm1295_vm2, %v9076_v30, %v869_v36  ;;  %v1880_v30 = vld [vmem:[%s13675_s1 + $0x20] sm:$0xff] }
  0xb5   : > { %997 = vrot.lane.b32.xlu1 %v9345_v12, %s8910_s13  ;;  %8088 = vmatprep.mubr.msk.bf16.mxu0 %vm8913_vm1, %v13689_v1  ;;  %v1233_v12 = vsel %vm622_vm0, %v1228_v55, %v1232_v38  ;;  %v1371_v14 = vsel %vm1355_vm3, %v1311_v57, %v960_v37 }
  0xb6   : > { %1289 = vrot.lane.b32.xlu0 %v1225_v34, %s8911_s14 }
  0xb7   : > { %v1252_v45 = vpop.permute.xlu1 %1251 }
  0xb8   : > { %v871_v52 = vpop.permute.xlu0 %870  ;;  %v1430_v7 = vsel %vm1414_vm4, %v1371_v14, %v1252_v45 }
  0xb9   : > { %908 = vrot.lane.b32.xlu1 %v850_v42, %s8912_s15  ;;  %v1313_v20 = vsel %vm1295_vm2, %v9088_v43, %v871_v52  ;;  %v1884_v43 = vld [vmem:[%s13675_s1 + $0x40] sm:$0xff]  ;;  %v1886_v42 = vld [vmem:[%s13675_s1 + $0x50] sm:$0xff]  ;;  %v1885_v52 = vld [vmem:[%s13675_s1 + $0x48] sm:$0xff] }
  0xba   : > { %999 = vrot.lane.b32.xlu0 %v7807_v32, %s8910_s13  ;;  %v1236_v32 = vor.u32 %v1234_v21, %v1232_v38  ;;  %v1887_v21 = vld [vmem:[%s13675_s1 + $0x58] sm:$0xff] }
  0xbb   : > { %v962_v59 = vpop.permute.xlu1 %961 }
  0xbc   : > { %8089 = vmatmul.mubr.msk.bf16.gmra.mrb[20].mxu0 %vm1496_vm5, %v1426_v53  ;;  %v1254_v0 = vpop.permute.xlu0 %1253  ;;  %v1373_v26 = vsel %vm1355_vm3, %v1313_v20, %v962_v59  ;;  %v1890_v59 = vld [vmem:[%s13675_s1 + $0x70] sm:$0xff] }
  0xbd   : > { %1291 = vrot.lane.b32.xlu1 %v1233_v12, %s8911_s14  ;;  %8092 = vmatprep.mubr.msk.bf16.mxu0 %vm8913_vm1, %v13689_v1  ;;  %v1432_v37 = vsel %vm1414_vm4, %v1373_v26, %v1254_v0  ;;  %v1898_v20 = vld [vmem:[%s13675_s1 + $0xb0] sm:$0xff]  ;;  %v1901_v26 = vld [vmem:[%s13675_s1 + $0xc8] sm:$0xff] }
  0xbe   : > { %910 = vrot.lane.b32.xlu0 %v853_v2, %s8912_s15 }
  0xbf   : > { %v873_v10 = vpop.permute.xlu1 %872 }
  0xc0   : > { %v964_v18 = vpop.permute.xlu0 %963  ;;  %v1315_v8 = vsel %vm1295_vm2, %v9098_v58, %v873_v10  ;;  %v1888_v58 = vld [vmem:[%s13675_s1 + $0x60] sm:$0xff] }
  0xc1   : > { %1001 = vrot.lane.b32.xlu1 %v7808_v4, %s8910_s13  ;;  %v1375_v45 = vsel %vm1355_vm3, %v1315_v8, %v964_v18 }
  0xc2   : > { %1293 = vrot.lane.b32.xlu0 %v1236_v32, %s8911_s14  ;;  %v1892_v32 = vld [vmem:[%s13675_s1 + $0x80] sm:$0xff] }
  0xc3   : > { %v1256_v60 = vpop.permute.xlu1 %1255 }
  0xc4   : > { %8093 = vmatmul.mubr.msk.bf16.gmra.mrb[24].mxu0 %vm1496_vm5, %v1428_v15  ;;  %v875_v46 = vpop.permute.xlu0 %874  ;;  %v1434_v2 = vsel %vm1414_vm4, %v1375_v45, %v1256_v60 }
  0xc5   : > { %1935 = vperm.xlu1 %8775, %v1876_v11   ;;  %8096 = vmatprep.mubr.msk.bf16.mxu0 %vm8913_vm1, %v13689_v1  ;;  %v1317_v39 = vsel %vm1295_vm2, %v9112_v13, %v875_v46  ;;  %v1889_v13 = vld [vmem:[%s13675_s1 + $0x68] sm:$0xff]  ;;  %v1891_v11 = vld [vmem:[%s13675_s1 + $0x78] sm:$0xff] }
  0xc6   : > { %1940 = vperm.xlu0 %8776, %v1877_v54   ;;  %v1894_v54 = vld [vmem:[%s13675_s1 + $0x90] sm:$0xff] }
  0xc7   : > { %v966_v40 = vpop.permute.xlu1 %965 }
  0xc8   : > { %v1258_v9 = vpop.permute.xlu0 %1257  ;;  %v1377_v51 = vsel %vm1355_vm3, %v1317_v39, %v966_v40 }
  0xc9   : > { %1945 = vperm.xlu1 %8775, %v1878_v17   ;;  %v1436_v15 = vsel %vm1414_vm4, %v1377_v51, %v1258_v9  ;;  %v1896_v17 = vld [vmem:[%s13675_s1 + $0xa0] sm:$0xff] }
  0xca   : > { %1955 = vperm.xlu0 %8776, %v1880_v30  }
  0xcb   : > { %v877_v24 = vpop.permute.xlu1 %876 }
  0xcc   : > { %8097 = vmatmul.mubr.msk.bf16.gmra.mrb[28].mxu0 %vm1496_vm5, %v1430_v7  ;;  %v968_v6 = vpop.permute.xlu0 %967  ;;  %v1319_v57 = vsel %vm1295_vm2, %v9120_v31, %v877_v24  ;;  %v1893_v31 = vld [vmem:[%s13675_s1 + $0x88] sm:$0xff]  ;;  %v1895_v7 = vld [vmem:[%s13675_s1 + $0x98] sm:$0xff] }
  0xcd   : > { %1950 = vperm.xlu1 %8775, %v1879_v27   ;;  %8100 = vmatprep.mubr.msk.bf16.mxu0 %vm8913_vm1, %v13689_v1  ;;  %v1379_v14 = vsel %vm1355_vm3, %v1319_v57, %v968_v6 }
  0xce   : > { %1965 = vperm.xlu0 %8776, %v1882_v16  }
  0xcf   : > { %v1260_v34 = vpop.permute.xlu1 %1259 }
  0xd0   : > { %v879_v36 = vpop.permute.xlu0 %878  ;;  %v1438_v9 = vsel %vm1414_vm4, %v1379_v14, %v1260_v34 }
  0xd1   : > { %1960 = vperm.xlu1 %8775, %v1881_v23   ;;  %v1321_v27 = vsel %vm1295_vm2, %v9133_v47, %v879_v36  ;;  %v1897_v47 = vld [vmem:[%s13675_s1 + $0xa8] sm:$0xff]  ;;  %v1899_v36 = vld [vmem:[%s13675_s1 + $0xb8] sm:$0xff] }
  0xd2   : > { %1975 = vperm.xlu0 %8776, %v1884_v43  }
  0xd3   : > { %v970_v55 = vpop.permute.xlu1 %969 }
  0xd4   : > { %8101 = vmatmul.mubr.msk.bf16.gmra.mrb[32].mxu0 %vm1496_vm5, %v1432_v37  ;;  %v1262_v38 = vpop.permute.xlu0 %1261  ;;  %v1381_v6 = vsel %vm1355_vm3, %v1321_v27, %v970_v55 }
  0xd5   : > { %1970 = vperm.xlu1 %8775, %v1883_v41   ;;  %8104 = vmatprep.mubr.msk.bf16.mxu0 %vm8913_vm1, %v13689_v1  ;;  %v1440_v34 = vsel %vm1414_vm4, %v1381_v6, %v1262_v38  ;;  %v1902_v41 = vld [vmem:[%s13675_s1 + $0xd0] sm:$0xff]  ;;  %v1905_v38 = vld [vmem:[%s13675_s1 + $0xe8] sm:$0xff] }
  0xd6   : > { %1985 = vperm.xlu0 %8776, %v1886_v42  }
  0xd7   : > { %v881_v53 = vpop.permute.xlu1 %880 }
  0xd8   : > { %v9472_v12 = vpop.permute.xlu0 %971  ;;  %v1323_v37 = vsel %vm1295_vm2, %v9142_v61, %v881_v53  ;;  %v1900_v61 = vld [vmem:[%s13675_s1 + $0xc0] sm:$0xff]  ;;  %v1903_v53 = vld [vmem:[%s13675_s1 + $0xd8] sm:$0xff] }
  0xd9   : > { %1980 = vperm.xlu1 %8775, %v1885_v52   ;;  %v1383_v55 = vsel %vm1355_vm3, %v1323_v37, %v9472_v12 }
  0xda   : > { %1995 = vperm.xlu0 %8776, %v1888_v58  }
  0xdb   : > { %v9483_v0 = vpop.permute.xlu1 %1263 }
  0xdc   : > { %8105 = vmatmul.mubr.msk.bf16.gmra.mrb[36].mxu0 %vm1496_vm5, %v1434_v2  ;;  %v9486_v4 = vpop.permute.xlu0 %882  ;;  %v1442_v58 = vsel %vm1414_vm4, %v1383_v55, %v9483_v0  ;;  %v1906_v2 = vld [vmem:[%s13675_s1 + $0xf0] sm:$0xff]  ;;  %v1909_v0 = vld [vmem:[%s13675_s1 + $0x108] sm:$0xff] }
  0xdd   : > { %1990 = vperm.xlu1 %8775, %v1887_v21   ;;  %8108 = vmatprep.mubr.msk.bf16.mxu0 %vm8913_vm1, %v13689_v1  ;;  %v1325_v12 = vsel %vm1295_vm2, %v9158_v22, %v9486_v4  ;;  %v1904_v22 = vld [vmem:[%s13675_s1 + $0xe0] sm:$0xff] }
  0xde   : > { %2005 = vperm.xlu0 %8776, %v1890_v59  }
  0xdf   : > { %v9497_v10 = vpop.permute.xlu1 %973 }
  0xe0   : > { %v9499_v18 = vpop.permute.xlu0 %1265  ;;  %v1385_v59 = vsel %vm1355_vm3, %v1325_v12, %v9497_v10 }
  0xe1   : > { %2000 = vperm.xlu1 %8775, %v1889_v13   ;;  %v1444_v13 = vsel %vm1414_vm4, %v1385_v59, %v9499_v18 }
  0xe2   : > { %2015 = vperm.xlu0 %8776, %v1892_v32   ;;  %v1907_v32 = vld [vmem:[%s13675_s1 + $0xf8] sm:$0xff] }
  0xe3   : > { %v9510_v60 = vpop.permute.xlu1 %884 }
  0xe4   : > { %8109 = vmatmul.mubr.msk.bf16.gmra.mrb[40].mxu0 %vm1496_vm5, %v1436_v15  ;;  %v9513_v46 = vpop.permute.xlu0 %975  ;;  %v1327_v10 = vsel %vm1295_vm2, %v9166_v35, %v9510_v60  ;;  %v1910_v15 = vld [vmem:[%s13675_s1 + $0x110] sm:$0xff]  ;;  %v1908_v35 = vld [vmem:[%s13675_s1 + $0x100] sm:$0xff] }
  0xe5   : > { %2010 = vperm.xlu1 %8775, %v1891_v11   ;;  %8112 = vmatprep.mubr.msk.bf16.mxu0 %vm8913_vm1, %v13689_v1  ;;  %v1387_v18 = vsel %vm1355_vm3, %v1327_v10, %v9513_v46  ;;  %v1911_v46 = vld [vmem:[%s13675_s1 + $0x118] sm:$0xff] }
  0xe6   : > { %2025 = vperm.xlu0 %8776, %v1894_v54   ;;  %v1913_v54 = vld [vmem:[%s13675_s1 + $0x128] sm:$0xff] }
  0xe7   : > { %v9524_v30 = vpop.permute.xlu1 %1267 }
  0xe8   : > { %v9526_v40 = vpop.permute.xlu0 %886 }
  0xe9   : > { %2020 = vperm.xlu1 %8775, %v1893_v31   ;;  %v1446_v31 = vsel %vm1414_vm4, %v1387_v18, %v9524_v30  ;;  %v1931_v18 = vld [vmem:[%s13675_s1 + $0x1b8] sm:$0xff] }
  0xea   : > { %2035 = vperm.xlu0 %8776, %v1896_v17   ;;  %v1329_v17 = vsel %vm1295_vm2, %v9176_v48, %v9526_v40  ;;  %v1912_v48 = vld [vmem:[%s13675_s1 + $0x120] sm:$0xff]  ;;  %v1917_v40 = vld [vmem:[%s13675_s1 + $0x148] sm:$0xff] }
  0xeb   : > { %v9537_v16 = vpop.permute.xlu1 %977 }
  0xec   : > { %8113 = vmatmul.mubr.msk.bf16.gmra.mrb[44].mxu0 %vm1496_vm5, %v1438_v9  ;;  %v9540_v24 = vpop.permute.xlu0 %1269  ;;  %v1914_v9 = vld [vmem:[%s13675_s1 + $0x130] sm:$0xff]  ;;  %v1389_v27 = vsel %vm1355_vm3, %v1329_v17, %v9537_v16  ;;  %v1915_v16 = vld [vmem:[%s13675_s1 + $0x138] sm:$0xff] }
  0xed   : > { %2030 = vperm.xlu1 %8775, %v1895_v7   ;;  %8116 = vmatprep.mubr.msk.bf16.mxu0 %vm8913_vm1, %v13689_v1  ;;  %v1448_v6 = vsel %vm1414_vm4, %v1389_v27, %v9540_v24  ;;  %v1930_v17 = vld [vmem:[%s13675_s1 + $0x1b0] sm:$0xff] }
  0xee   : > { %2045 = vperm.xlu0 %8776, %v1898_v20  }
  0xef   : > { %v9551_v23 = vpop.permute.xlu1 %888 }
  0xf0   : > { %v9553_v43 = vpop.permute.xlu0 %979 }
  0xf1   : > { %2040 = vperm.xlu1 %8775, %v1897_v47   ;;  %v1331_v47 = vsel %vm1295_vm2, %v9188_v5, %v9551_v23  ;;  %v1916_v5 = vld [vmem:[%s13675_s1 + $0x140] sm:$0xff]  ;;  %v1921_v23 = vld [vmem:[%s13675_s1 + $0x168] sm:$0xff] }
  0xf2   : > { %2060 = vperm.xlu0 %8776, %v1901_v26   ;;  %v1919_v26 = vld [vmem:[%s13675_s1 + $0x158] sm:$0xff]  ;;  %v1391_v24 = vsel %vm1355_vm3, %v1331_v47, %v9553_v43  ;;  %v1918_v43 = vld [vmem:[%s13675_s1 + $0x150] sm:$0xff] }
  0xf3   : > { %v9564_v8 = vpop.permute.xlu1 %1271 }
  0xf4   : > { %8117 = vmatmul.mubr.msk.bf16.gmra.mrb[48].mxu0 %vm1496_vm5, %v1440_v34  ;;  %v9567_v42 = vpop.permute.xlu0 %890 }
  0xf5   : > { %2050 = vperm.xlu1 %8775, %v1899_v36   ;;  %8120 = vmatprep.mubr.msk.bf16.mxu0 %vm8913_vm1, %v13689_v1 }
  0xf6   : > { %2065 = vperm.xlu0 %8776, %v1902_v41   ;;  %v1450_v41 = vsel %vm1414_vm4, %v1391_v24, %v9564_v8 }
  0xf7   : > { %v9579_v45 = vpop.permute.xlu1 %981 }
  0xf8   : > { %v9581_v52 = vpop.permute.xlu0 %1273 }
  0xf9   : > { %2055 = vperm.xlu1 %8775, %v1900_v61   ;;  %v1333_v61 = vsel %vm1295_vm2, %v9205_v33, %v9567_v42  ;;  %v1920_v33 = vld [vmem:[%s13675_s1 + $0x160] sm:$0xff]  ;;  %v1925_v42 = vld [vmem:[%s13675_s1 + $0x188] sm:$0xff] }
  0xfa   : > { %2080 = vperm.xlu0 %8776, %v1905_v38   ;;  %v1923_v38 = vld [vmem:[%s13675_s1 + $0x178] sm:$0xff]  ;;  %v1393_v8 = vsel %vm1355_vm3, %v1333_v61, %v9579_v45  ;;  %v1922_v45 = vld [vmem:[%s13675_s1 + $0x170] sm:$0xff]  ;;  %v8847_v61 = vld [vmem:[%s13678_s4] sm:$0xff]  }
  0xfb   : > { %v9594_v21 = vpop.permute.xlu1 %892  ;;  %v1452_v12 = vsel %vm1414_vm4, %v1393_v8, %v9581_v52  ;;  %v8844_v52 = vld [vmem:[%s13680_s6] sm:$0xff]   ;;  %3883 = vmatpush1.bf16.msra.mxu1 %v8847_v61 }
  0xfc   : > { %8121 = vmatmul.mubr.msk.bf16.gmra.mrb[52].mxu0 %vm1496_vm5, %v1442_v58  ;;  %v9597_v39 = vpop.permute.xlu0 %983  ;;  %v1335_v59 = vsel %vm1295_vm2, %v9213_v49, %v9594_v21  ;;  %v1924_v49 = vld [vmem:[%s13675_s1 + $0x180] sm:$0xff]  ;;  %v1929_v21 = vld [vmem:[%s13675_s1 + $0x1a8] sm:$0xff]  ;;  %3884 = vmatprep.subr.bf16.mxu1 %v13687_v25 }
  0xfd   : > { %2070 = vperm.xlu1 %8775, %v1903_v53   ;;  %8124 = vmatprep.mubr.msk.bf16.mxu0 %vm8913_vm1, %v13689_v1 }
  0xfe   : > { %2085 = vperm.xlu0 %8776, %v1906_v2   ;;  %8305 = vmatpush3.bf16.msra.mxu0 %v8844_v52  ;;  %v8850_v52 = vld [vmem:[%s13678_s4 + $0x18] sm:$0xff]  }
  0xff   : > { %v9609_v4 = vpop.permute.xlu1 %1275  ;;  %8306 = vmatprep.subr.bf16.mxu0 %v13689_v1 }
 0x100   : > { %v9611_v51 = vpop.permute.xlu0 %894 }
 0x101   : > { %2075 = vperm.xlu1 %8775, %v1904_v22   ;;  %v1927_v22 = vld [vmem:[%s13675_s1 + $0x198] sm:$0xff] }
 0x102   : > { %2100 = vperm.xlu0 %8776, %v1909_v0  }
 0x103   : > { %v9624_v11 = vpop.permute.xlu1 %985 }
 0x104   : > { %8125 = vmatmul.mubr.msk.bf16.gmra.mrb[56].mxu0 %vm1496_vm5, %v1444_v13  ;;  %v9627_v57 = vpop.permute.xlu0 %1277  ;;  %v1395_v13 = vsel %vm1355_vm3, %v1335_v59, %v9597_v39  ;;  %v1926_v39 = vld [vmem:[%s13675_s1 + $0x190] sm:$0xff] }
 0x105   : > { %2090 = vperm.xlu1 %8775, %v1907_v32   ;;  %8128 = vmatprep.mubr.msk.bf16.mxu0 %vm8913_vm1, %v13689_v1  ;;  %v1454_v10 = vsel %vm1414_vm4, %v1395_v13, %v9609_v4 }
 0x106   : > { %2105 = vperm.xlu0 %8776, %v1910_v15  }
 0x107   : > { %v9639_v60 = vpop.permute.xlu1 %896 }
 0x108   : > { %v9641_v14 = vpop.permute.xlu0 %987 }
 0x109   : > { %2095 = vperm.xlu1 %8775, %v1908_v35   ;;  %v1337_v35 = vsel %vm1295_vm2, %v9225_v3, %v9611_v51 }
 0x10a   : > { %2120 = vperm.xlu0 %8776, %v1913_v54   ;;  %v1928_v54 = vld [vmem:[%s13675_s1 + $0x1a0] sm:$0xff] }
 0x10b   : > { %v9654_v7 = vpop.permute.xlu1 %1279 }
 0x10c   : > { %8129 = vmatmul.mubr.msk.bf16.gmra.mrb[60].mxu0 %vm1496_vm5, %v1446_v31  ;;  %v9659_v30 = vpop.permute.xlu0 %898  ;;  %v1397_v31 = vsel %vm1355_vm3, %v1337_v35, %v9624_v11  ;;  %v1932_v11 = vld [vmem:[%s13675_s1 + $0x1c0] sm:$0xff] }
 0x10d   : > { %2110 = vperm.xlu1 %8775, %v1911_v46   ;;  %8132 = vmatprep.mubr.msk.bf16.mxu0 %vm8913_vm1, %v13689_v1  ;;  %v1456_v3 = vsel %vm1414_vm4, %v1397_v31, %v9627_v57 }
 0x10e   : > { %2125 = vperm.xlu0 %8776, %v1914_v9   ;;  %v1339_v9 = vsel %vm1295_vm2, %v9235_v28, %v9639_v60  ;;  %v1341_v28 = vsel %vm1295_vm2, %v9249_v50, %v9659_v30 }
 0x10f   : > { %v9669_v20 = vpop.permute.xlu1 %989  ;;  %v1399_v57 = vsel %vm1355_vm3, %v1339_v9, %v9641_v14  ;;  %v8853_v9 = vld [vmem:[%s13678_s4 + $0x28] sm:$0xff]  }
 0x110   : > { %v9682_v34 = vpop.permute.xlu0 %1281  ;;  %v1401_v14 = vsel %vm1355_vm3, %v1341_v28, %v9669_v20 }
 0x111   : > { %2115 = vperm.xlu1 %8775, %v1912_v48  }
 0x112   : > { %2140 = vperm.xlu0 %8776, %v1917_v40   ;;  %v1458_v40 = vsel %vm1414_vm4, %v1399_v57, %v9654_v7  ;;  %v1460_v7 = vsel %vm1414_vm4, %v1401_v14, %v9682_v34  ;;  %v8854_v14 = vld [vmem:[%s13680_s6 + $0x20] sm:$0xff]  }
 0x113   : > { %v9684_v36 = vpop.permute.xlu1 %900 }
 0x114   : > { %8133 = vmatmul.mubr.msk.bf16.gmra.mrb[64].mxu0 %vm1496_vm5, %v1448_v6  ;;  %v9701_v55 = vpop.permute.xlu0 %991  ;;  %v1343_v50 = vsel %vm1295_vm2, %v9266_v62, %v9684_v36 }
 0x115   : > { %2130 = vperm.xlu1 %8775, %v1915_v16   ;;  %8136 = vmatprep.mubr.msk.bf16.mxu0 %vm8913_vm1, %v13689_v1  ;;  %v8845_v16 = vld [vmem:[%s13680_s6 + $0x8] sm:$0xff]   ;;  %v1403_v20 = vsel %vm1355_vm3, %v1343_v50, %v9701_v55 }
 0x116   : > { %2150 = vperm.xlu0 %8776, %v1919_v26   ;;  %8307 = vmatpush3.bf16.msra.mxu0 %v8845_v16 }
 0x117   : > { %v9697_v37 = vpop.permute.xlu1 %1283  ;;  %8308 = vmatprep.subr.bf16.mxu0 %v13689_v1 }
 0x118   : > { %v9725_v53 = vpop.permute.xlu0 %902  ;;  %v1462_v34 = vsel %vm1414_vm4, %v1403_v20, %v9697_v37 }
 0x119   : > { %2135 = vperm.xlu1 %8775, %v1916_v5   ;;  %v1345_v62 = vsel %vm1295_vm2, %v9284_v44, %v9725_v53  ;;  %v8846_v53 = vld [vmem:[%s13680_s6 + $0x10] sm:$0xff]  }
 0x11a   : > { %2160 = vperm.xlu0 %8776, %v1921_v23   ;;  %8309 = vmatpush3.bf16.msra.mxu0 %v8846_v53 }
 0x11b   : > { %v9712_v58 = vpop.permute.xlu1 %993  ;;  %8310 = vmatprep.subr.bf16.mxu0 %v13689_v1 }
 0x11c   : > { %8137 = vmatmul.mubr.msk.bf16.gmra.mrb[68].mxu0 %vm1496_vm5, %v1450_v41  ;;  %v9744_v0 = vpop.permute.xlu0 %1285  ;;  %v1405_v5 = vsel %vm1355_vm3, %v1345_v62, %v9712_v58 }
 0x11d   : > { %2145 = vperm.xlu1 %8775, %v1918_v43   ;;  %8140 = vmatprep.mubr.msk.bf16.mxu0 %vm8913_vm1, %v13689_v1  ;;  %v1464_v37 = vsel %vm1414_vm4, %v1405_v5, %v9744_v0 }
 0x11e   : > { %2170 = vperm.xlu0 %8776, %v1923_v38  }
 0x11f   : > { %v9729_v2 = vpop.permute.xlu1 %904 }
 0x120   : > { %v996_v15 = vpop.permute.xlu0 %995  ;;  %v1347_v41 = vsel %vm1295_vm2, %v9304_v56, %v9729_v2 }
 0x121   : > { %2155 = vperm.xlu1 %8775, %v1920_v33   ;;  %v1407_v43 = vsel %vm1355_vm3, %v1347_v41, %v996_v15  ;;  %v8848_v33 = vld [vmem:[%s13678_s4 + $0x8] sm:$0xff]  }
 0x122   : > { %2180 = vperm.xlu0 %8776, %v1925_v42   ;;  %3885 = vmatpush1.bf16.msra.mxu1 %v8848_v33 }
 0x123   : > { %v9756_v32 = vpop.permute.xlu1 %1287  ;;  %3886 = vmatprep.subr.bf16.mxu1 %v13687_v25 }
 0x124   : > { %8141 = vmatmul.mubr.msk.bf16.gmra.mrb[72].mxu0 %vm1496_vm5, %v1452_v12  ;;  %v907_v46 = vpop.permute.xlu0 %906  ;;  %v1466_v38 = vsel %vm1414_vm4, %v1407_v43, %v9756_v32  ;;  %v7778_v32 = vcombine.low %v9334_v63, %v9334_v63 }
 0x125   : > { %2165 = vperm.xlu1 %8775, %v1922_v45   ;;  %8144 = vmatprep.mubr.msk.bf16.mxu0 %vm8913_vm1, %v13689_v1  ;;  %v1349_v56 = vsel %vm1295_vm2, %v9328_v19, %v907_v46  ;;  %v8849_v19 = vld [vmem:[%s13678_s4 + $0x10] sm:$0xff]  }
 0x126   : > { %2190 = vperm.xlu0 %8776, %v1927_v22   ;;  %3887 = vmatpush1.bf16.msra.mxu1 %v8849_v19  ;;  %v9896_v22 = vld [vmem:[%s13677_s3] ss:$0 sm:$0xff] }
 0x127   : > { %v998_v4 = vpop.permute.xlu1 %997  ;;  %3888 = vmatprep.subr.bf16.mxu1 %v13687_v25 }
 0x128   : > { %v1290_v27 = vpop.permute.xlu0 %1289  ;;  %v1409_v42 = vsel %vm1355_vm3, %v1349_v56, %v998_v4  ;;  %v8851_v4 = vld [vmem:[%s13678_s4 + $0x20] sm:$0xff]  }
 0x129   : > { %2175 = vperm.xlu1 %8775, %v1924_v49   ;;  %v1468_v2 = vsel %vm1414_vm4, %v1409_v42, %v1290_v27  ;;  %v8858_v42 = vld [vmem:[%s13680_s6 + $0x30] sm:$0xff]  }
 0x12a   : > { %2200 = vperm.xlu0 %8776, %v1929_v21   ;;  %3889 = vmatpush1.bf16.msra.mxu1 %v8850_v52 }
 0x12b   : > { %v9783_v51 = vpop.permute.xlu1 %908  ;;  %3890 = vmatprep.subr.bf16.mxu1 %v13687_v25 }
 0x12c   : > { %8145 = vmatmul.mubr.msk.bf16.gmra.mrb[76].mxu0 %vm1496_vm5, %v1454_v10  ;;  %v1000_v60 = vpop.permute.xlu0 %999  ;;  %v1351_v59 = vsel %vm1295_vm2, %v9351_v29, %v9783_v51 }
 0x12d   : > { %2185 = vperm.xlu1 %8775, %v1926_v39   ;;  %8148 = vmatprep.mubr.msk.bf16.mxu0 %vm8913_vm1, %v13689_v1  ;;  %v1411_v49 = vsel %vm1355_vm3, %v1351_v59, %v1000_v60 }
 0x12e   : > { %2210 = vperm.xlu0 %8776, %v1931_v18   ;;  %3891 = vmatpush1.bf16.msra.mxu1 %v8851_v4 }
 0x12f   : > { %v9796_v48 = vpop.permute.xlu1 %1291  ;;  %3892 = vmatprep.subr.bf16.mxu1 %v13687_v25 }
 0x130   : > { %v9815_v47 = vpop.permute.xlu0 %910 }
 0x131   : > { %2195 = vperm.xlu1 %8775, %v1928_v54   ;;  %v1470_v54 = vsel %vm1414_vm4, %v1411_v49, %v9796_v48  ;;  %v1354_v63 = vsel %vm1295_vm2, %v7778_v32, %v9815_v47 }
 0x132   : > { %3893 = vmatpush1.bf16.msra.mxu1 %v8853_v9 }
 0x133   : > { %v9806_v6 = vpop.permute.xlu1 %1001  ;;  %3894 = vmatprep.subr.bf16.mxu1 %v13687_v25 }
 0x134   : > { %8149 = vmatmul.mubr.msk.bf16.gmra.mrb[80].mxu0 %vm1496_vm5, %v1456_v3  ;;  %v9828_v26 = vpop.permute.xlu0 %1293  ;;  %v1413_v57 = vsel %vm1355_vm3, %v1354_v63, %v9806_v6  ;;  %v8855_v6 = vld [vmem:[%s13678_s4 + $0x30] sm:$0xff]  }
 0x135   : > { %2205 = vperm.xlu1 %8775, %v1930_v17   ;;  %8152 = vmatprep.mubr.msk.bf16.mxu0 %vm8913_vm1, %v13689_v1  ;;  %v8852_v17 = vld [vmem:[%s13680_s6 + $0x18] sm:$0xff]   ;;  %v1472_v50 = vsel %vm1414_vm4, %v1413_v57, %v9828_v26 }
 0x136   : > { %8311 = vmatpush3.bf16.msra.mxu0 %v8852_v17  ;;  %3895 = vmatpush1.bf16.msra.mxu1 %v8855_v6 }
 0x137   : > { %8312 = vmatprep.subr.bf16.mxu0 %v13689_v1  ;;  %3896 = vmatprep.subr.bf16.mxu1 %v13687_v25 }
 0x139   : > { %2215 = vperm.xlu1 %8775, %v1932_v11  }
 0x13a   : > { %8313 = vmatpush3.bf16.msra.mxu0 %v8854_v14 }
 0x13b   : > { %8314 = vmatprep.subr.bf16.mxu0 %v13689_v1 }
 0x13c   : > { %8153 = vmatmul.mubr.msk.bf16.gmra.mrb[84].mxu0 %vm1496_vm5, %v1458_v40 }
 0x13d   : > { %8156 = vmatprep.mubr.msk.bf16.mxu0 %vm8913_vm1, %v13689_v1 }
 0x144   : > { %8157 = vmatmul.mubr.msk.bf16.gmra.mrb[88].mxu0 %vm1496_vm5, %v1460_v7  ;;  %v9822_v30 = vpop.permute.xlu1 %1935 }
 0x145   : > { %8160 = vmatprep.mubr.msk.bf16.mxu0 %vm8913_vm1, %v13689_v1  ;;  %v1941_v36 = vpop.permute.xlu0 %1940 }
 0x148   : > { %v9832_v24 = vpop.permute.xlu1 %1945 }
 0x149   : > { %v9850_v55 = vpop.permute.xlu0 %1955 }
 0x14c   : > { %8161 = vmatmul.mubr.msk.bf16.gmra.mrb[92].mxu0 %vm1496_vm5, %v1462_v34  ;;  %v9842_v23 = vpop.permute.xlu1 %1950 }
 0x14d   : > { %8164 = vmatprep.mubr.msk.bf16.mxu0 %vm8913_vm1, %v13689_v1  ;;  %v9862_v58 = vpop.permute.xlu0 %1965 }
 0x150   : > { %v9854_v44 = vpop.permute.xlu1 %1960 }
 0x151   : > { %v9879_v12 = vpop.permute.xlu0 %1975 }
 0x154   : > { %8165 = vmatmul.mubr.msk.bf16.gmra.mrb[96].mxu0 %vm1496_vm5, %v1464_v37  ;;  %v9867_v8 = vpop.permute.xlu1 %1970  ;;  %v8857_v37 = vld [vmem:[%s13678_s4 + $0x38] sm:$0xff]  }
 0x155   : > { %8168 = vmatprep.mubr.msk.bf16.mxu0 %vm8913_vm1, %v13689_v1  ;;  %v9904_v0 = vpop.permute.xlu0 %1985  ;;  %3897 = vmatpush1.bf16.msra.mxu1 %v8857_v37 }
 0x156   : > { %3898 = vmatprep.subr.bf16.mxu1 %v13687_v25 }
 0x158   : > { %v9886_v45 = vpop.permute.xlu1 %1980 }
 0x159   : > { %v9922_v46 = vpop.permute.xlu0 %1995 }
 0x15c   : > { %8169 = vmatmul.mubr.msk.bf16.gmra.mrb[100].mxu0 %vm1496_vm5, %v1466_v38  ;;  %v9910_v10 = vpop.permute.xlu1 %1990 }
 0x15d   : > { %8172 = vmatprep.mubr.msk.bf16.mxu0 %vm8913_vm1, %v13689_v1 }
 0x160   : > { %v9934_v11 = vpop.permute.xlu1 %2000 }
 0x164   : > { %8173 = vmatmul.mubr.msk.bf16.gmra.mrb[104].mxu0 %vm1496_vm5, %v1468_v2  ;;  %v9955_v34 = vpop.permute.xlu1 %2010 }
 0x165   : > { %8176 = vmatprep.mubr.msk.bf16.mxu0 %vm8913_vm1, %v13689_v1 }
 0x167   : > { %v1589_v13 = vpop.f32.mrb[0].mxu0 }
 0x168   : > { %v1590_v29 = vadd.f32 %v9896_v22, %v1589_v13  ;;  %v8070_v21 = vpop.f32.mrb[1].mxu0  ;;  %v8859_v13 = vld [vmem:[%s13678_s4 + $0x40] sm:$0xff]   ;;  %v9987_v49 = vpop.permute.xlu1 %2020 }
 0x169   : > { %v1592_v39 = vpop.f32.mrb[2].mxu0  ;;  %3899 = vmatpush1.bf16.msra.mxu1 %v8859_v13 }
 0x16a   : > { %v1819_v15 = vmax.f32 %v1590_v29, 0.0  ;;  %v1593_v18 = vadd.f32 %v9896_v22, %v1592_v39  ;;  %v8071_v35 = vpop.f32.mrb[3].mxu0  ;;  %3900 = vmatprep.subr.bf16.mxu1 %v13687_v25 }
 0x16c   : > { %v1820_v31 = vmax.f32 %v1593_v18, 0.0  ;;  %8177 = vmatmul.mubr.msk.bf16.gmra.mrb[108].mxu0 %vm1496_vm5, %v1470_v54  ;;  %v2218_v3 = vmul.f32 %v9822_v30, %v1819_v15  ;;  %v9952_v30 = vpop.permute.xlu0 %2005  ;;  %v8860_v15 = vld [vmem:[%s13680_s6 + $0x38] sm:$0xff]   ;;  %v8861_v54 = vld [vmem:[%s13678_s4 + $0x48] sm:$0xff]  }
 0x16d   : > { %8180 = vmatprep.mubr.msk.bf16.mxu0 %vm8913_vm1, %v13689_v1  ;;  %3901 = vmatpush1.bf16.msra.mxu1 %v8861_v54 }
 0x16e   : > { %v2219_v51 = vmul.f32 %v1941_v36, %v1820_v31  ;;  %v8856_v36 = vld [vmem:[%s13680_s6 + $0x28] sm:$0xff]   ;;  %3902 = vmatprep.subr.bf16.mxu1 %v13687_v25 }
 0x16f   : > { %v1597_v27 = vpop.f32.mrb[4].mxu0  ;;  %8315 = vmatpush3.bf16.msra.mxu0 %v8856_v36 }
 0x170   : > { %v9938_v48 = vpack.c.bf16 %v2219_v51, %v2218_v3  ;;  %v1598_v40 = vadd.f32 %v9896_v22, %v1597_v27  ;;  %v8074_v28 = vpop.f32.mrb[5].mxu0  ;;  %8316 = vmatprep.subr.bf16.mxu0 %v13689_v1 }
 0x171   : > { %v1600_v60 = vpop.f32.mrb[6].mxu0 }
 0x172   : > { %v1821_v16 = vmax.f32 %v1598_v40, 0.0  ;;  %v1601_v7 = vadd.f32 %v9896_v22, %v1600_v60  ;;  %v8075_v47 = vpop.f32.mrb[7].mxu0  ;;  %v2311_v62 = vshll.u32 %v9938_v48, 16  ;;  %v2626_v56 = vrot.slane %v9938_v48, 1 }
 0x173   : > { %8317 = vmatpush3.bf16.msra.mxu0 %v8858_v42  ;;  %v2309_v32 = vshrl.u32 %v9938_v48, 16 }
 0x174   : > { %v1822_v20 = vmax.f32 %v1601_v7, 0.0  ;;  %8181 = vmatmul.mubr.msk.bf16.gmra.mrb[112].mxu0 %vm1496_vm5, %v1472_v50  ;;  %v2220_v26 = vmul.f32 %v9832_v24, %v1821_v16  ;;  %v9974_v24 = vpop.permute.xlu0 %2015  ;;  %v2313_v33 = vrot.slane %v2311_v62, 1  ;;  %8318 = vmatprep.subr.bf16.mxu0 %v13689_v1  ;;  %v8862_v16 = vld [vmem:[%s13678_s4 + $0x50] sm:$0xff]  }
 0x175   : > { %8320 = vmatprep.mubr.msk.bf16.mxu0 %vm8913_vm1, %v13689_v1  ;;  %3903 = vmatpush1.bf16.msra.mxu1 %v8862_v16 }
 0x176   : > { %v2221_v5 = vmul.f32 %v9842_v23, %v1822_v20  ;;  %v2314_v4 = vor.u32 %v2313_v33, %v2309_v32  ;;  %3904 = vmatprep.subr.bf16.mxu1 %v13687_v25 }
 0x177   : > { %v1605_v41 = vpop.f32.mrb[8].mxu0  ;;  %8319 = vmatpush3.bf16.msra.mxu0 %v8860_v15 }
 0x178   : > { %v9970_v43 = vpack.c.bf16 %v2221_v5, %v2220_v26  ;;  %v1606_v61 = vadd.f32 %v9896_v22, %v1605_v41  ;;  %v8078_v38 = vpop.f32.mrb[9].mxu0  ;;  %v10006_v31 = vpop.permute.xlu0 %2025  ;;  %6031 = vmatprep.subr.bf16.mxu0 %v13687_v25 }
 0x179   : > { %v1608_v23 = vpop.f32.mrb[10].mxu0 }
 0x17a   : > { %v1823_v53 = vmax.f32 %v1606_v61, 0.0  ;;  %v1609_v19 = vadd.f32 %v9896_v22, %v1608_v23  ;;  %v8079_v2 = vpop.f32.mrb[11].mxu0  ;;  %v2627_v59 = vrot.slane %v9970_v43, 1  ;;  %v2316_v52 = vshll.u32 %v9970_v43, 16 }
 0x17b   : > { %v2743_v27 = vrot.slane %v9970_v43, 4  ;;  %v2320_v14 = vshrl.u32 %v9970_v43, 16  ;;  %v2980_v26 = vrot.slane %v9970_v43, 5 }
 0x17c   : > { %v1824_v29 = vmax.f32 %v1609_v19, 0.0  ;;  %v2628_v21 = vsel %vm2625_vm6, %v2626_v56, %v2627_v59  ;;  %v9993_v39 = vrot.slane %v2316_v52, 1  ;;  %v2222_v18 = vmul.f32 %v9850_v55, %v1823_v53  ;;  %v10014_v55 = vpop.permute.xlu1 %2030  ;;  %v10032_v36 = vpop.permute.xlu0 %2035  ;;  %v8863_v56 = vld [vmem:[%s13678_s4 + $0x58] sm:$0xff]  }
 0x17d   : > { %2683 = vrot.lane.b32.xlu0 %v2628_v21, %s8915_s20  ;;  %v2859_v38 = vrot.slane %v2320_v14, 4  ;;  %v2860_v23 = vrot.slane %v2316_v52, 5  ;;  %3905 = vmatpush1.bf16.msra.mxu1 %v8863_v56 }
 0x17e   : > { %v2223_v35 = vmul.f32 %v9854_v44, %v1824_v29  ;;  %v2319_v9 = vsel %vm622_vm0, %v2314_v4, %v9993_v39  ;;  %3906 = vmatprep.subr.bf16.mxu1 %v13687_v25 }
 0x17f   : > { %v1613_v63 = vpop.f32.mrb[12].mxu0 }
 0x180   : > { %v10008_v17 = vpack.c.bf16 %v2223_v35, %v2222_v18  ;;  %v1614_v3 = vadd.f32 %v9896_v22, %v1613_v63  ;;  %v8082_v51 = vpop.f32.mrb[13].mxu0  ;;  %v10045_v33 = vpop.permute.xlu1 %2040  ;;  %v2322_v18 = vor.u32 %v2320_v14, %v9993_v39  ;;  %v8864_v35 = vld [vmem:[%s13678_s4 + $0x60] sm:$0xff]   ;;  %v8865_v14 = vld [vmem:[%s13678_s4 + $0x68] sm:$0xff]  }
 0x181   : > { %v1616_v44 = vpop.f32.mrb[14].mxu0  ;;  %2538 = vrot.lane.b32.xlu0 %v2319_v9, %s8916_s27  ;;  %v10068_v4 = vpop.permute.xlu0 %2045  ;;  %3907 = vmatpush1.bf16.msra.mxu1 %v8864_v35 }
 0x182   : > { %v1825_v57 = vmax.f32 %v1614_v3, 0.0  ;;  %v1617_v40 = vadd.f32 %v9896_v22, %v1616_v44  ;;  %v8083_v28 = vpop.f32.mrb[15].mxu0  ;;  %v2744_v60 = vrot.slane %v10008_v17, 4  ;;  %v2981_v7 = vrot.slane %v10008_v17, 5  ;;  %3908 = vmatprep.subr.bf16.mxu1 %v13687_v25 }
 0x183   : > { %v2629_v47 = vrot.slane %v10008_v17, 1  ;;  %v2324_v6 = vshll.u32 %v10008_v17, 16  ;;  %v2328_v50 = vshrl.u32 %v10008_v17, 16 }
 0x184   : > { %v1826_v20 = vmax.f32 %v1617_v40, 0.0  ;;  %v2745_v62 = vsel %vm2304_vm7, %v2743_v27, %v2744_v60  ;;  %v2224_v41 = vmul.f32 %v9862_v58, %v1825_v57  ;;  %v2982_v53 = vsel %vm2979_vm8, %v2980_v26, %v2981_v7  ;;  %v10078_v44 = vpop.permute.xlu1 %2050 }
 0x185   : > { %2800 = vrot.lane.b32.xlu0 %v2745_v62, %s8917_s30  ;;  %4467 = vrot.lane.b32.xlu1 %v2745_v62, %s8915_s20  ;;  %v2862_v5 = vrot.slane %v2328_v50, 4  ;;  %v2863_v37 = vrot.slane %v2324_v6, 5  ;;  %v2630_v58 = vsel %vm2625_vm6, %v2627_v59, %v2629_v47  ;;  %v10058_v13 = vrot.slane %v2324_v6, 1 }
 0x186   : > { %v2225_v61 = vmul.f32 %v9867_v8, %v1826_v20  ;;  %v2861_v59 = vor.u32 %v2860_v23, %v2859_v38  ;;  %3909 = vmatpush1.bf16.msra.mxu1 %v8865_v14 }
 0x187   : > { %v1621_v42 = vpop.f32.mrb[16].mxu0  ;;  %v2864_v52 = vor.u32 %v2863_v37, %v2862_v5  ;;  %v2327_v9 = vsel %vm622_vm0, %v2322_v18, %v10058_v13  ;;  %3910 = vmatprep.subr.bf16.mxu1 %v13687_v25 }
 0x188   : > { %v10055_v8 = vpack.c.bf16 %v2225_v61, %v2224_v41  ;;  %v1622_v19 = vadd.f32 %v9896_v22, %v1621_v42  ;;  %v8086_v2 = vpop.f32.mrb[17].mxu0  ;;  %v10110_v23 = vpop.permute.xlu1 %2055 }
 0x189   : > { %v1624_v29 = vpop.f32.mrb[18].mxu0  ;;  %3038 = vrot.lane.b32.xlu1 %v2982_v53, %s8916_s27  ;;  %2685 = vrot.lane.b32.xlu0 %v2630_v58, %s8915_s20  ;;  %v10073_v51 = vsel %vm2858_vm9, %v2861_v59, %v2864_v52 }
 0x18a   : > { %v1827_v21 = vmax.f32 %v1622_v19, 0.0  ;;  %v1625_v32 = vadd.f32 %v9896_v22, %v1624_v29  ;;  %v8087_v15 = vpop.f32.mrb[19].mxu0  ;;  %v2332_v54 = vshll.u32 %v10055_v8, 16  ;;  %v2336_v63 = vshrl.u32 %v10055_v8, 16 }
 0x18b   : > { %v2983_v39 = vrot.slane %v10055_v8, 5  ;;  %v2746_v6 = vrot.slane %v10055_v8, 4 }
 0x18c   : > { %v1828_v3 = vmax.f32 %v1625_v32, 0.0  ;;  %v2866_v27 = vrot.slane %v2336_v63, 4  ;;  %v2867_v57 = vrot.slane %v2332_v54, 5  ;;  %v2226_v40 = vmul.f32 %v9879_v12, %v1827_v21  ;;  %v10140_v35 = vpop.permute.xlu1 %2070 }
 0x18d   : > { %4525 = vrot.lane.b32.xlu0 %v10073_v51, %s8917_s30  ;;  %2540 = vrot.lane.b32.xlu1 %v2327_v9, %s8916_s27  ;;  %v2984_v12 = vsel %vm2979_vm8, %v2981_v7, %v2983_v39  ;;  %v8866_v7 = vld [vmem:[%s13678_s4 + $0x70] sm:$0xff]   ;;  %v2747_v42 = vsel %vm2304_vm7, %v2744_v60, %v2746_v6  ;;  %v8867_v60 = vld [vmem:[%s13678_s4 + $0x78] sm:$0xff]   ;;  %v2631_v21 = vrot.slane %v10055_v8, 1 }
 0x18e   : > { %v2227_v28 = vmul.f32 %v9886_v45, %v1828_v3  ;;  %v10098_v5 = vor.u32 %v2867_v57, %v2866_v27  ;;  %v10100_v45 = vpop.permute.xlu0 %2060  ;;  %3911 = vmatpush1.bf16.msra.mxu1 %v8866_v7 }
 0x18f   : > { %v1629_v16 = vpop.f32.mrb[20].mxu0  ;;  %3912 = vmatprep.subr.bf16.mxu1 %v13687_v25  ;;  %v2632_v14 = vsel %vm2625_vm6, %v2629_v47, %v2631_v21 }
 0x190   : > { %v10092_v20 = vpack.c.bf16 %v2227_v28, %v2226_v40  ;;  %v1630_v62 = vadd.f32 %v9896_v22, %v1629_v16  ;;  %v8090_v26 = vpop.f32.mrb[21].mxu0  ;;  %v10117_v53 = vsel %vm2858_vm9, %v2864_v52, %v10098_v5  ;;  %v2334_v40 = vrot.slane %v2332_v54, 1 }
 0x191   : > { %v1632_v37 = vpop.f32.mrb[22].mxu0  ;;  %3096 = vrot.lane.b32.xlu0 %v10055_v8, %s8915_s20  ;;  %3040 = vrot.lane.b32.xlu1 %v2984_v12, %s8916_s27  ;;  %v2330_v12 = vor.u32 %v2328_v50, %v10058_v13 }
 0x192   : > { %13777 = vst [vmem:[#allocation2_spill] sm:$0xff] %v10092_v20  ;;  %v1829_v41 = vmax.f32 %v1630_v62, 0.0  ;;  %v1633_v61 = vadd.f32 %v9896_v22, %v1632_v37  ;;  %v8091_v38 = vpop.f32.mrb[23].mxu0  ;;  %v2748_v58 = vrot.slane %v10092_v20, 4  ;;  %v10129_v52 = vpop.permute.xlu0 %2065  ;;  %v2985_v32 = vrot.slane %v10092_v20, 5  ;;  %3913 = vmatpush1.bf16.msra.mxu1 %v8867_v60 }
 0x193   : > { %v2340_v18 = vshll.u32 %v10092_v20, 16  ;;  %8184 = vmatprep.subr.bf16.mxu1 %v13689_v1  ;;  %v2338_v47 = vor.u32 %v2336_v63, %v2334_v40  ;;  %v10163_v37 = vpop.permute.xlu1 %2075  ;;  %v2335_v7 = vsel %vm622_vm0, %v2330_v12, %v2334_v40 }
 0x194   : > { %v1830_v56 = vmax.f32 %v1633_v61, 0.0  ;;  %v2228_v19 = vmul.f32 %v9904_v0, %v1829_v41  ;;  %v2986_v16 = vsel %vm2979_vm8, %v2983_v39, %v2985_v32 }
 0x195   : > { %4469 = vrot.lane.b32.xlu0 %v2747_v42, %s8915_s20  ;;  %4527 = vrot.lane.b32.xlu1 %v10117_v53, %s8917_s30 }
 0x196   : > { %v2229_v2 = vmul.f32 %v9910_v10, %v1830_v56  ;;  %v2749_v10 = vsel %vm2304_vm7, %v2746_v6, %v2748_v58  ;;  %v2342_v6 = vrot.slane %v2340_v18, 1  ;;  %v10152_v62 = vpop.permute.xlu0 %2080 }
 0x197   : > { %v1637_v29 = vpop.f32.mrb[24].mxu0 }
 0x198   : > { %v10133_v15 = vpack.c.bf16 %v2229_v2, %v2228_v19  ;;  %v1638_v59 = vadd.f32 %v9896_v22, %v1637_v29  ;;  %v8094_v0 = vpop.f32.mrb[25].mxu0  ;;  %v2344_v19 = vshrl.u32 %v10092_v20, 16 }
 0x199   : > { %v1640_v3 = vpop.f32.mrb[26].mxu0  ;;  %2802 = vrot.lane.b32.xlu0 %v2747_v42, %s8917_s30  ;;  %4471 = vrot.lane.b32.xlu1 %v2749_v10, %s8915_s20 }
 0x19a   : > { %13778 = vst [vmem:[#allocation3_spill] sm:$0xff] %v10133_v15  ;;  %v1831_v9 = vmax.f32 %v1638_v59, 0.0  ;;  %v1641_v27 = vadd.f32 %v9896_v22, %v1640_v3  ;;  %v8095_v57 = vpop.f32.mrb[27].mxu0  ;;  %v10173_v56 = vpop.permute.xlu0 %2085  ;;  %v2987_v42 = vrot.slane %v10133_v15, 5  ;;  %v2348_v2 = vshll.u32 %v10133_v15, 16 }
 0x19b   : > { %v2352_v29 = vshrl.u32 %v10133_v15, 16  ;;  %v10179_v59 = vpop.permute.xlu1 %2090 }
 0x19c   : > { %v1832_v28 = vmax.f32 %v1641_v27, 0.0  ;;  %v2230_v54 = vmul.f32 %v9922_v46, %v1831_v9  ;;  %v2343_v46 = vsel %vm622_vm0, %v2338_v47, %v2342_v6  ;;  %v2633_v9 = vrot.slane %v10092_v20, 1 }
 0x19d   : > { %2687 = vrot.lane.b32.xlu0 %v2632_v14, %s8915_s20  ;;  %3042 = vrot.lane.b32.xlu1 %v2986_v16, %s8916_s27  ;;  %v2988_v57 = vsel %vm2979_vm8, %v2985_v32, %v2987_v42  ;;  %v10190_v40 = vrot.slane %v2348_v2, 1  ;;  %v2871_v14 = vrot.slane %v2340_v18, 5  ;;  %v2346_v18 = vor.u32 %v2344_v19, %v2342_v6 }
 0x19e   : > { %v2231_v26 = vmul.f32 %v9934_v11, %v1832_v28  ;;  %v2870_v28 = vrot.slane %v2344_v19, 4  ;;  %v10197_v12 = vpop.permute.xlu0 %2100 }
 0x19f   : > { %v1645_v39 = vpop.f32.mrb[28].mxu0 }
 0x1a0   : > { %v10165_v41 = vpack.c.bf16 %v2231_v26, %v2230_v54  ;;  %v1646_v61 = vadd.f32 %v9896_v22, %v1645_v39  ;;  %v8098_v38 = vpop.f32.mrb[29].mxu0 }
 0x1a1   : > { %v1648_v11 = vpop.f32.mrb[30].mxu0  ;;  %2542 = vrot.lane.b32.xlu0 %v2335_v7, %s8916_s27  ;;  %2544 = vrot.lane.b32.xlu1 %v2343_v46, %s8916_s27  ;;  %v10202_v38 = vpop.permute.xlu1 %2095  ;;  %v2872_v7 = vor.u32 %v2871_v14, %v2870_v28  ;;  %v2750_v28 = vrot.slane %v10133_v15, 4 }
 0x1a2   : > { %13779 = vst [vmem:[#allocation4_spill] sm:$0xff] %v10165_v41  ;;  %v1833_v50 = vmax.f32 %v1646_v61, 0.0  ;;  %v1649_v13 = vadd.f32 %v9896_v22, %v1648_v11  ;;  %v8099_v63 = vpop.f32.mrb[31].mxu0  ;;  %v10209_v11 = vsel %vm2625_vm6, %v2631_v21, %v2633_v9 }
 0x1a3   : > { %13781 = vst [vmem:[#allocation6_spill] sm:$0xff] %v10209_v11  ;;  %v10223_v63 = vpop.permute.xlu0 %2105  ;;  %v10227_v19 = vsel %vm2858_vm9, %v10098_v5, %v2872_v7 }
 0x1a4   : > { %v1834_v60 = vmax.f32 %v1649_v13, 0.0  ;;  %v2232_v0 = vmul.f32 %v9952_v30, %v1833_v50  ;;  %v2874_v30 = vrot.slane %v2352_v29, 4 }
 0x1a5   : > { %3098 = vrot.lane.b32.xlu0 %v10092_v20, %s8915_s20  ;;  %3154 = vrot.lane.b32.xlu1 %v2343_v46, %s8917_s30 }
 0x1a6   : > { %v2233_v3 = vmul.f32 %v9955_v34, %v1834_v60  ;;  %v2875_v34 = vrot.slane %v2348_v2, 5 }
 0x1a7   : > { %v1653_v27 = vpop.f32.mrb[32].mxu0 }
 0x1a8   : > { %v10192_v16 = vpack.c.bf16 %v2233_v3, %v2232_v0  ;;  %v1654_v54 = vadd.f32 %v9896_v22, %v1653_v27  ;;  %v8102_v26 = vpop.f32.mrb[33].mxu0  ;;  %v10215_v50 = vor.u32 %v2875_v34, %v2874_v30  ;;  %v10237_v27 = vpop.permute.xlu1 %2110  ;;  %v2989_v30 = vrot.slane %v10165_v41, 5 }
 0x1a9   : > { %v1656_v47 = vpop.f32.mrb[34].mxu0  ;;  %2804 = vrot.lane.b32.xlu0 %v2749_v10, %s8917_s30  ;;  %3044 = vrot.lane.b32.xlu1 %v2988_v57, %s8916_s27  ;;  %v10213_v10 = vsel %vm622_vm0, %v2346_v18, %v10190_v40  ;;  %v2356_v34 = vshll.u32 %v10165_v41, 16 }
 0x1aa   : > { %13780 = vst [vmem:[#allocation5_spill] sm:$0xff] %v10192_v16  ;;  %v1835_v32 = vmax.f32 %v1654_v54, 0.0  ;;  %v1657_v39 = vadd.f32 %v9896_v22, %v1656_v47  ;;  %v8103_v61 = vpop.f32.mrb[35].mxu0  ;;  %v10234_v3 = vsel %vm2858_vm9, %v2872_v7, %v10215_v50  ;;  %v10252_v47 = vpop.permute.xlu0 %2120  ;;  %v2751_v7 = vsel %vm2304_vm7, %v2748_v58, %v2750_v28 }
 0x1ab   : > { %v2354_v58 = vor.u32 %v2352_v29, %v10190_v40  ;;  %v2991_v40 = vrot.slane %v10192_v16, 5 }
 0x1ac   : > { %v1836_v46 = vmax.f32 %v1657_v39, 0.0  ;;  %v2234_v6 = vmul.f32 %v9974_v24, %v1835_v32  ;;  %v13691_v24 = vrot.slane %v10165_v41, 4  ;;  %v10260_v18 = vpop.permute.xlu1 %2115 }
 0x1ad   : > { %2689 = vrot.lane.b32.xlu0 %v10209_v11, %s8915_s20  ;;  %3156 = vrot.lane.b32.xlu1 %v10213_v10, %s8917_s30 }
 0x1ae   : > { %v2235_v13 = vmul.f32 %v9987_v49, %v1836_v46  ;;  %v10248_v26 = vsel %vm2304_vm7, %v2750_v28, %v13691_v24 }
 0x1af   : > { %v1661_v21 = vpop.f32.mrb[36].mxu0 }
 0x1b0   : > { %v10229_v2 = vpack.c.bf16 %v2235_v13, %v2234_v6  ;;  %v1662_v60 = vadd.f32 %v9896_v22, %v1661_v21  ;;  %v8106_v0 = vpop.f32.mrb[37].mxu0  ;;  %v2990_v21 = vsel %vm2979_vm8, %v2987_v42, %v2989_v30 }
 0x1b1   : > { %v1664_v49 = vpop.f32.mrb[38].mxu0  ;;  %4529 = vrot.lane.b32.xlu0 %v10227_v19, %s8917_s30  ;;  %4531 = vrot.lane.b32.xlu1 %v10234_v3, %s8917_s30 }
 0x1b2   : > { %13782 = vst [vmem:[#allocation7_spill] sm:$0xff] %v10229_v2  ;;  %v1837_v5 = vmax.f32 %v1662_v60, 0.0  ;;  %v1665_v57 = vadd.f32 %v9896_v22, %v1664_v49  ;;  %v8107_v14 = vpop.f32.mrb[39].mxu0  ;;  %v2358_v60 = vrot.slane %v2356_v34, 1 }
 0x1b3   : > { %v10281_v14 = vpop.permute.xlu1 %2130 }
 0x1b4   : > { %v1838_v54 = vmax.f32 %v1665_v57, 0.0  ;;  %v2236_v32 = vmul.f32 %v10006_v31, %v1837_v5  ;;  %v10277_v5 = vpop.permute.xlu0 %2125  ;;  %v2635_v57 = vrot.slane %v10133_v15, 1  ;;  %v2359_v42 = vsel %vm622_vm0, %v2354_v58, %v2358_v60 }
 0x1b5   : > { %3100 = vrot.lane.b32.xlu0 %v10133_v15, %s8915_s20  ;;  %4475 = vrot.lane.b32.xlu1 %v10248_v26, %s8915_s20 }
 0x1b6   : > { %v2237_v39 = vmul.f32 %v10014_v55, %v1838_v54  ;;  %v10292_v29 = vsel %vm2625_vm6, %v2633_v9, %v2635_v57  ;;  %v2360_v9 = vshrl.u32 %v10165_v41, 16 }
 0x1b7   : > { %v1669_v61 = vpop.f32.mrb[40].mxu0  ;;  %13784 = vst [vmem:[#allocation9_spill] sm:$0xff] %v10292_v29  ;;  %v10307_v58 = vpop.permute.xlu1 %2135 }
 0x1b8   : > { %v10265_v46 = vpack.c.bf16 %v2237_v39, %v2236_v32  ;;  %v1670_v6 = vadd.f32 %v9896_v22, %v1669_v61  ;;  %v8110_v13 = vpop.f32.mrb[41].mxu0 }
 0x1b9   : > { %v1672_v31 = vpop.f32.mrb[42].mxu0  ;;  %4473 = vrot.lane.b32.xlu0 %v2751_v7, %s8915_s20  ;;  %3046 = vrot.lane.b32.xlu1 %v2990_v21, %s8916_s27  ;;  %v2364_v13 = vshll.u32 %v10192_v16, 16 }
 0x1ba   : > { %13783 = vst [vmem:[#allocation8_spill] sm:$0xff] %v10265_v46  ;;  %v1839_v55 = vmax.f32 %v1670_v6, 0.0  ;;  %v1673_v0 = vadd.f32 %v9896_v22, %v1672_v31  ;;  %v8111_v49 = vpop.f32.mrb[43].mxu0 }
 0x1bb   : > { %v2992_v49 = vsel %vm2979_vm8, %v2989_v30, %v2991_v40 }
 0x1bc   : > { %v1840_v28 = vmax.f32 %v1673_v0, 0.0  ;;  %v2238_v54 = vmul.f32 %v10032_v36, %v1839_v55  ;;  %v2368_v36 = vshrl.u32 %v10192_v16, 16 }
 0x1bd   : > { %2806 = vrot.lane.b32.xlu0 %v2751_v7, %s8917_s30  ;;  %2548 = vrot.lane.b32.xlu1 %v2359_v42, %s8916_s27 }
 0x1be   : > { %v2239_v32 = vmul.f32 %v10045_v33, %v1840_v28  ;;  %v10300_v33 = vpop.permute.xlu0 %2140 }
 0x1bf   : > { %v1677_v39 = vpop.f32.mrb[44].mxu0 }
 0x1c0   : > { %v10295_v61 = vpack.c.bf16 %v2239_v32, %v2238_v54  ;;  %v1678_v7 = vadd.f32 %v9896_v22, %v1677_v39  ;;  %v8114_v6 = vpop.f32.mrb[45].mxu0  ;;  %v2366_v54 = vrot.slane %v2364_v13, 1  ;;  %v2882_v32 = vrot.slane %v2368_v36, 4 }
 0x1c1   : > { %v1680_v21 = vpop.f32.mrb[46].mxu0  ;;  %2691 = vrot.lane.b32.xlu0 %v10292_v29, %s8915_s20  ;;  %3158 = vrot.lane.b32.xlu1 %v2359_v42, %s8917_s30  ;;  %v2883_v39 = vrot.slane %v2364_v13, 5  ;;  %v2878_v42 = vrot.slane %v2360_v9, 4 }
 0x1c2   : > { %v1841_v31 = vmax.f32 %v1678_v7, 0.0  ;;  %v1681_v55 = vadd.f32 %v9896_v22, %v1680_v21  ;;  %v8115_v0 = vpop.f32.mrb[47].mxu0  ;;  %v2362_v21 = vor.u32 %v2360_v9, %v2358_v60  ;;  %v10319_v25 = vpop.permute.xlu0 %2150 }
 0x1c3   : > { %v2879_v0 = vrot.slane %v2356_v34, 5 }
 0x1c4   : > { %v1842_v28 = vmax.f32 %v1681_v55, 0.0  ;;  %v2240_v7 = vmul.f32 %v10068_v4, %v1841_v31  ;;  %v10325_v24 = vsel %vm622_vm0, %v2362_v21, %v2366_v54  ;;  %v13693_v31 = vrot.slane %v10165_v41, 1 }
 0x1c5   : > { %2546 = vrot.lane.b32.xlu0 %v10213_v10, %s8916_s27  ;;  %3048 = vrot.lane.b32.xlu1 %v2992_v49, %s8916_s27  ;;  %v10327_v10 = vor.u32 %v2883_v39, %v2882_v32  ;;  %v10329_v49 = vpop.permute.xlu1 %2145  ;;  %v2880_v60 = vor.u32 %v2879_v0, %v2878_v42  ;;  %v13692_v39 = vrot.slane %v10229_v2, 4 }
 0x1c6   : > { %v2241_v6 = vmul.f32 %v10078_v44, %v1842_v28 }
 0x1c7   : > { %v1685_v30 = vpop.f32.mrb[48].mxu0  ;;  %v10339_v32 = vsel %vm2858_vm9, %v2880_v60, %v10327_v10 }
 0x1c8   : > { %v10321_v55 = vpack.c.bf16 %v2241_v6, %v2240_v7  ;;  %v1686_v1 = vadd.f32 %v9896_v22, %v1685_v30  ;;  %v8118_v13 = vpop.f32.mrb[49].mxu0  ;;  %13785 = vst [vmem:[#allocation10_spill] sm:$0xff] %v10339_v32  ;;  %v10342_v7 = vpop.permute.xlu0 %2160  ;;  %v2754_v6 = vrot.slane %v10192_v16, 4  ;;  %v10358_v30 = vsel %vm2625_vm6, %v2635_v57, %v13693_v31 }
 0x1c9   : > { %v1688_v4 = vpop.f32.mrb[50].mxu0  ;;  %3102 = vrot.lane.b32.xlu0 %v10165_v41, %s8915_s20  ;;  %3160 = vrot.lane.b32.xlu1 %v10325_v24, %s8917_s30  ;;  %v10351_v21 = vpop.permute.xlu1 %2155  ;;  %13786 = vst [vmem:[#allocation11_spill] sm:$0xff] %v10358_v30 }
 0x1ca   : > { %v1843_v44 = vmax.f32 %v1686_v1, 0.0  ;;  %v1689_v34 = vadd.f32 %v9896_v22, %v1688_v4  ;;  %v8119_v9 = vpop.f32.mrb[51].mxu0 }
 0x1cc   : > { %v1844_v28 = vmax.f32 %v1689_v34, 0.0  ;;  %v2242_v1 = vmul.f32 %v10110_v23, %v1843_v44  ;;  %v13694_v44 = vshll.u32 %v10229_v2, 16 }
 0x1cd   : > { %2808 = vrot.lane.b32.xlu0 %v10248_v26, %s8917_s30  ;;  %4535 = vrot.lane.b32.xlu1 %v10339_v32, %s8917_s30  ;;  %v2993_v26 = vrot.slane %v10229_v2, 5  ;;  %v10386_v31 = vpop.permute.xlu1 %2165 }
 0x1ce   : > { %v2243_v42 = vmul.f32 %v10100_v45, %v1844_v28  ;;  %v10367_v45 = vsel %vm2304_vm7, %v2754_v6, %v13692_v39  ;;  %v2374_v39 = vrot.slane %v13694_v44, 1 }
 0x1cf   : > { %v1693_v0 = vpop.f32.mrb[52].mxu0 }
 0x1d0   : > { %v10361_v13 = vpack.c.bf16 %v2243_v42, %v2242_v1  ;;  %v1694_v23 = vadd.f32 %v9896_v22, %v1693_v0  ;;  %v8122_v4 = vpop.f32.mrb[53].mxu0  ;;  %v10375_v1 = vpop.permute.xlu0 %2170  ;;  %v10379_v0 = vsel %vm2858_vm9, %v10215_v50, %v2880_v60  ;;  %v2370_v50 = vor.u32 %v2368_v36, %v2366_v54 }
 0x1d1   : > { %v1696_v34 = vpop.f32.mrb[54].mxu0  ;;  %2693 = vrot.lane.b32.xlu0 %v10358_v30, %s8915_s20  ;;  %4479 = vrot.lane.b32.xlu1 %v10367_v45, %s8915_s20  ;;  %13787 = vst [vmem:[#allocation12_spill] sm:$0xff] %v10379_v0  ;;  %v2994_v4 = vsel %vm2979_vm8, %v2991_v40, %v2993_v26  ;;  %v10405_v54 = vpop.permute.xlu1 %2175 }
 0x1d2   : > { %v1845_v57 = vmax.f32 %v1694_v23, 0.0  ;;  %v1697_v9 = vadd.f32 %v9896_v22, %v1696_v34  ;;  %v8123_v28 = vpop.f32.mrb[55].mxu0  ;;  %v2375_v44 = vsel %vm622_vm0, %v2370_v50, %v2374_v39 }
 0x1d4   : > { %v1846_v42 = vmax.f32 %v1697_v9, 0.0  ;;  %v2244_v23 = vmul.f32 %v10129_v52, %v1845_v57  ;;  %v10399_v30 = vpop.permute.xlu0 %2180 }
 0x1d5   : > { %4533 = vrot.lane.b32.xlu0 %v10379_v0, %s8917_s30  ;;  %3050 = vrot.lane.b32.xlu1 %v2994_v4, %s8916_s27 }
 0x1d6   : > { %v2245_v34 = vmul.f32 %v10140_v35, %v1846_v42  ;;  %v13788_v42 = vrot.slane %v10165_v41, 4 }
 0x1d7   : > { %v1701_v60 = vpop.f32.mrb[56].mxu0 }
 0x1d8   : > { %v10395_v9 = vpack.c.bf16 %v2245_v34, %v2244_v23  ;;  %v1702_v40 = vadd.f32 %v9896_v22, %v1701_v60  ;;  %v8126_v28 = vpop.f32.mrb[57].mxu0  ;;  %v2755_v4 = vsel %vm2304_vm7, %v13788_v42, %v2754_v6  ;;  %v13697_v23 = vrot.slane %v10265_v46, 5  ;;  %v10415_v60 = vpop.permute.xlu0 %2190 }
 0x1d9   : > { %v1704_v29 = vpop.f32.mrb[58].mxu0  ;;  %3104 = vrot.lane.b32.xlu0 %v10192_v16, %s8915_s20  ;;  %2552 = vrot.lane.b32.xlu1 %v2375_v44, %s8916_s27  ;;  %v13700_v28 = vrot.slane %v10265_v46, 1 }
 0x1da   : > { %v1847_v52 = vmax.f32 %v1702_v40, 0.0  ;;  %v1705_v35 = vadd.f32 %v9896_v22, %v1704_v29  ;;  %v8127_v36 = vpop.f32.mrb[59].mxu0  ;;  %v13699_v40 = vrot.slane %v10192_v16, 1 }
 0x1dc   : > { %v1848_v57 = vmax.f32 %v1705_v35, 0.0  ;;  %v2246_v34 = vmul.f32 %v10163_v37, %v1847_v52  ;;  %v2380_v35 = vshll.u32 %v10265_v46, 16  ;;  %v2996_v37 = vsel %vm2979_vm8, %v2993_v26, %v13697_v23 }
 0x1dd   : > { %4477 = vrot.lane.b32.xlu0 %v2755_v4, %s8915_s20  ;;  %3162 = vrot.lane.b32.xlu1 %v2375_v44, %s8917_s30  ;;  %v10427_v44 = vpop.permute.xlu1 %2185  ;;  %v13789_v26 = vrot.slane %v10165_v41, 1  ;;  %v13793_v41 = vshll.u32 %v10229_v2, 16 }
 0x1de   : > { %v2247_v50 = vmul.f32 %v10152_v62, %v1848_v57  ;;  %v2641_v57 = vrot.slane %v10229_v2, 1  ;;  %v10446_v62 = vrot.slane %v2380_v35, 1 }
 0x1df   : > { %v1709_v29 = vpop.f32.mrb[60].mxu0  ;;  %v10439_v23 = vsel %vm2625_vm6, %v13789_v26, %v13699_v40  ;;  %v2887_v32 = vrot.slane %v13793_v41, 5 }
 0x1e0   : > { %v10420_v6 = vpack.c.bf16 %v2247_v50, %v2246_v34  ;;  %v1710_v36 = vadd.f32 %v9896_v22, %v1709_v29  ;;  %v8130_v42 = vpop.f32.mrb[61].mxu0  ;;  %v2376_v34 = vshrl.u32 %v10229_v2, 16  ;;  %13790 = vst [vmem:[#allocation13_spill] sm:$0xff] %v10439_v23 }
 0x1e1   : > { %v1712_v52 = vpop.f32.mrb[62].mxu0  ;;  %2810 = vrot.lane.b32.xlu0 %v2755_v4, %s8917_s30  ;;  %3052 = vrot.lane.b32.xlu1 %v2996_v37, %s8916_s27  ;;  %v10444_v4 = vsel %vm2625_vm6, %v2641_v57, %v13700_v28  ;;  %v10460_v15 = vpop.permute.xlu1 %2195 }
 0x1e2   : > { %v1849_v50 = vmax.f32 %v1710_v36, 0.0  ;;  %v1713_v29 = vadd.f32 %v9896_v22, %v1712_v52  ;;  %v8131_v42 = vpop.f32.mrb[63].mxu0  ;;  %13791 = vst [vmem:[#allocation14_spill] sm:$0xff] %v10444_v4  ;;  %v13792_v36 = vshrl.u32 %v10265_v46, 16  ;;  %v2891_v52 = vrot.slane %v2380_v35, 5 }
 0x1e3   : > { %v10450_v42 = vpop.permute.xlu0 %2200  ;;  %v2886_v26 = vrot.slane %v2376_v34, 4 }
 0x1e4   : > { %v1850_v37 = vmax.f32 %v1713_v29, 0.0  ;;  %v2890_v11 = vrot.slane %v13792_v36, 4  ;;  %v2248_v40 = vmul.f32 %v10173_v56, %v1849_v50  ;;  %v2378_v29 = vor.u32 %v2376_v34, %v2374_v39 }
 0x1e5   : > { %2695 = vrot.lane.b32.xlu0 %v10439_v23, %s8915_s20  ;;  %2699 = vrot.lane.b32.xlu1 %v10444_v4, %s8915_s20  ;;  %v10483_v50 = vpop.permute.xlu1 %2205 }
 0x1e6   : > { %v2249_v28 = vmul.f32 %v10179_v59, %v1850_v37  ;;  %v10467_v4 = vsel %vm622_vm0, %v2378_v29, %v10446_v62  ;;  %v10469_v20 = vor.u32 %v2891_v52, %v2890_v11  ;;  %v13708_v11 = vrot.slane %v10295_v61, 4 }
 0x1e7   : > { %v1717_v35 = vpop.f32.mrb[64].mxu0 }
 0x1e8   : > { %v10462_v36 = vpack.c.bf16 %v2249_v28, %v2248_v40  ;;  %v1718_v0 = vadd.f32 %v9896_v22, %v1717_v35  ;;  %v8134_v23 = vpop.f32.mrb[65].mxu0  ;;  %v2888_v40 = vor.u32 %v2887_v32, %v2886_v26  ;;  %v10476_v28 = vpop.permute.xlu0 %2210 }
 0x1e9   : > { %v1720_v56 = vpop.f32.mrb[66].mxu0  ;;  %2550 = vrot.lane.b32.xlu0 %v10325_v24, %s8916_s27  ;;  %3164 = vrot.lane.b32.xlu1 %v10467_v4, %s8917_s30  ;;  %13794 = vst [vmem:[#allocation15_spill] sm:$0xff] %v10476_v28 }
 0x1ea   : > { %v1851_v41 = vmax.f32 %v1718_v0, 0.0  ;;  %v1721_v59 = vadd.f32 %v9896_v22, %v1720_v56  ;;  %v8135_v39 = vpop.f32.mrb[67].mxu0  ;;  %v10480_v34 = vsel %vm2858_vm9, %v2888_v40, %v10469_v20  ;;  %v2758_v0 = vrot.slane %v10265_v46, 4 }
 0x1eb   : > { %13795 = vst [vmem:[#allocation16_spill] sm:$0xff] %v10480_v34  ;;  %v10504_v39 = vpop.permute.xlu1 %2215 }
 0x1ec   : > { %v1852_v23 = vmax.f32 %v1721_v59, 0.0  ;;  %v2250_v24 = vmul.f32 %v10202_v38, %v1851_v41  ;;  %v2761_v56 = vsel %vm2304_vm7, %v2758_v0, %v13708_v11  ;;  %13796 = vst [vmem:[#allocation17_spill] sm:$0xff] %v10504_v39  ;;  %v13710_v11 = vshll.u32 %v10295_v61, 16 }
 0x1ed   : > { %3106 = vrot.lane.b32.xlu0 %v10229_v2, %s8915_s20  ;;  %4539 = vrot.lane.b32.xlu1 %v10480_v34, %s8917_s30 }
 0x1ee   : > { %v2251_v32 = vmul.f32 %v10197_v12, %v1852_v23 }
 0x1ef   : > { %v1725_v37 = vpop.f32.mrb[68].mxu0  ;;  %v10492_v52 = vpop.permute.xlu0 %2683 }
 0x1f0   : > { %v10494_v26 = vpack.c.bf16 %v2251_v32, %v2250_v24  ;;  %v1726_v29 = vadd.f32 %v9896_v22, %v1725_v37  ;;  %v8138_v35 = vpop.f32.mrb[69].mxu0  ;;  %v13797_v32 = vrot.slane %v10192_v16, 1 }
 0x1f1   : > { %v1728_v59 = vpop.f32.mrb[70].mxu0  ;;  %2812 = vrot.lane.b32.xlu0 %v10367_v45, %s8917_s30  ;;  %4483 = vrot.lane.b32.xlu1 %v2761_v56, %s8915_s20  ;;  %v13709_v35 = vrot.slane %v10295_v61, 1 }
 0x1f2   : > { %v1853_v12 = vmax.f32 %v1726_v29, 0.0  ;;  %v1729_v38 = vadd.f32 %v9896_v22, %v1728_v59  ;;  %v8139_v41 = vpop.f32.mrb[71].mxu0  ;;  %v10509_v37 = vsel %vm2625_vm6, %v13797_v32, %v2641_v57 }
 0x1f3   : > { %v2539_v23 = vpop.permute.xlu0 %2538  ;;  %13798 = vst [vmem:[#allocation18_spill] sm:$0xff] %v10509_v37  ;;  %v10527_v41 = vld [vmem:[%s13677_s3] ss:$0 sm:$0xff] }
 0x1f4   : > { %v1854_v24 = vmax.f32 %v1729_v38, 0.0  ;;  %v2252_v22 = vmul.f32 %v10223_v63, %v1853_v12  ;;  %v10520_v38 = vsel %vm2858_vm9, %v10327_v10, %v2888_v40  ;;  %v10541_v10 = vrot.slane %v13710_v11, 1 }
 0x1f5   : > { %2697 = vrot.lane.b32.xlu0 %v10509_v37, %s8915_s20  ;;  %2816 = vrot.lane.b32.xlu1 %v2761_v56, %s8917_s30  ;;  %13799 = vst [vmem:[#allocation19_spill] sm:$0xff] %v10520_v38 }
 0x1f6   : > { %v2253_v45 = vmul.f32 %v10237_v27, %v1854_v24  ;;  %v13800_v27 = vrot.slane %v10265_v46, 1 }
 0x1f7   : > { %v1733_v29 = vpop.f32.mrb[72].mxu0  ;;  %v4468_v59 = vpop.permute.xlu1 %4467 }
 0x1f8   : > { %v10522_v57 = vpack.c.bf16 %v2253_v45, %v2252_v22  ;;  %v1734_v32 = vadd.f32 %v10527_v41, %v1733_v29  ;;  %v10530_v56 = vpop.permute.xlu0 %2800  ;;  %v8142_v63 = vpop.f32.mrb[73].mxu0  ;;  %v10537_v12 = vsel %vm2625_vm6, %v13800_v27, %v13709_v35  ;;  %v13802_v29 = vshrl.u32 %v10265_v46, 16 }
 0x1f9   : > { %13801 = vst [vmem:[#allocation20_spill] sm:$0xff] %v10537_v12  ;;  %v1736_v40 = vpop.f32.mrb[74].mxu0  ;;  %2701 = vrot.lane.b32.xlu1 %v10537_v12, %s8915_s20  ;;  %4537 = vrot.lane.b32.xlu0 %v10520_v38, %s8917_s30  ;;  %v13808_v38 = vshll.u32 %v10295_v61, 16 }
 0x1fa   : > { %v1855_v24 = vmax.f32 %v1734_v32, 0.0  ;;  %v1737_v22 = vadd.f32 %v10527_v41, %v1736_v40  ;;  %v8143_v45 = vpop.f32.mrb[75].mxu0  ;;  %v2386_v63 = vor.u32 %v13802_v29, %v10446_v62  ;;  %v10564_v62 = vsel %vm1496_vm5, %v9938_v48, %v2539_v23 }
 0x1fb   : > { %v10551_v27 = vpop.permute.xlu1 %3038  ;;  %v4584_v29 = vsel %vm3271_vm10, %v10564_v62, %v4468_v59 }
 0x1fc   : > { %v1856_v35 = vmax.f32 %v1737_v22, 0.0  ;;  %v10553_v11 = vpop.permute.xlu0 %2685  ;;  %v2391_v37 = vsel %vm622_vm0, %v2386_v63, %v10541_v10  ;;  %v2254_v32 = vmul.f32 %v10260_v18, %v1855_v24  ;;  %v13803_v18 = vrot.slane %v10229_v2, 4 }
 0x1fd   : > { %2556 = vrot.lane.b32.xlu1 %v2391_v37, %s8916_s27  ;;  %3108 = vrot.lane.b32.xlu0 %v10265_v46, %s8915_s20 }
 0x1fe   : > { %v2255_v40 = vmul.f32 %v10252_v47, %v1856_v35  ;;  %v2759_v47 = vsel %vm2304_vm7, %v13803_v18, %v2758_v0  ;;  %v2392_v18 = vshrl.u32 %v10295_v61, 16 }
 0x1ff   : > { %v1741_v22 = vpop.f32.mrb[76].mxu0  ;;  %v2541_v45 = vpop.permute.xlu1 %2540 }
 0x200   : > { %v10568_v63 = vpack.c.bf16 %v2255_v40, %v2254_v32  ;;  %v1742_v12 = vadd.f32 %v10527_v41, %v1741_v22  ;;  %v4526_v39 = vpop.permute.xlu0 %4525  ;;  %v8146_v34 = vpop.f32.mrb[77].mxu0  ;;  %v13804_v40 = vmov 0.0   ;;  %v2894_v16 = vrot.slane %v2392_v18, 4 }
 0x201   : > { %v4642_v48 = vsel %vm3330_vm11, %v4584_v29, %v4526_v39  ;;  %v1744_v23 = vpop.f32.mrb[78].mxu0  ;;  %3166 = vrot.lane.b32.xlu1 %v2391_v37, %s8917_s30  ;;  %4481 = vrot.lane.b32.xlu0 %v2759_v47, %s8915_s20 }
 0x202   : > { %v1857_v35 = vmax.f32 %v1742_v12, 0.0  ;;  %v1745_v59 = vadd.f32 %v10527_v41, %v1744_v23  ;;  %8321 = vmatmul.mubr.bf16.vlgmr.msra.gmra.mrb[116].mxu0 %v4642_v48  ;;  %v8147_v24 = vpop.f32.mrb[79].mxu0  ;;  %v2396_v48 = vshll.u32 %v10321_v55, 16  ;;  %v10594_v23 = vsel %vm1496_vm5, %v9970_v43, %v2541_v45 }
 0x203   : > { %v10578_v32 = vpop.permute.xlu1 %3040  ;;  %8324 = vmatprep.mubr.msk.bf16.mxu0 %vm8913_vm1, %v13804_v40 }
 0x204   : > { %v1858_v34 = vmax.f32 %v1745_v59, 0.0  ;;  %v10582_v22 = vpop.permute.xlu0 %3096  ;;  %v2256_v39 = vmul.f32 %v10277_v5, %v1857_v35  ;;  %v13806_v5 = vrot.slane %v10321_v55, 4 }
 0x205   : > { %3112 = vrot.lane.b32.xlu1 %v10321_v55, %s8915_s20  ;;  %2814 = vrot.lane.b32.xlu0 %v2759_v47, %s8917_s30 }
 0x206   : > { %v2257_v37 = vmul.f32 %v10281_v14, %v1858_v34  ;;  %v13807_v14 = vrot.slane %v10295_v61, 4 }
 0x207   : > { %v1749_v12 = vpop.f32.mrb[80].mxu0  ;;  %v4528_v29 = vpop.permute.xlu1 %4527 }
 0x208   : > { %v10596_v59 = vpack.c.bf16 %v2257_v37, %v2256_v39  ;;  %v1750_v24 = vadd.f32 %v10527_v41, %v1749_v12  ;;  %v4470_v0 = vpop.permute.xlu0 %4469  ;;  %v8150_v47 = vpop.f32.mrb[81].mxu0  ;;  %v2763_v35 = vsel %vm2304_vm7, %v13807_v14, %v13806_v5 }
 0x209   : > { %v4586_v34 = vsel %vm3271_vm10, %v10594_v23, %v4470_v0  ;;  %v1752_v2 = vpop.f32.mrb[82].mxu0  ;;  %4485 = vrot.lane.b32.xlu1 %v2763_v35, %s8915_s20  ;;  %2554 = vrot.lane.b32.xlu0 %v10467_v4, %s8916_s27  ;;  %v2997_v47 = vrot.slane %v10295_v61, 5  ;;  %v10616_v0 = vrot.slane %v2396_v48, 1  ;;  %v2895_v4 = vrot.slane %v13808_v38, 5 }
 0x20a   : > { %13805 = vst [vmem:[#allocation21_spill] sm:$0xff] %v10596_v59  ;;  %v1859_v43 = vmax.f32 %v1750_v24, 0.0  ;;  %v1753_v45 = vadd.f32 %v10527_v41, %v1752_v2  ;;  %v8151_v39 = vpop.f32.mrb[83].mxu0  ;;  %v4645_v37 = vsel %vm3330_vm11, %v4586_v34, %v4528_v29  ;;  %v2394_v24 = vor.u32 %v2392_v18, %v10541_v10 }
 0x20b   : > { %8325 = vmatmul.mubr.bf16.gmra.mrb[120].mxu0 %v4645_v37  ;;  %v10611_v12 = vpop.permute.xlu1 %4471  ;;  %v13809_v39 = vrot.slane %v10265_v46, 5  ;;  %v2400_v37 = vshrl.u32 %v10321_v55, 16  ;;  %v2896_v10 = vor.u32 %v2895_v4, %v2894_v16  ;;  %v2899_v46 = vrot.slane %v2396_v48, 5 }
 0x20c   : > { %v1860_v5 = vmax.f32 %v1753_v45, 0.0  ;;  %v10614_v14 = vpop.permute.xlu0 %2802  ;;  %8328 = vmatprep.mubr.msk.bf16.mxu0 %vm8913_vm1, %v13804_v40  ;;  %v2258_v2 = vmul.f32 %v10307_v58, %v1859_v43  ;;  %v3420_v4 = vsel %vm1496_vm5, %v10073_v51, %v10551_v27  ;;  %v2404_v48 = vshll.u32 %v10361_v13, 16 }
 0x20d   : > { %2818 = vrot.lane.b32.xlu1 %v2763_v35, %s8917_s30  ;;  %3110 = vrot.lane.b32.xlu0 %v10295_v61, %s8915_s20  ;;  %v2998_v38 = vsel %vm2979_vm8, %v13809_v39, %v2997_v47  ;;  %v10649_v16 = vsel %vm2858_vm9, %v10469_v20, %v2896_v10 }
 0x20e   : > { %v2259_v29 = vmul.f32 %v10300_v33, %v1860_v5  ;;  %v2399_v33 = vsel %vm622_vm0, %v2394_v24, %v10616_v0 }
 0x20f   : > { %v1757_v34 = vpop.f32.mrb[84].mxu0  ;;  %v10628_v45 = vpop.permute.xlu1 %3042 }
 0x210   : > { %v10634_v59 = vpack.c.bf16 %v2259_v29, %v2258_v2  ;;  %v1758_v35 = vadd.f32 %v10527_v41, %v1757_v34  ;;  %v10637_v28 = vpop.permute.xlu0 %2687  ;;  %v8154_v58 = vpop.f32.mrb[85].mxu0  ;;  %v13720_v29 = vrot.slane %v10321_v55, 5  ;;  %v2898_v34 = vrot.slane %v2400_v37, 4 }
 0x211   : > { %v1760_v18 = vpop.f32.mrb[86].mxu0  ;;  %2558 = vrot.lane.b32.xlu1 %v2399_v33, %s8916_s27  ;;  %3054 = vrot.lane.b32.xlu0 %v2998_v38, %s8916_s27 }
 0x212   : > { %13810 = vst [vmem:[#allocation22_spill] sm:$0xff] %v10634_v59  ;;  %v1861_v43 = vmax.f32 %v1758_v35, 0.0  ;;  %v1761_v5 = vadd.f32 %v10527_v41, %v1760_v18  ;;  %v8155_v39 = vpop.f32.mrb[87].mxu0  ;;  %v3506_v35 = vsel %vm3271_vm10, %v3420_v4, %v10582_v22  ;;  %v2764_v22 = vrot.slane %v10361_v13, 4 }
 0x213   : > { %v10644_v2 = vpop.permute.xlu1 %2544  ;;  %v2408_v39 = vshrl.u32 %v10361_v13, 16 }
 0x214   : > { %v1862_v58 = vmax.f32 %v1761_v5, 0.0  ;;  %v2543_v59 = vpop.permute.xlu0 %2542  ;;  %v2260_v24 = vmul.f32 %v10329_v49, %v1861_v43  ;;  %v10665_v5 = vor.u32 %v2899_v46, %v2898_v34  ;;  %v3273_v46 = vsel %vm3271_vm10, %v10564_v62, %v10492_v52 }
 0x215   : > { %3168 = vrot.lane.b32.xlu1 %v2399_v33, %s8917_s30  ;;  %4541 = vrot.lane.b32.xlu0 %v10649_v16, %s8917_s30  ;;  %v3000_v33 = vsel %vm2979_vm8, %v2997_v47, %v13720_v29  ;;  %v13812_v52 = vrot.slane %v10321_v55, 4 }
 0x216   : > { %v2261_v38 = vmul.f32 %v10319_v25, %v1862_v58 }
 0x217   : > { %v1765_v20 = vpop.f32.mrb[88].mxu0  ;;  %v3155_v18 = vpop.permute.xlu1 %3154  ;;  %v10691_v62 = vsel %vm2304_vm7, %v13812_v52, %v2764_v22 }
 0x218   : > { %v10668_v51 = vpack.c.bf16 %v2261_v38, %v2260_v24  ;;  %v1766_v49 = vadd.f32 %v10527_v41, %v1765_v20  ;;  %v3099_v25 = vpop.permute.xlu0 %3098  ;;  %v8158_v27 = vpop.f32.mrb[89].mxu0  ;;  %v3562_v43 = vsel %vm3330_vm11, %v3506_v35, %v3155_v18  ;;  %v3332_v24 = vsel %vm3330_vm11, %v3273_v46, %v10530_v56 }
 0x219   : > { %v1768_v58 = vpop.f32.mrb[90].mxu0  ;;  %3114 = vrot.lane.b32.xlu1 %v10361_v13, %s8915_s20  ;;  %3056 = vrot.lane.b32.xlu0 %v3000_v33, %s8916_s27  ;;  %v2406_v38 = vrot.slane %v2404_v48, 1  ;;  %v2902_v20 = vrot.slane %v2408_v39, 4  ;;  %v2903_v18 = vrot.slane %v2404_v48, 5  ;;  %v2402_v56 = vor.u32 %v2400_v37, %v10616_v0 }
 0x21a   : > { %13811 = vst [vmem:[#allocation23_spill] sm:$0xff] %v10668_v51  ;;  %v1863_v47 = vmax.f32 %v1766_v49, 0.0  ;;  %v1769_v34 = vadd.f32 %v10527_v41, %v1768_v58  ;;  %3914 = vmatprep.mubr.bf16.mxu1 %v3562_v43  ;;  %v8159_v4 = vpop.f32.mrb[91].mxu0  ;;  %v10695_v49 = vsel %vm2858_vm9, %v2896_v10, %v10665_v5  ;;  %v3423_v48 = vsel %vm1496_vm5, %v10117_v53, %v10578_v32 }
 0x21b   : > { %3915 = vmatmul.mubr.bf16.vlgmr.msra.gmra.mrb[0].mxu1 %v3332_v24  ;;  %v10682_v35 = vpop.permute.xlu1 %3044  ;;  %v2407_v46 = vsel %vm622_vm0, %v2402_v56, %v2406_v38  ;;  %v3508_v10 = vsel %vm3271_vm10, %v3423_v48, %v3099_v25  ;;  %v2904_v37 = vor.u32 %v2903_v18, %v2902_v20  ;;  %v2412_v4 = vshll.u32 %v10395_v9, 16 }
 0x21c   : > { %v1864_v33 = vmax.f32 %v1769_v34, 0.0  ;;  %v10686_v27 = vpop.permute.xlu0 %2804  ;;  %v2262_v43 = vmul.f32 %v10351_v21, %v1863_v47  ;;  %v2416_v24 = vshrl.u32 %v10395_v9, 16  ;;  %v2766_v32 = vrot.slane %v10395_v9, 4 }
 0x21d   : > { %4487 = vrot.lane.b32.xlu1 %v10691_v62, %s8915_s20  ;;  %4543 = vrot.lane.b32.xlu0 %v10695_v49, %s8917_s30  ;;  %v10720_v25 = vsel %vm1496_vm5, %v10008_v17, %v2543_v59  ;;  %v3275_v20 = vsel %vm3271_vm10, %v10594_v23, %v10553_v11  ;;  %v10730_v59 = vrot.slane %v2412_v4, 1  ;;  %v10741_v23 = vsel %vm2858_vm9, %v10665_v5, %v2904_v37 }
 0x21e   : > { %v2263_v58 = vmul.f32 %v10342_v7, %v1864_v33  ;;  %v3335_v48 = vsel %vm3330_vm11, %v3275_v20, %v10614_v14  ;;  %v10737_v11 = vsel %vm2304_vm7, %v2764_v22, %v2766_v32  ;;  %v4588_v14 = vsel %vm3271_vm10, %v10720_v25, %v10611_v12 }
 0x21f   : > { %v1773_v34 = vpop.f32.mrb[92].mxu0  ;;  %v3157_v0 = vpop.permute.xlu1 %3156  ;;  %v2410_v22 = vor.u32 %v2408_v39, %v2406_v38 }
 0x220   : > { %v10711_v52 = vpack.c.bf16 %v2263_v58, %v2262_v43  ;;  %v1774_v29 = vadd.f32 %v10527_v41, %v1773_v34  ;;  %v10714_v53 = vpop.permute.xlu0 %2689  ;;  %v8162_v21 = vpop.f32.mrb[93].mxu0  ;;  %v3565_v7 = vsel %vm3330_vm11, %v3508_v10, %v3157_v0  ;;  %v2906_v43 = vrot.slane %v2416_v24, 4 }
 0x221   : > { %v1776_v47 = vpop.f32.mrb[94].mxu0  ;;  %2560 = vrot.lane.b32.xlu1 %v2407_v46, %s8916_s27  ;;  %3170 = vrot.lane.b32.xlu0 %v2407_v46, %s8917_s30  ;;  %v2907_v58 = vrot.slane %v2412_v4, 5  ;;  %v2415_v12 = vsel %vm622_vm0, %v2410_v22, %v10730_v59 }
 0x222   : > { %v1865_v18 = vmax.f32 %v1774_v29, 0.0  ;;  %v1777_v33 = vadd.f32 %v10527_v41, %v1776_v47  ;;  %3922 = vmatprep.mubr.bf16.mxu1 %v3565_v7  ;;  %v8163_v56 = vpop.f32.mrb[95].mxu0 }
 0x223   : > { %3923 = vmatmul.mubr.bf16.gmra.mrb[4].mxu1 %v3335_v48  ;;  %v4532_v17 = vpop.permute.xlu1 %4531  ;;  %v2908_v21 = vor.u32 %v2907_v58, %v2906_v43  ;;  %v13721_v58 = vrot.slane %v10321_v55, 1 }
 0x224   : > { %v1866_v46 = vmax.f32 %v1777_v33, 0.0  ;;  %v4530_v10 = vpop.permute.xlu0 %4529  ;;  %v2264_v34 = vmul.f32 %v10386_v31, %v1865_v18  ;;  %v2420_v31 = vshll.u32 %v10420_v6, 16 }
 0x225   : > { %4489 = vrot.lane.b32.xlu1 %v10737_v11, %s8915_s20  ;;  %4545 = vrot.lane.b32.xlu0 %v10741_v23, %s8917_s30  ;;  %v4648_v29 = vsel %vm3330_vm11, %v4588_v14, %v4530_v10  ;;  %v10772_v43 = vsel %vm2858_vm9, %v2904_v37, %v2908_v21  ;;  %v10779_v10 = vsel %vm1496_vm5, %v10055_v8, %v10644_v2 }
 0x226   : > { %v2265_v5 = vmul.f32 %v10375_v1, %v1866_v46  ;;  %8329 = vmatmul.mubr.bf16.gmra.mrb[124].mxu0 %v4648_v29  ;;  %v2424_v1 = vshrl.u32 %v10420_v6, 16  ;;  %13813 = vst [vmem:[#allocation24_spill] sm:$0xff] %v10772_v43  ;;  %v13722_v46 = vrot.slane %v10361_v13, 5 }
 0x227   : > { %v1781_v0 = vpop.f32.mrb[96].mxu0  ;;  %v10755_v4 = vpop.permute.xlu1 %4475  ;;  %8332 = vmatprep.mubr.msk.bf16.mxu0 %vm8913_vm1, %v13804_v40 }
 0x228   : > { %v10761_v7 = vpack.c.bf16 %v2265_v5, %v2264_v34  ;;  %v1782_v47 = vadd.f32 %v10527_v41, %v1781_v0  ;;  %v3101_v39 = vpop.permute.xlu0 %3100  ;;  %v8166_v38 = vpop.f32.mrb[97].mxu0  ;;  %v2910_v22 = vrot.slane %v2424_v1, 4  ;;  %v2911_v34 = vrot.slane %v2420_v31, 5 }
 0x229   : > { %v1784_v20 = vpop.f32.mrb[98].mxu0  ;;  %2562 = vrot.lane.b32.xlu1 %v2415_v12, %s8916_s27  ;;  %3172 = vrot.lane.b32.xlu0 %v2415_v12, %s8917_s30  ;;  %v2428_v0 = vshll.u32 %v10462_v36, 16  ;;  %v13814_v38 = vrot.slane %v10295_v61, 1 }
 0x22a   : > { %v1867_v18 = vmax.f32 %v1782_v47, 0.0  ;;  %v1785_v33 = vadd.f32 %v10527_v41, %v1784_v20  ;;  %v8167_v56 = vpop.f32.mrb[99].mxu0 }
 0x22b   : > { %v10769_v48 = vpop.permute.xlu1 %3046  ;;  %v10800_v20 = vsel %vm2625_vm6, %v13814_v38, %v13721_v58 }
 0x22c   : > { %v1868_v14 = vmax.f32 %v1785_v33, 0.0  ;;  %v4474_v29 = vpop.permute.xlu0 %4473  ;;  %v2266_v37 = vmul.f32 %v10405_v54, %v1867_v18  ;;  %13815 = vst [vmem:[#allocation25_spill] sm:$0xff] %v10800_v20  ;;  %v13816_v54 = vrot.slane %v10321_v55, 5 }
 0x22d   : > { %v4590_v5 = vsel %vm3271_vm10, %v10779_v10, %v4474_v29  ;;  %3116 = vrot.lane.b32.xlu1 %v10395_v9, %s8915_s20  ;;  %4547 = vrot.lane.b32.xlu0 %v10772_v43, %s8917_s30  ;;  %v2768_v29 = vrot.slane %v10420_v6, 4 }
 0x22e   : > { %v2267_v8 = vmul.f32 %v10399_v30, %v1868_v14  ;;  %v4651_v2 = vsel %vm3330_vm11, %v4590_v5, %v4532_v17  ;;  %v3002_v30 = vsel %vm2979_vm8, %v13816_v54, %v13722_v46  ;;  %v2432_v17 = vshrl.u32 %v10462_v36, 16 }
 0x22f   : > { %8333 = vmatmul.mubr.bf16.gmra.mrb[128].mxu0 %v4651_v2  ;;  %v1789_v12 = vpop.f32.mrb[100].mxu0  ;;  %v10793_v47 = vpop.permute.xlu1 %2548  ;;  %v2912_v5 = vor.u32 %v2911_v34, %v2910_v22  ;;  %v2915_v54 = vrot.slane %v2428_v0, 5 }
 0x230   : > { %v10808_v18 = vpack.c.bf16 %v2267_v8, %v2266_v37  ;;  %v1790_v33 = vadd.f32 %v10527_v41, %v1789_v12  ;;  %v10811_v56 = vpop.permute.xlu0 %2806  ;;  %v8170_v14 = vpop.f32.mrb[101].mxu0  ;;  %8336 = vmatprep.mubr.msk.bf16.mxu0 %vm8913_vm1, %v13804_v40  ;;  %v2418_v37 = vor.u32 %v2416_v24, %v10730_v59  ;;  %v2422_v8 = vrot.slane %v2420_v31, 1 }
 0x231   : > { %v1792_v2 = vpop.f32.mrb[102].mxu0  ;;  %2703 = vrot.lane.b32.xlu1 %v10800_v20, %s8915_s20  ;;  %3058 = vrot.lane.b32.xlu0 %v3002_v30, %s8916_s27  ;;  %v3426_v12 = vsel %vm1496_vm5, %v10227_v19, %v10628_v45  ;;  %v2914_v30 = vrot.slane %v2432_v17, 4  ;;  %v2436_v24 = vshll.u32 %v10494_v26, 16  ;;  %v13723_v59 = vshrl.u32 %v10494_v26, 16 }
 0x232   : > { %v1869_v38 = vmax.f32 %v1790_v33, 0.0  ;;  %v1793_v22 = vadd.f32 %v10527_v41, %v1792_v2  ;;  %v8171_v34 = vpop.f32.mrb[103].mxu0  ;;  %v3510_v14 = vsel %vm3271_vm10, %v3426_v12, %v3101_v39  ;;  %v10838_v19 = vsel %vm2304_vm7, %v2766_v32, %v2768_v29 }
 0x233   : > { %v3159_v58 = vpop.permute.xlu1 %3158  ;;  %v10841_v45 = vsel %vm2858_vm9, %v2908_v21, %v2912_v5  ;;  %v3277_v33 = vsel %vm3271_vm10, %v10720_v25, %v10637_v28  ;;  %v2770_v34 = vrot.slane %v10462_v36, 4  ;;  %v2918_v28 = vrot.slane %v13723_v59, 4 }
 0x234   : > { %v1870_v31 = vmax.f32 %v1793_v22, 0.0  ;;  %v10833_v46 = vpop.permute.xlu0 %2691  ;;  %13817 = vst [vmem:[#allocation26_spill] sm:$0xff] %v10841_v45  ;;  %v3568_v39 = vsel %vm3330_vm11, %v3510_v14, %v3159_v58  ;;  %v2268_v2 = vmul.f32 %v10427_v44, %v1869_v38  ;;  %v3338_v21 = vsel %vm3330_vm11, %v3277_v33, %v10686_v27 }
 0x235   : > { %4491 = vrot.lane.b32.xlu1 %v10838_v19, %s8915_s20  ;;  %4549 = vrot.lane.b32.xlu0 %v10841_v45, %s8917_s30  ;;  %v2423_v58 = vsel %vm622_vm0, %v2418_v37, %v2422_v8  ;;  %v2916_v14 = vor.u32 %v2915_v54, %v2914_v30  ;;  %v2919_v44 = vrot.slane %v2436_v24, 5  ;;  %v2444_v37 = vshll.u32 %v10522_v57, 16 }
 0x236   : > { %v2269_v32 = vmul.f32 %v10415_v60, %v1870_v31  ;;  %3930 = vmatprep.mubr.bf16.mxu1 %v3568_v39  ;;  %v13724_v31 = vshrl.u32 %v10522_v57, 16  ;;  %v3429_v59 = vsel %vm1496_vm5, %v10234_v3, %v10682_v35  ;;  %v3279_v3 = vsel %vm3271_vm10, %v10779_v10, %v10714_v53 }
 0x237   : > { %3931 = vmatmul.mubr.bf16.gmra.mrb[8].mxu1 %v3338_v21  ;;  %v1797_v12 = vpop.f32.mrb[104].mxu0  ;;  %v10856_v22 = vpop.permute.xlu1 %3048 }
 0x238   : > { %v10863_v60 = vpack.c.bf16 %v2269_v32, %v2268_v2  ;;  %v1798_v25 = vadd.f32 %v10527_v41, %v1797_v12  ;;  %v2547_v27 = vpop.permute.xlu0 %2546  ;;  %v8174_v38 = vpop.f32.mrb[105].mxu0  ;;  %v10872_v2 = vsel %vm2304_vm7, %v2768_v29, %v2770_v34  ;;  %v10875_v32 = vsel %vm2858_vm9, %v2912_v5, %v2916_v14 }
 0x239   : > { %v1800_v39 = vpop.f32.mrb[106].mxu0  ;;  %2564 = vrot.lane.b32.xlu1 %v2423_v58, %s8916_s27  ;;  %3174 = vrot.lane.b32.xlu0 %v2423_v58, %s8917_s30  ;;  %13818 = vst [vmem:[#allocation27_spill] sm:$0xff] %v10875_v32  ;;  %v2430_v12 = vrot.slane %v2428_v0, 1  ;;  %v2920_v38 = vor.u32 %v2919_v44, %v2918_v28  ;;  %v2426_v0 = vor.u32 %v2424_v1, %v2422_v8  ;;  %v2772_v1 = vrot.slane %v10494_v26, 4 }
 0x23a   : > { %v1871_v54 = vmax.f32 %v1798_v25, 0.0  ;;  %v1801_v30 = vadd.f32 %v10527_v41, %v1800_v39  ;;  %v8175_v33 = vpop.f32.mrb[107].mxu0  ;;  %v2922_v39 = vrot.slane %v13724_v31, 4 }
 0x23b   : > { %v3161_v21 = vpop.permute.xlu1 %3160  ;;  %v2923_v33 = vrot.slane %v2444_v37, 5  ;;  %v10911_v10 = vsel %vm2858_vm9, %v2916_v14, %v2920_v38  ;;  %v13725_v14 = vrot.slane %v10395_v9, 5 }
 0x23c   : > { %v1872_v58 = vmax.f32 %v1801_v30, 0.0  ;;  %v3103_v25 = vpop.permute.xlu0 %3102  ;;  %v2270_v35 = vmul.f32 %v10460_v15, %v1871_v54  ;;  %v3341_v30 = vsel %vm3330_vm11, %v3279_v3, %v10811_v56  ;;  %13819 = vst [vmem:[#allocation28_spill] sm:$0xff] %v10911_v10  ;;  %v2438_v3 = vrot.slane %v2436_v24, 1 }
 0x23d   : > { %v3512_v29 = vsel %vm3271_vm10, %v3429_v59, %v3103_v25  ;;  %4493 = vrot.lane.b32.xlu1 %v10872_v2, %s8915_s20  ;;  %4551 = vrot.lane.b32.xlu0 %v10875_v32, %s8917_s30  ;;  %v10902_v25 = vsel %vm622_vm0, %v2426_v0, %v2430_v12  ;;  %v2924_v54 = vor.u32 %v2923_v33, %v2922_v39  ;;  %v2452_v39 = vshll.u32 %v10568_v63, 16 }
 0x23e   : > { %v2271_v5 = vmul.f32 %v10450_v42, %v1872_v58  ;;  %v3571_v28 = vsel %vm3330_vm11, %v3512_v29, %v3161_v21  ;;  %v13726_v33 = vshrl.u32 %v10568_v63, 16  ;;  %v2434_v24 = vor.u32 %v2432_v17, %v2430_v12 }
 0x23f   : > { %3938 = vmatprep.mubr.bf16.mxu1 %v3571_v28  ;;  %v1805_v59 = vpop.f32.mrb[108].mxu0  ;;  %v10897_v44 = vpop.permute.xlu1 %4535  ;;  %v10928_v28 = vsel %vm2304_vm7, %v2770_v34, %v2772_v1 }
 0x240   : > { %v10905_v8 = vpack.c.bf16 %v2271_v5, %v2270_v35  ;;  %v1806_v15 = vadd.f32 %v10527_v41, %v1805_v59  ;;  %3939 = vmatmul.mubr.bf16.gmra.mrb[12].mxu1 %v3341_v30  ;;  %v10908_v42 = vpop.permute.xlu0 %2808  ;;  %v8178_v53 = vpop.f32.mrb[109].mxu0  ;;  %v13821_v59 = vld [vmem:[#allocation2_spill] sm:$0xff]  ;;  %v2926_v17 = vrot.slane %v13726_v33, 4 }
 0x241   : > { %v1808_v21 = vpop.f32.mrb[110].mxu0  ;;  %2566 = vrot.lane.b32.xlu1 %v10902_v25, %s8916_s27  ;;  %4553 = vrot.lane.b32.xlu0 %v10911_v10, %s8917_s30  ;;  %v3222_v30 = vsel %vm1496_vm5, %v13821_v59, %v2547_v27  ;;  %v13822_v53 = vld [vmem:[#allocation15_spill] sm:$0xff]  ;;  %v10948_v27 = vsel %vm622_vm0, %v2434_v24, %v2438_v3  ;;  %v2774_v24 = vrot.slane %v10522_v57, 4 }
 0x242   : > { %v1873_v56 = vmax.f32 %v1806_v15, 0.0  ;;  %v1809_v58 = vadd.f32 %v10527_v41, %v1808_v21  ;;  %v8179_v29 = vpop.f32.mrb[111].mxu0  ;;  %v10931_v41 = vsel %vm2858_vm9, %v2920_v38, %v2924_v54  ;;  %v2446_v21 = vrot.slane %v2444_v37, 1 }
 0x243   : > { %v10918_v0 = vpop.permute.xlu1 %4479  ;;  %13820 = vst [vmem:[#allocation29_spill] sm:$0xff] %v10931_v41  ;;  %v13823_v29 = vrot.slane %v10361_v13, 5 }
 0x244   : > { %v1874_v35 = vmax.f32 %v1809_v58, 0.0  ;;  %v10925_v5 = vpop.permute.xlu0 %2693  ;;  %v2272_v15 = vmul.f32 %v10483_v50, %v1873_v56  ;;  %v2927_v50 = vrot.slane %v2452_v39, 5 }
 0x245   : > { %4495 = vrot.lane.b32.xlu1 %v10928_v28, %s8915_s20  ;;  %4555 = vrot.lane.b32.xlu0 %v10931_v41, %s8917_s30  ;;  %v3004_v59 = vsel %vm2979_vm8, %v13823_v29, %v13725_v14  ;;  %v13829_v41 = vld [vmem:[#allocation21_spill] sm:$0xff] }
 0x246   : > { %v2273_v34 = vmul.f32 %v13822_v53, %v1874_v35  ;;  %v4592_v35 = vsel %vm3271_vm10, %v3222_v30, %v10755_v4  ;;  %v2454_v53 = vrot.slane %v2452_v39, 1  ;;  %v2928_v33 = vor.u32 %v2927_v50, %v2926_v17  ;;  %v13826_v17 = vld [vmem:[#allocation12_spill] sm:$0xff] }
 0x247   : > { %v10943_v58 = vpop.f32.mrb[112].mxu0  ;;  %v10945_v38 = vpop.permute.xlu1 %3050  ;;  %v3432_v50 = vsel %vm1496_vm5, %v13826_v17, %v10769_v48  ;;  %v2778_v48 = vrot.slane %v13829_v41, 4 }
 0x248   : > { %v10957_v12 = vpack.c.bf16 %v2273_v34, %v2272_v15  ;;  %v4534_v37 = vpop.permute.xlu0 %4533  ;;  %v8182_v56 = vpop.f32.mrb[113].mxu0  ;;  %v13824_v15 = vshrl.u32 %v10522_v57, 16 }
 0x249   : > { %v1816_v31 = vpop.f32.mrb[114].mxu0  ;;  %2568 = vrot.lane.b32.xlu1 %v10948_v27, %s8916_s27  ;;  %3060 = vrot.lane.b32.xlu0 %v3004_v59, %s8916_s27  ;;  %v4654_v29 = vsel %vm3330_vm11, %v4592_v35, %v4534_v37 }
 0x24a   : > { %8337 = vmatmul.mubr.bf16.gmra.mrb[132].mxu0 %v4654_v29  ;;  %v8183_v14 = vpop.f32.mrb[115].mxu0  ;;  %v2450_v34 = vor.u32 %v13824_v15, %v2446_v21  ;;  %v10973_v31 = vsel %vm2304_vm7, %v2772_v1, %v2774_v24  ;;  %v10992_v29 = vsel %vm2858_vm9, %v2924_v54, %v2928_v33  ;;  %v2776_v15 = vrot.slane %v10568_v63, 4 }
 0x24b   : > { %v10968_v56 = vpop.permute.xlu1 %2552  ;;  %8340 = vmatprep.mubr.msk.bf16.mxu0 %vm8913_vm1, %v13804_v40  ;;  %v13825_v14 = vshrl.u32 %v10494_v26, 16  ;;  %13827 = vst [vmem:[#allocation2_spill] sm:$0xff] %v10992_v29  ;;  %v3281_v54 = vsel %vm3271_vm10, %v3222_v30, %v10833_v46 }
 0x24c   : > { %v3105_v4 = vpop.permute.xlu0 %3104  ;;  %v10976_v39 = vsel %vm622_vm0, %v2450_v34, %v2454_v53  ;;  %v13828_v34 = vld [vmem:[#allocation3_spill] sm:$0xff] }
 0x24d   : > { %4497 = vrot.lane.b32.xlu1 %v10973_v31, %s8915_s20  ;;  %2572 = vrot.lane.b32.xlu0 %v10976_v39, %s8916_s27  ;;  %v2442_v59 = vor.u32 %v13825_v14, %v2438_v3  ;;  %v3514_v37 = vsel %vm3271_vm10, %v3432_v50, %v3105_v4  ;;  %v3224_v20 = vsel %vm1496_vm5, %v13828_v34, %v10793_v47  ;;  %v2460_v4 = vshll.u32 %v13829_v41, 16 }
 0x24e   : > { %v3344_v47 = vsel %vm3330_vm11, %v3281_v54, %v10908_v42  ;;  %v2464_v50 = vshrl.u32 %v13829_v41, 16  ;;  %v11019_v34 = vsel %vm2304_vm7, %v2776_v15, %v2778_v48 }
 0x24f   : > { %v3163_v1 = vpop.permute.xlu1 %3162  ;;  %v10989_v35 = vsel %vm622_vm0, %v2442_v59, %v2446_v21  ;;  %13831 = vst [vmem:[#allocation12_spill] sm:$0xff] %v11019_v34  ;;  %v2462_v46 = vrot.slane %v2460_v4, 1 }
 0x250   : > { %v4478_v3 = vpop.permute.xlu0 %4477  ;;  %v3574_v14 = vsel %vm3330_vm11, %v3514_v37, %v3163_v1  ;;  %v11016_v1 = vsel %vm2304_vm7, %v2774_v24, %v2776_v15  ;;  %v2930_v24 = vrot.slane %v2464_v50, 4 }
 0x251   : > { %v4594_v17 = vsel %vm3271_vm10, %v3224_v20, %v4478_v3  ;;  %2570 = vrot.lane.b32.xlu1 %v10989_v35, %s8916_s27  ;;  %4557 = vrot.lane.b32.xlu0 %v10992_v29, %s8917_s30  ;;  %13830 = vst [vmem:[#allocation15_spill] sm:$0xff] %v11016_v1  ;;  %v2931_v3 = vrot.slane %v2460_v4, 5  ;;  %v13836_v29 = vld [vmem:[#allocation10_spill] sm:$0xff] }
 0x252   : > { %3946 = vmatprep.mubr.bf16.mxu1 %v3574_v14  ;;  %v4657_v21 = vsel %vm3330_vm11, %v4594_v17, %v10897_v44  ;;  %v13832_v44 = vshrl.u32 %v10568_v63, 16  ;;  %v3435_v10 = vsel %vm1496_vm5, %v13836_v29, %v10856_v22 }
 0x253   : > { %3947 = vmatmul.mubr.bf16.gmra.mrb[16].mxu1 %v3344_v47  ;;  %8341 = vmatmul.mubr.bf16.gmra.mrb[136].mxu0 %v4657_v21  ;;  %v11012_v59 = vpop.permute.xlu1 %3052  ;;  %v2932_v54 = vor.u32 %v2931_v3, %v2930_v24  ;;  %v13833_v47 = vld [vmem:[#allocation22_spill] sm:$0xff]  ;;  %v2466_v3 = vor.u32 %v2464_v50, %v2462_v46 }
 0x254   : > { %v2811_v37 = vpop.permute.xlu0 %2810  ;;  %8344 = vmatprep.mubr.msk.bf16.mxu0 %vm8913_vm1, %v13804_v40  ;;  %v2458_v42 = vor.u32 %v13832_v44, %v2454_v53  ;;  %v2780_v21 = vrot.slane %v13833_v47, 4  ;;  %v2468_v44 = vshll.u32 %v13833_v47, 16  ;;  %v2472_v4 = vshrl.u32 %v13833_v47, 16 }
 0x255   : > { %4499 = vrot.lane.b32.xlu1 %v11016_v1, %s8915_s20  ;;  %4501 = vrot.lane.b32.xlu0 %v11019_v34, %s8915_s20 }
 0x256   : > { %v11034_v15 = vsel %vm622_vm0, %v2458_v42, %v2462_v46  ;;  %v11053_v24 = vsel %vm2304_vm7, %v2778_v48, %v2780_v21  ;;  %v2470_v45 = vrot.slane %v2468_v44, 1  ;;  %v2934_v34 = vrot.slane %v2472_v4, 4 }
 0x257   : > { %v11029_v30 = vpop.permute.xlu1 %2699  ;;  %13835 = vst [vmem:[#allocation21_spill] sm:$0xff] %v11053_v24  ;;  %v2935_v43 = vrot.slane %v2468_v44, 5  ;;  %v2476_v44 = vshll.u32 %v10668_v51, 16  ;;  %v2782_v46 = vrot.slane %v10668_v51, 4 }
 0x258   : > { %v11031_v14 = vpop.permute.xlu0 %2695 }
 0x259   : > { %2820 = vrot.lane.b32.xlu1 %v10691_v62, %s8917_s30  ;;  %2574 = vrot.lane.b32.xlu0 %v11034_v15, %s8916_s27  ;;  %v11050_v62 = vsel %vm2858_vm9, %v2928_v33, %v2932_v54  ;;  %v3283_v33 = vsel %vm3271_vm10, %v3224_v20, %v10925_v5  ;;  %v11080_v5 = vsel %vm622_vm0, %v2466_v3, %v2470_v45 }
 0x25a   : > { %13834 = vst [vmem:[#allocation3_spill] sm:$0xff] %v11050_v62  ;;  %v3347_v29 = vsel %vm3330_vm11, %v3283_v33, %v2811_v37  ;;  %13840 = vst [vmem:[#allocation30_spill] sm:$0xff] %v11080_v5  ;;  %v2936_v50 = vor.u32 %v2935_v43, %v2934_v34  ;;  %v2939_v33 = vrot.slane %v2476_v44, 5  ;;  %v11095_v43 = vsel %vm2304_vm7, %v2780_v21, %v2782_v46  ;;  %v13843_v34 = vld [vmem:[#allocation4_spill] sm:$0xff] }
 0x25b   : > { %v3165_v17 = vpop.permute.xlu1 %3164  ;;  %13842 = vst [vmem:[#allocation32_spill] sm:$0xff] %v11095_v43  ;;  %v2474_v3 = vor.u32 %v2472_v4, %v2470_v45 }
 0x25c   : > { %v2551_v53 = vpop.permute.xlu0 %2550 }
 0x25d   : > { %3118 = vrot.lane.b32.xlu1 %v10420_v6, %s8915_s20  ;;  %3176 = vrot.lane.b32.xlu0 %v10902_v25, %s8917_s30 }
 0x25f   : > { %v11047_v42 = vpop.permute.xlu1 %4539 }
 0x260   : > { %v3107_v32 = vpop.permute.xlu0 %3106 }
 0x261   : > { %v3516_v25 = vsel %vm3271_vm10, %v3435_v10, %v3107_v32  ;;  %4559 = vrot.lane.b32.xlu1 %v11050_v62, %s8917_s30  ;;  %4503 = vrot.lane.b32.xlu0 %v11053_v24, %s8915_s20  ;;  %v2480_v32 = vshrl.u32 %v10668_v51, 16  ;;  %v13837_v62 = vrot.slane %v10361_v13, 1  ;;  %v13838_v24 = vrot.slane %v10321_v55, 1 }
 0x262   : > { %v3577_v48 = vsel %vm3330_vm11, %v3516_v25, %v3165_v17  ;;  %v2478_v17 = vrot.slane %v2476_v44, 1  ;;  %v2784_v51 = vrot.slane %v10711_v52, 4 }
 0x263   : > { %3954 = vmatprep.mubr.bf16.mxu1 %v3577_v48  ;;  %v11067_v22 = vpop.permute.xlu1 %4483  ;;  %v11077_v20 = vsel %vm2625_vm6, %v13838_v24, %v13837_v62  ;;  %v2938_v25 = vrot.slane %v2480_v32, 4  ;;  %v11092_v62 = vsel %vm2858_vm9, %v2932_v54, %v2936_v50  ;;  %v3226_v24 = vsel %vm1496_vm5, %v13843_v34, %v2551_v53 }
 0x264   : > { %3955 = vmatmul.mubr.bf16.gmra.mrb[20].mxu1 %v3347_v29  ;;  %v2813_v10 = vpop.permute.xlu0 %2812  ;;  %13839 = vst [vmem:[#allocation10_spill] sm:$0xff] %v11077_v20  ;;  %13841 = vst [vmem:[#allocation31_spill] sm:$0xff] %v11092_v62  ;;  %v11106_v44 = vsel %vm622_vm0, %v2474_v3, %v2478_v17  ;;  %v4596_v21 = vsel %vm3271_vm10, %v3226_v24, %v10918_v0  ;;  %v2484_v53 = vshll.u32 %v10711_v52, 16  ;;  %v13742_v34 = vshrl.u32 %v10711_v52, 16 }
 0x265   : > { %2705 = vrot.lane.b32.xlu1 %v11077_v20, %s8915_s20  ;;  %2576 = vrot.lane.b32.xlu0 %v11080_v5, %s8916_s27  ;;  %13844 = vst [vmem:[#allocation4_spill] sm:$0xff] %v11106_v44  ;;  %v2940_v54 = vor.u32 %v2939_v33, %v2938_v25  ;;  %v3005_v25 = vrot.slane %v10420_v6, 5  ;;  %v11127_v3 = vsel %vm2304_vm7, %v2782_v46, %v2784_v51  ;;  %v13848_v46 = vrot.slane %v10395_v9, 5 }
 0x266   : > { %13846 = vst [vmem:[#allocation34_spill] sm:$0xff] %v11127_v3 }
 0x267   : > { %v11087_v37 = vpop.permute.xlu1 %2816  ;;  %v11124_v33 = vsel %vm2858_vm9, %v2936_v50, %v2940_v54 }
 0x268   : > { %v11089_v48 = vpop.permute.xlu0 %2697  ;;  %13845 = vst [vmem:[#allocation33_spill] sm:$0xff] %v11124_v33 }
 0x269   : > { %4561 = vrot.lane.b32.xlu1 %v11092_v62, %s8917_s30  ;;  %4505 = vrot.lane.b32.xlu0 %v11095_v43, %s8915_s20  ;;  %v2943_v62 = vrot.slane %v2484_v53, 5  ;;  %v3006_v43 = vsel %vm2979_vm8, %v13848_v46, %v3005_v25  ;;  %v13750_v46 = vrot.slane %v10462_v36, 5 }
 0x26b   : > { %v11103_v29 = vpop.permute.xlu1 %2701 }
 0x26c   : > { %v4538_v20 = vpop.permute.xlu0 %4537 }
 0x26d   : > { %2822 = vrot.lane.b32.xlu1 %v10737_v11, %s8917_s30  ;;  %2578 = vrot.lane.b32.xlu0 %v11106_v44, %s8916_s27  ;;  %v4660_v45 = vsel %vm3330_vm11, %v4596_v21, %v4538_v20  ;;  %v2942_v11 = vrot.slane %v13742_v34, 4  ;;  %v13847_v20 = vld [vmem:[#allocation19_spill] sm:$0xff]  ;;  %v13849_v34 = vld [vmem:[#allocation5_spill] sm:$0xff] }
 0x26e   : > { %8345 = vmatmul.mubr.bf16.gmra.mrb[140].mxu0 %v4660_v45  ;;  %v3438_v21 = vsel %vm1496_vm5, %v13847_v20, %v10945_v38  ;;  %v3228_v44 = vsel %vm1496_vm5, %v13849_v34, %v10968_v56  ;;  %v3285_v38 = vsel %vm3271_vm10, %v3226_v24, %v11031_v14  ;;  %v2482_v34 = vor.u32 %v2480_v32, %v2478_v17 }
 0x26f   : > { %v11118_v4 = vpop.permute.xlu1 %2556  ;;  %8348 = vmatprep.mubr.msk.bf16.mxu0 %vm8913_vm1, %v13804_v40  ;;  %v2944_v1 = vor.u32 %v2943_v62, %v2942_v11  ;;  %v2492_v14 = vshll.u32 %v10761_v7, 16  ;;  %v2786_v24 = vrot.slane %v10761_v7, 4 }
 0x270   : > { %v3109_v0 = vpop.permute.xlu0 %3108 }
 0x271   : > { %4563 = vrot.lane.b32.xlu1 %v11124_v33, %s8917_s30  ;;  %4507 = vrot.lane.b32.xlu0 %v11127_v3, %s8915_s20  ;;  %v3518_v50 = vsel %vm3271_vm10, %v3438_v21, %v3109_v0  ;;  %v2486_v3 = vrot.slane %v2484_v53, 1  ;;  %v3350_v0 = vsel %vm3330_vm11, %v3285_v38, %v2813_v10  ;;  %v11159_v11 = vsel %vm2858_vm9, %v2940_v54, %v2944_v1 }
 0x272   : > { %v13749_v10 = vshrl.u32 %v10761_v7, 16 }
 0x273   : > { %v3167_v45 = vpop.permute.xlu1 %3166 }
 0x274   : > { %v4482_v47 = vpop.permute.xlu0 %4481  ;;  %v3580_v33 = vsel %vm3330_vm11, %v3518_v50, %v3167_v45  ;;  %v2946_v54 = vrot.slane %v13749_v10, 4  ;;  %v11187_v50 = vsel %vm2304_vm7, %v2784_v51, %v2786_v24  ;;  %v3008_v51 = vsel %vm2979_vm8, %v3005_v25, %v13750_v46 }
 0x275   : > { %v4598_v5 = vsel %vm3271_vm10, %v3228_v44, %v4482_v47  ;;  %3120 = vrot.lane.b32.xlu1 %v10462_v36, %s8915_s20  ;;  %3062 = vrot.lane.b32.xlu0 %v3006_v43, %s8916_s27  ;;  %v2651_v47 = vrot.slane %v10395_v9, 1  ;;  %v11162_v43 = vsel %vm622_vm0, %v2482_v34, %v2486_v3  ;;  %v13851_v34 = vld [vmem:[#allocation7_spill] sm:$0xff] }
 0x276   : > { %3962 = vmatprep.mubr.bf16.mxu1 %v3580_v33  ;;  %v4663_v56 = vsel %vm3330_vm11, %v4598_v5, %v11047_v42  ;;  %v13850_v5 = vrot.slane %v10361_v13, 1  ;;  %v2947_v33 = vrot.slane %v2492_v14, 5 }
 0x277   : > { %3963 = vmatmul.mubr.bf16.gmra.mrb[24].mxu1 %v3350_v0  ;;  %8349 = vmatmul.mubr.bf16.gmra.mrb[144].mxu0 %v4663_v56  ;;  %v11155_v62 = vpop.permute.xlu1 %3112  ;;  %v11198_v0 = vrot.slane %v2492_v14, 1 }
 0x278   : > { %v2815_v53 = vpop.permute.xlu0 %2814  ;;  %8352 = vmatprep.mubr.msk.bf16.mxu0 %vm8913_vm1, %v13804_v40  ;;  %v11175_v17 = vsel %vm2625_vm6, %v13850_v5, %v2651_v47  ;;  %v11189_v45 = vor.u32 %v2947_v33, %v2946_v54  ;;  %v13853_v54 = vld [vmem:[#allocation16_spill] sm:$0xff] }
 0x279   : > { %4565 = vrot.lane.b32.xlu1 %v11159_v11, %s8917_s30  ;;  %2580 = vrot.lane.b32.xlu0 %v11162_v43, %s8916_s27 }
 0x27a   : > { %v11202_v56 = vsel %vm2858_vm9, %v2944_v1, %v11189_v45  ;;  %v3441_v1 = vsel %vm1496_vm5, %v13853_v54, %v11012_v59  ;;  %v3287_v59 = vsel %vm3271_vm10, %v3228_v44, %v11089_v48  ;;  %v8868_v48 = vld [vmem:[%s13678_s4 + $0x80] sm:$0xff]  }
 0x27b   : > { %v4486_v42 = vpop.permute.xlu1 %4485  ;;  %v8869_v44 = vld [vmem:[%s13682_s8] sm:$0xff]   ;;  %8185 = vmatpush3.bf16.msra.mxu1 %v8868_v48  ;;  %v3009_v48 = vrot.slane %v10494_v26, 5 }
 0x27c   : > { %v2555_v32 = vpop.permute.xlu0 %2554  ;;  %6032 = vmatpush1.bf16.msra.mxu0 %v8869_v44  ;;  %8186 = vmatprep.subr.bf16.mxu1 %v13804_v40 }
 0x27d   : > { %2707 = vrot.lane.b32.xlu1 %v11175_v17, %s8915_s20  ;;  %3178 = vrot.lane.b32.xlu0 %v10948_v27, %s8917_s30  ;;  %v3230_v5 = vsel %vm1496_vm5, %v13851_v34, %v2555_v32  ;;  %v2653_v32 = vrot.slane %v10420_v6, 1 }
 0x27f   : > { %v11184_v20 = vpop.permute.xlu1 %2818 }
 0x280   : > { %v3111_v21 = vpop.permute.xlu0 %3110 }
 0x281   : > { %2824 = vrot.lane.b32.xlu1 %v10838_v19, %s8917_s30  ;;  %4509 = vrot.lane.b32.xlu0 %v11187_v50, %s8915_s20  ;;  %v13852_v19 = vshrl.u32 %v10711_v52, 16  ;;  %v3520_v33 = vsel %vm3271_vm10, %v3441_v1, %v3111_v21 }
 0x283   : > { %v11196_v38 = vpop.permute.xlu1 %2558  ;;  %v2490_v14 = vor.u32 %v13852_v19, %v2486_v3  ;;  %v2500_v3 = vshll.u32 %v10808_v18, 16  ;;  %v2504_v19 = vshrl.u32 %v10808_v18, 16 }
 0x284   : > { %v3055_v27 = vpop.permute.xlu0 %3054 }
 0x285   : > { %4567 = vrot.lane.b32.xlu1 %v11202_v56, %s8917_s30  ;;  %3064 = vrot.lane.b32.xlu0 %v3008_v51, %s8916_s27  ;;  %v11220_v25 = vsel %vm622_vm0, %v2490_v14, %v11198_v0  ;;  %v4600_v51 = vsel %vm3271_vm10, %v3230_v5, %v11067_v22  ;;  %v2950_v54 = vrot.slane %v2504_v19, 4  ;;  %v2951_v1 = vrot.slane %v2500_v3, 5 }
 0x287   : > { %v3169_v10 = vpop.permute.xlu1 %3168 }
 0x288   : > { %v4542_v34 = vpop.permute.xlu0 %4541  ;;  %v3583_v46 = vsel %vm3330_vm11, %v3520_v33, %v3169_v10  ;;  %v3353_v10 = vsel %vm3330_vm11, %v3287_v59, %v2815_v53  ;;  %v2788_v53 = vrot.slane %v10808_v18, 4  ;;  %v13855_v33 = vld [vmem:[#allocation8_spill] sm:$0xff] }
 0x289   : > { %3122 = vrot.lane.b32.xlu1 %v10494_v26, %s8915_s20  ;;  %2582 = vrot.lane.b32.xlu0 %v11220_v25, %s8916_s27  ;;  %v4666_v21 = vsel %vm3330_vm11, %v4600_v51, %v4542_v34  ;;  %v3232_v34 = vsel %vm1496_vm5, %v13855_v33, %v11118_v4  ;;  %v13856_v51 = vmov 0   ;;  %v3444_v4 = vsel %vm1496_vm5, %v10649_v16, %v3055_v27 }
 0x28a   : > { %3970 = vmatprep.mubr.bf16.mxu1 %v3583_v46  ;;  %8353 = vmatmul.mubr.bf16.gmra.mrb[148].mxu0 %v4666_v21  ;;  %v11247_v46 = vsel %vm2625_vm6, %v2651_v47, %v2653_v32  ;;  %v4602_v59 = vsel %vm3271_vm10, %v3232_v34, %v4486_v42  ;;  %v2502_v33 = vrot.slane %v2500_v3, 1 }
 0x28b   : > { %3971 = vmatmul.mubr.bf16.gmra.mrb[28].mxu1 %v3353_v10  ;;  %v3115_v22 = vpop.permute.xlu1 %3114  ;;  %8356 = vmatprep.mubr.msk.bf16.mxu0 %vm8913_vm1, %v13804_v40  ;;  %13854 = vst [vmem:[#allocation19_spill] sm:$0xff] %v11247_v46  ;;  %v11265_v10 = vsel %vm2304_vm7, %v2786_v24, %v2788_v53  ;;  %v3289_v24 = vsel %vm3271_vm10, %v3230_v5, %v11029_v30  ;;  %v13858_v5 = vshrl.u32 %v10761_v7, 16 }
 0x28c   : > { %v3057_v14 = vpop.permute.xlu0 %3056  ;;  %6033 = vmatprep.subr.bf16.mxu0 %v13856_v51 }
 0x28d   : > { %2709 = vrot.lane.b32.xlu1 %v11247_v46, %s8915_s20  ;;  %3180 = vrot.lane.b32.xlu0 %v10989_v35, %s8917_s30  ;;  %v11267_v35 = vor.u32 %v2951_v1, %v2950_v54  ;;  %v3522_v1 = vsel %vm3271_vm10, %v3444_v4, %v11155_v62  ;;  %v11305_v62 = vsel %vm1496_vm5, %v10295_v61, %v11196_v38  ;;  %v8870_v4 = vld [vmem:[%s13682_s8 + $0x8] sm:$0xff]   ;;  %v2512_v61 = vshrl.u32 %v10863_v60, 16 }
 0x28e   : > { %v3447_v38 = vsel %vm1496_vm5, %v10695_v49, %v3057_v14  ;;  %6034 = vmatpush1.bf16.msra.mxu0 %v8870_v4 }
 0x28f   : > { %v4488_v47 = vpop.permute.xlu1 %4487  ;;  %v11284_v16 = vsel %vm2858_vm9, %v11189_v45, %v11267_v35  ;;  %v3356_v45 = vsel %vm3330_vm11, %v3289_v24, %v11087_v37  ;;  %v3524_v14 = vsel %vm3271_vm10, %v3447_v38, %v3115_v22  ;;  %6035 = vmatprep.subr.bf16.mxu0 %v13856_v51 }
 0x290   : > { %v4544_v21 = vpop.permute.xlu0 %4543  ;;  %v4604_v37 = vsel %vm3271_vm10, %v11305_v62, %v4488_v47 }
 0x291   : > { %2826 = vrot.lane.b32.xlu1 %v10872_v2, %s8917_s30  ;;  %4511 = vrot.lane.b32.xlu0 %v11265_v10, %s8915_s20  ;;  %v4669_v42 = vsel %vm3330_vm11, %v4602_v59, %v4544_v21  ;;  %v13857_v2 = vrot.slane %v10462_v36, 5  ;;  %v2498_v59 = vor.u32 %v13858_v5, %v11198_v0  ;;  %v2655_v21 = vrot.slane %v10462_v36, 1 }
 0x292   : > { %8357 = vmatmul.mubr.bf16.gmra.mrb[152].mxu0 %v4669_v42  ;;  %v2508_v0 = vshll.u32 %v10863_v60, 16 }
 0x293   : > { %v2561_v44 = vpop.permute.xlu1 %2560  ;;  %8360 = vmatprep.mubr.msk.bf16.mxu0 %vm8913_vm1, %v13804_v40  ;;  %v3010_v27 = vsel %vm2979_vm8, %v13857_v2, %v3009_v48  ;;  %v11314_v24 = vsel %vm622_vm0, %v2498_v59, %v2502_v33  ;;  %v11330_v2 = vsel %vm2625_vm6, %v2653_v32, %v2655_v21 }
 0x294   : > { %v3171_v54 = vpop.permute.xlu0 %3170  ;;  %13859 = vst [vmem:[#allocation5_spill] sm:$0xff] %v11330_v2  ;;  %v11350_v5 = vsel %vm1496_vm5, %v10321_v55, %v2561_v44 }
 0x295   : > { %4569 = vrot.lane.b32.xlu1 %v11284_v16, %s8917_s30  ;;  %3066 = vrot.lane.b32.xlu0 %v3010_v27, %s8916_s27  ;;  %v3586_v30 = vsel %vm3330_vm11, %v3522_v1, %v3171_v54  ;;  %v2790_v27 = vrot.slane %v10863_v60, 4  ;;  %v2954_v1 = vrot.slane %v2512_v61, 4 }
 0x296   : > { %3978 = vmatprep.mubr.bf16.mxu1 %v3586_v30  ;;  %v2955_v30 = vrot.slane %v2508_v0, 5 }
 0x297   : > { %3979 = vmatmul.mubr.bf16.gmra.mrb[32].mxu1 %v3356_v45  ;;  %v4490_v3 = vpop.permute.xlu1 %4489  ;;  %v3291_v45 = vsel %vm3271_vm10, %v3232_v34, %v11103_v29 }
 0x298   : > { %v4546_v42 = vpop.permute.xlu0 %4545  ;;  %v3359_v22 = vsel %vm3330_vm11, %v3291_v45, %v11184_v20  ;;  %v4606_v4 = vsel %vm3271_vm10, %v11350_v5, %v4490_v3  ;;  %v2956_v29 = vor.u32 %v2955_v30, %v2954_v1  ;;  %v3011_v20 = vrot.slane %v10522_v57, 5 }
 0x299   : > { %3124 = vrot.lane.b32.xlu1 %v10522_v57, %s8915_s20  ;;  %2584 = vrot.lane.b32.xlu0 %v11314_v24, %s8916_s27  ;;  %v4672_v54 = vsel %vm3330_vm11, %v4604_v37, %v4546_v42  ;;  %v2510_v3 = vrot.slane %v2508_v0, 1  ;;  %v2506_v42 = vor.u32 %v2504_v19, %v2502_v33  ;;  %v2520_v1 = vshrl.u32 %v10905_v8, 16  ;;  %v8871_v33 = vld [vmem:[%s13682_s8 + $0x10] sm:$0xff]  }
 0x29a   : > { %8361 = vmatmul.mubr.bf16.gmra.mrb[156].mxu0 %v4672_v54  ;;  %v2792_v45 = vrot.slane %v10905_v8, 4 }
 0x29b   : > { %v2563_v47 = vpop.permute.xlu1 %2562  ;;  %8364 = vmatprep.mubr.msk.bf16.mxu0 %vm8913_vm1, %v13804_v40  ;;  %v11391_v0 = vsel %vm622_vm0, %v2506_v42, %v2510_v3  ;;  %6036 = vmatpush1.bf16.msra.mxu0 %v8871_v33  ;;  %v8872_v33 = vld [vmem:[%s13682_s8 + $0x18] sm:$0xff]  }
 0x29c   : > { %v3173_v49 = vpop.permute.xlu0 %3172  ;;  %v11385_v38 = vsel %vm1496_vm5, %v10361_v13, %v2563_v47  ;;  %6037 = vmatprep.subr.bf16.mxu0 %v13856_v51 }
 0x29d   : > { %2711 = vrot.lane.b32.xlu1 %v11330_v2, %s8915_s20  ;;  %3182 = vrot.lane.b32.xlu0 %v10976_v39, %s8917_s30  ;;  %v3589_v32 = vsel %vm3330_vm11, %v3524_v14, %v3173_v49  ;;  %v11359_v39 = vsel %vm2304_vm7, %v2788_v53, %v2790_v27  ;;  %v11373_v53 = vsel %vm2858_vm9, %v11267_v35, %v2956_v29  ;;  %v2657_v35 = vrot.slane %v10494_v26, 1 }
 0x29e   : > { %3986 = vmatprep.mubr.bf16.mxu1 %v3589_v32  ;;  %v2516_v14 = vshll.u32 %v10905_v8, 16 }
 0x29f   : > { %3987 = vmatmul.mubr.bf16.gmra.mrb[36].mxu1 %v3359_v22  ;;  %v3117_v59 = vpop.permute.xlu1 %3116  ;;  %v2958_v22 = vrot.slane %v2520_v1, 4  ;;  %6038 = vmatpush1.bf16.msra.mxu0 %v8872_v33 }
 0x2a0   : > { %v4548_v37 = vpop.permute.xlu0 %4547  ;;  %6039 = vmatprep.subr.bf16.mxu0 %v13856_v51 }
 0x2a1   : > { %2828 = vrot.lane.b32.xlu1 %v10928_v28, %s8917_s30  ;;  %4513 = vrot.lane.b32.xlu0 %v11359_v39, %s8915_s20  ;;  %v4675_v55 = vsel %vm3330_vm11, %v4606_v4, %v4548_v37  ;;  %v3012_v28 = vsel %vm2979_vm8, %v3009_v48, %v3011_v20  ;;  %v2959_v4 = vrot.slane %v2516_v14, 5 }
 0x2a2   : > { %8365 = vmatmul.mubr.bf16.gmra.mrb[160].mxu0 %v4675_v55 }
 0x2a3   : > { %v11367_v34 = vpop.permute.xlu1 %2703  ;;  %8368 = vmatprep.mubr.msk.bf16.mxu0 %vm8913_vm1, %v13804_v40  ;;  %v2960_v42 = vor.u32 %v2959_v4, %v2958_v22  ;;  %v2524_v22 = vshll.u32 %v10957_v12, 16  ;;  %v13753_v4 = vshrl.u32 %v10957_v12, 16 }
 0x2a4   : > { %v3059_v44 = vpop.permute.xlu0 %3058 }
 0x2a5   : > { %4571 = vrot.lane.b32.xlu1 %v11373_v53, %s8917_s30  ;;  %3068 = vrot.lane.b32.xlu0 %v3012_v28, %s8916_s27  ;;  %v3450_v19 = vsel %vm1496_vm5, %v10741_v23, %v3059_v44  ;;  %v11410_v23 = vsel %vm2625_vm6, %v2655_v21, %v2657_v35  ;;  %v11433_v28 = vsel %vm2304_vm7, %v2790_v27, %v2792_v45 }
 0x2a6   : > { %13860 = vst [vmem:[#allocation7_spill] sm:$0xff] %v11410_v23  ;;  %v3526_v32 = vsel %vm3271_vm10, %v3450_v19, %v3117_v59  ;;  %v11444_v27 = vsel %vm2858_vm9, %v2956_v29, %v2960_v42  ;;  %v2518_v19 = vrot.slane %v2516_v14, 1  ;;  %v2514_v29 = vor.u32 %v2512_v61, %v2510_v3 }
 0x2a7   : > { %v4492_v54 = vpop.permute.xlu1 %4491 }
 0x2a8   : > { %v4608_v49 = vsel %vm3271_vm10, %v11385_v38, %v4492_v54  ;;  %v4550_v48 = vpop.permute.xlu0 %4549 }
 0x2a9   : > { %3126 = vrot.lane.b32.xlu1 %v10568_v63, %s8915_s20  ;;  %2586 = vrot.lane.b32.xlu0 %v11391_v0, %s8916_s27  ;;  %v4678_v13 = vsel %vm3330_vm11, %v4608_v49, %v4550_v48 }
 0x2aa   : > { %8369 = vmatmul.mubr.bf16.gmra.mrb[164].mxu0 %v4678_v13 }
 0x2ab   : > { %v2565_v47 = vpop.permute.xlu1 %2564  ;;  %8372 = vmatprep.mubr.msk.bf16.mxu0 %vm8913_vm1, %v13804_v40 }
 0x2ac   : > { %v3175_v30 = vpop.permute.xlu0 %3174  ;;  %v11426_v59 = vsel %vm1496_vm5, %v10395_v9, %v2565_v47  ;;  %v2659_v47 = vrot.slane %v10522_v57, 1 }
 0x2ad   : > { %2713 = vrot.lane.b32.xlu1 %v11410_v23, %s8915_s20  ;;  %3184 = vrot.lane.b32.xlu0 %v11034_v15, %s8917_s30  ;;  %v3592_v21 = vsel %vm3330_vm11, %v3526_v32, %v3175_v30  ;;  %v3013_v15 = vrot.slane %v10568_v63, 5  ;;  %v11467_v32 = vsel %vm622_vm0, %v2514_v29, %v2518_v19  ;;  %v11634_v23 = vrot.slane %v13856_v51, 4 }
 0x2ae   : > { %3994 = vmatprep.mubr.bf16.mxu1 %v3592_v21 }
 0x2af   : > { %v4494_v37 = vpop.permute.xlu1 %4493  ;;  %v3014_v48 = vsel %vm2979_vm8, %v3011_v20, %v3013_v15 }
 0x2b0   : > { %v4610_v55 = vsel %vm3271_vm10, %v11426_v59, %v4494_v37  ;;  %v4552_v44 = vpop.permute.xlu0 %4551  ;;  %v11482_v37 = vsel %vm2625_vm6, %v2657_v35, %v2659_v47 }
 0x2b1   : > { %2830 = vrot.lane.b32.xlu1 %v10973_v31, %s8917_s30  ;;  %4515 = vrot.lane.b32.xlu0 %v11433_v28, %s8915_s20  ;;  %v4681_v9 = vsel %vm3330_vm11, %v4610_v55, %v4552_v44  ;;  %v8895_v31 = vld [vmem:[%s13677_s3] ss:$0 sm:$0xff]  ;;  %13861 = vst [vmem:[#allocation16_spill] sm:$0xff] %v11482_v37  ;;  %v2794_v55 = vrot.slane %v10957_v12, 4  ;;  %v2962_v44 = vrot.slane %v13753_v4, 4 }
 0x2b2   : > { %8373 = vmatmul.mubr.bf16.gmra.mrb[168].mxu0 %v4681_v9  ;;  %v1814_v13 = vadd.f32 %v8895_v31, %v10943_v58  ;;  %v2963_v9 = vrot.slane %v2524_v22, 5 }
 0x2b3   : > { %v2567_v54 = vpop.permute.xlu1 %2566  ;;  %8376 = vmatprep.mubr.msk.bf16.mxu0 %vm8913_vm1, %v13804_v40  ;;  %v11499_v29 = vsel %vm2304_vm7, %v2792_v45, %v2794_v55 }
 0x2b4   : > { %v4554_v49 = vpop.permute.xlu0 %4553  ;;  %v11461_v20 = vsel %vm1496_vm5, %v10420_v6, %v2567_v54  ;;  %v1875_v61 = vmax.f32 %v1814_v13, 0.0  ;;  %v13862_v54 = vld [vmem:[#allocation17_spill] sm:$0xff] }
 0x2b5   : > { %4573 = vrot.lane.b32.xlu1 %v11444_v27, %s8917_s30  ;;  %3070 = vrot.lane.b32.xlu0 %v3014_v48, %s8916_s27 }
 0x2b6   : > { %v2274_v48 = vmul.f32 %v13862_v54, %v1875_v61 }
 0x2b7   : > { %v4496_v14 = vpop.permute.xlu1 %4495 }
 0x2b8   : > { %v4612_v58 = vsel %vm3271_vm10, %v11461_v20, %v4496_v14  ;;  %v4556_v30 = vpop.permute.xlu0 %4555  ;;  %v2964_v14 = vor.u32 %v2963_v9, %v2962_v44  ;;  %v2303_v61 = vpack.c.bf16 %v2274_v48, %v2274_v48  ;;  %v2526_v9 = vrot.slane %v2524_v22, 1 }
 0x2b9   : > { %3128 = vrot.lane.b32.xlu1 %v13829_v41, %s8915_s20  ;;  %2588 = vrot.lane.b32.xlu0 %v11467_v32, %s8916_s27  ;;  %v4684_v6 = vsel %vm3330_vm11, %v4612_v58, %v4554_v49  ;;  %v13863_v49 = vld [vmem:[#allocation30_spill] sm:$0xff]  ;;  %v3015_v58 = vrot.slane %v13829_v41, 5 }
 0x2ba   : > { %8377 = vmatmul.mubr.bf16.gmra.mrb[172].mxu0 %v4684_v6  ;;  %v13864_v6 = vld [vmem:[#allocation15_spill] sm:$0xff]  ;;  %v11510_v45 = vsel %vm2858_vm9, %v2960_v42, %v2964_v14  ;;  %v11514_v48 = vsel %vm2304_vm7, %v2303_v61, 0  ;;  %13874 = vst [vmem:[#allocation30_spill] sm:$0xff] %v11634_v23 }
 0x2bb   : > { %v2569_v3 = vpop.permute.xlu1 %2568  ;;  %8380 = vmatprep.mubr.msk.bf16.mxu0 %vm8913_vm1, %v13804_v40  ;;  %v3016_v44 = vsel %vm2979_vm8, %v3013_v15, %v3015_v58  ;;  %v2531_v61 = vshll.u32 %v11514_v48, 16 }
 0x2bc   : > { %v3061_v21 = vpop.permute.xlu0 %3060  ;;  %v11494_v31 = vsel %vm1496_vm5, %v10462_v36, %v2569_v3 }
 0x2bd   : > { %2715 = vrot.lane.b32.xlu1 %v11482_v37, %s8915_s20  ;;  %3186 = vrot.lane.b32.xlu0 %v13863_v49, %s8917_s30 }
 0x2bf   : > { %v4498_v35 = vpop.permute.xlu1 %4497 }
 0x2c0   : > { %v4614_v13 = vsel %vm3271_vm10, %v11494_v31, %v4498_v35  ;;  %v2573_v33 = vpop.permute.xlu0 %2572  ;;  %v13751_v35 = vrot.slane %v10568_v63, 1 }
 0x2c1   : > { %2832 = vrot.lane.b32.xlu1 %v13864_v6, %s8917_s30  ;;  %4517 = vrot.lane.b32.xlu0 %v11499_v29, %s8915_s20  ;;  %v4687_v36 = vsel %vm3330_vm11, %v4614_v13, %v4556_v30  ;;  %v2522_v30 = vor.u32 %v2520_v1, %v2518_v19  ;;  %v13752_v6 = vshrl.u32 %v11514_v48, 16  ;;  %v13865_v1 = vld [vmem:[#allocation22_spill] sm:$0xff] }
 0x2c2   : > { %8381 = vmatmul.mubr.bf16.gmra.mrb[176].mxu0 %v4687_v36  ;;  %v8873_v19 = vld [vmem:[%s13682_s8 + $0x20] sm:$0xff]   ;;  %v3293_v36 = vsel %vm3271_vm10, %v11305_v62, %v11367_v34  ;;  %v13867_v62 = vld [vmem:[#allocation4_spill] sm:$0xff]  ;;  %v13756_v4 = vrot.slane %v13865_v1, 5 }
 0x2c3   : > { %v2571_v3 = vpop.permute.xlu1 %2570  ;;  %8384 = vmatprep.mubr.msk.bf16.mxu0 %vm8913_vm1, %v13804_v40  ;;  %v11529_v13 = vsel %vm622_vm0, %v2522_v30, %v2526_v9  ;;  %6040 = vmatpush1.bf16.msra.mxu0 %v8873_v19  ;;  %v13868_v34 = vld [vmem:[#allocation24_spill] sm:$0xff] }
 0x2c4   : > { %v4558_v54 = vpop.permute.xlu0 %4557  ;;  %v11523_v49 = vsel %vm1496_vm5, %v10494_v26, %v2571_v3  ;;  %6041 = vmatprep.subr.bf16.mxu0 %v13856_v51 }
 0x2c5   : > { %4575 = vrot.lane.b32.xlu1 %v11510_v45, %s8917_s30  ;;  %3072 = vrot.lane.b32.xlu0 %v3016_v44, %s8916_s27  ;;  %v11547_v44 = vsel %vm2625_vm6, %v2659_v47, %v13751_v35  ;;  %v3453_v47 = vsel %vm1496_vm5, %v13868_v34, %v3061_v21  ;;  %v8874_v34 = vld [vmem:[%s13682_s8 + $0x28] sm:$0xff]  }
 0x2c6   : > { %13866 = vst [vmem:[#allocation8_spill] sm:$0xff] %v11547_v44 }
 0x2c7   : > { %v4500_v42 = vpop.permute.xlu1 %4499  ;;  %6042 = vmatpush1.bf16.msra.mxu0 %v8874_v34 }
 0x2c8   : > { %v4616_v15 = vsel %vm3271_vm10, %v11523_v49, %v4500_v42  ;;  %v4502_v22 = vpop.permute.xlu0 %4501  ;;  %v13754_v42 = vrot.slane %v11514_v48, 4  ;;  %6043 = vmatprep.subr.bf16.mxu0 %v13856_v51 }
 0x2c9   : > { %3130 = vrot.lane.b32.xlu1 %v13865_v1, %s8915_s20  ;;  %2590 = vrot.lane.b32.xlu0 %v11529_v13, %s8916_s27  ;;  %v4690_v26 = vsel %vm3330_vm11, %v4616_v15, %v4558_v54  ;;  %v2966_v15 = vrot.slane %v13752_v6, 4 }
 0x2ca   : > { %8385 = vmatmul.mubr.bf16.gmra.mrb[180].mxu0 %v4690_v26  ;;  %v2967_v26 = vrot.slane %v2531_v61, 5  ;;  %v11566_v19 = vsel %vm2304_vm7, %v2794_v55, %v13754_v42 }
 0x2cb   : > { %v2821_v3 = vpop.permute.xlu1 %2820  ;;  %8388 = vmatprep.mubr.msk.bf16.mxu0 %vm8913_vm1, %v13804_v40 }
 0x2cc   : > { %v2575_v30 = vpop.permute.xlu0 %2574  ;;  %v3362_v54 = vsel %vm3330_vm11, %v3293_v36, %v2821_v3  ;;  %v11568_v6 = vor.u32 %v2967_v26, %v2966_v15  ;;  %v11585_v26 = vld [vmem:[%s13681_s7] ss:$0 sm:$0xff] }
 0x2cd   : > { %2717 = vrot.lane.b32.xlu1 %v11547_v44, %s8915_s20  ;;  %3188 = vrot.lane.b32.xlu0 %v13867_v62, %s8917_s30  ;;  %v11578_v62 = vsel %vm1496_vm5, %v10522_v57, %v2573_v33  ;;  %v3018_v57 = vsel %vm2979_vm8, %v3015_v58, %v13756_v4  ;;  %v11621_v34 = vsel %vm1496_vm5, %v10568_v63, %v2575_v30 }
 0x2ce   : > { %3995 = vmatmul.mubr.bf16.gmra.mrb[40].mxu1 %v3362_v54  ;;  %v13869_v54 = vld [vmem:[#allocation12_spill] sm:$0xff]  ;;  %v4618_v55 = vsel %vm3271_vm10, %v11578_v62, %v4502_v22  ;;  %v11598_v22 = vrot.slane %v2531_v61, 1 }
 0x2cf   : > { %v3119_v36 = vpop.permute.xlu1 %3118 }
 0x2d0   : > { %v3528_v3 = vsel %vm3271_vm10, %v3453_v47, %v3119_v36  ;;  %v3177_v35 = vpop.permute.xlu0 %3176 }
 0x2d1   : > { %2834 = vrot.lane.b32.xlu1 %v13869_v54, %s8917_s30  ;;  %4519 = vrot.lane.b32.xlu0 %v11566_v19, %s8915_s20  ;;  %v3595_v21 = vsel %vm3330_vm11, %v3528_v3, %v3177_v35  ;;  %v11592_v35 = vsel %vm2858_vm9, %v2964_v14, %v11568_v6  ;;  %v13870_v14 = vshrl.u32 %v10957_v12, 16 }
 0x2d2   : > { %4002 = vmatprep.mubr.bf16.mxu1 %v3595_v21 }
 0x2d3   : > { %v4560_v15 = vpop.permute.xlu1 %4559  ;;  %v2530_v21 = vor.u32 %v13870_v14, %v2526_v9  ;;  %v13871_v9 = vld [vmem:[#allocation23_spill] sm:$0xff] }
 0x2d4   : > { %v4504_v47 = vpop.permute.xlu0 %4503  ;;  %v4693_v33 = vsel %vm3330_vm11, %v4618_v55, %v4560_v15 }
 0x2d5   : > { %v4833_v36 = vpop.f32.mrb[116].mxu0  ;;  %4577 = vrot.lane.b32.xlu1 %v11592_v35, %s8917_s30  ;;  %3074 = vrot.lane.b32.xlu0 %v3018_v57, %s8916_s27  ;;  %v11611_v15 = vsel %vm622_vm0, %v2530_v21, %v11598_v22  ;;  %v2663_v57 = vrot.slane %v13829_v41, 1 }
 0x2d6   : > { %v4834_v3 = vadd.f32 %v11585_v26, %v4833_v36  ;;  %v8322_v54 = vpop.f32.mrb[117].mxu0  ;;  %8389 = vmatmul.mubr.bf16.gmra.mrb[184].mxu0 %v4693_v33  ;;  %v4620_v36 = vsel %vm3271_vm10, %v11621_v34, %v4504_v47  ;;  %v11641_v47 = vrot.slane %v13856_v51, 5 }
 0x2d7   : > { %v4836_v42 = vpop.f32.mrb[118].mxu0  ;;  %v2706_v44 = vpop.permute.xlu1 %2705  ;;  %8392 = vmatprep.mubr.msk.bf16.mxu0 %vm8913_vm1, %v13804_v40 }
 0x2d8   : > { %v4837_v58 = vadd.f32 %v11585_v26, %v4836_v42  ;;  %v8323_v61 = vpop.f32.mrb[119].mxu0  ;;  %v2577_v55 = vpop.permute.xlu0 %2576  ;;  %v5063_v42 = vmax.f32 %v4834_v3, 0.0 }
 0x2d9   : > { %3132 = vrot.lane.b32.xlu1 %v13871_v9, %s8915_s20  ;;  %2592 = vrot.lane.b32.xlu0 %v11611_v15, %s8916_s27  ;;  %v13872_v61 = vrot.slane %v10568_v63, 1  ;;  %v3295_v63 = vsel %vm3271_vm10, %v11350_v5, %v2706_v44  ;;  %v11657_v5 = vor.u32 %v11641_v47, %v11634_v23  ;;  %v3019_v44 = vrot.slane %v13871_v9, 5 }
 0x2da   : > { %v5064_v33 = vmax.f32 %v4837_v58, 0.0 }
 0x2db   : > { %v4562_v54 = vpop.permute.xlu1 %4561  ;;  %v11630_v4 = vsel %vm2625_vm6, %v13872_v61, %v2663_v57  ;;  %13876 = vst [vmem:[#allocation15_spill] sm:$0xff] %v11657_v5 }
 0x2dc   : > { %v11625_v14 = vpack.c.bf16 %v5064_v33, %v5063_v42  ;;  %v4506_v21 = vpop.permute.xlu0 %4505  ;;  %13873 = vst [vmem:[#allocation17_spill] sm:$0xff] %v11630_v4  ;;  %v4696_v37 = vsel %vm3330_vm11, %v4620_v36, %v4562_v54 }
 0x2dd   : > { %2719 = vrot.lane.b32.xlu1 %v11630_v4, %s8915_s20  ;;  %3190 = vrot.lane.b32.xlu0 %v11162_v43, %s8917_s30  ;;  %v13875_v43 = vrot.slane %v11514_v48, 4 }
 0x2de   : > { %v4841_v30 = vpop.f32.mrb[120].mxu0  ;;  %8393 = vmatmul.mubr.bf16.gmra.mrb[188].mxu0 %v4696_v37 }
 0x2df   : > { %v4842_v3 = vadd.f32 %v11585_v26, %v4841_v30  ;;  %v8326_v58 = vpop.f32.mrb[121].mxu0  ;;  %v2823_v42 = vpop.permute.xlu1 %2822  ;;  %8396 = vmatprep.mubr.msk.bf16.mxu0 %vm8913_vm1, %v13804_v40  ;;  %v11652_v37 = vsel %vm2304_vm7, %v13875_v43, %v11634_v23  ;;  %v11667_v43 = vsel %vm1496_vm5, %v13829_v41, %v2577_v55  ;;  %v2665_v55 = vrot.slane %v13865_v1, 1 }
 0x2e0   : > { %v4844_v33 = vpop.f32.mrb[122].mxu0  ;;  %v2579_v36 = vpop.permute.xlu0 %2578  ;;  %v3365_v54 = vsel %vm3330_vm11, %v3295_v63, %v2823_v42  ;;  %v13877_v58 = vld [vmem:[#allocation21_spill] sm:$0xff]  ;;  %v4622_v63 = vsel %vm3271_vm10, %v11667_v43, %v4506_v21 }
 0x2e1   : > { %v4845_v61 = vadd.f32 %v11585_v26, %v4844_v33  ;;  %v8327_v30 = vpop.f32.mrb[123].mxu0  ;;  %2836 = vrot.lane.b32.xlu1 %v13877_v58, %s8917_s30  ;;  %4521 = vrot.lane.b32.xlu0 %v11652_v37, %s8915_s20  ;;  %v5065_v42 = vmax.f32 %v4842_v3, 0.0  ;;  %v11674_v33 = vsel %vm2858_vm9, %v11568_v6, %v11657_v5  ;;  %v8875_v6 = vld [vmem:[%s13682_s8 + $0x30] sm:$0xff]  }
 0x2e2   : > { %4003 = vmatmul.mubr.bf16.gmra.mrb[44].mxu1 %v3365_v54  ;;  %v13878_v30 = vrot.slane %v13865_v1, 5  ;;  %6044 = vmatpush1.bf16.msra.mxu0 %v8875_v6 }
 0x2e3   : > { %v5066_v4 = vmax.f32 %v4845_v61, 0.0  ;;  %v4564_v2 = vpop.permute.xlu1 %4563  ;;  %6045 = vmatprep.subr.bf16.mxu0 %v13856_v51 }
 0x2e4   : > { %v4508_v46 = vpop.permute.xlu0 %4507  ;;  %v3020_v58 = vsel %vm2979_vm8, %v13878_v30, %v3019_v44  ;;  %v4699_v41 = vsel %vm3330_vm11, %v4622_v63, %v4564_v2  ;;  %v11692_v2 = vsel %vm2625_vm6, %v2663_v57, %v2665_v55  ;;  %v13880_v57 = vshrl.u32 %v11514_v48, 16 }
 0x2e5   : > { %v11681_v54 = vpack.c.bf16 %v5066_v4, %v5065_v42  ;;  %4579 = vrot.lane.b32.xlu1 %v11674_v33, %s8917_s30  ;;  %3076 = vrot.lane.b32.xlu0 %v3020_v58, %s8916_s27  ;;  %13879 = vst [vmem:[#allocation22_spill] sm:$0xff] %v11692_v2  ;;  %v11700_v4 = vsel %vm1496_vm5, %v13865_v1, %v2579_v36  ;;  %v3021_v36 = vrot.slane %v10711_v52, 5 }
 0x2e6   : > { %8397 = vmatmul.mubr.bf16.gmra.mrb[192].mxu0 %v4699_v41  ;;  %v4624_v61 = vsel %vm3271_vm10, %v11700_v4, %v4508_v46  ;;  %v11708_v42 = vor.u32 %v13880_v57, %v11598_v22  ;;  %v13881_v41 = vld [vmem:[#allocation26_spill] sm:$0xff] }
 0x2e7   : > { %v3121_v21 = vpop.permute.xlu1 %3120  ;;  %8400 = vmatprep.mubr.msk.bf16.mxu0 %vm8913_vm1, %v13804_v40 }
 0x2e8   : > { %v3063_v3 = vpop.permute.xlu0 %3062 }
 0x2e9   : > { %3134 = vrot.lane.b32.xlu1 %v10711_v52, %s8915_s20  ;;  %2721 = vrot.lane.b32.xlu0 %v11692_v2, %s8915_s20  ;;  %v3456_v6 = vsel %vm1496_vm5, %v13881_v41, %v3063_v3  ;;  %v11729_v3 = vsel %vm2858_vm9, %v11657_v5, %v11641_v47 }
 0x2ea   : > { %v3530_v22 = vsel %vm3271_vm10, %v3456_v6, %v3121_v21  ;;  %v2667_v6 = vrot.slane %v13871_v9, 1 }
 0x2eb   : > { %v4566_v63 = vpop.permute.xlu1 %4565 }
 0x2ec   : > { %v2581_v30 = vpop.permute.xlu0 %2580  ;;  %v4702_v58 = vsel %vm3330_vm11, %v4624_v61, %v4566_v63  ;;  %v13882_v61 = vld [vmem:[#allocation32_spill] sm:$0xff] }
 0x2ed   : > { %3192 = vrot.lane.b32.xlu1 %v11220_v25, %s8917_s30  ;;  %2594 = vrot.lane.b32.xlu0 %v11708_v42, %s8916_s27 }
 0x2ee   : > { %8401 = vmatmul.mubr.bf16.gmra.mrb[196].mxu0 %v4702_v58  ;;  %v3022_v58 = vsel %vm2979_vm8, %v3019_v44, %v3021_v36 }
 0x2ef   : > { %v2708_v46 = vpop.permute.xlu1 %2707  ;;  %8404 = vmatprep.mubr.msk.bf16.mxu0 %vm8913_vm1, %v13804_v40 }
 0x2f0   : > { %v3179_v1 = vpop.permute.xlu0 %3178  ;;  %v3297_v63 = vsel %vm3271_vm10, %v11385_v38, %v2708_v46  ;;  %v8876_v38 = vld [vmem:[%s13682_s8 + $0x38] sm:$0xff]  }
 0x2f1   : > { %2838 = vrot.lane.b32.xlu1 %v13882_v61, %s8917_s30  ;;  %4523 = vrot.lane.b32.xlu0 %v11634_v23, %s8915_s20  ;;  %v3598_v25 = vsel %vm3330_vm11, %v3530_v22, %v3179_v1  ;;  %v11741_v1 = vsel %vm1496_vm5, %v13871_v9, %v2581_v30  ;;  %v11749_v61 = vsel %vm2625_vm6, %v2665_v55, %v2667_v6 }
 0x2f2   : > { %4010 = vmatprep.mubr.bf16.mxu1 %v3598_v25  ;;  %13883 = vst [vmem:[#allocation4_spill] sm:$0xff] %v11749_v61  ;;  %6046 = vmatpush1.bf16.msra.mxu0 %v8876_v38  ;;  %v3023_v38 = vrot.slane %v10761_v7, 5 }
 0x2f3   : > { %v2825_v21 = vpop.permute.xlu1 %2824  ;;  %6047 = vmatprep.subr.bf16.mxu0 %v13856_v51 }
 0x2f4   : > { %v4510_v57 = vpop.permute.xlu0 %4509  ;;  %v3368_v41 = vsel %vm3330_vm11, %v3297_v63, %v2825_v21 }
 0x2f5   : > { %4581 = vrot.lane.b32.xlu1 %v11729_v3, %s8917_s30  ;;  %3078 = vrot.lane.b32.xlu0 %v3022_v58, %s8916_s27  ;;  %v4626_v44 = vsel %vm3271_vm10, %v11741_v1, %v4510_v57 }
 0x2f6   : > { %4011 = vmatmul.mubr.bf16.gmra.mrb[48].mxu1 %v3368_v41 }
 0x2f7   : > { %v4568_v46 = vpop.permute.xlu1 %4567 }
 0x2f8   : > { %v3065_v22 = vpop.permute.xlu0 %3064  ;;  %v4705_v25 = vsel %vm3330_vm11, %v4626_v44, %v4568_v46  ;;  %v13884_v44 = vld [vmem:[#allocation34_spill] sm:$0xff] }
 0x2f9   : > { %v4849_v63 = vpop.f32.mrb[124].mxu0  ;;  %3136 = vrot.lane.b32.xlu1 %v10761_v7, %s8915_s20  ;;  %2723 = vrot.lane.b32.xlu0 %v11749_v61, %s8915_s20 }
 0x2fa   : > { %v4850_v9 = vadd.f32 %v11585_v26, %v4849_v63  ;;  %v8330_v30 = vpop.f32.mrb[125].mxu0  ;;  %8405 = vmatmul.mubr.bf16.gmra.mrb[200].mxu0 %v4705_v25  ;;  %v8877_v63 = vld [vmem:[%s13678_s4 + $0x88] sm:$0xff]  }
 0x2fb   : > { %v4852_v21 = vpop.f32.mrb[126].mxu0  ;;  %v3123_v57 = vpop.permute.xlu1 %3122  ;;  %8408 = vmatprep.mubr.msk.bf16.mxu0 %vm8913_vm1, %v13804_v40  ;;  %v8878_v30 = vld [vmem:[%s13682_s8 + $0x40] sm:$0xff]   ;;  %8187 = vmatpush3.bf16.msra.mxu1 %v8877_v63 }
 0x2fc   : > { %v4853_v55 = vadd.f32 %v11585_v26, %v4852_v21  ;;  %v8331_v58 = vpop.f32.mrb[127].mxu0  ;;  %v2583_v41 = vpop.permute.xlu0 %2582  ;;  %v5067_v46 = vmax.f32 %v4850_v9, 0.0  ;;  %v13885_v21 = vld [vmem:[#allocation27_spill] sm:$0xff]  ;;  %v3024_v9 = vsel %vm2979_vm8, %v3021_v36, %v3023_v38  ;;  %6048 = vmatpush1.bf16.msra.mxu0 %v8878_v30  ;;  %8568 = vmatprep.subr.bf16.mxu1 %v13804_v40 }
 0x2fd   : > { %3194 = vrot.lane.b32.xlu1 %v11314_v24, %s8917_s30  ;;  %2840 = vrot.lane.b32.xlu0 %v13884_v44, %s8917_s30  ;;  %v3459_v58 = vsel %vm1496_vm5, %v13885_v21, %v3065_v22 }
 0x2fe   : > { %v5068_v25 = vmax.f32 %v4853_v55, 0.0  ;;  %v3532_v24 = vsel %vm3271_vm10, %v3459_v58, %v3123_v57  ;;  %v2669_v55 = vrot.slane %v10711_v52, 1  ;;  %6049 = vmatprep.subr.bf16.mxu0 %v13856_v51  ;;  %v3025_v58 = vrot.slane %v10808_v18, 5 }
 0x2ff   : > { %v2710_v5 = vpop.permute.xlu1 %2709 }
 0x300   : > { %v11774_v61 = vpack.c.bf16 %v5068_v25, %v5067_v46  ;;  %v3181_v2 = vpop.permute.xlu0 %3180  ;;  %v3299_v57 = vsel %vm3271_vm10, %v11426_v59, %v2710_v5  ;;  %v11789_v21 = vsel %vm2625_vm6, %v2667_v6, %v2669_v55  ;;  %v11800_v59 = vsel %vm1496_vm5, %v10711_v52, %v2583_v41 }
 0x301   : > { %3080 = vrot.lane.b32.xlu1 %v3024_v9, %s8916_s27  ;;  %3138 = vrot.lane.b32.xlu0 %v10808_v18, %s8915_s20  ;;  %v3601_v44 = vsel %vm3330_vm11, %v3532_v24, %v3181_v2 }
 0x302   : > { %v4857_v22 = vpop.f32.mrb[128].mxu0  ;;  %4018 = vmatprep.mubr.bf16.mxu1 %v3601_v44 }
 0x303   : > { %v4858_v36 = vadd.f32 %v11585_v26, %v4857_v22  ;;  %v8334_v46 = vpop.f32.mrb[129].mxu0  ;;  %v2827_v25 = vpop.permute.xlu1 %2826 }
 0x304   : > { %v4860_v63 = vpop.f32.mrb[130].mxu0  ;;  %v4512_v30 = vpop.permute.xlu0 %4511  ;;  %v3371_v2 = vsel %vm3330_vm11, %v3299_v57, %v2827_v25  ;;  %v3026_v46 = vsel %vm2979_vm8, %v3023_v38, %v3025_v58  ;;  %v13886_v38 = vld [vmem:[#allocation28_spill] sm:$0xff] }
 0x305   : > { %v4861_v24 = vadd.f32 %v11585_v26, %v4860_v63  ;;  %v8335_v9 = vpop.f32.mrb[131].mxu0  ;;  %2725 = vrot.lane.b32.xlu1 %v11789_v21, %s8915_s20  ;;  %3196 = vrot.lane.b32.xlu0 %v11391_v0, %s8917_s30  ;;  %v5069_v5 = vmax.f32 %v4858_v36, 0.0  ;;  %v4628_v44 = vsel %vm3271_vm10, %v11800_v59, %v4512_v30  ;;  %v2671_v63 = vrot.slane %v10761_v7, 1 }
 0x306   : > { %4019 = vmatmul.mubr.bf16.gmra.mrb[52].mxu1 %v3371_v2 }
 0x307   : > { %v5070_v6 = vmax.f32 %v4861_v24, 0.0  ;;  %v4570_v22 = vpop.permute.xlu1 %4569  ;;  %v11815_v41 = vsel %vm2625_vm6, %v2669_v55, %v2671_v63  ;;  %v3027_v55 = vrot.slane %v10863_v60, 5 }
 0x308   : > { %v3067_v57 = vpop.permute.xlu0 %3066  ;;  %v4708_v25 = vsel %vm3330_vm11, %v4628_v44, %v4570_v22 }
 0x309   : > { %v11807_v9 = vpack.c.bf16 %v5070_v6, %v5069_v5  ;;  %2842 = vrot.lane.b32.xlu1 %v11187_v50, %s8917_s30  ;;  %3082 = vrot.lane.b32.xlu0 %v3026_v46, %s8916_s27  ;;  %v8879_v50 = vld [vmem:[%s13682_s8 + $0x48] sm:$0xff]   ;;  %v3462_v36 = vsel %vm1496_vm5, %v13886_v38, %v3067_v57  ;;  %v3028_v57 = vsel %vm2979_vm8, %v3025_v58, %v3027_v55  ;;  %v3029_v38 = vrot.slane %v10905_v8, 5 }
 0x30a   : > { %8409 = vmatmul.mubr.bf16.gmra.mrb[204].mxu0 %v4708_v25  ;;  %v2673_v25 = vrot.slane %v10808_v18, 1 }
 0x30b   : > { %v3125_v52 = vpop.permute.xlu1 %3124  ;;  %8412 = vmatprep.mubr.msk.bf16.mxu0 %vm8913_vm1, %v13804_v40  ;;  %6050 = vmatpush1.bf16.msra.mxu0 %v8879_v50 }
 0x30c   : > { %v2585_v0 = vpop.permute.xlu0 %2584  ;;  %v3534_v2 = vsel %vm3271_vm10, %v3462_v36, %v3125_v52  ;;  %6051 = vmatprep.subr.bf16.mxu0 %v13856_v51  ;;  %v11849_v58 = vsel %vm2625_vm6, %v2671_v63, %v2673_v25  ;;  %v3030_v36 = vsel %vm2979_vm8, %v3027_v55, %v3029_v38  ;;  %v2675_v63 = vrot.slane %v10863_v60, 1 }
 0x30d   : > { %3140 = vrot.lane.b32.xlu1 %v10863_v60, %s8915_s20  ;;  %2727 = vrot.lane.b32.xlu0 %v11815_v41, %s8915_s20 }
 0x30f   : > { %v2712_v30 = vpop.permute.xlu1 %2711 }
 0x310   : > { %v3183_v24 = vpop.permute.xlu0 %3182  ;;  %v3301_v6 = vsel %vm3271_vm10, %v11461_v20, %v2712_v30 }
 0x311   : > { %3198 = vrot.lane.b32.xlu1 %v11467_v32, %s8917_s30  ;;  %2844 = vrot.lane.b32.xlu0 %v11265_v10, %s8917_s30  ;;  %v3604_v5 = vsel %vm3330_vm11, %v3534_v2, %v3183_v24  ;;  %v11844_v10 = vsel %vm1496_vm5, %v10761_v7, %v2585_v0 }
 0x312   : > { %4026 = vmatprep.mubr.bf16.mxu1 %v3604_v5  ;;  %v13887_v5 = vld [vmem:[#allocation29_spill] sm:$0xff] }
 0x313   : > { %v2829_v44 = vpop.permute.xlu1 %2828 }
 0x314   : > { %v4514_v22 = vpop.permute.xlu0 %4513  ;;  %v3374_v46 = vsel %vm3330_vm11, %v3301_v6, %v2829_v44 }
 0x315   : > { %3084 = vrot.lane.b32.xlu1 %v3028_v57, %s8916_s27  ;;  %3142 = vrot.lane.b32.xlu0 %v10905_v8, %s8915_s20  ;;  %v4630_v20 = vsel %vm3271_vm10, %v11844_v10, %v4514_v22 }
 0x316   : > { %4027 = vmatmul.mubr.bf16.gmra.mrb[56].mxu1 %v3374_v46 }
 0x317   : > { %v4572_v32 = vpop.permute.xlu1 %4571 }
 0x318   : > { %v3069_v52 = vpop.permute.xlu0 %3068  ;;  %v4711_v50 = vsel %vm3330_vm11, %v4630_v20, %v4572_v32  ;;  %v11873_v20 = vsel %vm2625_vm6, %v2673_v25, %v2675_v63 }
 0x319   : > { %2729 = vrot.lane.b32.xlu1 %v11849_v58, %s8915_s20  ;;  %3200 = vrot.lane.b32.xlu0 %v11529_v13, %s8917_s30  ;;  %v8880_v13 = vld [vmem:[%s13682_s8 + $0x50] sm:$0xff]   ;;  %v3465_v6 = vsel %vm1496_vm5, %v13887_v5, %v3069_v52 }
 0x31a   : > { %8413 = vmatmul.mubr.bf16.gmra.mrb[208].mxu0 %v4711_v50 }
 0x31b   : > { %v3127_v7 = vpop.permute.xlu1 %3126  ;;  %8416 = vmatprep.mubr.msk.bf16.mxu0 %vm8913_vm1, %v13804_v40  ;;  %6052 = vmatpush1.bf16.msra.mxu0 %v8880_v13  ;;  %v3031_v13 = vrot.slane %v10957_v12, 5 }
 0x31c   : > { %v2587_v0 = vpop.permute.xlu0 %2586  ;;  %v3536_v22 = vsel %vm3271_vm10, %v3465_v6, %v3127_v7  ;;  %6053 = vmatprep.subr.bf16.mxu0 %v13856_v51 }
 0x31d   : > { %v4865_v30 = vpop.f32.mrb[132].mxu0  ;;  %2846 = vrot.lane.b32.xlu1 %v11359_v39, %s8917_s30  ;;  %3086 = vrot.lane.b32.xlu0 %v3030_v36, %s8916_s27 }
 0x31e   : > { %v4866_v2 = vadd.f32 %v11585_v26, %v4865_v30  ;;  %v8338_v24 = vpop.f32.mrb[133].mxu0 }
 0x31f   : > { %v4868_v44 = vpop.f32.mrb[134].mxu0  ;;  %v2714_v55 = vpop.permute.xlu1 %2713 }
 0x320   : > { %v4869_v57 = vadd.f32 %v11585_v26, %v4868_v44  ;;  %v8339_v46 = vpop.f32.mrb[135].mxu0  ;;  %v3185_v39 = vpop.permute.xlu0 %3184  ;;  %v5071_v52 = vmax.f32 %v4866_v2, 0.0  ;;  %v3303_v7 = vsel %vm3271_vm10, %v11494_v31, %v2714_v55  ;;  %v11893_v2 = vsel %vm1496_vm5, %v10808_v18, %v2587_v0 }
 0x321   : > { %3144 = vrot.lane.b32.xlu1 %v10957_v12, %s8915_s20  ;;  %2731 = vrot.lane.b32.xlu0 %v11873_v20, %s8915_s20  ;;  %v3607_v32 = vsel %vm3330_vm11, %v3536_v22, %v3185_v39  ;;  %v11906_v39 = vrot.slane %v13856_v51, 1 }
 0x322   : > { %v5072_v50 = vmax.f32 %v4869_v57, 0.0  ;;  %4034 = vmatprep.mubr.bf16.mxu1 %v3607_v32 }
 0x323   : > { %v2831_v36 = vpop.permute.xlu1 %2830 }
 0x324   : > { %v11883_v25 = vpack.c.bf16 %v5072_v50, %v5071_v52  ;;  %v4516_v30 = vpop.permute.xlu0 %4515  ;;  %v3377_v24 = vsel %vm3330_vm11, %v3303_v7, %v2831_v36  ;;  %v3151_v36 = vsel %vm622_vm0, %v11708_v42, %v11906_v39 }
 0x325   : > { %3202 = vrot.lane.b32.xlu1 %v11611_v15, %s8917_s30  ;;  %2848 = vrot.lane.b32.xlu0 %v11433_v28, %s8917_s30  ;;  %v4632_v31 = vsel %vm3271_vm10, %v11893_v2, %v4516_v30  ;;  %v3032_v15 = vsel %vm2979_vm8, %v3029_v38, %v3031_v13  ;;  %v2677_v28 = vrot.slane %v10905_v8, 1  ;;  %v3033_v30 = vrot.slane %v11514_v48, 5 }
 0x326   : > { %v4873_v5 = vpop.f32.mrb[136].mxu0  ;;  %4035 = vmatmul.mubr.bf16.gmra.mrb[60].mxu1 %v3377_v24  ;;  %v8881_v24 = vld [vmem:[%s13682_s8 + $0x58] sm:$0xff]  }
 0x327   : > { %v4874_v6 = vadd.f32 %v11585_v26, %v4873_v5  ;;  %v8342_v44 = vpop.f32.mrb[137].mxu0  ;;  %v4574_v55 = vpop.permute.xlu1 %4573  ;;  %v11911_v7 = vsel %vm2625_vm6, %v2675_v63, %v2677_v28  ;;  %6054 = vmatpush1.bf16.msra.mxu0 %v8881_v24  ;;  %v13889_v63 = vld [vmem:[#allocation2_spill] sm:$0xff]  ;;  %v11961_v24 = vrot.slane %v11514_v48, 1 }
 0x328   : > { %v4876_v22 = vpop.f32.mrb[138].mxu0  ;;  %v3071_v57 = vpop.permute.xlu0 %3070  ;;  %v4714_v46 = vsel %vm3330_vm11, %v4632_v31, %v4574_v55  ;;  %13888 = vst [vmem:[#allocation24_spill] sm:$0xff] %v11911_v7  ;;  %6055 = vmatprep.subr.bf16.mxu0 %v13856_v51  ;;  %v3034_v55 = vsel %vm2979_vm8, %v3031_v13, %v3033_v30 }
 0x329   : > { %v4877_v18 = vadd.f32 %v11585_v26, %v4876_v22  ;;  %v8343_v0 = vpop.f32.mrb[139].mxu0  ;;  %3088 = vrot.lane.b32.xlu1 %v3032_v15, %s8916_s27  ;;  %3146 = vrot.lane.b32.xlu0 %v11514_v48, %s8915_s20  ;;  %v5073_v32 = vmax.f32 %v4874_v6, 0.0  ;;  %v3468_v31 = vsel %vm1496_vm5, %v13889_v63, %v3071_v57  ;;  %v2679_v22 = vrot.slane %v10957_v12, 1  ;;  %v8882_v15 = vld [vmem:[%s13682_s8 + $0x60] sm:$0xff]   ;;  %13891 = vst [vmem:[#allocation23_spill] sm:$0xff] %v11961_v24  ;;  %v8884_v63 = vld [vmem:[%s13682_s8 + $0x70] sm:$0xff]  }
 0x32a   : > { %8417 = vmatmul.mubr.bf16.gmra.mrb[212].mxu0 %v4714_v46 }
 0x32b   : > { %v5074_v52 = vmax.f32 %v4877_v18, 0.0  ;;  %v3129_v50 = vpop.permute.xlu1 %3128  ;;  %8420 = vmatprep.mubr.msk.bf16.mxu0 %vm8913_vm1, %v13804_v40  ;;  %6056 = vmatpush1.bf16.msra.mxu0 %v8882_v15  ;;  %v11942_v0 = vsel %vm2625_vm6, %v2677_v28, %v2679_v22  ;;  %v11981_v15 = vsel %vm2625_vm6, %v2679_v22, %v11961_v24  ;;  %v5175_v22 = vshll.u32 %v11807_v9, 16 }
 0x32c   : > { %v2589_v38 = vpop.permute.xlu0 %2588  ;;  %v3538_v42 = vsel %vm3271_vm10, %v3468_v31, %v3129_v50  ;;  %6057 = vmatprep.subr.bf16.mxu0 %v13856_v51  ;;  %13890 = vst [vmem:[#allocation12_spill] sm:$0xff] %v11942_v0  ;;  %v13766_v31 = vshrl.u32 %v11774_v61, 16  ;;  %13892 = vst [vmem:[#allocation21_spill] sm:$0xff] %v11981_v15 }
 0x32d   : > { %v11920_v5 = vpack.c.bf16 %v5074_v52, %v5073_v32  ;;  %2733 = vrot.lane.b32.xlu1 %v11911_v7, %s8915_s20  ;;  %3204 = vrot.lane.b32.xlu0 %v3151_v36, %s8917_s30  ;;  %v13772_v7 = vshrl.u32 %v11883_v25, 16 }
 0x32f   : > { %v2716_v6 = vpop.permute.xlu1 %2715 }
 0x330   : > { %v3187_v44 = vpop.permute.xlu0 %3186  ;;  %v3305_v46 = vsel %vm3271_vm10, %v11523_v49, %v2716_v6  ;;  %v11954_v49 = vsel %vm1496_vm5, %v10863_v60, %v2589_v38  ;;  %v5154_v60 = vshll.u32 %v11625_v14, 16  ;;  %v5167_v38 = vshll.u32 %v11774_v61, 16 }
 0x331   : > { %2850 = vrot.lane.b32.xlu1 %v11499_v29, %s8917_s30  ;;  %3090 = vrot.lane.b32.xlu0 %v3034_v55, %s8916_s27  ;;  %v3610_v57 = vsel %vm3330_vm11, %v3538_v42, %v3187_v44  ;;  %v8883_v29 = vld [vmem:[%s13682_s8 + $0x68] sm:$0xff]   ;;  %v5159_v42 = vshll.u32 %v11681_v54, 16  ;;  %v5163_v44 = vshrl.u32 %v11681_v54, 16 }
 0x332   : > { %4042 = vmatprep.mubr.bf16.mxu1 %v3610_v57  ;;  %6058 = vmatpush1.bf16.msra.mxu0 %v8883_v29  ;;  %v8885_v57 = vld [vmem:[%s13682_s8 + $0x78] sm:$0xff]  }
 0x333   : > { %v2833_v18 = vpop.permute.xlu1 %2832  ;;  %6059 = vmatprep.subr.bf16.mxu0 %v13856_v51 }
 0x334   : > { %v4518_v13 = vpop.permute.xlu0 %4517  ;;  %v3380_v32 = vsel %vm3330_vm11, %v3305_v46, %v2833_v18  ;;  %v5156_v46 = vrot.slane %v5154_v60, 1  ;;  %v5524_v60 = vrot.slane %v5159_v42, 5 }
 0x335   : > { %3148 = vrot.lane.b32.xlu1 %v13856_v51, %s8915_s20  ;;  %2735 = vrot.lane.b32.xlu0 %v11942_v0, %s8915_s20  ;;  %v4634_v28 = vsel %vm3271_vm10, %v11954_v49, %v4518_v13  ;;  %v5527_v13 = vrot.slane %v5167_v38, 5 }
 0x336   : > { %4043 = vmatmul.mubr.bf16.gmra.mrb[64].mxu1 %v3380_v32  ;;  %6060 = vmatpush1.bf16.msra.mxu0 %v8884_v63  ;;  %v13893_v32 = vld [vmem:[#allocation3_spill] sm:$0xff]  ;;  %v5523_v63 = vrot.slane %v5163_v44, 4 }
 0x337   : > { %v4576_v52 = vpop.permute.xlu1 %4575  ;;  %6061 = vmatprep.subr.bf16.mxu0 %v13856_v51 }
 0x338   : > { %v3073_v50 = vpop.permute.xlu0 %3072  ;;  %v4717_v36 = vsel %vm3330_vm11, %v4634_v28, %v4576_v52  ;;  %v5152_v28 = vshrl.u32 %v11625_v14, 16 }
 0x339   : > { %3206 = vrot.lane.b32.xlu1 %v11906_v39, %s8917_s30  ;;  %2852 = vrot.lane.b32.xlu0 %v11566_v19, %s8917_s30  ;;  %v3036_v19 = vsel %vm2979_vm8, %v3033_v30, %v11641_v47  ;;  %v5526_v30 = vrot.slane %v13766_v31, 4  ;;  %v3471_v51 = vsel %vm1496_vm5, %v13893_v32, %v3073_v50  ;;  %v5161_v32 = vrot.slane %v5159_v42, 1 }
 0x33a   : > { %8421 = vmatmul.mubr.bf16.gmra.mrb[216].mxu0 %v4717_v36  ;;  %v5157_v18 = vor.u32 %v5156_v46, %v5152_v28  ;;  %v5525_v46 = vor.u32 %v5524_v60, %v5523_v63  ;;  %v5169_v28 = vrot.slane %v5167_v38, 1  ;;  %v5191_v38 = vshll.u32 %v11920_v5, 16 }
 0x33b   : > { %v3131_v6 = vpop.permute.xlu1 %3130  ;;  %8424 = vmatprep.mubr.msk.bf16.mxu0 %vm8913_vm1, %v13804_v40  ;;  %6062 = vmatpush1.bf16.msra.mxu0 %v8885_v57  ;;  %v8777_v57 = vpack.i.bf16 %v11634_v23, %v11906_v39  ;;  %v5528_v31 = vor.u32 %v5527_v13, %v5526_v30  ;;  %v5531_v23 = vrot.slane %v5175_v22, 5  ;;  %v5165_v13 = vor.u32 %v5163_v44, %v5161_v32 }
 0x33c   : > { %v2591_v55 = vpop.permute.xlu0 %2590  ;;  %v3540_v52 = vsel %vm3271_vm10, %v3471_v51, %v3131_v6  ;;  %8436 = vmatprep.subr.bf16.mxu0 %v13804_v40  ;;  %v13773_v44 = vshrl.u32 %v11920_v5, 16 }
 0x33d   : > { %3092 = vrot.lane.b32.xlu1 %v3036_v19, %s8916_s27  ;;  %2737 = vrot.lane.b32.xlu0 %v11981_v15, %s8915_s20  ;;  %v13894_v15 = vshrl.u32 %v11807_v9, 16 }
 0x33f   : > { %v2718_v29 = vpop.permute.xlu1 %2717  ;;  %v5530_v0 = vrot.slane %v13894_v15, 4  ;;  %v5162_v15 = vsel %vm622_vm0, %v5157_v18, %v5161_v32 }
 0x340   : > { %v3189_v36 = vpop.permute.xlu0 %3188 }
 0x341   : > { %v4881_v19 = vpop.f32.mrb[140].mxu0  ;;  %2854 = vrot.lane.b32.xlu1 %v11652_v37, %s8917_s30  ;;  %3094 = vrot.lane.b32.xlu0 %v11641_v47, %s8916_s27  ;;  %v3613_v50 = vsel %vm3330_vm11, %v3540_v52, %v3189_v36  ;;  %v5183_v37 = vshll.u32 %v11883_v25, 16  ;;  %v3307_v47 = vsel %vm3271_vm10, %v11578_v62, %v2718_v29  ;;  %v12021_v62 = vsel %vm1496_vm5, %v10905_v8, %v2591_v55 }
 0x342   : > { %v4882_v6 = vadd.f32 %v11585_v26, %v4881_v19  ;;  %v8346_v51 = vpop.f32.mrb[141].mxu0  ;;  %4050 = vmatprep.mubr.bf16.mxu1 %v3613_v50 }
 0x343   : > { %v4884_v52 = vpop.f32.mrb[142].mxu0  ;;  %v2835_v36 = vpop.permute.xlu1 %2834  ;;  %v5535_v18 = vrot.slane %v5183_v37, 5 }
 0x344   : > { %v4885_v42 = vadd.f32 %v11585_v26, %v4884_v52  ;;  %v8347_v19 = vpop.f32.mrb[143].mxu0  ;;  %v4520_v51 = vpop.permute.xlu0 %4519  ;;  %v3383_v30 = vsel %vm3330_vm11, %v3307_v47, %v2835_v36  ;;  %v5075_v29 = vmax.f32 %v4882_v6, 0.0  ;;  %v5529_v52 = vsel %vm2858_vm9, %v5525_v46, %v5528_v31 }
 0x345   : > { %2739 = vrot.lane.b32.xlu1 %v11961_v24, %s8915_s20  ;;  %8778 = vrot.lane.b32.xlu0 %v8777_v57, %s8917_s30  ;;  %v4636_v63 = vsel %vm3271_vm10, %v12021_v62, %v4520_v51  ;;  %v5532_v47 = vor.u32 %v5531_v23, %v5530_v0  ;;  %v5534_v57 = vrot.slane %v13772_v7, 4  ;;  %v5170_v23 = vsel %vm622_vm0, %v5165_v13, %v5169_v28 }
 0x346   : > { %v5076_v50 = vmax.f32 %v4885_v42, 0.0  ;;  %4051 = vmatmul.mubr.bf16.gmra.mrb[68].mxu1 %v3383_v30  ;;  %v5177_v0 = vrot.slane %v5175_v22, 1  ;;  %v13895_v46 = vshrl.u32 %v11774_v61, 16  ;;  %v5538_v22 = vrot.slane %v13773_v44, 4 }
 0x347   : > { %v4578_v60 = vpop.permute.xlu1 %4577  ;;  %v5533_v51 = vsel %vm2858_vm9, %v5528_v31, %v5532_v47  ;;  %v5536_v30 = vor.u32 %v5535_v18, %v5534_v57  ;;  %v5185_v57 = vrot.slane %v5183_v37, 1  ;;  %v13896_v18 = vld [vmem:[#allocation31_spill] sm:$0xff] }
 0x348   : > { %v12030_v8 = vpack.c.bf16 %v5076_v50, %v5075_v29  ;;  %v3075_v55 = vpop.permute.xlu0 %3074  ;;  %v4720_v32 = vsel %vm3330_vm11, %v4636_v63, %v4578_v60  ;;  %v5173_v29 = vor.u32 %v13895_v46, %v5169_v28  ;;  %v5539_v63 = vrot.slane %v5191_v38, 5 }
 0x349   : > { %5635 = vrot.lane.b32.xlu1 %v5529_v52, %s8915_s20  ;;  %5381 = vrot.lane.b32.xlu0 %v5162_v15, %s8915_s20  ;;  %v5537_v7 = vsel %vm2858_vm9, %v5532_v47, %v5536_v30 }
 0x34a   : > { %v4889_v6 = vpop.f32.mrb[144].mxu0  ;;  %8425 = vmatmul.mubr.bf16.gmra.mrb[220].mxu0 %v4720_v32  ;;  %v5199_v15 = vshll.u32 %v12030_v8, 16  ;;  %v5178_v28 = vsel %vm622_vm0, %v5173_v29, %v5177_v0  ;;  %v3474_v32 = vsel %vm1496_vm5, %v13896_v18, %v3075_v55  ;;  %v13898_v55 = vshrl.u32 %v11807_v9, 16 }
 0x34b   : > { %v4890_v36 = vadd.f32 %v11585_v26, %v4889_v6  ;;  %v8350_v42 = vpop.f32.mrb[145].mxu0  ;;  %v3133_v19 = vpop.permute.xlu1 %3132  ;;  %8428 = vmatprep.mubr.msk.bf16.mxu0 %vm8913_vm1, %v13804_v40 }
 0x34c   : > { %v4892_v52 = vpop.f32.mrb[146].mxu0  ;;  %v2593_v13 = vpop.permute.xlu0 %2592  ;;  %v3542_v44 = vsel %vm3271_vm10, %v3474_v32, %v3133_v19  ;;  %v5543_v24 = vrot.slane %v5199_v15, 5  ;;  %v5181_v47 = vor.u32 %v13898_v55, %v5177_v0  ;;  %v13899_v0 = vshrl.u32 %v11883_v25, 16 }
 0x34d   : > { %v4893_v60 = vadd.f32 %v11585_v26, %v4892_v52  ;;  %v8351_v31 = vpop.f32.mrb[147].mxu0  ;;  %5637 = vrot.lane.b32.xlu1 %v5533_v51, %s8915_s20  ;;  %5383 = vrot.lane.b32.xlu0 %v5170_v23, %s8915_s20  ;;  %v5077_v6 = vmax.f32 %v4890_v36, 0.0  ;;  %v5540_v52 = vor.u32 %v5539_v63, %v5538_v22  ;;  %v5193_v63 = vrot.slane %v5191_v38, 1 }
 0x34e   : > { %v13897_v31 = vshrl.u32 %v12030_v8, 16  ;;  %v5189_v18 = vor.u32 %v13899_v0, %v5185_v57  ;;  %v12078_v38 = vsel %vm1496_vm5, %v10957_v12, %v2593_v13  ;;  %v13900_v12 = vshrl.u32 %v11920_v5, 16 }
 0x34f   : > { %v5078_v42 = vmax.f32 %v4893_v60, 0.0  ;;  %v2720_v46 = vpop.permute.xlu1 %2719 }
 0x350   : > { %v3191_v50 = vpop.permute.xlu0 %3190  ;;  %v5542_v51 = vrot.slane %v13897_v31, 4  ;;  %v3309_v29 = vsel %vm3271_vm10, %v11621_v34, %v2720_v46  ;;  %v5197_v13 = vor.u32 %v13900_v12, %v5193_v63 }
 0x351   : > { %v12056_v23 = vpack.c.bf16 %v5078_v42, %v5077_v6  ;;  %5639 = vrot.lane.b32.xlu1 %v5537_v7, %s8915_s20  ;;  %5385 = vrot.lane.b32.xlu0 %v5178_v28, %s8915_s20  ;;  %v3616_v37 = vsel %vm3330_vm11, %v3542_v44, %v3191_v50  ;;  %v5541_v7 = vsel %vm2858_vm9, %v5536_v30, %v5540_v52 }
 0x352   : > { %4058 = vmatprep.mubr.bf16.mxu1 %v3616_v37  ;;  %v5186_v28 = vsel %vm622_vm0, %v5181_v47, %v5185_v57  ;;  %v5544_v50 = vor.u32 %v5543_v24, %v5542_v51  ;;  %v5194_v6 = vsel %vm622_vm0, %v5189_v18, %v5193_v63  ;;  %v5201_v51 = vrot.slane %v5199_v15, 1 }
 0x353   : > { %v5207_v36 = vshll.u32 %v12056_v23, 16  ;;  %v5211_v19 = vshrl.u32 %v12056_v23, 16  ;;  %v2837_v22 = vpop.permute.xlu1 %2836 }
 0x354   : > { %v4522_v60 = vpop.permute.xlu0 %4521  ;;  %v3386_v44 = vsel %vm3330_vm11, %v3309_v29, %v2837_v22  ;;  %v5545_v46 = vsel %vm2858_vm9, %v5540_v52, %v5544_v50  ;;  %v5202_v47 = vsel %vm622_vm0, %v5197_v13, %v5201_v51  ;;  %v13901_v22 = vld [vmem:[#allocation33_spill] sm:$0xff] }
 0x355   : > { %5641 = vrot.lane.b32.xlu1 %v5541_v7, %s8915_s20  ;;  %5387 = vrot.lane.b32.xlu0 %v5186_v28, %s8915_s20  ;;  %v5546_v34 = vrot.slane %v5211_v19, 4  ;;  %v5547_v32 = vrot.slane %v5207_v36, 5  ;;  %v4638_v30 = vsel %vm3271_vm10, %v12078_v38, %v4522_v60  ;;  %v5209_v29 = vrot.slane %v5207_v36, 1 }
 0x356   : > { %4059 = vmatmul.mubr.bf16.gmra.mrb[72].mxu1 %v3386_v44  ;;  %v13902_v28 = vshrl.u32 %v12030_v8, 16 }
 0x357   : > { %v4580_v24 = vpop.permute.xlu1 %4579  ;;  %v12085_v31 = vor.u32 %v5547_v32, %v5546_v34 }
 0x358   : > { %v3077_v42 = vpop.permute.xlu0 %3076  ;;  %v4723_v57 = vsel %vm3330_vm11, %v4638_v30, %v4580_v24  ;;  %v5205_v44 = vor.u32 %v13902_v28, %v5201_v51 }
 0x359   : > { %5643 = vrot.lane.b32.xlu1 %v5545_v46, %s8915_s20  ;;  %5389 = vrot.lane.b32.xlu0 %v5194_v6, %s8915_s20  ;;  %v5549_v52 = vsel %vm2858_vm9, %v5544_v50, %v12085_v31  ;;  %v3477_v60 = vsel %vm1496_vm5, %v13901_v22, %v3077_v42 }
 0x35a   : > { %8429 = vmatmul.mubr.bf16.gmra.mrb[224].mxu0 %v4723_v57  ;;  %v5210_v30 = vsel %vm622_vm0, %v5205_v44, %v5209_v29 }
 0x35b   : > { %v3135_v37 = vpop.permute.xlu1 %3134  ;;  %8432 = vmatprep.mubr.msk.bf16.mxu0 %vm8913_vm1, %v13804_v40 }
 0x35c   : > { %v2722_v55 = vpop.permute.xlu0 %2721  ;;  %v3544_v0 = vsel %vm3271_vm10, %v3477_v60, %v3135_v37 }
 0x35d   : > { %v4897_v15 = vpop.f32.mrb[148].mxu0  ;;  %5645 = vrot.lane.b32.xlu1 %v5549_v52, %s8915_s20  ;;  %5391 = vrot.lane.b32.xlu0 %v5202_v47, %s8915_s20  ;;  %v3311_v46 = vsel %vm3271_vm10, %v11667_v43, %v2722_v55 }
 0x35e   : > { %v4898_v63 = vadd.f32 %v11585_v26, %v4897_v15  ;;  %v8354_v7 = vpop.f32.mrb[149].mxu0 }
 0x35f   : > { %v4900_v50 = vpop.f32.mrb[150].mxu0  ;;  %v3193_v18 = vpop.permute.xlu1 %3192 }
 0x360   : > { %v4901_v36 = vadd.f32 %v11585_v26, %v4900_v50  ;;  %v8355_v34 = vpop.f32.mrb[151].mxu0  ;;  %v2595_v32 = vpop.permute.xlu0 %2594  ;;  %v3619_v24 = vsel %vm3330_vm11, %v3544_v0, %v3193_v18  ;;  %v5079_v6 = vmax.f32 %v4898_v63, 0.0  ;;  %v5213_v0 = vor.u32 %v5211_v19, %v5209_v29 }
 0x361   : > { %5393 = vrot.lane.b32.xlu0 %v5210_v30, %s8915_s20  ;;  %4066 = vmatprep.mubr.bf16.mxu1 %v3619_v24  ;;  %v12118_v47 = vsel %vm1496_vm5, %v11514_v48, %v2595_v32 }
 0x362   : > { %v5080_v42 = vmax.f32 %v4901_v36, 0.0 }
 0x363   : > { %v2839_v57 = vpop.permute.xlu1 %2838 }
 0x364   : > { %v12110_v51 = vpack.c.bf16 %v5080_v42, %v5079_v6  ;;  %v12112_v12 = vpop.permute.xlu0 %4523  ;;  %v3389_v13 = vsel %vm3330_vm11, %v3311_v46, %v2839_v57 }
 0x365   : > { %v4905_v37 = vpop.f32.mrb[152].mxu0  ;;  %4067 = vmatmul.mubr.bf16.gmra.mrb[76].mxu1 %v3389_v13  ;;  %v4640_v55 = vsel %vm3271_vm10, %v12118_v47, %v12112_v12  ;;  %v12145_v13 = vld [vmem:[%s13681_s7] ss:$0 sm:$0xff] }
 0x366   : > { %v5219_v52 = vshrl.u32 %v12110_v51, 16  ;;  %v4906_v15 = vadd.f32 %v11585_v26, %v4905_v37  ;;  %v8358_v22 = vpop.f32.mrb[153].mxu0  ;;  %v5215_v43 = vshll.u32 %v12110_v51, 16 }
 0x367   : > { %v4908_v60 = vpop.f32.mrb[154].mxu0  ;;  %v12125_v63 = vpop.permute.xlu1 %4581 }
 0x368   : > { %v4909_v7 = vadd.f32 %v11585_v26, %v4908_v60  ;;  %v8359_v28 = vpop.f32.mrb[155].mxu0  ;;  %v3079_v44 = vpop.permute.xlu0 %3078  ;;  %v4726_v48 = vsel %vm3330_vm11, %v4640_v55, %v12125_v63  ;;  %v5217_v50 = vrot.slane %v5215_v43, 1  ;;  %v5550_v18 = vrot.slane %v5219_v52, 4 }
 0x369   : > { %8433 = vmatmul.mubr.bf16.gmra.mrb[228].mxu0 %v4726_v48  ;;  %v5551_v36 = vrot.slane %v5215_v43, 5  ;;  %v5081_v34 = vmax.f32 %v4906_v15, 0.0  ;;  %v3480_v29 = vsel %vm1496_vm5, %v11159_v11, %v3079_v44 }
 0x36a   : > { %v5082_v32 = vmax.f32 %v4909_v7, 0.0  ;;  %v5218_v30 = vsel %vm622_vm0, %v5213_v0, %v5217_v50  ;;  %v5221_v60 = vor.u32 %v5219_v52, %v5217_v50 }
 0x36b   : > { %5395 = vrot.lane.b32.xlu0 %v5218_v30, %s8915_s20  ;;  %v3137_v24 = vpop.permute.xlu1 %3136  ;;  %v5552_v26 = vor.u32 %v5551_v36, %v5550_v18 }
 0x36c   : > { %v12134_v6 = vpack.c.bf16 %v5082_v32, %v5081_v34  ;;  %v2724_v42 = vpop.permute.xlu0 %2723 }
 0x36d   : > { %v5553_v46 = vsel %vm2858_vm9, %v12085_v31, %v5552_v26  ;;  %v4913_v57 = vpop.f32.mrb[156].mxu0  ;;  %v3546_v31 = vsel %vm3271_vm10, %v3480_v29, %v3137_v24  ;;  %v3313_v11 = vsel %vm3271_vm10, %v11700_v4, %v2724_v42 }
 0x36e   : > { %v5227_v19 = vshrl.u32 %v12134_v6, 16  ;;  %5647 = vrot.lane.b32.xlu1 %v5553_v46, %s8915_s20  ;;  %v4914_v37 = vadd.f32 %v12145_v13, %v4913_v57  ;;  %v8362_v15 = vpop.f32.mrb[157].mxu0  ;;  %v5223_v22 = vshll.u32 %v12134_v6, 16 }
 0x36f   : > { %v4916_v43 = vpop.f32.mrb[158].mxu0  ;;  %v3195_v55 = vpop.permute.xlu1 %3194 }
 0x370   : > { %v4917_v7 = vadd.f32 %v12145_v13, %v4916_v43  ;;  %v8363_v28 = vpop.f32.mrb[159].mxu0  ;;  %v2841_v44 = vpop.permute.xlu0 %2840  ;;  %v3622_v48 = vsel %vm3330_vm11, %v3546_v31, %v3195_v55  ;;  %v5225_v0 = vrot.slane %v5223_v22, 1  ;;  %v5554_v36 = vrot.slane %v5227_v19, 4 }
 0x371   : > { %4074 = vmatprep.mubr.bf16.mxu1 %v3622_v48  ;;  %v3392_v18 = vsel %vm3330_vm11, %v3313_v11, %v2841_v44  ;;  %v5555_v34 = vrot.slane %v5223_v22, 5  ;;  %v5083_v32 = vmax.f32 %v4914_v37, 0.0 }
 0x372   : > { %v5084_v30 = vmax.f32 %v4917_v7, 0.0  ;;  %v5226_v24 = vsel %vm622_vm0, %v5221_v60, %v5225_v0  ;;  %4075 = vmatmul.mubr.bf16.gmra.mrb[80].mxu1 %v3392_v18  ;;  %v5229_v28 = vor.u32 %v5227_v19, %v5225_v0 }
 0x373   : > { %5397 = vrot.lane.b32.xlu0 %v5226_v24, %s8915_s20  ;;  %v3081_v4 = vpop.permute.xlu1 %3080  ;;  %v5556_v52 = vor.u32 %v5555_v34, %v5554_v36 }
 0x374   : > { %v12157_v50 = vpack.c.bf16 %v5084_v30, %v5083_v32  ;;  %v3139_v42 = vpop.permute.xlu0 %3138  ;;  %v3483_v46 = vsel %vm1496_vm5, %v11202_v56, %v3081_v4 }
 0x375   : > { %v5557_v57 = vsel %vm2858_vm9, %v5552_v26, %v5556_v52  ;;  %v4921_v29 = vpop.f32.mrb[160].mxu0  ;;  %v3548_v60 = vsel %vm3271_vm10, %v3483_v46, %v3139_v42 }
 0x376   : > { %v5235_v15 = vshrl.u32 %v12157_v50, 16  ;;  %5649 = vrot.lane.b32.xlu1 %v5557_v57, %s8915_s20  ;;  %v4922_v37 = vadd.f32 %v12145_v13, %v4921_v29  ;;  %v8366_v22 = vpop.f32.mrb[161].mxu0  ;;  %v5231_v31 = vshll.u32 %v12157_v50, 16 }
 0x377   : > { %v4924_v43 = vpop.f32.mrb[162].mxu0  ;;  %v2726_v55 = vpop.permute.xlu1 %2725 }
 0x378   : > { %v4925_v11 = vadd.f32 %v12145_v13, %v4924_v43  ;;  %v8367_v7 = vpop.f32.mrb[163].mxu0  ;;  %v3197_v56 = vpop.permute.xlu0 %3196  ;;  %v5233_v26 = vrot.slane %v5231_v31, 1  ;;  %v5558_v48 = vrot.slane %v5235_v15, 4  ;;  %v5559_v18 = vrot.slane %v5231_v31, 5 }
 0x379   : > { %v3625_v44 = vsel %vm3330_vm11, %v3548_v60, %v3197_v56  ;;  %v5085_v36 = vmax.f32 %v4922_v37, 0.0  ;;  %v3315_v30 = vsel %vm3271_vm10, %v11741_v1, %v2726_v55 }
 0x37a   : > { %v5086_v34 = vmax.f32 %v4925_v11, 0.0  ;;  %4082 = vmatprep.mubr.bf16.mxu1 %v3625_v44  ;;  %v5234_v32 = vsel %vm622_vm0, %v5229_v28, %v5233_v26  ;;  %v5560_v4 = vor.u32 %v5559_v18, %v5558_v48  ;;  %v5237_v7 = vor.u32 %v5235_v15, %v5233_v26 }
 0x37b   : > { %5399 = vrot.lane.b32.xlu0 %v5234_v32, %s8915_s20  ;;  %v2843_v24 = vpop.permute.xlu1 %2842 }
 0x37c   : > { %v12173_v42 = vpack.c.bf16 %v5086_v34, %v5085_v36  ;;  %v3083_v19 = vpop.permute.xlu0 %3082  ;;  %v3395_v0 = vsel %vm3330_vm11, %v3315_v30, %v2843_v24  ;;  %v5561_v46 = vsel %vm2858_vm9, %v5556_v52, %v5560_v4 }
 0x37d   : > { %4083 = vmatmul.mubr.bf16.gmra.mrb[84].mxu1 %v3395_v0  ;;  %v4929_v57 = vpop.f32.mrb[164].mxu0  ;;  %5651 = vrot.lane.b32.xlu1 %v5561_v46, %s8915_s20  ;;  %v3486_v44 = vsel %vm1496_vm5, %v11284_v16, %v3083_v19 }
 0x37e   : > { %v5243_v29 = vshrl.u32 %v12173_v42, 16  ;;  %v4930_v37 = vadd.f32 %v12145_v13, %v4929_v57  ;;  %v8370_v1 = vpop.f32.mrb[165].mxu0  ;;  %v5239_v22 = vshll.u32 %v12173_v42, 16 }
 0x37f   : > { %v3141_v31 = vpop.permute.xlu1 %3140  ;;  %v4932_v43 = vpop.f32.mrb[166].mxu0 }
 0x380   : > { %v4933_v55 = vadd.f32 %v12145_v13, %v4932_v43  ;;  %v2728_v60 = vpop.permute.xlu0 %2727  ;;  %v8371_v11 = vpop.f32.mrb[167].mxu0  ;;  %v5241_v56 = vrot.slane %v5239_v22, 1  ;;  %v5562_v52 = vrot.slane %v5243_v29, 4  ;;  %v5563_v28 = vrot.slane %v5239_v22, 5 }
 0x381   : > { %v5087_v48 = vmax.f32 %v4930_v37, 0.0  ;;  %v3550_v34 = vsel %vm3271_vm10, %v3486_v44, %v3141_v31  ;;  %v3317_v15 = vsel %vm3271_vm10, %v11800_v59, %v2728_v60 }
 0x382   : > { %v5088_v18 = vmax.f32 %v4933_v55, 0.0  ;;  %v5242_v36 = vsel %vm622_vm0, %v5237_v7, %v5241_v56  ;;  %v5564_v30 = vor.u32 %v5563_v28, %v5562_v52  ;;  %v5245_v60 = vor.u32 %v5243_v29, %v5241_v56 }
 0x383   : > { %5401 = vrot.lane.b32.xlu0 %v5242_v36, %s8915_s20  ;;  %v3199_v32 = vpop.permute.xlu1 %3198 }
 0x384   : > { %v12187_v24 = vpack.c.bf16 %v5088_v18, %v5087_v48  ;;  %v2845_v26 = vpop.permute.xlu0 %2844  ;;  %v3628_v0 = vsel %vm3330_vm11, %v3550_v34, %v3199_v32  ;;  %v5565_v16 = vsel %vm2858_vm9, %v5560_v4, %v5564_v30 }
 0x385   : > { %4090 = vmatprep.mubr.bf16.mxu1 %v3628_v0  ;;  %v4937_v19 = vpop.f32.mrb[168].mxu0  ;;  %v3398_v46 = vsel %vm3330_vm11, %v3317_v15, %v2845_v26  ;;  %5653 = vrot.lane.b32.xlu1 %v5565_v16, %s8915_s20 }
 0x386   : > { %v5251_v57 = vshrl.u32 %v12187_v24, 16  ;;  %v4938_v37 = vadd.f32 %v12145_v13, %v4937_v19  ;;  %4091 = vmatmul.mubr.bf16.gmra.mrb[88].mxu1 %v3398_v46  ;;  %v8374_v1 = vpop.f32.mrb[169].mxu0  ;;  %v5247_v22 = vshll.u32 %v12187_v24, 16 }
 0x387   : > { %v3085_v59 = vpop.permute.xlu1 %3084  ;;  %v4940_v31 = vpop.f32.mrb[170].mxu0 }
 0x388   : > { %v4941_v43 = vadd.f32 %v12145_v13, %v4940_v31  ;;  %v3143_v55 = vpop.permute.xlu0 %3142  ;;  %v8375_v4 = vpop.f32.mrb[171].mxu0  ;;  %v5249_v11 = vrot.slane %v5247_v22, 1  ;;  %v3489_v7 = vsel %vm1496_vm5, %v11373_v53, %v3085_v59  ;;  %v5566_v52 = vrot.slane %v5251_v57, 4 }
 0x389   : > { %v5567_v28 = vrot.slane %v5247_v22, 5  ;;  %v5089_v44 = vmax.f32 %v4938_v37, 0.0  ;;  %v3552_v15 = vsel %vm3271_vm10, %v3489_v7, %v3143_v55 }
 0x38a   : > { %v5090_v48 = vmax.f32 %v4941_v43, 0.0  ;;  %v5250_v18 = vsel %vm622_vm0, %v5245_v60, %v5249_v11  ;;  %v5253_v55 = vor.u32 %v5251_v57, %v5249_v11 }
 0x38b   : > { %v2730_v36 = vpop.permute.xlu1 %2729  ;;  %5403 = vrot.lane.b32.xlu0 %v5250_v18, %s8915_s20  ;;  %v5568_v34 = vor.u32 %v5567_v28, %v5566_v52 }
 0x38c   : > { %v12203_v32 = vpack.c.bf16 %v5090_v48, %v5089_v44  ;;  %v3201_v26 = vpop.permute.xlu0 %3200  ;;  %v3319_v37 = vsel %vm3271_vm10, %v11844_v10, %v2730_v36 }
 0x38d   : > { %v5569_v29 = vsel %vm2858_vm9, %v5564_v30, %v5568_v34  ;;  %v3631_v56 = vsel %vm3330_vm11, %v3552_v15, %v3201_v26  ;;  %v4945_v53 = vpop.f32.mrb[172].mxu0 }
 0x38e   : > { %v5259_v0 = vshrl.u32 %v12203_v32, 16  ;;  %5655 = vrot.lane.b32.xlu1 %v5569_v29, %s8915_s20  ;;  %4098 = vmatprep.mubr.bf16.mxu1 %v3631_v56  ;;  %v4946_v16 = vadd.f32 %v12145_v13, %v4945_v53  ;;  %v8378_v19 = vpop.f32.mrb[173].mxu0  ;;  %v5255_v46 = vshll.u32 %v12203_v32, 16 }
 0x38f   : > { %v2847_v1 = vpop.permute.xlu1 %2846  ;;  %v4948_v22 = vpop.f32.mrb[174].mxu0 }
 0x390   : > { %v4949_v30 = vadd.f32 %v12145_v13, %v4948_v22  ;;  %v3087_v59 = vpop.permute.xlu0 %3086  ;;  %v8379_v31 = vpop.f32.mrb[175].mxu0  ;;  %v3401_v43 = vsel %vm3330_vm11, %v3319_v37, %v2847_v1  ;;  %v5257_v4 = vrot.slane %v5255_v46, 1  ;;  %v5570_v60 = vrot.slane %v5259_v0, 4 }
 0x391   : > { %4099 = vmatmul.mubr.bf16.gmra.mrb[92].mxu1 %v3401_v43  ;;  %v5571_v7 = vrot.slane %v5255_v46, 5  ;;  %v5091_v52 = vmax.f32 %v4946_v16, 0.0  ;;  %v3492_v11 = vsel %vm1496_vm5, %v11444_v27, %v3087_v59 }
 0x392   : > { %v5092_v28 = vmax.f32 %v4949_v30, 0.0  ;;  %v5258_v44 = vsel %vm622_vm0, %v5253_v55, %v5257_v4  ;;  %v5261_v37 = vor.u32 %v5259_v0, %v5257_v4 }
 0x393   : > { %v3145_v48 = vpop.permute.xlu1 %3144  ;;  %5405 = vrot.lane.b32.xlu0 %v5258_v44, %s8915_s20  ;;  %v5572_v10 = vor.u32 %v5571_v7, %v5570_v60 }
 0x394   : > { %v12218_v18 = vpack.c.bf16 %v5092_v28, %v5091_v52  ;;  %v2732_v36 = vpop.permute.xlu0 %2731  ;;  %v3554_v16 = vsel %vm3271_vm10, %v3492_v11, %v3145_v48 }
 0x395   : > { %v5573_v15 = vsel %vm2858_vm9, %v5568_v34, %v5572_v10  ;;  %v4953_v26 = vpop.f32.mrb[176].mxu0  ;;  %v3321_v34 = vsel %vm3271_vm10, %v11893_v2, %v2732_v36 }
 0x396   : > { %v5267_v57 = vshrl.u32 %v12218_v18, 16  ;;  %5657 = vrot.lane.b32.xlu1 %v5573_v15, %s8915_s20  ;;  %v4954_v29 = vadd.f32 %v12145_v13, %v4953_v26  ;;  %v8382_v56 = vpop.f32.mrb[177].mxu0  ;;  %v5263_v53 = vshll.u32 %v12218_v18, 16 }
 0x397   : > { %v3203_v19 = vpop.permute.xlu1 %3202  ;;  %v4956_v46 = vpop.f32.mrb[178].mxu0 }
 0x398   : > { %v4957_v1 = vadd.f32 %v12145_v13, %v4956_v46  ;;  %v2849_v22 = vpop.permute.xlu0 %2848  ;;  %v8383_v30 = vpop.f32.mrb[179].mxu0  ;;  %v3634_v27 = vsel %vm3330_vm11, %v3554_v16, %v3203_v19  ;;  %v5265_v59 = vrot.slane %v5263_v53, 1  ;;  %v5574_v43 = vrot.slane %v5267_v57, 4 }
 0x399   : > { %4106 = vmatprep.mubr.bf16.mxu1 %v3634_v27  ;;  %v3404_v31 = vsel %vm3330_vm11, %v3321_v34, %v2849_v22  ;;  %v5575_v55 = vrot.slane %v5263_v53, 5  ;;  %v5093_v60 = vmax.f32 %v4954_v29, 0.0 }
 0x39a   : > { %v5094_v7 = vmax.f32 %v4957_v1, 0.0  ;;  %4107 = vmatmul.mubr.bf16.gmra.mrb[96].mxu1 %v3404_v31  ;;  %v5266_v0 = vsel %vm622_vm0, %v5261_v37, %v5265_v59  ;;  %v5269_v37 = vor.u32 %v5267_v57, %v5265_v59 }
 0x39b   : > { %v3089_v4 = vpop.permute.xlu1 %3088  ;;  %5407 = vrot.lane.b32.xlu0 %v5266_v0, %s8915_s20  ;;  %v5576_v2 = vor.u32 %v5575_v55, %v5574_v43 }
 0x39c   : > { %v12235_v52 = vpack.c.bf16 %v5094_v7, %v5093_v60  ;;  %v3147_v28 = vpop.permute.xlu0 %3146  ;;  %v3495_v44 = vsel %vm1496_vm5, %v11510_v45, %v3089_v4 }
 0x39d   : > { %v5577_v48 = vsel %vm2858_vm9, %v5572_v10, %v5576_v2  ;;  %v4961_v36 = vpop.f32.mrb[180].mxu0  ;;  %v3556_v16 = vsel %vm3271_vm10, %v3495_v44, %v3147_v28 }
 0x39e   : > { %v5275_v15 = vshrl.u32 %v12235_v52, 16  ;;  %5659 = vrot.lane.b32.xlu1 %v5577_v48, %s8915_s20  ;;  %v4962_v26 = vadd.f32 %v12145_v13, %v4961_v36  ;;  %v8386_v11 = vpop.f32.mrb[181].mxu0  ;;  %v5271_v29 = vshll.u32 %v12235_v52, 16 }
 0x39f   : > { %v2734_v56 = vpop.permute.xlu1 %2733  ;;  %v4964_v53 = vpop.f32.mrb[182].mxu0 }
 0x3a0   : > { %v4965_v19 = vadd.f32 %v12145_v13, %v4964_v53  ;;  %v3205_v46 = vpop.permute.xlu0 %3204  ;;  %v8387_v45 = vpop.f32.mrb[183].mxu0  ;;  %v5273_v10 = vrot.slane %v5271_v29, 1  ;;  %v5578_v1 = vrot.slane %v5275_v15, 4  ;;  %v5579_v22 = vrot.slane %v5271_v29, 5 }
 0x3a1   : > { %v3637_v34 = vsel %vm3330_vm11, %v3556_v16, %v3205_v46  ;;  %v5095_v30 = vmax.f32 %v4962_v26, 0.0  ;;  %v3323_v43 = vsel %vm3271_vm10, %v11954_v49, %v2734_v56 }
 0x3a2   : > { %v5096_v27 = vmax.f32 %v4965_v19, 0.0  ;;  %4114 = vmatprep.mubr.bf16.mxu1 %v3637_v34  ;;  %v5274_v31 = vsel %vm622_vm0, %v5269_v37, %v5273_v10  ;;  %v5580_v60 = vor.u32 %v5579_v22, %v5578_v1  ;;  %v5277_v48 = vor.u32 %v5275_v15, %v5273_v10 }
 0x3a3   : > { %v2851_v55 = vpop.permute.xlu1 %2850  ;;  %5409 = vrot.lane.b32.xlu0 %v5274_v31, %s8915_s20 }
 0x3a4   : > { %v12251_v7 = vpack.c.bf16 %v5096_v27, %v5095_v30  ;;  %v3091_v57 = vpop.permute.xlu0 %3090  ;;  %v3407_v59 = vsel %vm3330_vm11, %v3323_v43, %v2851_v55  ;;  %v5581_v0 = vsel %vm2858_vm9, %v5576_v2, %v5580_v60 }
 0x3a5   : > { %4115 = vmatmul.mubr.bf16.gmra.mrb[100].mxu1 %v3407_v59  ;;  %5661 = vrot.lane.b32.xlu1 %v5581_v0, %s8915_s20  ;;  %v3498_v56 = vsel %vm1496_vm5, %v11592_v35, %v3091_v57 }
 0x3a6   : > { %v5283_v4 = vshrl.u32 %v12251_v7, 16  ;;  %v5279_v28 = vshll.u32 %v12251_v7, 16 }
 0x3a7   : > { %v12258_v44 = vpop.permute.xlu1 %3148 }
 0x3a8   : > { %v2736_v49 = vpop.permute.xlu0 %2735  ;;  %v5281_v36 = vrot.slane %v5279_v28, 1  ;;  %v5582_v26 = vrot.slane %v5283_v4, 4  ;;  %v5583_v11 = vrot.slane %v5279_v28, 5  ;;  %v3558_v15 = vsel %vm3271_vm10, %v3498_v56, %v12258_v44 }
 0x3a9   : > { %v4969_v29 = vpop.f32.mrb[184].mxu0  ;;  %v3325_v37 = vsel %vm3271_vm10, %v12021_v62, %v2736_v49 }
 0x3aa   : > { %v4970_v2 = vadd.f32 %v12145_v13, %v4969_v29  ;;  %v8390_v53 = vpop.f32.mrb[185].mxu0  ;;  %v5282_v16 = vsel %vm622_vm0, %v5277_v48, %v5281_v36  ;;  %v5584_v19 = vor.u32 %v5583_v11, %v5582_v26 }
 0x3ab   : > { %v4972_v46 = vpop.f32.mrb[186].mxu0  ;;  %v3207_v45 = vpop.permute.xlu1 %3206  ;;  %5411 = vrot.lane.b32.xlu0 %v5282_v16, %s8915_s20  ;;  %v5285_v16 = vor.u32 %v5283_v4, %v5281_v36 }
 0x3ac   : > { %v4973_v10 = vadd.f32 %v12145_v13, %v4972_v46  ;;  %v8391_v34 = vpop.f32.mrb[187].mxu0  ;;  %v2853_v35 = vpop.permute.xlu0 %2852  ;;  %v5585_v1 = vsel %vm2858_vm9, %v5580_v60, %v5584_v19  ;;  %v3640_v22 = vsel %vm3330_vm11, %v3558_v15, %v3207_v45  ;;  %v5097_v27 = vmax.f32 %v4970_v2, 0.0 }
 0x3ad   : > { %5663 = vrot.lane.b32.xlu1 %v5585_v1, %s8915_s20  ;;  %4122 = vmatprep.mubr.bf16.mxu1 %v3640_v22  ;;  %v3410_v30 = vsel %vm3330_vm11, %v3325_v37, %v2853_v35 }
 0x3ae   : > { %v5098_v31 = vmax.f32 %v4973_v10, 0.0  ;;  %4123 = vmatmul.mubr.bf16.gmra.mrb[104].mxu1 %v3410_v30  ;;  %v5468_v30 = vrot.slane %v11774_v61, 4 }
 0x3af   : > { %v3093_v43 = vpop.permute.xlu1 %3092 }
 0x3b0   : > { %v12274_v55 = vpack.c.bf16 %v5098_v31, %v5097_v27  ;;  %v3501_v62 = vsel %vm1496_vm5, %v11674_v33, %v3093_v43  ;;  %v2738_v57 = vpop.permute.xlu0 %2737 }
 0x3b1   : > { %v4977_v59 = vpop.f32.mrb[188].mxu0  ;;  %v3559_v60 = vsel %vm3271_vm10, %v3501_v62, %v12258_v44  ;;  %v3327_v11 = vsel %vm3271_vm10, %v12078_v38, %v2738_v57 }
 0x3b2   : > { %v5291_v0 = vshrl.u32 %v12274_v55, 16  ;;  %v4978_v28 = vadd.f32 %v12145_v13, %v4977_v59  ;;  %v8394_v49 = vpop.f32.mrb[189].mxu0  ;;  %v3642_v48 = vsel %vm3330_vm11, %v3559_v60, %v3207_v45  ;;  %v5287_v26 = vshll.u32 %v12274_v55, 16 }
 0x3b3   : > { %v4980_v29 = vpop.f32.mrb[190].mxu0  ;;  %v2855_v56 = vpop.permute.xlu1 %2854  ;;  %4130 = vmatprep.mubr.bf16.mxu1 %v3642_v48  ;;  %v5467_v59 = vrot.slane %v11681_v54, 4 }
 0x3b4   : > { %v4981_v33 = vadd.f32 %v12145_v13, %v4980_v29  ;;  %v8395_v2 = vpop.f32.mrb[191].mxu0  ;;  %v3095_v53 = vpop.permute.xlu0 %3094  ;;  %v5289_v46 = vrot.slane %v5287_v26, 1  ;;  %v3413_v15 = vsel %vm3330_vm11, %v3327_v11, %v2855_v56  ;;  %v5586_v45 = vrot.slane %v5291_v0, 4 }
 0x3b5   : > { %v3504_v37 = vsel %vm1496_vm5, %v11729_v3, %v3095_v53  ;;  %v5587_v10 = vrot.slane %v5287_v26, 5  ;;  %v5099_v34 = vmax.f32 %v4978_v28, 0.0  ;;  %v5470_v56 = vrot.slane %v11807_v9, 4 }
 0x3b6   : > { %v5100_v35 = vmax.f32 %v4981_v33, 0.0  ;;  %v5290_v38 = vsel %vm622_vm0, %v5285_v16, %v5289_v46  ;;  %4131 = vmatmul.mubr.bf16.gmra.mrb[108].mxu1 %v3413_v15  ;;  %v3560_v27 = vsel %vm3271_vm10, %v3504_v37, %v12258_v44  ;;  %v5293_v16 = vor.u32 %v5291_v0, %v5289_v46 }
 0x3b7   : > { %5413 = vrot.lane.b32.xlu0 %v5290_v38, %s8915_s20  ;;  %v2740_v1 = vpop.permute.xlu1 %2739  ;;  %v5588_v22 = vor.u32 %v5587_v10, %v5586_v45  ;;  %v5471_v0 = vsel %vm2304_vm7, %v5468_v30, %v5470_v56 }
 0x3b8   : > { %v12293_v4 = vpack.c.bf16 %v5100_v35, %v5099_v34  ;;  %v8779_v36 = vpop.permute.xlu0 %8778  ;;  %v3329_v28 = vsel %vm3271_vm10, %v12118_v47, %v2740_v1 }
 0x3b9   : > { %v8781_v31 = vunpack.i.h.bf16 %v8779_v36  ;;  %v8780_v43 = vunpack.i.l.bf16 %v8779_v36  ;;  %v5589_v62 = vsel %vm2858_vm9, %v5584_v19, %v5588_v22  ;;  %v4985_v57 = vpop.f32.mrb[192].mxu0  ;;  %v5469_v19 = vsel %vm2304_vm7, %v5467_v59, %v5468_v30 }
 0x3ba   : > { %v5299_v60 = vshrl.u32 %v12293_v4, 16  ;;  %5665 = vrot.lane.b32.xlu1 %v5589_v62, %s8915_s20  ;;  %v4986_v49 = vadd.f32 %v12145_v13, %v4985_v57  ;;  %v8398_v48 = vpop.f32.mrb[193].mxu0  ;;  %v5295_v26 = vshll.u32 %v12293_v4, 16  ;;  %v5472_v62 = vrot.slane %v11883_v25, 4 }
 0x3bb   : > { %v4988_v44 = vpop.f32.mrb[194].mxu0  ;;  %v5636_v11 = vpop.permute.xlu1 %5635  ;;  %v3645_v29 = vsel %vm3330_vm11, %v3560_v27, %v8780_v43  ;;  %v3416_v45 = vsel %vm3330_vm11, %v3329_v28, %v8781_v31 }
 0x3bc   : > { %v4989_v33 = vadd.f32 %v12145_v13, %v4988_v44  ;;  %v8399_v2 = vpop.f32.mrb[195].mxu0  ;;  %v5382_v53 = vpop.permute.xlu0 %5381  ;;  %4138 = vmatprep.mubr.bf16.mxu1 %v3645_v29  ;;  %v5782_v47 = vsel %vm3271_vm10, %v5469_v19, %v5636_v11  ;;  %v5297_v15 = vrot.slane %v5295_v26, 1  ;;  %v5590_v10 = vrot.slane %v5299_v60, 4 }
 0x3bd   : > { %v5694_v37 = vsel %vm3271_vm10, %v11625_v14, %v5382_v53  ;;  %6063 = vmatprep.mubr.bf16.mxu0 %v5782_v47  ;;  %v5591_v34 = vrot.slane %v5295_v26, 5  ;;  %v5101_v35 = vmax.f32 %v4986_v49, 0.0 }
 0x3be   : > { %v5102_v38 = vmax.f32 %v4989_v33, 0.0  ;;  %v5298_v1 = vsel %vm622_vm0, %v5293_v16, %v5297_v15  ;;  %4139 = vmatmul.mubr.bf16.gmra.mrb[112].mxu1 %v3416_v45  ;;  %6064 = vmatmul.mubr.bf16.vlgmr.msra.gmra.mrb[232].mxu0 %v5694_v37  ;;  %v5473_v33 = vsel %vm2304_vm7, %v5470_v56, %v5472_v62  ;;  %v13903_v45 = vld [vmem:[#allocation6_spill] sm:$0xff] }
 0x3bf   : > { %5415 = vrot.lane.b32.xlu0 %v5298_v1, %s8915_s20  ;;  %v5638_v36 = vpop.permute.xlu1 %5637  ;;  %v5592_v27 = vor.u32 %v5591_v34, %v5590_v10  ;;  %8188 = vmatprep.mubr.msk.bf16.mxu1 %vm8913_vm1, %v13804_v40 }
 0x3c0   : > { %v12318_v14 = vpack.c.bf16 %v5102_v38, %v5101_v35  ;;  %v5786_v46 = vsel %vm3271_vm10, %v5471_v0, %v5638_v36  ;;  %v5384_v59 = vpop.permute.xlu0 %5383 }
 0x3c1   : > { %v5593_v31 = vsel %vm2858_vm9, %v5588_v22, %v5592_v27  ;;  %v4993_v43 = vpop.f32.mrb[196].mxu0  ;;  %6071 = vmatprep.mubr.bf16.mxu0 %v5786_v46  ;;  %v5301_v22 = vor.u32 %v5299_v60, %v5297_v15  ;;  %v5697_v19 = vsel %vm3271_vm10, %v11681_v54, %v5384_v59  ;;  %v5474_v54 = vrot.slane %v11920_v5, 4 }
 0x3c2   : > { %v5307_v57 = vshrl.u32 %v12318_v14, 16  ;;  %5667 = vrot.lane.b32.xlu1 %v5593_v31, %s8915_s20  ;;  %v4994_v30 = vadd.f32 %v12145_v13, %v4993_v43  ;;  %v8402_v28 = vpop.f32.mrb[197].mxu0  ;;  %v5303_v49 = vshll.u32 %v12318_v14, 16 }
 0x3c3   : > { %v4996_v48 = vpop.f32.mrb[198].mxu0  ;;  %v5640_v26 = vpop.permute.xlu1 %5639  ;;  %v5475_v36 = vsel %vm2304_vm7, %v5472_v62, %v5474_v54 }
 0x3c4   : > { %v4997_v44 = vadd.f32 %v12145_v13, %v4996_v48  ;;  %v8403_v11 = vpop.f32.mrb[199].mxu0  ;;  %v5305_v29 = vrot.slane %v5303_v49, 1  ;;  %v5594_v2 = vrot.slane %v5307_v57, 4  ;;  %v5595_v53 = vrot.slane %v5303_v49, 5  ;;  %v5386_v35 = vpop.permute.xlu0 %5385 }
 0x3c5   : > { %v5103_v47 = vmax.f32 %v4994_v30, 0.0  ;;  %v5790_v10 = vsel %vm3271_vm10, %v5473_v33, %v5640_v26  ;;  %v5700_v30 = vsel %vm3271_vm10, %v11774_v61, %v5386_v35  ;;  %v13904_v26 = vld [vmem:[#allocation9_spill] sm:$0xff] }
 0x3c6   : > { %v5104_v16 = vmax.f32 %v4997_v44, 0.0  ;;  %v5306_v37 = vsel %vm622_vm0, %v5301_v22, %v5305_v29  ;;  %8189 = vmatmul.mubr.msk.bf16.vlgmr.msra.gmra.mrb[0].mxu1 %vm1496_vm5, %v13903_v45  ;;  %6072 = vmatmul.mubr.bf16.gmra.mrb[236].mxu0 %v5697_v19  ;;  %v5596_v60 = vor.u32 %v5595_v53, %v5594_v2  ;;  %v5309_v0 = vor.u32 %v5307_v57, %v5305_v29  ;;  %v13905_v45 = vld [vmem:[#allocation11_spill] sm:$0xff] }
 0x3c7   : > { %5417 = vrot.lane.b32.xlu0 %v5306_v37, %s8915_s20  ;;  %6079 = vmatprep.mubr.bf16.mxu0 %v5790_v10  ;;  %v5642_v38 = vpop.permute.xlu1 %5641  ;;  %v5476_v22 = vrot.slane %v12030_v8, 4 }
 0x3c8   : > { %v12337_v15 = vpack.c.bf16 %v5104_v16, %v5103_v47  ;;  %8192 = vmatprep.mubr.msk.bf16.mxu1 %vm8913_vm1, %v13804_v40  ;;  %v5597_v56 = vsel %vm2858_vm9, %v5592_v27, %v5596_v60  ;;  %v5794_v27 = vsel %vm3271_vm10, %v5475_v36, %v5642_v38  ;;  %v5388_v29 = vpop.permute.xlu0 %5387 }
 0x3c9   : > { %5669 = vrot.lane.b32.xlu1 %v5597_v56, %s8915_s20  ;;  %v5703_v47 = vsel %vm3271_vm10, %v11807_v9, %v5388_v29  ;;  %v5477_v16 = vsel %vm2304_vm7, %v5474_v54, %v5476_v22  ;;  %v5478_v54 = vrot.slane %v12056_v23, 4 }
 0x3ca   : > { %v5315_v34 = vshrl.u32 %v12337_v15, 16  ;;  %v5311_v1 = vshll.u32 %v12337_v15, 16 }
 0x3cb   : > { %v5644_v2 = vpop.permute.xlu1 %5643 }
 0x3cc   : > { %v5313_v46 = vrot.slane %v5311_v1, 1  ;;  %v5598_v31 = vrot.slane %v5315_v34, 4  ;;  %v5599_v43 = vrot.slane %v5311_v1, 5  ;;  %v5798_v10 = vsel %vm3271_vm10, %v5477_v16, %v5644_v2  ;;  %v5390_v1 = vpop.permute.xlu0 %5389  ;;  %v13907_v2 = vld [vmem:[#allocation18_spill] sm:$0xff] }
 0x3cd   : > { %v5001_v59 = vpop.f32.mrb[200].mxu0 }
 0x3ce   : > { %v5002_v28 = vadd.f32 %v12145_v13, %v5001_v59  ;;  %v8406_v49 = vpop.f32.mrb[201].mxu0  ;;  %v5314_v48 = vsel %vm622_vm0, %v5309_v0, %v5313_v46  ;;  %8193 = vmatmul.mubr.msk.bf16.gmra.mrb[4].mxu1 %vm1496_vm5, %v13904_v26  ;;  %6080 = vmatmul.mubr.bf16.gmra.mrb[240].mxu0 %v5700_v30  ;;  %v5600_v62 = vor.u32 %v5599_v43, %v5598_v31 }
 0x3cf   : > { %v5004_v57 = vpop.f32.mrb[202].mxu0  ;;  %5419 = vrot.lane.b32.xlu0 %v5314_v48, %s8915_s20  ;;  %6087 = vmatprep.mubr.bf16.mxu0 %v5794_v27  ;;  %v5317_v56 = vor.u32 %v5315_v34, %v5313_v46  ;;  %v5646_v31 = vpop.permute.xlu1 %5645  ;;  %v5706_v34 = vsel %vm3271_vm10, %v11883_v25, %v5390_v1  ;;  %v5479_v46 = vsel %vm2304_vm7, %v5476_v22, %v5478_v54  ;;  %v5480_v25 = vrot.slane %v12110_v51, 4 }
 0x3d0   : > { %v5005_v44 = vadd.f32 %v12145_v13, %v5004_v57  ;;  %v8407_v11 = vpop.f32.mrb[203].mxu0  ;;  %v5601_v61 = vsel %vm2858_vm9, %v5596_v60, %v5600_v62  ;;  %8196 = vmatprep.mubr.msk.bf16.mxu1 %vm8913_vm1, %v13804_v40  ;;  %v5105_v19 = vmax.f32 %v5002_v28, 0.0  ;;  %v13906_v28 = vld [vmem:[#allocation13_spill] sm:$0xff]  ;;  %v5802_v49 = vsel %vm3271_vm10, %v5479_v46, %v5646_v31  ;;  %v5392_v57 = vpop.permute.xlu0 %5391 }
 0x3d1   : > { %5671 = vrot.lane.b32.xlu1 %v5601_v61, %s8915_s20  ;;  %v5709_v29 = vsel %vm3271_vm10, %v11920_v5, %v5392_v57 }
 0x3d2   : > { %v5106_v33 = vmax.f32 %v5005_v44, 0.0 }
 0x3d4   : > { %v12360_v53 = vpack.c.bf16 %v5106_v33, %v5105_v19  ;;  %v5481_v19 = vsel %vm2304_vm7, %v5478_v54, %v5480_v25 }
 0x3d6   : > { %v5323_v37 = vshrl.u32 %v12360_v53, 16  ;;  %8197 = vmatmul.mubr.msk.bf16.gmra.mrb[8].mxu1 %vm1496_vm5, %v13905_v45  ;;  %6088 = vmatmul.mubr.bf16.gmra.mrb[244].mxu0 %v5703_v47  ;;  %v5319_v60 = vshll.u32 %v12360_v53, 16 }
 0x3d7   : > { %6095 = vmatprep.mubr.bf16.mxu0 %v5798_v10  ;;  %8200 = vmatprep.mubr.msk.bf16.mxu1 %vm8913_vm1, %v13804_v40 }
 0x3d8   : > { %v5321_v35 = vrot.slane %v5319_v60, 1  ;;  %v5602_v38 = vrot.slane %v5323_v37, 4  ;;  %v5603_v9 = vrot.slane %v5319_v60, 5 }
 0x3da   : > { %v5322_v36 = vsel %vm622_vm0, %v5317_v56, %v5321_v35  ;;  %v5604_v0 = vor.u32 %v5603_v9, %v5602_v38  ;;  %v5325_v45 = vor.u32 %v5323_v37, %v5321_v35  ;;  %v5482_v56 = vrot.slane %v12134_v6, 4  ;;  %v5394_v38 = vpop.permute.xlu0 %5393 }
 0x3db   : > { %5421 = vrot.lane.b32.xlu0 %v5322_v36, %s8915_s20  ;;  %v5712_v31 = vsel %vm3271_vm10, %v12030_v8, %v5394_v38 }
 0x3dc   : > { %v5605_v43 = vsel %vm2858_vm9, %v5600_v62, %v5604_v0  ;;  %v5483_v35 = vsel %vm2304_vm7, %v5480_v25, %v5482_v56 }
 0x3dd   : > { %5673 = vrot.lane.b32.xlu1 %v5605_v43, %s8915_s20  ;;  %v5009_v59 = vpop.f32.mrb[204].mxu0 }
 0x3de   : > { %v5010_v30 = vadd.f32 %v12145_v13, %v5009_v59  ;;  %v8410_v27 = vpop.f32.mrb[205].mxu0  ;;  %8201 = vmatmul.mubr.msk.bf16.gmra.mrb[12].mxu1 %vm1496_vm5, %v13906_v28  ;;  %6096 = vmatmul.mubr.bf16.gmra.mrb[248].mxu0 %v5706_v34  ;;  %v13908_v34 = vld [vmem:[#allocation14_spill] sm:$0xff]  ;;  %v5396_v28 = vpop.permute.xlu0 %5395 }
 0x3df   : > { %v5012_v48 = vpop.f32.mrb[206].mxu0  ;;  %6103 = vmatprep.mubr.bf16.mxu0 %v5802_v49  ;;  %8204 = vmatprep.mubr.msk.bf16.mxu1 %vm8913_vm1, %v13804_v40  ;;  %v5484_v27 = vrot.slane %v12157_v50, 4  ;;  %v5715_v25 = vsel %vm3271_vm10, %v12056_v23, %v5396_v28 }
 0x3e0   : > { %v5013_v26 = vadd.f32 %v12145_v13, %v5012_v48  ;;  %v8411_v62 = vpop.f32.mrb[207].mxu0  ;;  %v5107_v44 = vmax.f32 %v5010_v30, 0.0  ;;  %v5648_v61 = vpop.permute.xlu1 %5647 }
 0x3e1   : > { %v5806_v47 = vsel %vm3271_vm10, %v5481_v19, %v5648_v61  ;;  %v5485_v57 = vsel %vm2304_vm7, %v5482_v56, %v5484_v27 }
 0x3e2   : > { %v5108_v11 = vmax.f32 %v5013_v26, 0.0 }
 0x3e4   : > { %v12388_v22 = vpack.c.bf16 %v5108_v11, %v5107_v44  ;;  %v13909_v11 = vld [vmem:[#allocation20_spill] sm:$0xff] }
 0x3e6   : > { %v5331_v33 = vshrl.u32 %v12388_v22, 16  ;;  %8205 = vmatmul.mubr.msk.bf16.gmra.mrb[16].mxu1 %vm1496_vm5, %v13907_v2  ;;  %6104 = vmatmul.mubr.bf16.gmra.mrb[252].mxu0 %v5709_v29  ;;  %v5327_v16 = vshll.u32 %v12388_v22, 16 }
 0x3e7   : > { %6111 = vmatprep.mubr.bf16.mxu0 %v5806_v47  ;;  %8208 = vmatprep.mubr.msk.bf16.mxu1 %vm8913_vm1, %v13804_v40 }
 0x3e8   : > { %v5329_v10 = vrot.slane %v5327_v16, 1  ;;  %v5606_v60 = vrot.slane %v5331_v33, 4  ;;  %v5607_v5 = vrot.slane %v5327_v16, 5  ;;  %v5650_v1 = vpop.permute.xlu1 %5649  ;;  %v5486_v16 = vrot.slane %v12173_v42, 4 }
 0x3e9   : > { %v5810_v46 = vsel %vm3271_vm10, %v5483_v35, %v5650_v1 }
 0x3ea   : > { %v5330_v9 = vsel %vm622_vm0, %v5325_v45, %v5329_v10  ;;  %v5608_v54 = vor.u32 %v5607_v5, %v5606_v60  ;;  %v5333_v19 = vor.u32 %v5331_v33, %v5329_v10  ;;  %v5398_v45 = vpop.permute.xlu0 %5397  ;;  %v5487_v10 = vsel %vm2304_vm7, %v5484_v27, %v5486_v16 }
 0x3eb   : > { %5423 = vrot.lane.b32.xlu0 %v5330_v9, %s8915_s20  ;;  %v5718_v9 = vsel %vm3271_vm10, %v12110_v51, %v5398_v45 }
 0x3ec   : > { %v5609_v36 = vsel %vm2858_vm9, %v5604_v0, %v5608_v54 }
 0x3ed   : > { %5675 = vrot.lane.b32.xlu1 %v5609_v36, %s8915_s20  ;;  %v5017_v37 = vpop.f32.mrb[208].mxu0 }
 0x3ee   : > { %v5018_v43 = vadd.f32 %v12145_v13, %v5017_v37  ;;  %v8414_v59 = vpop.f32.mrb[209].mxu0  ;;  %8209 = vmatmul.mubr.msk.bf16.gmra.mrb[20].mxu1 %vm1496_vm5, %v13908_v34  ;;  %6112 = vmatmul.mubr.bf16.gmra.mrb[0].mxu0 %v5712_v31  ;;  %v13910_v31 = vld [vmem:[#allocation25_spill] sm:$0xff] }
 0x3ef   : > { %v5020_v30 = vpop.f32.mrb[210].mxu0  ;;  %6119 = vmatprep.mubr.bf16.mxu0 %v5810_v46  ;;  %8212 = vmatprep.mubr.msk.bf16.mxu1 %vm8913_vm1, %v13804_v40  ;;  %v5652_v26 = vpop.permute.xlu1 %5651 }
 0x3f0   : > { %v5021_v8 = vadd.f32 %v12145_v13, %v5020_v30  ;;  %v8415_v0 = vpop.f32.mrb[211].mxu0  ;;  %v5109_v49 = vmax.f32 %v5018_v43, 0.0  ;;  %v5814_v61 = vsel %vm3271_vm10, %v5485_v57, %v5652_v26  ;;  %v5488_v43 = vrot.slane %v12187_v24, 4  ;;  %v5400_v59 = vpop.permute.xlu0 %5399  ;;  %v8886_v26 = vld [vmem:[%s13684_s10] sm:$0xff]  }
 0x3f1   : > { %v5721_v0 = vsel %vm3271_vm10, %v12134_v6, %v5400_v59  ;;  %8576 = vmatpush3.bf16.msra.mxu1 %v8886_v26  ;;  %8437 = vmatpush3.bf16.msra.mxu0 %v8886_v26 }
 0x3f2   : > { %v5110_v48 = vmax.f32 %v5021_v8, 0.0  ;;  %v5489_v27 = vsel %vm2304_vm7, %v5486_v16, %v5488_v43  ;;  %8569 = vmatprep.subr.bf16.mxu1 %v13804_v40  ;;  %8438 = vmatprep.subr.bf16.mxu0 %v13804_v40 }
 0x3f4   : > { %v12416_v62 = vpack.c.bf16 %v5110_v48, %v5109_v49  ;;  %v13911_v49 = vld [vmem:[#allocation10_spill] sm:$0xff] }
 0x3f6   : > { %v5339_v44 = vshrl.u32 %v12416_v62, 16  ;;  %8213 = vmatmul.mubr.msk.bf16.gmra.mrb[24].mxu1 %vm1496_vm5, %v13909_v11  ;;  %6120 = vmatmul.mubr.bf16.gmra.mrb[4].mxu0 %v5715_v25  ;;  %v5335_v29 = vshll.u32 %v12416_v62, 16 }
 0x3f7   : > { %6127 = vmatprep.mubr.bf16.mxu0 %v5814_v61  ;;  %8216 = vmatprep.mubr.msk.bf16.mxu1 %vm8913_vm1, %v13804_v40  ;;  %v5654_v56 = vpop.permute.xlu1 %5653  ;;  %v5490_v61 = vrot.slane %v12203_v32, 4 }
 0x3f8   : > { %v5337_v2 = vrot.slane %v5335_v29, 1  ;;  %v5610_v47 = vrot.slane %v5339_v44, 4  ;;  %v5611_v23 = vrot.slane %v5335_v29, 5  ;;  %v5818_v37 = vsel %vm3271_vm10, %v5487_v10, %v5654_v56  ;;  %v5402_v29 = vpop.permute.xlu0 %5401 }
 0x3f9   : > { %v5491_v45 = vsel %vm2304_vm7, %v5488_v43, %v5490_v61  ;;  %v5492_v10 = vrot.slane %v12218_v18, 4  ;;  %v13912_v43 = vld [vmem:[#allocation19_spill] sm:$0xff] }
 0x3fa   : > { %v5338_v60 = vsel %vm622_vm0, %v5333_v19, %v5337_v2  ;;  %v5612_v5 = vor.u32 %v5611_v23, %v5610_v47  ;;  %v5341_v6 = vor.u32 %v5339_v44, %v5337_v2  ;;  %v5724_v2 = vsel %vm3271_vm10, %v12157_v50, %v5402_v29  ;;  %v13913_v29 = vld [vmem:[#allocation5_spill] sm:$0xff] }
 0x3fb   : > { %5425 = vrot.lane.b32.xlu0 %v5338_v60, %s8915_s20  ;;  %v12472_v60 = vld [vmem:[%s13681_s7] ss:$0 sm:$0xff] }
 0x3fc   : > { %v5613_v38 = vsel %vm2858_vm9, %v5608_v54, %v5612_v5 }
 0x3fd   : > { %5677 = vrot.lane.b32.xlu1 %v5613_v38, %s8915_s20  ;;  %v5025_v33 = vpop.f32.mrb[212].mxu0 }
 0x3fe   : > { %v5026_v1 = vadd.f32 %v12145_v13, %v5025_v33  ;;  %v8418_v36 = vpop.f32.mrb[213].mxu0  ;;  %8217 = vmatmul.mubr.msk.bf16.gmra.mrb[28].mxu1 %vm1496_vm5, %v13910_v31  ;;  %6128 = vmatmul.mubr.bf16.gmra.mrb[8].mxu0 %v5718_v9 }
 0x3ff   : > { %v5028_v35 = vpop.f32.mrb[214].mxu0  ;;  %6135 = vmatprep.mubr.bf16.mxu0 %v5818_v37  ;;  %8220 = vmatprep.mubr.msk.bf16.mxu1 %vm8913_vm1, %v13804_v40 }
 0x400   : > { %v5029_v51 = vadd.f32 %v12145_v13, %v5028_v35  ;;  %v8419_v54 = vpop.f32.mrb[215].mxu0  ;;  %v5111_v34 = vmax.f32 %v5026_v1, 0.0  ;;  %v5656_v30 = vpop.permute.xlu1 %5655 }
 0x401   : > { %v5822_v13 = vsel %vm3271_vm10, %v5489_v27, %v5656_v30  ;;  %v5404_v1 = vpop.permute.xlu0 %5403  ;;  %v5494_v27 = vrot.slane %v12235_v52, 4 }
 0x402   : > { %v5112_v46 = vmax.f32 %v5029_v51, 0.0  ;;  %v5493_v51 = vsel %vm2304_vm7, %v5490_v61, %v5492_v10 }
 0x404   : > { %v12444_v8 = vpack.c.bf16 %v5112_v46, %v5111_v34 }
 0x406   : > { %v5347_v28 = vshrl.u32 %v12444_v8, 16  ;;  %8221 = vmatmul.mubr.msk.bf16.gmra.mrb[32].mxu1 %vm1496_vm5, %v13911_v49  ;;  %6136 = vmatmul.mubr.bf16.gmra.mrb[12].mxu0 %v5721_v0  ;;  %v5343_v48 = vshll.u32 %v12444_v8, 16  ;;  %v5406_v49 = vpop.permute.xlu0 %5405 }
 0x407   : > { %6143 = vmatprep.mubr.bf16.mxu0 %v5822_v13  ;;  %8224 = vmatprep.mubr.msk.bf16.mxu1 %vm8913_vm1, %v13804_v40 }
 0x408   : > { %v5345_v25 = vrot.slane %v5343_v48, 1  ;;  %v5614_v57 = vrot.slane %v5347_v28, 4  ;;  %v5615_v11 = vrot.slane %v5343_v48, 5  ;;  %v5658_v23 = vpop.permute.xlu1 %5657 }
 0x40a   : > { %v5346_v19 = vsel %vm622_vm0, %v5341_v6, %v5345_v25  ;;  %v5616_v47 = vor.u32 %v5615_v11, %v5614_v57  ;;  %v5349_v46 = vor.u32 %v5347_v28, %v5345_v25  ;;  %v5730_v57 = vsel %vm3271_vm10, %v12187_v24, %v5406_v49 }
 0x40b   : > { %5427 = vrot.lane.b32.xlu0 %v5346_v19, %s8915_s20  ;;  %v5495_v25 = vsel %vm2304_vm7, %v5492_v10, %v5494_v27 }
 0x40c   : > { %v5617_v44 = vsel %vm2858_vm9, %v5612_v5, %v5616_v47  ;;  %v5826_v5 = vsel %vm3271_vm10, %v5491_v45, %v5658_v23 }
 0x40d   : > { %5679 = vrot.lane.b32.xlu1 %v5617_v44, %s8915_s20  ;;  %v5033_v16 = vpop.f32.mrb[216].mxu0  ;;  %v5496_v44 = vrot.slane %v12251_v7, 4 }
 0x40e   : > { %v5034_v56 = vadd.f32 %v12472_v60, %v5033_v16  ;;  %v8422_v38 = vpop.f32.mrb[217].mxu0  ;;  %8225 = vmatmul.mubr.msk.bf16.gmra.mrb[36].mxu1 %vm1496_vm5, %v11175_v17  ;;  %6144 = vmatmul.mubr.bf16.gmra.mrb[16].mxu0 %v5724_v2  ;;  %v5727_v17 = vsel %vm3271_vm10, %v12173_v42, %v5404_v1  ;;  %v5408_v2 = vpop.permute.xlu0 %5407 }
 0x40f   : > { %v5036_v50 = vpop.f32.mrb[218].mxu0  ;;  %6151 = vmatprep.mubr.bf16.mxu0 %v5826_v5  ;;  %8228 = vmatprep.mubr.msk.bf16.mxu1 %vm8913_vm1, %v13804_v40  ;;  %v5733_v5 = vsel %vm3271_vm10, %v12203_v32, %v5408_v2 }
 0x410   : > { %v5037_v9 = vadd.f32 %v12472_v60, %v5036_v50  ;;  %v8423_v33 = vpop.f32.mrb[219].mxu0  ;;  %v5113_v36 = vmax.f32 %v5034_v56, 0.0  ;;  %v5660_v37 = vpop.permute.xlu1 %5659  ;;  %v5497_v50 = vsel %vm2304_vm7, %v5494_v27, %v5496_v44 }
 0x411   : > { %v5830_v59 = vsel %vm3271_vm10, %v5493_v51, %v5660_v37  ;;  %v13914_v33 = vld [vmem:[#allocation7_spill] sm:$0xff] }
 0x412   : > { %v5114_v31 = vmax.f32 %v5037_v9, 0.0 }
 0x414   : > { %v12482_v35 = vpack.c.bf16 %v5114_v31, %v5113_v36 }
 0x415   : > { %v5410_v51 = vpop.permute.xlu0 %5409 }
 0x416   : > { %v5355_v54 = vshrl.u32 %v12482_v35, 16  ;;  %8229 = vmatmul.mubr.msk.bf16.gmra.mrb[40].mxu1 %vm1496_vm5, %v13912_v43  ;;  %6152 = vmatmul.mubr.bf16.gmra.mrb[20].mxu0 %v5727_v17  ;;  %v5351_v34 = vshll.u32 %v12482_v35, 16  ;;  %v5498_v17 = vrot.slane %v12274_v55, 4 }
 0x417   : > { %6159 = vmatprep.mubr.bf16.mxu0 %v5830_v59  ;;  %8232 = vmatprep.mubr.msk.bf16.mxu1 %vm8913_vm1, %v13804_v40  ;;  %v5662_v26 = vpop.permute.xlu1 %5661 }
 0x418   : > { %v5353_v30 = vrot.slane %v5351_v34, 1  ;;  %v5618_v0 = vrot.slane %v5355_v54, 4  ;;  %v5619_v42 = vrot.slane %v5351_v34, 5  ;;  %v5834_v19 = vsel %vm3271_vm10, %v5495_v25, %v5662_v26  ;;  %v8887_v34 = vld [vmem:[%s13684_s10 + $0x8] sm:$0xff]  }
 0x419   : > { %8577 = vmatpush3.bf16.msra.mxu1 %v8887_v34  ;;  %8439 = vmatpush3.bf16.msra.mxu0 %v8887_v34 }
 0x41a   : > { %v5354_v13 = vsel %vm622_vm0, %v5349_v46, %v5353_v30  ;;  %v5620_v48 = vor.u32 %v5619_v42, %v5618_v0  ;;  %v5357_v36 = vor.u32 %v5355_v54, %v5353_v30  ;;  %v5736_v54 = vsel %vm3271_vm10, %v12218_v18, %v5410_v51  ;;  %8570 = vmatprep.subr.bf16.mxu1 %v13804_v40  ;;  %v13917_v51 = vld [vmem:[#allocation17_spill] sm:$0xff] }
 0x41b   : > { %5429 = vrot.lane.b32.xlu0 %v5354_v13, %s8915_s20  ;;  %v5499_v42 = vsel %vm2304_vm7, %v5496_v44, %v5498_v17  ;;  %v13915_v13 = vld [vmem:[#allocation16_spill] sm:$0xff]  ;;  %8440 = vmatprep.subr.bf16.mxu0 %v13804_v40 }
 0x41c   : > { %v5621_v6 = vsel %vm2858_vm9, %v5616_v47, %v5620_v48 }
 0x41d   : > { %5681 = vrot.lane.b32.xlu1 %v5621_v6, %s8915_s20  ;;  %v5041_v28 = vpop.f32.mrb[220].mxu0 }
 0x41e   : > { %v5042_v11 = vadd.f32 %v12472_v60, %v5041_v28  ;;  %v8426_v61 = vpop.f32.mrb[221].mxu0  ;;  %8233 = vmatmul.mubr.msk.bf16.gmra.mrb[44].mxu1 %vm1496_vm5, %v13913_v29  ;;  %6160 = vmatmul.mubr.bf16.gmra.mrb[24].mxu0 %v5730_v57  ;;  %v5500_v57 = vrot.slane %v12293_v4, 4  ;;  %v5412_v28 = vpop.permute.xlu0 %5411 }
 0x41f   : > { %v5044_v23 = vpop.f32.mrb[222].mxu0  ;;  %6167 = vmatprep.mubr.bf16.mxu0 %v5834_v19  ;;  %8236 = vmatprep.mubr.msk.bf16.mxu1 %vm8913_vm1, %v13804_v40  ;;  %v5664_v56 = vpop.permute.xlu1 %5663  ;;  %v5739_v19 = vsel %vm3271_vm10, %v12235_v52, %v5412_v28 }
 0x420   : > { %v5045_v24 = vadd.f32 %v12472_v60, %v5044_v23  ;;  %v8427_v47 = vpop.f32.mrb[223].mxu0  ;;  %v5115_v16 = vmax.f32 %v5042_v11, 0.0  ;;  %v5838_v10 = vsel %vm3271_vm10, %v5497_v50, %v5664_v56  ;;  %v5501_v23 = vsel %vm2304_vm7, %v5498_v17, %v5500_v57 }
 0x421   : > { %v13916_v47 = vld [vmem:[#allocation8_spill] sm:$0xff] }
 0x422   : > { %v5116_v45 = vmax.f32 %v5045_v24, 0.0 }
 0x424   : > { %v12510_v38 = vpack.c.bf16 %v5116_v45, %v5115_v16 }
 0x426   : > { %v5363_v9 = vshrl.u32 %v12510_v38, 16  ;;  %8237 = vmatmul.mubr.msk.bf16.gmra.mrb[48].mxu1 %vm1496_vm5, %v13914_v33  ;;  %6168 = vmatmul.mubr.bf16.gmra.mrb[28].mxu0 %v5733_v5  ;;  %v5359_v1 = vshll.u32 %v12510_v38, 16  ;;  %v5502_v5 = vrot.slane %v12318_v14, 4 }
 0x427   : > { %6175 = vmatprep.mubr.bf16.mxu0 %v5838_v10  ;;  %8240 = vmatprep.mubr.msk.bf16.mxu1 %vm8913_vm1, %v13804_v40 }
 0x428   : > { %v5361_v31 = vrot.slane %v5359_v1, 1  ;;  %v5622_v37 = vrot.slane %v5363_v9, 4  ;;  %v5623_v32 = vrot.slane %v5359_v1, 5  ;;  %v5503_v17 = vsel %vm2304_vm7, %v5500_v57, %v5502_v5 }
 0x429   : > { %v5414_v50 = vpop.permute.xlu0 %5413 }
 0x42a   : > { %v5362_v43 = vsel %vm622_vm0, %v5357_v36, %v5361_v31  ;;  %v5624_v59 = vor.u32 %v5623_v32, %v5622_v37  ;;  %v5365_v16 = vor.u32 %v5363_v9, %v5361_v31  ;;  %v5742_v32 = vsel %vm3271_vm10, %v12251_v7, %v5414_v50 }
 0x42b   : > { %5431 = vrot.lane.b32.xlu0 %v5362_v43, %s8915_s20  ;;  %v5508_v50 = vrot.slane %v12388_v22, 4 }
 0x42c   : > { %v5666_v46 = vpop.permute.xlu1 %5665  ;;  %v5625_v0 = vsel %vm2858_vm9, %v5620_v48, %v5624_v59 }
 0x42d   : > { %5683 = vrot.lane.b32.xlu1 %v5625_v0, %s8915_s20  ;;  %v5049_v30 = vpop.f32.mrb[224].mxu0  ;;  %v5842_v26 = vsel %vm3271_vm10, %v5499_v42, %v5666_v46  ;;  %v5504_v0 = vrot.slane %v12337_v15, 4 }
 0x42e   : > { %v5050_v27 = vadd.f32 %v12472_v60, %v5049_v30  ;;  %v8430_v49 = vpop.f32.mrb[225].mxu0  ;;  %8241 = vmatmul.mubr.msk.bf16.gmra.mrb[52].mxu1 %vm1496_vm5, %v13915_v13  ;;  %6176 = vmatmul.mubr.bf16.gmra.mrb[32].mxu0 %v5736_v54 }
 0x42f   : > { %v5052_v6 = vpop.f32.mrb[226].mxu0  ;;  %6183 = vmatprep.mubr.bf16.mxu0 %v5842_v26  ;;  %8244 = vmatprep.mubr.msk.bf16.mxu1 %vm8913_vm1, %v13804_v40  ;;  %v5505_v13 = vsel %vm2304_vm7, %v5502_v5, %v5504_v0 }
 0x430   : > { %v5053_v18 = vadd.f32 %v12472_v60, %v5052_v6  ;;  %v8431_v48 = vpop.f32.mrb[227].mxu0  ;;  %v5117_v25 = vmax.f32 %v5050_v27, 0.0 }
 0x431   : > { %v13918_v48 = vld [vmem:[#allocation22_spill] sm:$0xff] }
 0x432   : > { %v5118_v11 = vmax.f32 %v5053_v18, 0.0 }
 0x434   : > { %v12543_v61 = vpack.c.bf16 %v5118_v11, %v5117_v25  ;;  %v5668_v29 = vpop.permute.xlu1 %5667 }
 0x435   : > { %v5846_v44 = vsel %vm3271_vm10, %v5501_v23, %v5668_v29 }
 0x436   : > { %v5371_v24 = vshrl.u32 %v12543_v61, 16  ;;  %8245 = vmatmul.mubr.msk.bf16.gmra.mrb[56].mxu1 %vm1496_vm5, %v13916_v47  ;;  %6184 = vmatmul.mubr.bf16.gmra.mrb[36].mxu0 %v5739_v19  ;;  %v5367_v2 = vshll.u32 %v12543_v61, 16  ;;  %v8888_v19 = vld [vmem:[%s13684_s10 + $0x10] sm:$0xff]  }
 0x437   : > { %6191 = vmatprep.mubr.bf16.mxu0 %v5846_v44  ;;  %8248 = vmatprep.mubr.msk.bf16.mxu1 %vm8913_vm1, %v13804_v40  ;;  %v13919_v44 = vld [vmem:[#allocation4_spill] sm:$0xff] }
 0x438   : > { %v5369_v45 = vrot.slane %v5367_v2, 1  ;;  %v5626_v56 = vrot.slane %v5371_v24, 4  ;;  %v5627_v52 = vrot.slane %v5367_v2, 5  ;;  %8578 = vmatpush3.bf16.msra.mxu1 %v8888_v19  ;;  %8441 = vmatpush3.bf16.msra.mxu0 %v8888_v19  ;;  %v13920_v2 = vld [vmem:[#allocation15_spill] sm:$0xff] }
 0x439   : > { %8571 = vmatprep.subr.bf16.mxu1 %v13804_v40  ;;  %8442 = vmatprep.subr.bf16.mxu0 %v13804_v40 }
 0x43a   : > { %v5370_v33 = vsel %vm622_vm0, %v5365_v16, %v5369_v45  ;;  %v5628_v10 = vor.u32 %v5627_v52, %v5626_v56  ;;  %v5373_v26 = vor.u32 %v5371_v24, %v5369_v45  ;;  %v5506_v24 = vrot.slane %v12360_v53, 4 }
 0x43b   : > { %5433 = vrot.lane.b32.xlu0 %v5370_v33, %s8915_s20  ;;  %v5670_v1 = vpop.permute.xlu1 %5669 }
 0x43c   : > { %v5629_v36 = vsel %vm2858_vm9, %v5624_v59, %v5628_v10  ;;  %v5057_v37 = vpop.f32.mrb[228].mxu0  ;;  %v5850_v34 = vsel %vm3271_vm10, %v5503_v17, %v5670_v1  ;;  %v5507_v56 = vsel %vm2304_vm7, %v5504_v0, %v5506_v24  ;;  %v5509_v1 = vsel %vm2304_vm7, %v5506_v24, %v5508_v50  ;;  %v13922_v17 = vld [vmem:[#allocation12_spill] sm:$0xff] }
 0x43d   : > { %5685 = vrot.lane.b32.xlu1 %v5629_v36, %s8915_s20  ;;  %v5058_v9 = vadd.f32 %v12472_v60, %v5057_v37  ;;  %v8434_v31 = vpop.f32.mrb[229].mxu0  ;;  %v5416_v60 = vpop.permute.xlu0 %5415 }
 0x43e   : > { %8249 = vmatmul.mubr.msk.bf16.gmra.mrb[60].mxu1 %vm1496_vm5, %v13917_v51  ;;  %v5060_v43 = vpop.f32.mrb[230].mxu0  ;;  %6192 = vmatmul.mubr.bf16.gmra.mrb[40].mxu0 %v5742_v32  ;;  %v5745_v49 = vsel %vm3271_vm10, %v12274_v55, %v5416_v60 }
 0x43f   : > { %v5119_v46 = vmax.f32 %v5058_v9, 0.0  ;;  %v8435_v59 = vpop.f32.mrb[231].mxu0  ;;  %6199 = vmatprep.mubr.bf16.mxu0 %v5850_v34  ;;  %8252 = vmatprep.mubr.msk.bf16.mxu1 %vm8913_vm1, %v13804_v40  ;;  %v13921_v9 = vld [vmem:[#allocation24_spill] sm:$0xff] }
 0x440   : > { %v13923_v59 = vld [vmem:[#allocation21_spill] sm:$0xff] }
 0x441   : > { %v5148_v7 = vpack.c.bf16 %v5119_v46, %v5119_v46  ;;  %v5418_v55 = vpop.permute.xlu0 %5417  ;;  %v8890_v46 = vld [vmem:[%s13684_s10 + $0x20] sm:$0xff]  }
 0x442   : > { %v5748_v47 = vsel %vm3271_vm10, %v12293_v4, %v5418_v55 }
 0x443   : > { %v12571_v54 = vsel %vm2304_vm7, %v5148_v7, 0  ;;  %v5672_v30 = vpop.permute.xlu1 %5671  ;;  %v13924_v7 = vld [vmem:[#allocation23_spill] sm:$0xff] }
 0x444   : > { %v5374_v42 = vshll.u32 %v12571_v54, 16  ;;  %v5378_v27 = vshrl.u32 %v12571_v54, 16  ;;  %v5854_v57 = vsel %vm3271_vm10, %v5505_v13, %v5672_v30  ;;  %v3211_v0 = vsel %vm2625_vm6, %v13924_v7, %v11906_v39 }
 0x445   : > { %v5420_v52 = vpop.permute.xlu0 %5419 }
 0x446   : > { %v5630_v6 = vrot.slane %v5378_v27, 4  ;;  %v5631_v18 = vrot.slane %v5374_v42, 5  ;;  %8253 = vmatmul.mubr.msk.bf16.gmra.mrb[64].mxu1 %vm1496_vm5, %v13918_v48  ;;  %6200 = vmatmul.mubr.bf16.gmra.mrb[44].mxu0 %v5745_v49  ;;  %v5376_v28 = vrot.slane %v5374_v42, 1  ;;  %v5751_v5 = vsel %vm3271_vm10, %v12318_v14, %v5420_v52  ;;  %v12676_v48 = vld [vmem:[%s13683_s9] ss:$0 sm:$0xff] }
 0x447   : > { %6207 = vmatprep.mubr.bf16.mxu0 %v5854_v57  ;;  %8256 = vmatprep.mubr.msk.bf16.mxu1 %vm8913_vm1, %v13804_v40  ;;  %v5510_v14 = vrot.slane %v12416_v62, 4  ;;  %v12683_v57 = vld [vmem:[%s13679_s5] ss:$0 sm:$0xff] }
 0x448   : > { %v5377_v25 = vsel %vm622_vm0, %v5373_v26, %v5376_v28  ;;  %v5632_v11 = vor.u32 %v5631_v18, %v5630_v6  ;;  %v5380_v23 = vor.u32 %v5378_v27, %v5376_v28 }
 0x449   : > { %5435 = vrot.lane.b32.xlu0 %v5377_v25, %s8915_s20  ;;  %v5511_v36 = vsel %vm2304_vm7, %v5508_v50, %v5510_v14 }
 0x44a   : > { %v5633_v29 = vsel %vm2858_vm9, %v5628_v10, %v5632_v11  ;;  %v5634_v16 = vsel %vm2858_vm9, %v5632_v11, %v13920_v2 }
 0x44b   : > { %5687 = vrot.lane.b32.xlu1 %v5633_v29, %s8915_s20 }
 0x44d   : > { %5437 = vrot.lane.b32.xlu0 %v5380_v23, %s8915_s20  ;;  %v5422_v33 = vpop.permute.xlu0 %5421 }
 0x44e   : > { %8257 = vmatmul.mubr.msk.bf16.gmra.mrb[68].mxu1 %vm1496_vm5, %v13919_v44  ;;  %6208 = vmatmul.mubr.bf16.gmra.mrb[48].mxu0 %v5748_v47  ;;  %v5516_v47 = vrot.slane %v12510_v38, 4 }
 0x44f   : > { %v5674_v45 = vpop.permute.xlu1 %5673  ;;  %5689 = vrot.lane.b32.xlu1 %v5634_v16, %s8915_s20  ;;  %8260 = vmatprep.mubr.msk.bf16.mxu1 %vm8913_vm1, %v13804_v40 }
 0x450   : > { %v5858_v4 = vsel %vm3271_vm10, %v5507_v56, %v5674_v45 }
 0x451   : > { %6215 = vmatprep.mubr.bf16.mxu0 %v5858_v4 }
 0x453   : > { %5691 = vrot.lane.b32.xlu1 %v11729_v3, %s8915_s20 }
 0x456   : > { %8261 = vmatmul.mubr.msk.bf16.gmra.mrb[72].mxu1 %vm1496_vm5, %v11789_v21  ;;  %6216 = vmatmul.mubr.bf16.gmra.mrb[52].mxu0 %v5751_v5  ;;  %v5754_v21 = vsel %vm3271_vm10, %v12337_v15, %v5422_v33 }
 0x457   : > { %8264 = vmatprep.mubr.msk.bf16.mxu1 %vm8913_vm1, %v13804_v40 }
 0x45d   : > { %v5424_v15 = vpop.permute.xlu0 %5423 }
 0x45e   : > { %8265 = vmatmul.mubr.msk.bf16.gmra.mrb[76].mxu1 %vm1496_vm5, %v11815_v41  ;;  %v8889_v41 = vld [vmem:[%s13684_s10 + $0x18] sm:$0xff]   ;;  %v5757_v32 = vsel %vm3271_vm10, %v12360_v53, %v5424_v15 }
 0x45f   : > { %v5676_v10 = vpop.permute.xlu1 %5675  ;;  %8268 = vmatprep.mubr.msk.bf16.mxu1 %vm8913_vm1, %v13804_v40  ;;  %8579 = vmatpush3.bf16.msra.mxu1 %v8889_v41 }
 0x460   : > { %v5862_v3 = vsel %vm3271_vm10, %v5509_v1, %v5676_v10  ;;  %8443 = vmatpush3.bf16.msra.mxu0 %v8889_v41  ;;  %8572 = vmatprep.subr.bf16.mxu1 %v13804_v40 }
 0x461   : > { %6223 = vmatprep.mubr.bf16.mxu0 %v5862_v3  ;;  %8444 = vmatprep.subr.bf16.mxu0 %v13804_v40 }
 0x462   : > { %6224 = vmatmul.mubr.bf16.gmra.mrb[56].mxu0 %v5754_v21 }
 0x463   : > { %8580 = vmatpush3.bf16.msra.mxu1 %v8890_v46 }
 0x464   : > { %8445 = vmatpush3.bf16.msra.mxu0 %v8890_v46  ;;  %8573 = vmatprep.subr.bf16.mxu1 %v13804_v40 }
 0x465   : > { %8446 = vmatprep.subr.bf16.mxu0 %v13804_v40 }
 0x466   : > { %8269 = vmatmul.mubr.msk.bf16.gmra.mrb[80].mxu1 %vm1496_vm5, %v11849_v58 }
 0x467   : > { %8272 = vmatprep.mubr.msk.bf16.mxu1 %vm8913_vm1, %v13804_v40 }
 0x46d   : > { %v5426_v31 = vpop.permute.xlu0 %5425 }
 0x46e   : > { %8273 = vmatmul.mubr.msk.bf16.gmra.mrb[84].mxu1 %vm1496_vm5, %v11873_v20  ;;  %v5512_v20 = vrot.slane %v12444_v8, 4  ;;  %v5760_v34 = vsel %vm3271_vm10, %v12388_v22, %v5426_v31  ;;  %v5514_v22 = vrot.slane %v12482_v35, 4 }
 0x46f   : > { %v5678_v58 = vpop.permute.xlu1 %5677  ;;  %8276 = vmatprep.mubr.msk.bf16.mxu1 %vm8913_vm1, %v13804_v40 }
 0x470   : > { %v5866_v37 = vsel %vm3271_vm10, %v5511_v36, %v5678_v58  ;;  %v5513_v43 = vsel %vm2304_vm7, %v5510_v14, %v5512_v20  ;;  %v5515_v42 = vsel %vm2304_vm7, %v5512_v20, %v5514_v22  ;;  %v5517_v1 = vsel %vm2304_vm7, %v5514_v22, %v5516_v47  ;;  %v8891_v20 = vld [vmem:[%s13684_s10 + $0x28] sm:$0xff]  }
 0x471   : > { %6231 = vmatprep.mubr.bf16.mxu0 %v5866_v37  ;;  %8581 = vmatpush3.bf16.msra.mxu1 %v8891_v20 }
 0x472   : > { %6232 = vmatmul.mubr.bf16.gmra.mrb[60].mxu0 %v5757_v32  ;;  %8574 = vmatprep.subr.bf16.mxu1 %v13804_v40 }
 0x473   : > { %8447 = vmatpush3.bf16.msra.mxu0 %v8891_v20 }
 0x474   : > { %8448 = vmatprep.subr.bf16.mxu0 %v13804_v40 }
 0x476   : > { %8277 = vmatmul.mubr.msk.bf16.gmra.mrb[88].mxu1 %vm1496_vm5, %v13921_v9 }
 0x477   : > { %8280 = vmatprep.mubr.msk.bf16.mxu1 %vm8913_vm1, %v13804_v40 }
 0x47d   : > { %v5428_v60 = vpop.permute.xlu0 %5427 }
 0x47e   : > { %8281 = vmatmul.mubr.msk.bf16.gmra.mrb[92].mxu1 %vm1496_vm5, %v13922_v17  ;;  %v5763_v49 = vsel %vm3271_vm10, %v12416_v62, %v5428_v60 }
 0x47f   : > { %v5680_v51 = vpop.permute.xlu1 %5679  ;;  %8284 = vmatprep.mubr.msk.bf16.mxu1 %vm8913_vm1, %v13804_v40 }
 0x480   : > { %v5870_v53 = vsel %vm3271_vm10, %v5513_v43, %v5680_v51 }
 0x481   : > { %6239 = vmatprep.mubr.bf16.mxu0 %v5870_v53 }
 0x482   : > { %6240 = vmatmul.mubr.bf16.gmra.mrb[64].mxu0 %v5760_v34 }
 0x486   : > { %8285 = vmatmul.mubr.msk.bf16.gmra.mrb[96].mxu1 %vm1496_vm5, %v13923_v59 }
 0x487   : > { %8288 = vmatprep.mubr.msk.bf16.mxu1 %vm8913_vm1, %v13804_v40 }
 0x48d   : > { %v5430_v52 = vpop.permute.xlu0 %5429 }
 0x48e   : > { %8289 = vmatmul.mubr.msk.bf16.gmra.mrb[100].mxu1 %vm1496_vm5, %v3211_v0  ;;  %v5766_v14 = vsel %vm3271_vm10, %v12444_v8, %v5430_v52 }
 0x48f   : > { %v5682_v30 = vpop.permute.xlu1 %5681  ;;  %8292 = vmatprep.mubr.msk.bf16.mxu1 %vm8913_vm1, %v13804_v40 }
 0x490   : > { %v5874_v27 = vsel %vm3271_vm10, %v5515_v42, %v5682_v30 }
 0x491   : > { %6247 = vmatprep.mubr.bf16.mxu0 %v5874_v27  ;;  %v6065_v13 = vpop.f32.mrb[232].mxu0 }
 0x492   : > { %6248 = vmatmul.mubr.bf16.gmra.mrb[68].mxu0 %v5763_v49  ;;  %v6067_v26 = vpop.f32.mrb[233].mxu0  ;;  %v6066_v62 = vadd.f32 %v12676_v48, %v6065_v13 }
 0x493   : > { %v6068_v6 = vpop.f32.mrb[234].mxu0 }
 0x494   : > { %v6070_v18 = vpop.f32.mrb[235].mxu0  ;;  %v6069_v11 = vadd.f32 %v12676_v48, %v6068_v6  ;;  %v6295_v44 = vmax.f32 %v6066_v62, 0.0  ;;  %v5518_v62 = vrot.slane %v12543_v61, 4 }
 0x496   : > { %8293 = vmatmul.mubr.msk.bf16.gmra.mrb[104].mxu1 %vm1496_vm5, %v11906_v39  ;;  %v6296_v5 = vmax.f32 %v6069_v11, 0.0 }
 0x497   : > { %8296 = vmatprep.mubr.msk.bf16.mxu1 %vm8913_vm1, %v13804_v40 }
 0x499   : > { %v4180_v28 = vpop.f32.mrb[0].mxu1  ;;  %v6073_v25 = vpop.f32.mrb[236].mxu0 }
 0x49a   : > { %v8584_v55 = vadd.f32 %v12683_v57, %v4180_v28  ;;  %v8190_v29 = vpop.f32.mrb[1].mxu1  ;;  %v6075_v19 = vpop.f32.mrb[237].mxu0  ;;  %v6074_v3 = vadd.f32 %v12676_v48, %v6073_v25 }
 0x49b   : > { %v4183_v23 = vpop.f32.mrb[2].mxu1  ;;  %v6076_v24 = vpop.f32.mrb[238].mxu0 }
 0x49c   : > { %v4410_v16 = vmax.f32 %v8584_v55, 0.0  ;;  %v8585_v45 = vadd.f32 %v12683_v57, %v4183_v23  ;;  %v6078_v56 = vpop.f32.mrb[239].mxu0  ;;  %v8191_v4 = vpop.f32.mrb[3].mxu1  ;;  %v6077_v31 = vadd.f32 %v12676_v48, %v6076_v24  ;;  %v6297_v43 = vmax.f32 %v6074_v3, 0.0 }
 0x49d   : > { %v5432_v19 = vpop.permute.xlu0 %5431 }
 0x49e   : > { %v6352_v50 = vadd.f32 %v6295_v44, %v4410_v16  ;;  %v4411_v33 = vmax.f32 %v8585_v45, 0.0  ;;  %8297 = vmatmul.mubr.msk.bf16.gmra.mrb[108].mxu1 %vm1496_vm5, %v11906_v39  ;;  %v6298_v22 = vmax.f32 %v6077_v31, 0.0  ;;  %v5519_v45 = vsel %vm2304_vm7, %v5516_v47, %v5518_v62 }
 0x49f   : > { %v5684_v10 = vpop.permute.xlu1 %5683  ;;  %8300 = vmatprep.mubr.msk.bf16.mxu1 %vm8913_vm1, %v13804_v40 }
 0x4a0   : > { %v6353_v21 = vadd.f32 %v6296_v5, %v4411_v33  ;;  %v5878_v41 = vsel %vm3271_vm10, %v5517_v1, %v5684_v10  ;;  %v5769_v5 = vsel %vm3271_vm10, %v12482_v35, %v5432_v19 }
 0x4a1   : > { %6255 = vmatprep.mubr.bf16.mxu0 %v5878_v41  ;;  %v4188_v15 = vpop.f32.mrb[4].mxu1  ;;  %v6081_v58 = vpop.f32.mrb[240].mxu0 }
 0x4a2   : > { %v12703_v36 = vpack.c.bf16 %v6353_v21, %v6352_v50  ;;  %v8586_v37 = vadd.f32 %v12683_v57, %v4188_v15  ;;  %6256 = vmatmul.mubr.bf16.gmra.mrb[72].mxu0 %v5766_v14  ;;  %v8194_v32 = vpop.f32.mrb[5].mxu1  ;;  %v6083_v9 = vpop.f32.mrb[241].mxu0  ;;  %v6082_v0 = vadd.f32 %v12676_v48, %v6081_v58 }
 0x4a3   : > { %v4191_v17 = vpop.f32.mrb[6].mxu1  ;;  %v6084_v51 = vpop.f32.mrb[242].mxu0 }
 0x4a4   : > { %v4412_v8 = vmax.f32 %v8586_v37, 0.0  ;;  %v8195_v53 = vpop.f32.mrb[7].mxu1  ;;  %v6086_v34 = vpop.f32.mrb[243].mxu0  ;;  %v8587_v46 = vadd.f32 %v12683_v57, %v4191_v17  ;;  %v6085_v27 = vadd.f32 %v12676_v48, %v6084_v51  ;;  %v6299_v28 = vmax.f32 %v6082_v0, 0.0 }
 0x4a6   : > { %v6354_v59 = vadd.f32 %v6297_v43, %v4412_v8  ;;  %8301 = vmatmul.mubr.msk.bf16.gmra.mrb[112].mxu1 %vm1496_vm5, %v11906_v39  ;;  %v4413_v7 = vmax.f32 %v8587_v46, 0.0  ;;  %v6300_v23 = vmax.f32 %v6085_v27, 0.0  ;;  %v5520_v43 = vrot.slane %v12571_v54, 4 }
 0x4a7   : > { %8464 = vmatprep.mubr.msk.bf16.mxu1 %vm8913_vm1, %v13804_v40 }
 0x4a8   : > { %v6355_v60 = vadd.f32 %v6298_v22, %v4413_v7 }
 0x4a9   : > { %v4196_v30 = vpop.f32.mrb[8].mxu1  ;;  %v6089_v42 = vpop.f32.mrb[244].mxu0 }
 0x4aa   : > { %v8588_v49 = vadd.f32 %v12683_v57, %v4196_v30  ;;  %v8198_v13 = vpop.f32.mrb[9].mxu1  ;;  %v6091_v26 = vpop.f32.mrb[245].mxu0  ;;  %v12720_v6 = vpack.c.bf16 %v6355_v60, %v6354_v59  ;;  %v6090_v56 = vadd.f32 %v12676_v48, %v6089_v42 }
 0x4ab   : > { %v4199_v18 = vpop.f32.mrb[10].mxu1  ;;  %v6092_v39 = vpop.f32.mrb[246].mxu0 }
 0x4ac   : > { %v4414_v25 = vmax.f32 %v8588_v49, 0.0  ;;  %v8589_v11 = vadd.f32 %v12683_v57, %v4199_v18  ;;  %v6094_v55 = vpop.f32.mrb[247].mxu0  ;;  %v8199_v29 = vpop.f32.mrb[11].mxu1  ;;  %v6093_v1 = vadd.f32 %v12676_v48, %v6092_v39  ;;  %v6301_v15 = vmax.f32 %v6090_v56, 0.0 }
 0x4ad   : > { %v5434_v7 = vpop.permute.xlu0 %5433  ;;  %v5521_v39 = vsel %vm2304_vm7, %v5518_v62, %v5520_v43  ;;  %v8892_v29 = vld [vmem:[%s13684_s10 + $0x30] sm:$0xff]  }
 0x4ae   : > { %v6356_v24 = vadd.f32 %v6299_v28, %v4414_v25  ;;  %v4415_v44 = vmax.f32 %v8589_v11, 0.0  ;;  %v6302_v9 = vmax.f32 %v6093_v1, 0.0  ;;  %v5772_v19 = vsel %vm3271_vm10, %v12510_v38, %v5434_v7  ;;  %8582 = vmatpush3.bf16.msra.mxu1 %v8892_v29  ;;  %8449 = vmatpush3.bf16.msra.mxu0 %v8892_v29 }
 0x4af   : > { %v5686_v16 = vpop.permute.xlu1 %5685  ;;  %8575 = vmatprep.subr.bf16.mxu1 %v13804_v40  ;;  %8450 = vmatprep.subr.bf16.mxu0 %v13804_v40 }
 0x4b0   : > { %v6357_v4 = vadd.f32 %v6300_v23, %v4415_v44  ;;  %v5882_v52 = vsel %vm3271_vm10, %v5519_v45, %v5686_v16 }
 0x4b1   : > { %6263 = vmatprep.mubr.bf16.mxu0 %v5882_v52  ;;  %v4204_v50 = vpop.f32.mrb[12].mxu1  ;;  %v6097_v33 = vpop.f32.mrb[248].mxu0 }
 0x4b2   : > { %v12731_v10 = vpack.c.bf16 %v6357_v4, %v6356_v24  ;;  %v8590_v3 = vadd.f32 %v12683_v57, %v4204_v50  ;;  %6264 = vmatmul.mubr.bf16.gmra.mrb[76].mxu0 %v5769_v5  ;;  %v8202_v21 = vpop.f32.mrb[13].mxu1  ;;  %v6099_v47 = vpop.f32.mrb[249].mxu0  ;;  %v6098_v17 = vadd.f32 %v12676_v48, %v6097_v33  ;;  %v13925_v50 = vld [vmem:[#allocation30_spill] sm:$0xff] }
 0x4b3   : > { %v4207_v41 = vpop.f32.mrb[14].mxu1  ;;  %v6100_v14 = vpop.f32.mrb[250].mxu0  ;;  %v5522_v33 = vsel %vm2304_vm7, %v5520_v43, %v13925_v50 }
 0x4b4   : > { %v4416_v58 = vmax.f32 %v8590_v3, 0.0  ;;  %v8591_v37 = vadd.f32 %v12683_v57, %v4207_v41  ;;  %v8203_v32 = vpop.f32.mrb[15].mxu1  ;;  %v6102_v35 = vpop.f32.mrb[251].mxu0  ;;  %v6101_v0 = vadd.f32 %v12676_v48, %v6100_v14  ;;  %v6303_v30 = vmax.f32 %v6098_v17, 0.0 }
 0x4b6   : > { %v6358_v20 = vadd.f32 %v6301_v15, %v4416_v58  ;;  %v4417_v31 = vmax.f32 %v8591_v37, 0.0  ;;  %v6304_v23 = vmax.f32 %v6101_v0, 0.0 }
 0x4b8   : > { %v6359_v51 = vadd.f32 %v6302_v9, %v4417_v31 }
 0x4b9   : > { %v4212_v8 = vpop.f32.mrb[16].mxu1  ;;  %v6105_v53 = vpop.f32.mrb[252].mxu0 }
 0x4ba   : > { %v12738_v34 = vpack.c.bf16 %v6359_v51, %v6358_v20  ;;  %v8592_v46 = vadd.f32 %v12683_v57, %v4212_v8  ;;  %v8206_v59 = vpop.f32.mrb[17].mxu1  ;;  %v6107_v22 = vpop.f32.mrb[253].mxu0  ;;  %v6106_v62 = vadd.f32 %v12676_v48, %v6105_v53  ;;  %v8893_v8 = vld [vmem:[%s13684_s10 + $0x38] sm:$0xff]  }
 0x4bb   : > { %v6108_v60 = vpop.f32.mrb[254].mxu0  ;;  %v4215_v27 = vpop.f32.mrb[18].mxu1  ;;  %8583 = vmatpush3.bf16.msra.mxu1 %v8893_v8  ;;  %8451 = vmatpush3.bf16.msra.mxu0 %v8893_v8 }
 0x4bc   : > { %v4418_v42 = vmax.f32 %v8592_v46, 0.0  ;;  %v6110_v49 = vpop.f32.mrb[255].mxu0  ;;  %v8593_v13 = vadd.f32 %v12683_v57, %v4215_v27  ;;  %v8207_v26 = vpop.f32.mrb[19].mxu1  ;;  %v6464_v28 = vshll.u32 %v12738_v34, 16  ;;  %v6468_v25 = vshrl.u32 %v12738_v34, 16 }
 0x4bd   : > { %v5688_v18 = vpop.permute.xlu1 %5687  ;;  %v5436_v16 = vpop.permute.xlu0 %5435  ;;  %v6109_v56 = vadd.f32 %v12676_v48, %v6108_v60  ;;  %v6305_v37 = vmax.f32 %v6106_v62, 0.0 }
 0x4be   : > { %v6360_v11 = vadd.f32 %v6303_v30, %v4418_v42  ;;  %v5886_v55 = vsel %vm3271_vm10, %v5521_v39, %v5688_v18  ;;  %v4419_v24 = vmax.f32 %v8593_v13, 0.0  ;;  %v6875_v44 = vrot.slane %v6468_v25, 4 }
 0x4bf   : > { %6271 = vmatprep.mubr.bf16.mxu0 %v5886_v55  ;;  %v6876_v45 = vrot.slane %v6464_v28, 5  ;;  %v12764_v58 = vrot.slane %v6464_v28, 1  ;;  %v6306_v31 = vmax.f32 %v6109_v56, 0.0  ;;  %v5775_v7 = vsel %vm3271_vm10, %v12543_v61, %v5436_v16 }
 0x4c0   : > { %6272 = vmatmul.mubr.bf16.gmra.mrb[80].mxu0 %v5772_v19  ;;  %v6361_v4 = vadd.f32 %v6304_v23, %v4419_v24 }
 0x4c1   : > { %v5690_v52 = vpop.permute.xlu1 %5689  ;;  %v4220_v5 = vpop.f32.mrb[20].mxu1  ;;  %v12759_v47 = vor.u32 %v6876_v45, %v6875_v44  ;;  %v6470_v0 = vor.u32 %v6468_v25, %v12764_v58 }
 0x4c2   : > { %v8594_v38 = vadd.f32 %v12683_v57, %v4220_v5  ;;  %v6113_v1 = vpop.f32.mrb[0].mxu0  ;;  %v8210_v3 = vpop.f32.mrb[21].mxu1  ;;  %v5890_v21 = vsel %vm3271_vm10, %v5522_v33, %v5690_v52  ;;  %v12762_v41 = vpack.c.bf16 %v6361_v4, %v6360_v11 }
 0x4c3   : > { %v6115_v14 = vpop.f32.mrb[1].mxu0  ;;  %v4223_v15 = vpop.f32.mrb[22].mxu1  ;;  %6279 = vmatprep.mubr.bf16.mxu0 %v5890_v21  ;;  %v6114_v27 = vadd.f32 %v12676_v48, %v6113_v1 }
 0x4c4   : > { %v4420_v32 = vmax.f32 %v8594_v38, 0.0  ;;  %v8595_v35 = vadd.f32 %v12683_v57, %v4223_v15  ;;  %v6116_v9 = vpop.f32.mrb[2].mxu0  ;;  %v8211_v20 = vpop.f32.mrb[23].mxu1  ;;  %v6472_v51 = vshll.u32 %v12762_v41, 16  ;;  %v6476_v22 = vshrl.u32 %v12762_v41, 16 }
 0x4c5   : > { %v6118_v17 = vpop.f32.mrb[3].mxu0  ;;  %v5692_v43 = vpop.permute.xlu1 %5691  ;;  %v6117_v61 = vadd.f32 %v12676_v48, %v6116_v9  ;;  %v6307_v24 = vmax.f32 %v6114_v27, 0.0  ;;  %v13775_v56 = vrot.slane %v12762_v41, 4 }
 0x4c6   : > { %v6362_v53 = vadd.f32 %v6305_v37, %v4420_v32  ;;  %v4421_v46 = vmax.f32 %v8595_v35, 0.0  ;;  %v5894_v59 = vsel %vm3271_vm10, %v13925_v50, %v5692_v43  ;;  %v6474_v60 = vrot.slane %v6472_v51, 1  ;;  %v5438_v42 = vpop.permute.xlu0 %5437 }
 0x4c7   : > { %v6880_v30 = vrot.slane %v6472_v51, 5  ;;  %v6879_v13 = vrot.slane %v6476_v22, 4  ;;  %v5778_v38 = vsel %vm3271_vm10, %v12571_v54, %v5438_v42  ;;  %v6308_v1 = vmax.f32 %v6117_v61, 0.0 }
 0x4c8   : > { %v6363_v49 = vadd.f32 %v6306_v31, %v4421_v46  ;;  %6280 = vmatmul.mubr.bf16.gmra.mrb[84].mxu0 %v5775_v7  ;;  %v6475_v18 = vsel %vm622_vm0, %v6470_v0, %v6474_v60  ;;  %v6478_v54 = vor.u32 %v6476_v22, %v6474_v60 }
 0x4c9   : > { %v6121_v26 = vpop.f32.mrb[4].mxu0  ;;  %v4228_v39 = vpop.f32.mrb[24].mxu1  ;;  %6287 = vmatprep.mubr.bf16.mxu0 %v5894_v59  ;;  %6676 = vrot.lane.b32.xlu1 %v6475_v18, %s8916_s27  ;;  %v6881_v29 = vor.u32 %v6880_v30, %v6879_v13 }
 0x4ca   : > { %v12779_v28 = vpack.c.bf16 %v6363_v49, %v6362_v53  ;;  %v8596_v25 = vadd.f32 %v12683_v57, %v4228_v39  ;;  %v8214_v11 = vpop.f32.mrb[25].mxu1  ;;  %v6123_v55 = vpop.f32.mrb[5].mxu0  ;;  %v6122_v35 = vadd.f32 %v12676_v48, %v6121_v26 }
 0x4cb   : > { %v4231_v19 = vpop.f32.mrb[26].mxu1  ;;  %v6124_v23 = vpop.f32.mrb[6].mxu0  ;;  %v12791_v33 = vsel %vm2858_vm9, %v12759_v47, %v6881_v29 }
 0x4cc   : > { %v4422_v44 = vmax.f32 %v8596_v25, 0.0  ;;  %v8597_v62 = vadd.f32 %v12683_v57, %v4231_v19  ;;  %v8215_v16 = vpop.f32.mrb[27].mxu1  ;;  %v6126_v45 = vpop.f32.mrb[7].mxu0  ;;  %v6763_v4 = vrot.slane %v12779_v28, 4  ;;  %v6480_v52 = vshll.u32 %v12779_v28, 16 }
 0x4cd   : > { %v6484_v5 = vshrl.u32 %v12779_v28, 16  ;;  %v6125_v43 = vadd.f32 %v12676_v48, %v6124_v23  ;;  %v6309_v42 = vmax.f32 %v6122_v35, 0.0 }
 0x4ce   : > { %v6364_v3 = vadd.f32 %v6307_v24, %v4422_v44  ;;  %v4423_v21 = vmax.f32 %v8597_v62, 0.0  ;;  %v6764_v14 = vsel %vm2304_vm7, %v13775_v56, %v6763_v4  ;;  %v6884_v37 = vrot.slane %v6480_v52, 5 }
 0x4cf   : > { %v6883_v15 = vrot.slane %v6484_v5, 4  ;;  %v6482_v32 = vrot.slane %v6480_v52, 1  ;;  %6818 = vrot.lane.b32.xlu0 %v6764_v14, %s8915_s20  ;;  %v6310_v39 = vmax.f32 %v6125_v43, 0.0 }
 0x4d0   : > { %v6365_v9 = vadd.f32 %v6308_v1, %v4423_v21  ;;  %6288 = vmatmul.mubr.bf16.gmra.mrb[88].mxu0 %v5778_v38 }
 0x4d1   : > { %v4236_v20 = vpop.f32.mrb[28].mxu1  ;;  %v6129_v31 = vpop.f32.mrb[8].mxu0  ;;  %v6885_v17 = vor.u32 %v6884_v37, %v6883_v15  ;;  %8452 = vmatprep.mubr.msk.bf16.mxu0 %vm8913_vm1, %v13804_v40  ;;  %v6483_v0 = vsel %vm622_vm0, %v6478_v54, %v6482_v32  ;;  %v6486_v45 = vor.u32 %v6484_v5, %v6482_v32 }
 0x4d2   : > { %v12802_v51 = vpack.c.bf16 %v6365_v9, %v6364_v3  ;;  %v8598_v8 = vadd.f32 %v12683_v57, %v4236_v20  ;;  %v8218_v53 = vpop.f32.mrb[29].mxu1  ;;  %v6131_v46 = vpop.f32.mrb[9].mxu0  ;;  %v6130_v23 = vadd.f32 %v12676_v48, %v6129_v31 }
 0x4d3   : > { %v6132_v59 = vpop.f32.mrb[10].mxu0  ;;  %v6886_v7 = vsel %vm2858_vm9, %v6881_v29, %v6885_v17  ;;  %v4239_v30 = vpop.f32.mrb[30].mxu1  ;;  %6678 = vrot.lane.b32.xlu0 %v6483_v0, %s8916_s27 }
 0x4d4   : > { %v4424_v27 = vmax.f32 %v8598_v8, 0.0  ;;  %6986 = vrot.lane.b32.xlu1 %v6886_v7, %s8917_s30  ;;  %v8599_v22 = vadd.f32 %v12683_v57, %v4239_v30  ;;  %v8219_v60 = vpop.f32.mrb[31].mxu1  ;;  %v6134_v49 = vpop.f32.mrb[11].mxu0  ;;  %v6765_v13 = vrot.slane %v12802_v51, 4  ;;  %v6488_v26 = vshll.u32 %v12802_v51, 16 }
 0x4d5   : > { %v6492_v18 = vshrl.u32 %v12802_v51, 16  ;;  %v6133_v52 = vadd.f32 %v12676_v48, %v6132_v59  ;;  %v6311_v35 = vmax.f32 %v6130_v23, 0.0 }
 0x4d6   : > { %v6366_v61 = vadd.f32 %v6309_v42, %v4424_v27  ;;  %v4425_v25 = vmax.f32 %v8599_v22, 0.0  ;;  %v6766_v11 = vsel %vm2304_vm7, %v6763_v4, %v6765_v13  ;;  %v6888_v29 = vrot.slane %v6488_v26, 5 }
 0x4d7   : > { %v6887_v55 = vrot.slane %v6492_v18, 4  ;;  %v6490_v19 = vrot.slane %v6488_v26, 1 }
 0x4d8   : > { %v6367_v24 = vadd.f32 %v6310_v39, %v4425_v25  ;;  %6820 = vrot.lane.b32.xlu1 %v6766_v11, %s8915_s20 }
 0x4d9   : > { %v4244_v44 = vpop.f32.mrb[32].mxu1  ;;  %v6137_v62 = vpop.f32.mrb[12].mxu0  ;;  %v6889_v16 = vor.u32 %v6888_v29, %v6887_v55  ;;  %v6491_v15 = vsel %vm622_vm0, %v6486_v45, %v6490_v19  ;;  %v6494_v49 = vor.u32 %v6492_v18, %v6490_v19 }
 0x4da   : > { %v12818_v38 = vpack.c.bf16 %v6367_v24, %v6366_v61  ;;  %v8600_v1 = vadd.f32 %v12683_v57, %v4244_v44  ;;  %v8222_v3 = vpop.f32.mrb[33].mxu1  ;;  %v6139_v4 = vpop.f32.mrb[13].mxu0  ;;  %v6138_v30 = vadd.f32 %v12676_v48, %v6137_v62 }
 0x4db   : > { %v6140_v21 = vpop.f32.mrb[14].mxu0  ;;  %v6890_v14 = vsel %vm2858_vm9, %v6885_v17, %v6889_v16  ;;  %v4247_v37 = vpop.f32.mrb[34].mxu1  ;;  %v6312_v17 = vmax.f32 %v6133_v52, 0.0 }
 0x4dc   : > { %v4426_v9 = vmax.f32 %v8600_v1, 0.0  ;;  %6988 = vrot.lane.b32.xlu0 %v6890_v14, %s8917_s30  ;;  %6680 = vrot.lane.b32.xlu1 %v6491_v15, %s8916_s27  ;;  %v8601_v5 = vadd.f32 %v12683_v57, %v4247_v37  ;;  %v8223_v32 = vpop.f32.mrb[35].mxu1  ;;  %v6142_v20 = vpop.f32.mrb[15].mxu0  ;;  %v6767_v31 = vrot.slane %v12818_v38, 4  ;;  %v6496_v54 = vshll.u32 %v12818_v38, 16 }
 0x4dd   : > { %v6500_v43 = vshrl.u32 %v12818_v38, 16  ;;  %v6141_v26 = vadd.f32 %v12676_v48, %v6140_v21  ;;  %v6313_v24 = vmax.f32 %v6138_v30, 0.0 }
 0x4de   : > { %v6368_v8 = vadd.f32 %v6311_v35, %v4426_v9  ;;  %v4427_v53 = vmax.f32 %v8601_v5, 0.0  ;;  %v6768_v46 = vsel %vm2304_vm7, %v6765_v13, %v6767_v31  ;;  %v6892_v7 = vrot.slane %v6496_v54, 5 }
 0x4df   : > { %v6891_v59 = vrot.slane %v6500_v43, 4  ;;  %v6498_v0 = vrot.slane %v6496_v54, 1 }
 0x4e0   : > { %v6369_v42 = vadd.f32 %v6312_v17, %v4427_v53  ;;  %6822 = vrot.lane.b32.xlu0 %v6768_v46, %s8915_s20 }
 0x4e1   : > { %v4252_v27 = vpop.f32.mrb[36].mxu1  ;;  %v6145_v22 = vpop.f32.mrb[16].mxu0  ;;  %v6893_v60 = vor.u32 %v6892_v7, %v6891_v59  ;;  %v6499_v29 = vsel %vm622_vm0, %v6494_v49, %v6498_v0  ;;  %v6502_v54 = vor.u32 %v6500_v43, %v6498_v0 }
 0x4e2   : > { %v12833_v39 = vpack.c.bf16 %v6369_v42, %v6368_v8  ;;  %v8602_v61 = vadd.f32 %v12683_v57, %v4252_v27  ;;  %v8226_v25 = vpop.f32.mrb[37].mxu1  ;;  %v6147_v13 = vpop.f32.mrb[17].mxu0  ;;  %v6146_v35 = vadd.f32 %v12676_v48, %v6145_v22 }
 0x4e3   : > { %v6148_v11 = vpop.f32.mrb[18].mxu0  ;;  %v6894_v55 = vsel %vm2858_vm9, %v6889_v16, %v6893_v60  ;;  %v4255_v23 = vpop.f32.mrb[38].mxu1  ;;  %v6314_v16 = vmax.f32 %v6141_v26, 0.0 }
 0x4e4   : > { %v4428_v44 = vmax.f32 %v8602_v61, 0.0  ;;  %6990 = vrot.lane.b32.xlu1 %v6894_v55, %s8917_s30  ;;  %6682 = vrot.lane.b32.xlu0 %v6499_v29, %s8916_s27  ;;  %v8603_v18 = vadd.f32 %v12683_v57, %v4255_v23  ;;  %v8227_v19 = vpop.f32.mrb[39].mxu1  ;;  %v6150_v62 = vpop.f32.mrb[19].mxu0  ;;  %v6769_v45 = vrot.slane %v12833_v39, 4  ;;  %v6504_v52 = vshll.u32 %v12833_v39, 16 }
 0x4e5   : > { %v6508_v1 = vshrl.u32 %v12833_v39, 16  ;;  %v6149_v17 = vadd.f32 %v12676_v48, %v6148_v11  ;;  %v6315_v27 = vmax.f32 %v6146_v35, 0.0 }
 0x4e6   : > { %v6370_v3 = vadd.f32 %v6313_v24, %v4428_v44  ;;  %v4429_v4 = vmax.f32 %v8603_v18, 0.0  ;;  %v6770_v21 = vsel %vm2304_vm7, %v6767_v31, %v6769_v45  ;;  %v6896_v15 = vrot.slane %v6504_v52, 5 }
 0x4e7   : > { %v6895_v14 = vrot.slane %v6508_v1, 4  ;;  %v6506_v37 = vrot.slane %v6504_v52, 1 }
 0x4e8   : > { %v6371_v9 = vadd.f32 %v6314_v16, %v4429_v4  ;;  %6824 = vrot.lane.b32.xlu1 %v6770_v21, %s8915_s20 }
 0x4e9   : > { %v4260_v5 = vpop.f32.mrb[40].mxu1  ;;  %v6153_v32 = vpop.f32.mrb[20].mxu0  ;;  %v6897_v20 = vor.u32 %v6896_v15, %v6895_v14  ;;  %v6507_v30 = vsel %vm622_vm0, %v6502_v54, %v6506_v37  ;;  %v6510_v16 = vor.u32 %v6508_v1, %v6506_v37 }
 0x4ea   : > { %v12848_v8 = vpack.c.bf16 %v6371_v9, %v6370_v3  ;;  %v8604_v53 = vadd.f32 %v12683_v57, %v4260_v5  ;;  %v8230_v46 = vpop.f32.mrb[41].mxu1  ;;  %v6155_v31 = vpop.f32.mrb[21].mxu0  ;;  %v6154_v44 = vadd.f32 %v12676_v48, %v6153_v32 }
 0x4eb   : > { %v6156_v59 = vpop.f32.mrb[22].mxu0  ;;  %v6898_v7 = vsel %vm2858_vm9, %v6893_v60, %v6897_v20  ;;  %v4263_v42 = vpop.f32.mrb[42].mxu1  ;;  %v6316_v60 = vmax.f32 %v6149_v17, 0.0 }
 0x4ec   : > { %v4430_v22 = vmax.f32 %v8604_v53, 0.0  ;;  %6992 = vrot.lane.b32.xlu0 %v6898_v7, %s8917_s30  ;;  %6684 = vrot.lane.b32.xlu1 %v6507_v30, %s8916_s27  ;;  %v8605_v43 = vadd.f32 %v12683_v57, %v4263_v42  ;;  %v8231_v0 = vpop.f32.mrb[43].mxu1  ;;  %v6158_v49 = vpop.f32.mrb[23].mxu0  ;;  %v6771_v26 = vrot.slane %v12848_v8, 4  ;;  %v6512_v61 = vshll.u32 %v12848_v8, 16 }
 0x4ed   : > { %v6516_v25 = vshrl.u32 %v12848_v8, 16  ;;  %v6157_v3 = vadd.f32 %v12676_v48, %v6156_v59  ;;  %v6317_v32 = vmax.f32 %v6154_v44, 0.0 }
 0x4ee   : > { %v6372_v13 = vadd.f32 %v6315_v27, %v4430_v22  ;;  %v4431_v11 = vmax.f32 %v8605_v43, 0.0  ;;  %v6772_v55 = vsel %vm2304_vm7, %v6769_v45, %v6771_v26  ;;  %v6900_v23 = vrot.slane %v6512_v61, 5 }
 0x4ef   : > { %v6899_v29 = vrot.slane %v6516_v25, 4  ;;  %v6514_v24 = vrot.slane %v6512_v61, 1 }
 0x4f0   : > { %v6373_v18 = vadd.f32 %v6316_v60, %v4431_v11  ;;  %6826 = vrot.lane.b32.xlu0 %v6772_v55, %s8915_s20 }
 0x4f1   : > { %v4268_v19 = vpop.f32.mrb[44].mxu1  ;;  %v6161_v62 = vpop.f32.mrb[24].mxu0  ;;  %v6901_v52 = vor.u32 %v6900_v23, %v6899_v29  ;;  %v6515_v9 = vsel %vm622_vm0, %v6510_v16, %v6514_v24 }
 0x4f2   : > { %v12863_v4 = vpack.c.bf16 %v6373_v18, %v6372_v13  ;;  %v8606_v21 = vadd.f32 %v12683_v57, %v4268_v19  ;;  %v8234_v14 = vpop.f32.mrb[45].mxu1  ;;  %v6163_v45 = vpop.f32.mrb[25].mxu0  ;;  %v6162_v43 = vadd.f32 %v12676_v48, %v6161_v62  ;;  %v6518_v13 = vor.u32 %v6516_v25, %v6514_v24 }
 0x4f3   : > { %v6164_v15 = vpop.f32.mrb[26].mxu0  ;;  %v6902_v35 = vsel %vm2858_vm9, %v6897_v20, %v6901_v52  ;;  %v4271_v5 = vpop.f32.mrb[46].mxu1  ;;  %v6318_v20 = vmax.f32 %v6157_v3, 0.0 }
 0x4f4   : > { %v4432_v54 = vmax.f32 %v8606_v21, 0.0  ;;  %6994 = vrot.lane.b32.xlu1 %v6902_v35, %s8917_s30  ;;  %6686 = vrot.lane.b32.xlu0 %v6515_v9, %s8916_s27  ;;  %v8607_v1 = vadd.f32 %v12683_v57, %v4271_v5  ;;  %v8235_v37 = vpop.f32.mrb[47].mxu1  ;;  %v6166_v17 = vpop.f32.mrb[27].mxu0  ;;  %v6773_v53 = vrot.slane %v12863_v4, 4  ;;  %v6520_v46 = vshll.u32 %v12863_v4, 16 }
 0x4f5   : > { %v6524_v31 = vshrl.u32 %v12863_v4, 16  ;;  %v6165_v11 = vadd.f32 %v12676_v48, %v6164_v15  ;;  %v6319_v16 = vmax.f32 %v6162_v43, 0.0 }
 0x4f6   : > { %v6374_v59 = vadd.f32 %v6317_v32, %v4432_v54  ;;  %v4433_v7 = vmax.f32 %v8607_v1, 0.0  ;;  %v6774_v30 = vsel %vm2304_vm7, %v6771_v26, %v6773_v53  ;;  %v6904_v27 = vrot.slane %v6520_v46, 5 }
 0x4f7   : > { %v6903_v42 = vrot.slane %v6524_v31, 4  ;;  %v6522_v22 = vrot.slane %v6520_v46, 1 }
 0x4f8   : > { %v6375_v0 = vadd.f32 %v6318_v20, %v4433_v7  ;;  %6828 = vrot.lane.b32.xlu1 %v6774_v30, %s8915_s20 }
 0x4f9   : > { %v4276_v49 = vpop.f32.mrb[48].mxu1  ;;  %v6169_v61 = vpop.f32.mrb[28].mxu0  ;;  %v6905_v60 = vor.u32 %v6904_v27, %v6903_v42  ;;  %v6523_v19 = vsel %vm622_vm0, %v6518_v13, %v6522_v22  ;;  %v6526_v7 = vor.u32 %v6524_v31, %v6522_v22 }
 0x4fa   : > { %v12878_v55 = vpack.c.bf16 %v6375_v0, %v6374_v59  ;;  %v8608_v29 = vadd.f32 %v12683_v57, %v4276_v49  ;;  %v8238_v23 = vpop.f32.mrb[49].mxu1  ;;  %v6171_v26 = vpop.f32.mrb[29].mxu0  ;;  %v6170_v37 = vadd.f32 %v12676_v48, %v6169_v61 }
 0x4fb   : > { %v6172_v44 = vpop.f32.mrb[30].mxu0  ;;  %v6906_v18 = vsel %vm2858_vm9, %v6901_v52, %v6905_v60  ;;  %v4279_v62 = vpop.f32.mrb[50].mxu1  ;;  %v6320_v52 = vmax.f32 %v6165_v11, 0.0 }
 0x4fc   : > { %v4434_v3 = vmax.f32 %v8608_v29, 0.0  ;;  %6996 = vrot.lane.b32.xlu0 %v6906_v18, %s8917_s30  ;;  %6688 = vrot.lane.b32.xlu1 %v6523_v19, %s8916_s27  ;;  %v8609_v25 = vadd.f32 %v12683_v57, %v4279_v62  ;;  %v8239_v24 = vpop.f32.mrb[51].mxu1  ;;  %v6174_v21 = vpop.f32.mrb[31].mxu0  ;;  %v6775_v14 = vrot.slane %v12878_v55, 4  ;;  %v6528_v45 = vshll.u32 %v12878_v55, 16 }
 0x4fd   : > { %v6532_v15 = vshrl.u32 %v12878_v55, 16  ;;  %v6173_v30 = vadd.f32 %v12676_v48, %v6172_v44  ;;  %v6321_v11 = vmax.f32 %v6170_v37, 0.0 }
 0x4fe   : > { %v6376_v35 = vadd.f32 %v6319_v16, %v4434_v3  ;;  %v4435_v9 = vmax.f32 %v8609_v25, 0.0  ;;  %v6776_v5 = vsel %vm2304_vm7, %v6773_v53, %v6775_v14  ;;  %v6908_v54 = vrot.slane %v6528_v45, 5 }
 0x4ff   : > { %v6907_v32 = vrot.slane %v6532_v15, 4  ;;  %v6530_v1 = vrot.slane %v6528_v45, 1 }
 0x500   : > { %v6377_v17 = vadd.f32 %v6320_v52, %v4435_v9  ;;  %6830 = vrot.lane.b32.xlu0 %v6776_v5, %s8915_s20 }
 0x501   : > { %v4284_v46 = vpop.f32.mrb[52].mxu1  ;;  %v6177_v20 = vpop.f32.mrb[32].mxu0  ;;  %v6909_v59 = vor.u32 %v6908_v54, %v6907_v32  ;;  %v6531_v61 = vsel %vm622_vm0, %v6526_v7, %v6530_v1  ;;  %v6534_v5 = vor.u32 %v6532_v15, %v6530_v1 }
 0x502   : > { %v12893_v42 = vpack.c.bf16 %v6377_v17, %v6376_v35  ;;  %v8610_v27 = vadd.f32 %v12683_v57, %v4284_v46  ;;  %v8242_v43 = vpop.f32.mrb[53].mxu1  ;;  %v6179_v53 = vpop.f32.mrb[33].mxu0  ;;  %v6178_v21 = vadd.f32 %v12676_v48, %v6177_v20 }
 0x503   : > { %v6180_v0 = vpop.f32.mrb[34].mxu0  ;;  %v6910_v49 = vsel %vm2858_vm9, %v6905_v60, %v6909_v59  ;;  %v4287_v13 = vpop.f32.mrb[54].mxu1  ;;  %v6322_v60 = vmax.f32 %v6173_v30, 0.0 }
 0x504   : > { %v4436_v29 = vmax.f32 %v8610_v27, 0.0  ;;  %6998 = vrot.lane.b32.xlu1 %v6910_v49, %s8917_s30  ;;  %6690 = vrot.lane.b32.xlu0 %v6531_v61, %s8916_s27  ;;  %v8611_v31 = vadd.f32 %v12683_v57, %v4287_v13  ;;  %v8243_v22 = vpop.f32.mrb[55].mxu1  ;;  %v6182_v23 = vpop.f32.mrb[35].mxu0  ;;  %v6777_v26 = vrot.slane %v12893_v42, 4  ;;  %v6536_v44 = vshll.u32 %v12893_v42, 16 }
 0x505   : > { %v6540_v18 = vshrl.u32 %v12893_v42, 16  ;;  %v6181_v32 = vadd.f32 %v12676_v48, %v6180_v0  ;;  %v6323_v27 = vmax.f32 %v6178_v21, 0.0 }
 0x506   : > { %v6378_v19 = vadd.f32 %v6321_v11, %v4436_v29  ;;  %v4437_v62 = vmax.f32 %v8611_v31, 0.0  ;;  %v6778_v16 = vsel %vm2304_vm7, %v6775_v14, %v6777_v26  ;;  %v6912_v25 = vrot.slane %v6536_v44, 5 }
 0x507   : > { %v6911_v3 = vrot.slane %v6540_v18, 4  ;;  %v6538_v24 = vrot.slane %v6536_v44, 1 }
 0x508   : > { %v6379_v45 = vadd.f32 %v6322_v60, %v4437_v62  ;;  %6832 = vrot.lane.b32.xlu1 %v6778_v16, %s8915_s20 }
 0x509   : > { %v4292_v52 = vpop.f32.mrb[56].mxu1  ;;  %v6185_v35 = vpop.f32.mrb[36].mxu0  ;;  %v6913_v9 = vor.u32 %v6912_v25, %v6911_v3  ;;  %v6539_v20 = vsel %vm622_vm0, %v6534_v5, %v6538_v24  ;;  %v6542_v3 = vor.u32 %v6540_v18, %v6538_v24 }
 0x50a   : > { %v12908_v54 = vpack.c.bf16 %v6379_v45, %v6378_v19  ;;  %v8612_v37 = vadd.f32 %v12683_v57, %v4292_v52  ;;  %v8246_v17 = vpop.f32.mrb[57].mxu1  ;;  %v6187_v14 = vpop.f32.mrb[37].mxu0  ;;  %v6186_v44 = vadd.f32 %v12676_v48, %v6185_v35 }
 0x50b   : > { %v6188_v46 = vpop.f32.mrb[38].mxu0  ;;  %v6914_v7 = vsel %vm2858_vm9, %v6909_v59, %v6913_v9  ;;  %v4295_v30 = vpop.f32.mrb[58].mxu1  ;;  %v6324_v59 = vmax.f32 %v6181_v32, 0.0 }
 0x50c   : > { %v4438_v43 = vmax.f32 %v8612_v37, 0.0  ;;  %7000 = vrot.lane.b32.xlu0 %v6914_v7, %s8917_s30  ;;  %6692 = vrot.lane.b32.xlu1 %v6539_v20, %s8916_s27  ;;  %v8613_v15 = vadd.f32 %v12683_v57, %v4295_v30  ;;  %v8247_v1 = vpop.f32.mrb[59].mxu1  ;;  %v6190_v53 = vpop.f32.mrb[39].mxu0  ;;  %v6779_v0 = vrot.slane %v12908_v54, 4  ;;  %v6544_v49 = vshll.u32 %v12908_v54, 16 }
 0x50d   : > { %v6548_v61 = vshrl.u32 %v12908_v54, 16  ;;  %v6189_v25 = vadd.f32 %v12676_v48, %v6188_v46  ;;  %v6325_v17 = vmax.f32 %v6186_v44, 0.0 }
 0x50e   : > { %v6380_v13 = vadd.f32 %v6323_v27, %v4438_v43  ;;  %v4439_v11 = vmax.f32 %v8613_v15, 0.0  ;;  %v6780_v29 = vsel %vm2304_vm7, %v6777_v26, %v6779_v0  ;;  %v6916_v22 = vrot.slane %v6544_v49, 5 }
 0x50f   : > { %v6915_v31 = vrot.slane %v6548_v61, 4  ;;  %v6546_v23 = vrot.slane %v6544_v49, 1 }
 0x510   : > { %v6381_v60 = vadd.f32 %v6324_v59, %v4439_v11  ;;  %6834 = vrot.lane.b32.xlu0 %v6780_v29, %s8915_s20 }
 0x511   : > { %v4300_v19 = vpop.f32.mrb[60].mxu1  ;;  %v6193_v62 = vpop.f32.mrb[40].mxu0  ;;  %v6917_v16 = vor.u32 %v6916_v22, %v6915_v31  ;;  %v6547_v35 = vsel %vm622_vm0, %v6542_v3, %v6546_v23  ;;  %v6550_v31 = vor.u32 %v6548_v61, %v6546_v23  ;;  %v12940_v22 = vld [vmem:[%s13683_s9] ss:$0 sm:$0xff] }
 0x512   : > { %v12923_v21 = vpack.c.bf16 %v6381_v60, %v6380_v13  ;;  %v8614_v45 = vadd.f32 %v12683_v57, %v4300_v19  ;;  %v8250_v52 = vpop.f32.mrb[61].mxu1  ;;  %v6195_v26 = vpop.f32.mrb[41].mxu0  ;;  %v6194_v59 = vadd.f32 %v12676_v48, %v6193_v62  ;;  %v12948_v48 = vld [vmem:[%s13679_s5] ss:$0 sm:$0xff] }
 0x513   : > { %v6196_v5 = vpop.f32.mrb[42].mxu0  ;;  %v6918_v32 = vsel %vm2858_vm9, %v6913_v9, %v6917_v16  ;;  %v4303_v37 = vpop.f32.mrb[62].mxu1  ;;  %v6326_v9 = vmax.f32 %v6189_v25, 0.0 }
 0x514   : > { %v4440_v14 = vmax.f32 %v8614_v45, 0.0  ;;  %7002 = vrot.lane.b32.xlu1 %v6918_v32, %s8917_s30  ;;  %6694 = vrot.lane.b32.xlu0 %v6547_v35, %s8916_s27  ;;  %v8615_v18 = vadd.f32 %v12683_v57, %v4303_v37  ;;  %v8251_v24 = vpop.f32.mrb[63].mxu1  ;;  %v6198_v46 = vpop.f32.mrb[43].mxu0  ;;  %v6781_v7 = vrot.slane %v12923_v21, 4  ;;  %v6552_v20 = vshll.u32 %v12923_v21, 16 }
 0x515   : > { %v6556_v30 = vshrl.u32 %v12923_v21, 16  ;;  %v6197_v44 = vadd.f32 %v12940_v22, %v6196_v5  ;;  %v6327_v45 = vmax.f32 %v6194_v59, 0.0 }
 0x516   : > { %v6382_v27 = vadd.f32 %v6325_v17, %v4440_v14  ;;  %v4441_v43 = vmax.f32 %v8615_v18, 0.0  ;;  %v6782_v15 = vsel %vm2304_vm7, %v6779_v0, %v6781_v7  ;;  %v6920_v53 = vrot.slane %v6552_v20, 5 }
 0x517   : > { %v6919_v1 = vrot.slane %v6556_v30, 4  ;;  %v6554_v49 = vrot.slane %v6552_v20, 1 }
 0x518   : > { %v6383_v13 = vadd.f32 %v6326_v9, %v4441_v43  ;;  %6836 = vrot.lane.b32.xlu1 %v6782_v15, %s8915_s20 }
 0x519   : > { %v4308_v57 = vpop.f32.mrb[64].mxu1  ;;  %v6201_v11 = vpop.f32.mrb[44].mxu0  ;;  %v6921_v29 = vor.u32 %v6920_v53, %v6919_v1  ;;  %v6555_v23 = vsel %vm622_vm0, %v6550_v31, %v6554_v49  ;;  %v6558_v59 = vor.u32 %v6556_v30, %v6554_v49 }
 0x51a   : > { %v12943_v0 = vpack.c.bf16 %v6383_v13, %v6382_v27  ;;  %v8616_v60 = vadd.f32 %v12948_v48, %v4308_v57  ;;  %v8254_v19 = vpop.f32.mrb[65].mxu1  ;;  %v6203_v62 = vpop.f32.mrb[45].mxu0  ;;  %v6202_v27 = vadd.f32 %v12940_v22, %v6201_v11 }
 0x51b   : > { %v6204_v3 = vpop.f32.mrb[46].mxu0  ;;  %v6922_v61 = vsel %vm2858_vm9, %v6917_v16, %v6921_v29  ;;  %v4311_v25 = vpop.f32.mrb[66].mxu1  ;;  %v6328_v16 = vmax.f32 %v6197_v44, 0.0 }
 0x51c   : > { %v4442_v52 = vmax.f32 %v8616_v60, 0.0  ;;  %7004 = vrot.lane.b32.xlu0 %v6922_v61, %s8917_s30  ;;  %6696 = vrot.lane.b32.xlu1 %v6555_v23, %s8916_s27  ;;  %v8617_v26 = vadd.f32 %v12948_v48, %v4311_v25  ;;  %v8255_v5 = vpop.f32.mrb[67].mxu1  ;;  %v6206_v32 = vpop.f32.mrb[47].mxu0  ;;  %v6783_v35 = vrot.slane %v12943_v0, 4  ;;  %v6560_v37 = vshll.u32 %v12943_v0, 16 }
 0x51d   : > { %v6564_v17 = vshrl.u32 %v12943_v0, 16  ;;  %v6205_v13 = vadd.f32 %v12940_v22, %v6204_v3  ;;  %v6329_v61 = vmax.f32 %v6202_v27, 0.0 }
 0x51e   : > { %v6384_v14 = vadd.f32 %v6327_v45, %v4442_v52  ;;  %v4443_v18 = vmax.f32 %v8617_v26, 0.0  ;;  %v6784_v24 = vsel %vm2304_vm7, %v6781_v7, %v6783_v35  ;;  %v6924_v20 = vrot.slane %v6560_v37, 5 }
 0x51f   : > { %v6923_v46 = vrot.slane %v6564_v17, 4  ;;  %v6562_v9 = vrot.slane %v6560_v37, 1 }
 0x520   : > { %v6385_v43 = vadd.f32 %v6328_v16, %v4443_v18  ;;  %6838 = vrot.lane.b32.xlu0 %v6784_v24, %s8915_s20 }
 0x521   : > { %v4316_v15 = vpop.f32.mrb[68].mxu1  ;;  %v6209_v1 = vpop.f32.mrb[48].mxu0  ;;  %v6925_v53 = vor.u32 %v6924_v20, %v6923_v46  ;;  %v6563_v11 = vsel %vm622_vm0, %v6558_v59, %v6562_v9 }
 0x522   : > { %v12963_v57 = vpack.c.bf16 %v6385_v43, %v6384_v14  ;;  %v8618_v31 = vadd.f32 %v12948_v48, %v4316_v15  ;;  %v8258_v44 = vpop.f32.mrb[69].mxu1  ;;  %v6211_v7 = vpop.f32.mrb[49].mxu0  ;;  %v6210_v18 = vadd.f32 %v12940_v22, %v6209_v1  ;;  %v6566_v43 = vor.u32 %v6564_v17, %v6562_v9 }
 0x523   : > { %v6212_v60 = vpop.f32.mrb[50].mxu0  ;;  %v6926_v19 = vsel %vm2858_vm9, %v6921_v29, %v6925_v53  ;;  %v4319_v62 = vpop.f32.mrb[70].mxu1  ;;  %v6330_v29 = vmax.f32 %v6205_v13, 0.0 }
 0x524   : > { %v4444_v23 = vmax.f32 %v8618_v31, 0.0  ;;  %7006 = vrot.lane.b32.xlu1 %v6926_v19, %s8917_s30  ;;  %6698 = vrot.lane.b32.xlu0 %v6563_v11, %s8916_s27  ;;  %v8619_v30 = vadd.f32 %v12948_v48, %v4319_v62  ;;  %v8259_v49 = vpop.f32.mrb[71].mxu1  ;;  %v6214_v3 = vpop.f32.mrb[51].mxu0  ;;  %v6785_v25 = vrot.slane %v12963_v57, 4  ;;  %v6568_v45 = vshll.u32 %v12963_v57, 16 }
 0x525   : > { %v6572_v52 = vshrl.u32 %v12963_v57, 16  ;;  %v6213_v15 = vadd.f32 %v12940_v22, %v6212_v60  ;;  %v6331_v11 = vmax.f32 %v6210_v18, 0.0 }
 0x526   : > { %v6386_v26 = vadd.f32 %v6329_v61, %v4444_v23  ;;  %v4445_v5 = vmax.f32 %v8619_v30, 0.0  ;;  %v6786_v32 = vsel %vm2304_vm7, %v6783_v35, %v6785_v25  ;;  %v6928_v16 = vrot.slane %v6568_v45, 5 }
 0x527   : > { %v6927_v37 = vrot.slane %v6572_v52, 4  ;;  %v6570_v14 = vrot.slane %v6568_v45, 1 }
 0x528   : > { %v6387_v24 = vadd.f32 %v6330_v29, %v4445_v5  ;;  %6840 = vrot.lane.b32.xlu1 %v6786_v32, %s8915_s20 }
 0x529   : > { %v4324_v46 = vpop.f32.mrb[72].mxu1  ;;  %v6217_v20 = vpop.f32.mrb[52].mxu0  ;;  %v6929_v27 = vor.u32 %v6928_v16, %v6927_v37  ;;  %v6571_v1 = vsel %vm622_vm0, %v6566_v43, %v6570_v14 }
 0x52a   : > { %v12978_v59 = vpack.c.bf16 %v6387_v24, %v6386_v26  ;;  %v8620_v13 = vadd.f32 %v12948_v48, %v4324_v46  ;;  %v8262_v31 = vpop.f32.mrb[73].mxu1  ;;  %v6219_v35 = vpop.f32.mrb[53].mxu0  ;;  %v6218_v3 = vadd.f32 %v12940_v22, %v6217_v20  ;;  %v6574_v24 = vor.u32 %v6572_v52, %v6570_v14 }
 0x52b   : > { %v6220_v44 = vpop.f32.mrb[54].mxu0  ;;  %v6930_v7 = vsel %vm2858_vm9, %v6925_v53, %v6929_v27  ;;  %v4327_v19 = vpop.f32.mrb[74].mxu1  ;;  %v6332_v53 = vmax.f32 %v6213_v15, 0.0 }
 0x52c   : > { %v4446_v62 = vmax.f32 %v8620_v13, 0.0  ;;  %7008 = vrot.lane.b32.xlu0 %v6930_v7, %s8917_s30  ;;  %6700 = vrot.lane.b32.xlu1 %v6571_v1, %s8916_s27  ;;  %v8621_v17 = vadd.f32 %v12948_v48, %v4327_v19  ;;  %v8263_v9 = vpop.f32.mrb[75].mxu1  ;;  %v6222_v60 = vpop.f32.mrb[55].mxu0  ;;  %v6787_v61 = vrot.slane %v12978_v59, 4  ;;  %v6576_v23 = vshll.u32 %v12978_v59, 16 }
 0x52d   : > { %v6580_v30 = vshrl.u32 %v12978_v59, 16  ;;  %v6221_v46 = vadd.f32 %v12940_v22, %v6220_v44  ;;  %v6333_v20 = vmax.f32 %v6218_v3, 0.0 }
 0x52e   : > { %v6388_v49 = vadd.f32 %v6331_v11, %v4446_v62  ;;  %v4447_v45 = vmax.f32 %v8621_v17, 0.0  ;;  %v6788_v29 = vsel %vm2304_vm7, %v6785_v25, %v6787_v61  ;;  %v6932_v5 = vrot.slane %v6576_v23, 5 }
 0x52f   : > { %v6931_v26 = vrot.slane %v6580_v30, 4  ;;  %v6578_v32 = vrot.slane %v6576_v23, 1  ;;  %v6334_v62 = vmax.f32 %v6221_v46, 0.0 }
 0x530   : > { %v6389_v37 = vadd.f32 %v6332_v53, %v4447_v45  ;;  %6842 = vrot.lane.b32.xlu0 %v6788_v29, %s8915_s20 }
 0x531   : > { %v4332_v16 = vpop.f32.mrb[76].mxu1  ;;  %v6933_v18 = vor.u32 %v6932_v5, %v6931_v26  ;;  %v6579_v25 = vsel %vm622_vm0, %v6574_v24, %v6578_v32  ;;  %v6582_v24 = vor.u32 %v6580_v30, %v6578_v32 }
 0x532   : > { %v12993_v43 = vpack.c.bf16 %v6389_v37, %v6388_v49  ;;  %v8622_v15 = vadd.f32 %v12948_v48, %v4332_v16  ;;  %v8266_v13 = vpop.f32.mrb[77].mxu1 }
 0x533   : > { %v6934_v31 = vsel %vm2858_vm9, %v6929_v27, %v6933_v18  ;;  %v4335_v35 = vpop.f32.mrb[78].mxu1 }
 0x534   : > { %v4448_v7 = vmax.f32 %v8622_v15, 0.0  ;;  %7010 = vrot.lane.b32.xlu1 %v6934_v31, %s8917_s30  ;;  %6702 = vrot.lane.b32.xlu0 %v6579_v25, %s8916_s27  ;;  %v8623_v52 = vadd.f32 %v12948_v48, %v4335_v35  ;;  %v8267_v14 = vpop.f32.mrb[79].mxu1  ;;  %v6789_v44 = vrot.slane %v12993_v43, 4  ;;  %v6584_v1 = vshll.u32 %v12993_v43, 16 }
 0x535   : > { %v6225_v19 = vpop.f32.mrb[56].mxu0  ;;  %v6588_v11 = vshrl.u32 %v12993_v43, 16 }
 0x536   : > { %v6390_v27 = vadd.f32 %v6333_v20, %v4448_v7  ;;  %v4449_v17 = vmax.f32 %v8623_v52, 0.0  ;;  %v6227_v9 = vpop.f32.mrb[57].mxu0  ;;  %v6790_v60 = vsel %vm2304_vm7, %v6787_v61, %v6789_v44  ;;  %v6226_v23 = vadd.f32 %v12940_v22, %v6225_v19 }
 0x537   : > { %v6228_v53 = vpop.f32.mrb[58].mxu0  ;;  %v6935_v49 = vrot.slane %v6588_v11, 4  ;;  %v6936_v3 = vrot.slane %v6584_v1, 5  ;;  %v6586_v45 = vrot.slane %v6584_v1, 1 }
 0x538   : > { %v6391_v29 = vadd.f32 %v6334_v62, %v4449_v17  ;;  %v6230_v26 = vpop.f32.mrb[59].mxu0  ;;  %6844 = vrot.lane.b32.xlu1 %v6790_v60, %s8915_s20  ;;  %v6229_v5 = vadd.f32 %v12940_v22, %v6228_v53  ;;  %v6335_v13 = vmax.f32 %v6226_v23, 0.0 }
 0x539   : > { %v4340_v37 = vpop.f32.mrb[80].mxu1  ;;  %v6937_v16 = vor.u32 %v6936_v3, %v6935_v49  ;;  %v6587_v31 = vsel %vm622_vm0, %v6582_v24, %v6586_v45  ;;  %v6590_v3 = vor.u32 %v6588_v11, %v6586_v45 }
 0x53a   : > { %v13008_v46 = vpack.c.bf16 %v6391_v29, %v6390_v27  ;;  %v8624_v15 = vadd.f32 %v12948_v48, %v4340_v37  ;;  %v8270_v61 = vpop.f32.mrb[81].mxu1  ;;  %v6336_v14 = vmax.f32 %v6229_v5, 0.0 }
 0x53b   : > { %v6938_v20 = vsel %vm2858_vm9, %v6933_v18, %v6937_v16  ;;  %v4343_v25 = vpop.f32.mrb[82].mxu1  ;;  %v6677_v23 = vpop.permute.xlu1 %6676 }
 0x53c   : > { %v4450_v35 = vmax.f32 %v8624_v15, 0.0  ;;  %7012 = vrot.lane.b32.xlu0 %v6938_v20, %s8917_s30  ;;  %6704 = vrot.lane.b32.xlu1 %v6587_v31, %s8916_s27  ;;  %v8625_v7 = vadd.f32 %v12948_v48, %v4343_v25  ;;  %v8271_v52 = vpop.f32.mrb[83].mxu1  ;;  %v6791_v30 = vrot.slane %v13008_v46, 4  ;;  %v6592_v32 = vshll.u32 %v13008_v46, 16 }
 0x53d   : > { %v6596_v1 = vshrl.u32 %v13008_v46, 16 }
 0x53e   : > { %v6392_v19 = vadd.f32 %v6335_v13, %v4450_v35  ;;  %v4451_v18 = vmax.f32 %v8625_v7, 0.0  ;;  %v6792_v62 = vsel %vm2304_vm7, %v6789_v44, %v6791_v30  ;;  %v6940_v27 = vrot.slane %v6592_v32, 5 }
 0x53f   : > { %v6939_v17 = vrot.slane %v6596_v1, 4  ;;  %v6594_v9 = vrot.slane %v6592_v32, 1  ;;  %v7043_v44 = vsel %vm1496_vm5, %v12738_v34, %v6677_v23 }
 0x540   : > { %v6393_v60 = vadd.f32 %v6336_v14, %v4451_v18  ;;  %6846 = vrot.lane.b32.xlu0 %v6792_v62, %s8915_s20 }
 0x541   : > { %v4348_v53 = vpop.f32.mrb[84].mxu1  ;;  %v6941_v49 = vor.u32 %v6940_v27, %v6939_v17  ;;  %v6819_v26 = vpop.permute.xlu0 %6818  ;;  %v6595_v24 = vsel %vm622_vm0, %v6590_v3, %v6594_v9 }
 0x542   : > { %v13021_v29 = vpack.c.bf16 %v6393_v60, %v6392_v19  ;;  %v8274_v5 = vpop.f32.mrb[85].mxu1  ;;  %v8626_v61 = vadd.f32 %v12948_v48, %v4348_v53  ;;  %v7101_v20 = vsel %vm3271_vm10, %v7043_v44, %v6819_v26 }
 0x543   : > { %v6942_v37 = vsel %vm2858_vm9, %v6937_v16, %v6941_v49  ;;  %v4351_v15 = vpop.f32.mrb[86].mxu1  ;;  %v6598_v5 = vor.u32 %v6596_v1, %v6594_v9 }
 0x544   : > { %7014 = vrot.lane.b32.xlu1 %v6942_v37, %s8917_s30  ;;  %6706 = vrot.lane.b32.xlu0 %v6595_v24, %s8916_s27  ;;  %v8275_v13 = vpop.f32.mrb[87].mxu1  ;;  %v6793_v11 = vrot.slane %v13021_v29, 4  ;;  %v6600_v45 = vshll.u32 %v13021_v29, 16  ;;  %v6604_v31 = vshrl.u32 %v13021_v29, 16  ;;  %v8627_v25 = vadd.f32 %v12948_v48, %v4351_v15 }
 0x545   : > { %v6233_v16 = vpop.f32.mrb[60].mxu0  ;;  %v4452_v17 = vmax.f32 %v8626_v61, 0.0  ;;  %v6679_v24 = vpop.permute.xlu0 %6678 }
 0x546   : > { %v6234_v35 = vadd.f32 %v12940_v22, %v6233_v16  ;;  %v6235_v7 = vpop.f32.mrb[61].mxu0  ;;  %v6987_v52 = vpop.permute.xlu1 %6986  ;;  %v6794_v32 = vsel %vm2304_vm7, %v6791_v30, %v6793_v11  ;;  %v6944_v14 = vrot.slane %v6600_v45, 5  ;;  %v6943_v62 = vrot.slane %v6604_v31, 4 }
 0x547   : > { %v7161_v19 = vsel %vm3330_vm11, %v7101_v20, %v6987_v52  ;;  %v6236_v18 = vpop.f32.mrb[62].mxu0  ;;  %v6602_v27 = vrot.slane %v6600_v45, 1  ;;  %v4453_v30 = vmax.f32 %v8627_v25, 0.0  ;;  %v7045_v9 = vsel %vm1496_vm5, %v12762_v41, %v6679_v24 }
 0x548   : > { %v6337_v60 = vmax.f32 %v6234_v35, 0.0  ;;  %v6237_v23 = vadd.f32 %v12940_v22, %v6236_v18  ;;  %v6238_v53 = vpop.f32.mrb[63].mxu0  ;;  %8465 = vmatmul.mubr.bf16.vlgmr.msra.gmra.mrb[116].mxu1 %v7161_v19  ;;  %6848 = vrot.lane.b32.xlu1 %v6794_v32, %s8915_s20  ;;  %v6945_v26 = vor.u32 %v6944_v14, %v6943_v62 }
 0x549   : > { %v4356_v3 = vpop.f32.mrb[88].mxu1  ;;  %8468 = vmatprep.mubr.msk.bf16.mxu1 %vm8913_vm1, %v13804_v40  ;;  %v6603_v45 = vsel %vm622_vm0, %v6598_v5, %v6602_v27 }
 0x54a   : > { %v6394_v37 = vadd.f32 %v6337_v60, %v4452_v17  ;;  %v6338_v15 = vmax.f32 %v6237_v23, 0.0  ;;  %v8278_v44 = vpop.f32.mrb[89].mxu1  ;;  %v6821_v13 = vpop.permute.xlu1 %6820  ;;  %v6946_v61 = vsel %vm2858_vm9, %v6941_v49, %v6945_v26 }
 0x54b   : > { %v4359_v20 = vpop.f32.mrb[90].mxu1  ;;  %7016 = vrot.lane.b32.xlu0 %v6946_v61, %s8917_s30  ;;  %v7103_v35 = vsel %vm3271_vm10, %v7045_v9, %v6821_v13  ;;  %v6606_v44 = vor.u32 %v6604_v31, %v6602_v27 }
 0x54c   : > { %v6395_v16 = vadd.f32 %v6338_v15, %v4453_v30  ;;  %6708 = vrot.lane.b32.xlu1 %v6603_v45, %s8916_s27  ;;  %v8279_v1 = vpop.f32.mrb[91].mxu1  ;;  %v8629_v13 = vadd.f32 %v12948_v48, %v4359_v20 }
 0x54e   : > { %v13048_v25 = vpack.c.bf16 %v6395_v16, %v6394_v37  ;;  %v6989_v7 = vpop.permute.xlu0 %6988  ;;  %v6681_v18 = vpop.permute.xlu1 %6680  ;;  %v8628_v37 = vadd.f32 %v12948_v48, %v4356_v3 }
 0x54f   : > { %v7164_v52 = vsel %vm3330_vm11, %v7103_v35, %v6989_v7 }
 0x550   : > { %8469 = vmatmul.mubr.bf16.gmra.mrb[120].mxu1 %v7164_v52  ;;  %v6795_v49 = vrot.slane %v13048_v25, 4  ;;  %v6608_v32 = vshll.u32 %v13048_v25, 16  ;;  %v6612_v14 = vshrl.u32 %v13048_v25, 16 }
 0x551   : > { %v13055_v19 = vpop.f32.mrb[92].mxu1  ;;  %8472 = vmatprep.mubr.msk.bf16.mxu1 %vm8913_vm1, %v13804_v40 }
 0x552   : > { %v6796_v62 = vsel %vm2304_vm7, %v6793_v11, %v6795_v49  ;;  %v8282_v17 = vpop.f32.mrb[93].mxu1  ;;  %v6947_v60 = vrot.slane %v6612_v14, 4  ;;  %v6948_v23 = vrot.slane %v6608_v32, 5  ;;  %v6823_v53 = vpop.permute.xlu0 %6822  ;;  %v6610_v30 = vrot.slane %v6608_v32, 1 }
 0x553   : > { %6850 = vrot.lane.b32.xlu0 %v6796_v62, %s8915_s20  ;;  %v4367_v5 = vpop.f32.mrb[94].mxu1  ;;  %v7047_v11 = vsel %vm1496_vm5, %v12779_v28, %v6681_v18  ;;  %v4454_v28 = vmax.f32 %v8628_v37, 0.0 }
 0x554   : > { %v8283_v24 = vpop.f32.mrb[95].mxu1  ;;  %v13064_v15 = vor.u32 %v6948_v23, %v6947_v60  ;;  %v7105_v45 = vsel %vm3271_vm10, %v7047_v11, %v6823_v53  ;;  %v6611_v3 = vsel %vm622_vm0, %v6606_v44, %v6610_v30 }
 0x555   : > { %v6241_v61 = vpop.f32.mrb[64].mxu0 }
 0x556   : > { %v6242_v16 = vadd.f32 %v12940_v22, %v6241_v61  ;;  %v6243_v1 = vpop.f32.mrb[65].mxu0  ;;  %v6991_v9 = vpop.permute.xlu1 %6990  ;;  %v6950_v35 = vsel %vm2858_vm9, %v6945_v26, %v13064_v15  ;;  %v4455_v26 = vmax.f32 %v8629_v13, 0.0 }
 0x557   : > { %v6244_v7 = vpop.f32.mrb[66].mxu0  ;;  %7018 = vrot.lane.b32.xlu1 %v6950_v35, %s8917_s30  ;;  %6710 = vrot.lane.b32.xlu0 %v6611_v3, %s8916_s27  ;;  %v7167_v31 = vsel %vm3330_vm11, %v7105_v45, %v6991_v9  ;;  %v6683_v62 = vpop.permute.xlu0 %6682 }
 0x558   : > { %v6339_v27 = vmax.f32 %v6242_v16, 0.0  ;;  %v6245_v20 = vadd.f32 %v12940_v22, %v6244_v7  ;;  %v6246_v52 = vpop.f32.mrb[67].mxu0  ;;  %8473 = vmatmul.mubr.bf16.gmra.mrb[124].mxu1 %v7167_v31  ;;  %v7049_v44 = vsel %vm1496_vm5, %v12802_v51, %v6683_v62 }
 0x559   : > { %v13078_v32 = vpop.f32.mrb[96].mxu1  ;;  %8476 = vmatprep.mubr.msk.bf16.mxu1 %vm8913_vm1, %v13804_v40 }
 0x55a   : > { %v6396_v18 = vadd.f32 %v6339_v27, %v4454_v28  ;;  %v6340_v17 = vmax.f32 %v6245_v20, 0.0  ;;  %v8286_v60 = vpop.f32.mrb[97].mxu1  ;;  %v6825_v23 = vpop.permute.xlu1 %6824 }
 0x55b   : > { %v13082_v53 = vpop.f32.mrb[98].mxu1  ;;  %v7107_v61 = vsel %vm3271_vm10, %v7049_v44, %v6825_v23 }
 0x55c   : > { %v6397_v24 = vadd.f32 %v6340_v17, %v4455_v26  ;;  %v8287_v37 = vpop.f32.mrb[99].mxu1  ;;  %v8630_v26 = vadd.f32 %v12948_v48, %v13055_v19  ;;  %v8631_v17 = vadd.f32 %v12948_v48, %v4367_v5 }
 0x55e   : > { %v13086_v11 = vpack.c.bf16 %v6397_v24, %v6396_v18  ;;  %v6993_v45 = vpop.permute.xlu0 %6992  ;;  %v6685_v51 = vpop.permute.xlu1 %6684 }
 0x55f   : > { %v7170_v16 = vsel %vm3330_vm11, %v7107_v61, %v6993_v45  ;;  %v7051_v60 = vsel %vm1496_vm5, %v12818_v38, %v6685_v51 }
 0x560   : > { %8477 = vmatmul.mubr.bf16.gmra.mrb[128].mxu1 %v7170_v16  ;;  %v6797_v13 = vrot.slane %v13086_v11, 4  ;;  %v6616_v1 = vshll.u32 %v13086_v11, 16  ;;  %v6620_v9 = vshrl.u32 %v13086_v11, 16 }
 0x561   : > { %v13093_v35 = vpop.f32.mrb[100].mxu1  ;;  %8480 = vmatprep.mubr.msk.bf16.mxu1 %vm8913_vm1, %v13804_v40 }
 0x562   : > { %v6798_v3 = vsel %vm2304_vm7, %v6795_v49, %v6797_v13  ;;  %v8290_v7 = vpop.f32.mrb[101].mxu1  ;;  %v6951_v31 = vrot.slane %v6620_v9, 4  ;;  %v6952_v28 = vrot.slane %v6616_v1, 5  ;;  %v6827_v27 = vpop.permute.xlu0 %6826  ;;  %v6618_v52 = vrot.slane %v6616_v1, 1 }
 0x563   : > { %6852 = vrot.lane.b32.xlu1 %v6798_v3, %s8915_s20  ;;  %v13101_v20 = vpop.f32.mrb[102].mxu1  ;;  %v6614_v49 = vor.u32 %v6612_v14, %v6610_v30  ;;  %v7109_v24 = vsel %vm3271_vm10, %v7051_v60, %v6827_v27  ;;  %v4456_v14 = vmax.f32 %v8630_v26, 0.0 }
 0x564   : > { %v8291_v18 = vpop.f32.mrb[103].mxu1  ;;  %v13105_v62 = vor.u32 %v6952_v28, %v6951_v31 }
 0x565   : > { %v6249_v23 = vpop.f32.mrb[68].mxu0  ;;  %v6619_v45 = vsel %vm622_vm0, %v6614_v49, %v6618_v52 }
 0x566   : > { %v6250_v37 = vadd.f32 %v12940_v22, %v6249_v23  ;;  %v6251_v44 = vpop.f32.mrb[69].mxu0  ;;  %v6995_v61 = vpop.permute.xlu1 %6994  ;;  %v6954_v19 = vsel %vm2858_vm9, %v13064_v15, %v13105_v62  ;;  %v4457_v15 = vmax.f32 %v8631_v17, 0.0 }
 0x567   : > { %v6252_v16 = vpop.f32.mrb[70].mxu0  ;;  %7020 = vrot.lane.b32.xlu0 %v6954_v19, %s8917_s30  ;;  %6712 = vrot.lane.b32.xlu1 %v6619_v45, %s8916_s27  ;;  %v7173_v38 = vsel %vm3330_vm11, %v7109_v24, %v6995_v61  ;;  %v6687_v7 = vpop.permute.xlu0 %6686 }
 0x568   : > { %v6341_v5 = vmax.f32 %v6250_v37, 0.0  ;;  %v6253_v30 = vadd.f32 %v12940_v22, %v6252_v16  ;;  %v6254_v1 = vpop.f32.mrb[71].mxu0  ;;  %8481 = vmatmul.mubr.bf16.gmra.mrb[132].mxu1 %v7173_v38  ;;  %v7053_v60 = vsel %vm1496_vm5, %v12833_v39, %v6687_v7 }
 0x569   : > { %v13122_v51 = vpop.f32.mrb[104].mxu1  ;;  %8484 = vmatprep.mubr.msk.bf16.mxu1 %vm8913_vm1, %v13804_v40 }
 0x56a   : > { %v6398_v3 = vadd.f32 %v6341_v5, %v4456_v14  ;;  %v6342_v31 = vmax.f32 %v6253_v30, 0.0  ;;  %v8294_v28 = vpop.f32.mrb[105].mxu1  ;;  %v6829_v27 = vpop.permute.xlu1 %6828 }
 0x56b   : > { %v13126_v18 = vpop.f32.mrb[106].mxu1  ;;  %v7111_v24 = vsel %vm3271_vm10, %v7053_v60, %v6829_v27  ;;  %v8633_v28 = vadd.f32 %v12948_v48, %v13082_v53 }
 0x56c   : > { %v6399_v49 = vadd.f32 %v6342_v31, %v4457_v15  ;;  %v8295_v26 = vpop.f32.mrb[107].mxu1 }
 0x56e   : > { %v13130_v23 = vpack.c.bf16 %v6399_v49, %v6398_v3  ;;  %v6997_v37 = vpop.permute.xlu0 %6996  ;;  %v6689_v39 = vpop.permute.xlu1 %6688  ;;  %v8632_v3 = vadd.f32 %v12948_v48, %v13078_v32 }
 0x56f   : > { %v7176_v44 = vsel %vm3330_vm11, %v7111_v24, %v6997_v37  ;;  %v7055_v27 = vsel %vm1496_vm5, %v12848_v8, %v6689_v39 }
 0x570   : > { %8485 = vmatmul.mubr.bf16.gmra.mrb[136].mxu1 %v7176_v44  ;;  %v6799_v17 = vrot.slane %v13130_v23, 4  ;;  %v6624_v61 = vshll.u32 %v13130_v23, 16  ;;  %v6628_v19 = vshrl.u32 %v13130_v23, 16  ;;  %v4458_v53 = vmax.f32 %v8632_v3, 0.0 }
 0x571   : > { %v13137_v45 = vpop.f32.mrb[108].mxu1  ;;  %8488 = vmatprep.mubr.msk.bf16.mxu1 %vm8913_vm1, %v13804_v40 }
 0x572   : > { %v6800_v16 = vsel %vm2304_vm7, %v6797_v13, %v6799_v17  ;;  %v8298_v38 = vpop.f32.mrb[109].mxu1  ;;  %v6955_v14 = vrot.slane %v6628_v19, 4  ;;  %v6956_v5 = vrot.slane %v6624_v61, 5  ;;  %v6831_v30 = vpop.permute.xlu0 %6830  ;;  %v6626_v15 = vrot.slane %v6624_v61, 1 }
 0x573   : > { %6854 = vrot.lane.b32.xlu0 %v6800_v16, %s8915_s20  ;;  %v13145_v1 = vpop.f32.mrb[110].mxu1  ;;  %v6622_v13 = vor.u32 %v6620_v9, %v6618_v52  ;;  %v7113_v26 = vsel %vm3271_vm10, %v7055_v27, %v6831_v30 }
 0x574   : > { %v8299_v7 = vpop.f32.mrb[111].mxu1  ;;  %v13149_v31 = vor.u32 %v6956_v5, %v6955_v14 }
 0x575   : > { %v6257_v49 = vpop.f32.mrb[72].mxu0  ;;  %v6627_v44 = vsel %vm622_vm0, %v6622_v13, %v6626_v15 }
 0x576   : > { %v6258_v60 = vadd.f32 %v12940_v22, %v6257_v49  ;;  %v6259_v24 = vpop.f32.mrb[73].mxu0  ;;  %v6999_v37 = vpop.permute.xlu1 %6998  ;;  %v6958_v32 = vsel %vm2858_vm9, %v13105_v62, %v13149_v31  ;;  %v4459_v62 = vmax.f32 %v8633_v28, 0.0 }
 0x577   : > { %v6260_v9 = vpop.f32.mrb[74].mxu0  ;;  %7022 = vrot.lane.b32.xlu1 %v6958_v32, %s8917_s30  ;;  %6714 = vrot.lane.b32.xlu0 %v6627_v44, %s8916_s27  ;;  %v7179_v8 = vsel %vm3330_vm11, %v7113_v26, %v6999_v37  ;;  %v6691_v14 = vpop.permute.xlu0 %6690  ;;  %v6443_v37 = vshll.u32 %v12703_v36, 16 }
 0x578   : > { %v6343_v52 = vmax.f32 %v6258_v60, 0.0  ;;  %v6261_v61 = vadd.f32 %v12940_v22, %v6260_v9  ;;  %v6262_v39 = vpop.f32.mrb[75].mxu0  ;;  %8489 = vmatmul.mubr.bf16.gmra.mrb[140].mxu1 %v7179_v8  ;;  %v7057_v3 = vsel %vm1496_vm5, %v12863_v4, %v6691_v14  ;;  %v6448_v4 = vshll.u32 %v12720_v6, 16 }
 0x579   : > { %v13167_v16 = vpop.f32.mrb[112].mxu1  ;;  %8492 = vmatprep.mubr.msk.bf16.mxu1 %vm8913_vm1, %v13804_v40  ;;  %v6441_v14 = vshrl.u32 %v12703_v36, 16 }
 0x57a   : > { %v6400_v38 = vadd.f32 %v6343_v52, %v4458_v53  ;;  %v6344_v5 = vmax.f32 %v6261_v61, 0.0  ;;  %v8302_v30 = vpop.f32.mrb[113].mxu1  ;;  %v6833_v7 = vpop.permute.xlu1 %6832 }
 0x57b   : > { %v4407_v13 = vpop.f32.mrb[114].mxu1  ;;  %v7115_v60 = vsel %vm3271_vm10, %v7057_v3, %v6833_v7  ;;  %v8635_v7 = vadd.f32 %v12948_v48, %v13101_v20  ;;  %v6757_v3 = vrot.slane %v12731_v10, 4 }
 0x57c   : > { %v6401_v27 = vadd.f32 %v6344_v5, %v4459_v62  ;;  %v8303_v49 = vpop.f32.mrb[115].mxu1  ;;  %v8634_v5 = vadd.f32 %v12948_v48, %v13093_v35 }
 0x57d   : > { %v13205_v49 = vrot.slane %v6448_v4, 1 }
 0x57e   : > { %v13173_v26 = vpack.c.bf16 %v6401_v27, %v6400_v38  ;;  %v7001_v24 = vpop.permute.xlu0 %7000  ;;  %v6693_v8 = vpop.permute.xlu1 %6692  ;;  %v6445_v38 = vrot.slane %v6443_v37, 1 }
 0x57f   : > { %v7182_v28 = vsel %vm3330_vm11, %v7115_v60, %v7001_v24  ;;  %v7059_v13 = vsel %vm1496_vm5, %v12878_v55, %v6693_v8 }
 0x580   : > { %8493 = vmatmul.mubr.bf16.gmra.mrb[144].mxu1 %v7182_v28  ;;  %v6801_v32 = vrot.slane %v13173_v26, 4  ;;  %v6632_v44 = vshll.u32 %v13173_v26, 16  ;;  %v6636_v9 = vshrl.u32 %v13173_v26, 16  ;;  %v6446_v28 = vor.u32 %v6445_v38, %v6441_v14 }
 0x581   : > { %8496 = vmatprep.mubr.msk.bf16.mxu1 %vm8913_vm1, %v13804_v40 }
 0x582   : > { %v6802_v53 = vsel %vm2304_vm7, %v6799_v17, %v6801_v32  ;;  %v6959_v52 = vrot.slane %v6636_v9, 4  ;;  %v6960_v61 = vrot.slane %v6632_v44, 5  ;;  %v13189_v39 = vrot.slane %v6632_v44, 1  ;;  %v6835_v62 = vpop.permute.xlu0 %6834 }
 0x583   : > { %6856 = vrot.lane.b32.xlu1 %v6802_v53, %s8915_s20  ;;  %v6630_v17 = vor.u32 %v6628_v19, %v6626_v15  ;;  %v7117_v35 = vsel %vm3271_vm10, %v7059_v13, %v6835_v62  ;;  %v4460_v44 = vmax.f32 %v8634_v5, 0.0  ;;  %v4461_v62 = vmax.f32 %v8635_v7, 0.0 }
 0x584   : > { %v13195_v30 = vor.u32 %v6960_v61, %v6959_v52  ;;  %v6756_v61 = vrot.slane %v12720_v6, 4  ;;  %v13776_v7 = vshrl.u32 %v12731_v10, 16 }
 0x585   : > { %v6265_v27 = vpop.f32.mrb[76].mxu0  ;;  %v6635_v55 = vsel %vm622_vm0, %v6630_v17, %v13189_v39 }
 0x586   : > { %v6266_v60 = vadd.f32 %v12940_v22, %v6265_v27  ;;  %v6267_v24 = vpop.f32.mrb[77].mxu0  ;;  %v7003_v37 = vpop.permute.xlu1 %7002  ;;  %v6962_v20 = vsel %vm2858_vm9, %v13149_v31, %v13195_v30  ;;  %v6451_v31 = vsel %vm622_vm0, %v6446_v28, %v13205_v49  ;;  %v6758_v38 = vsel %vm2304_vm7, %v6756_v61, %v6757_v3 }
 0x587   : > { %v6268_v19 = vpop.f32.mrb[78].mxu0  ;;  %7024 = vrot.lane.b32.xlu0 %v6962_v20, %s8917_s30  ;;  %6716 = vrot.lane.b32.xlu1 %v6635_v55, %s8916_s27  ;;  %v7185_v15 = vsel %vm3330_vm11, %v7117_v35, %v7003_v37  ;;  %v6695_v13 = vpop.permute.xlu0 %6694 }
 0x588   : > { %v6345_v8 = vmax.f32 %v6266_v60, 0.0  ;;  %v6269_v53 = vadd.f32 %v12940_v22, %v6268_v19  ;;  %v6270_v52 = vpop.f32.mrb[79].mxu0  ;;  %8497 = vmatmul.mubr.bf16.gmra.mrb[148].mxu1 %v7185_v15  ;;  %v7061_v35 = vsel %vm1496_vm5, %v12893_v42, %v6695_v13  ;;  %v6456_v60 = vshll.u32 %v12731_v10, 16 }
 0x589   : > { %8500 = vmatprep.mubr.msk.bf16.mxu1 %vm8913_vm1, %v13804_v40  ;;  %v6452_v19 = vshrl.u32 %v12720_v6, 16  ;;  %v8637_v13 = vadd.f32 %v12948_v48, %v13126_v18  ;;  %v6638_v18 = vor.u32 %v6636_v9, %v13189_v39 }
 0x58a   : > { %v6402_v17 = vadd.f32 %v6345_v8, %v4460_v44  ;;  %v6346_v27 = vmax.f32 %v6269_v53, 0.0  ;;  %v6837_v14 = vpop.permute.xlu1 %6836  ;;  %v8636_v44 = vadd.f32 %v12948_v48, %v13122_v51  ;;  %v6871_v53 = vrot.slane %v13776_v7, 4 }
 0x58b   : > { %6670 = vrot.lane.b32.xlu0 %v6451_v31, %s8916_s27  ;;  %6812 = vrot.lane.b32.xlu1 %v6758_v38, %s8915_s20  ;;  %v7119_v37 = vsel %vm3271_vm10, %v7061_v35, %v6837_v14  ;;  %v6872_v52 = vrot.slane %v6456_v60, 5  ;;  %v6868_v38 = vrot.slane %v6452_v19, 4  ;;  %v6869_v14 = vrot.slane %v6448_v4, 5 }
 0x58c   : > { %v6403_v5 = vadd.f32 %v6346_v27, %v4461_v62  ;;  %v4463_v39 = vmax.f32 %v8637_v13, 0.0 }
 0x58e   : > { %v13233_v24 = vpack.c.bf16 %v6403_v5, %v6402_v17  ;;  %v7005_v20 = vpop.permute.xlu0 %7004  ;;  %v6697_v8 = vpop.permute.xlu1 %6696 }
 0x58f   : > { %v7188_v55 = vsel %vm3330_vm11, %v7119_v37, %v7005_v20  ;;  %v4462_v20 = vmax.f32 %v8636_v44, 0.0 }
 0x590   : > { %8501 = vmatmul.mubr.bf16.gmra.mrb[152].mxu1 %v7188_v55  ;;  %v6803_v15 = vrot.slane %v13233_v24, 4  ;;  %v6640_v28 = vshll.u32 %v13233_v24, 16  ;;  %v6644_v42 = vshrl.u32 %v13233_v24, 16 }
 0x591   : > { %8504 = vmatprep.mubr.msk.bf16.mxu1 %vm8913_vm1, %v13804_v40 }
 0x592   : > { %v6839_v61 = vpop.permute.xlu0 %6838  ;;  %v6804_v31 = vsel %vm2304_vm7, %v6801_v32, %v6803_v15  ;;  %v6963_v51 = vrot.slane %v6644_v42, 4  ;;  %v6964_v62 = vrot.slane %v6640_v28, 5  ;;  %v13256_v17 = vrot.slane %v6640_v28, 1 }
 0x593   : > { %6858 = vrot.lane.b32.xlu0 %v6804_v31, %s8915_s20  ;;  %v6273_v27 = vpop.f32.mrb[80].mxu0  ;;  %v7063_v32 = vsel %vm1496_vm5, %v12908_v54, %v6697_v8  ;;  %v13274_v31 = vor.u32 %v6872_v52, %v6871_v53  ;;  %v6870_v52 = vor.u32 %v6869_v14, %v6868_v38 }
 0x594   : > { %v6274_v5 = vadd.f32 %v12940_v22, %v6273_v27  ;;  %v6275_v35 = vpop.f32.mrb[81].mxu0  ;;  %v13268_v37 = vor.u32 %v6964_v62, %v6963_v51  ;;  %v7121_v55 = vsel %vm3271_vm10, %v7063_v32, %v6839_v61  ;;  %v6643_v8 = vsel %vm622_vm0, %v6638_v18, %v13256_v17 }
 0x595   : > { %v6276_v28 = vpop.f32.mrb[82].mxu0  ;;  %v8638_v61 = vadd.f32 %v12948_v48, %v13137_v45  ;;  %v6874_v32 = vsel %vm2858_vm9, %v6870_v52, %v13274_v31 }
 0x596   : > { %v6347_v56 = vmax.f32 %v6274_v5, 0.0  ;;  %v6277_v4 = vadd.f32 %v12940_v22, %v6276_v28  ;;  %v7007_v7 = vpop.permute.xlu1 %7006  ;;  %v6966_v54 = vsel %vm2858_vm9, %v13195_v30, %v13268_v37  ;;  %v6278_v51 = vpop.f32.mrb[83].mxu0 }
 0x597   : > { %7026 = vrot.lane.b32.xlu1 %v6966_v54, %s8917_s30  ;;  %6718 = vrot.lane.b32.xlu0 %v6643_v8, %s8916_s27  ;;  %v7191_v9 = vsel %vm3330_vm11, %v7121_v55, %v7007_v7  ;;  %v6699_v62 = vpop.permute.xlu0 %6698  ;;  %v8639_v7 = vadd.f32 %v12948_v48, %v13145_v1  ;;  %v4464_v5 = vmax.f32 %v8638_v61, 0.0 }
 0x598   : > { %v6404_v44 = vadd.f32 %v6347_v56, %v4462_v20  ;;  %v6348_v53 = vmax.f32 %v6277_v4, 0.0  ;;  %8505 = vmatmul.mubr.bf16.gmra.mrb[156].mxu1 %v7191_v9  ;;  %v7065_v45 = vsel %vm1496_vm5, %v12923_v21, %v6699_v62 }
 0x599   : > { %8508 = vmatprep.mubr.msk.bf16.mxu1 %vm8913_vm1, %v13804_v40  ;;  %v4465_v54 = vmax.f32 %v8639_v7, 0.0 }
 0x59a   : > { %v6405_v30 = vadd.f32 %v6348_v53, %v4463_v39  ;;  %v6841_v27 = vpop.permute.xlu1 %6840 }
 0x59b   : > { %6980 = vrot.lane.b32.xlu1 %v6874_v32, %s8917_s30  ;;  %v6281_v56 = vpop.f32.mrb[84].mxu0  ;;  %v7123_v35 = vsel %vm3271_vm10, %v7065_v45, %v6841_v27  ;;  %v6646_v27 = vor.u32 %v6644_v42, %v13256_v17  ;;  %v13331_v17 = vrot.slane %v6456_v60, 1 }
 0x59c   : > { %v13294_v13 = vpack.c.bf16 %v6405_v30, %v6404_v44  ;;  %v6282_v38 = vadd.f32 %v12940_v22, %v6281_v56  ;;  %v6283_v14 = vpop.f32.mrb[85].mxu0 }
 0x59d   : > { %v6284_v18 = vpop.f32.mrb[86].mxu0 }
 0x59e   : > { %v6349_v20 = vmax.f32 %v6282_v38, 0.0  ;;  %v6285_v55 = vadd.f32 %v12940_v22, %v6284_v18  ;;  %v7009_v28 = vpop.permute.xlu0 %7008  ;;  %v6805_v1 = vrot.slane %v13294_v13, 4  ;;  %v6648_v4 = vshll.u32 %v13294_v13, 16  ;;  %v6286_v8 = vpop.f32.mrb[87].mxu0 }
 0x59f   : > { %v7194_v51 = vsel %vm3330_vm11, %v7123_v35, %v7009_v28  ;;  %v6652_v21 = vshrl.u32 %v13294_v13, 16  ;;  %v8640_v22 = vadd.f32 %v12948_v48, %v13167_v16  ;;  %v6701_v30 = vpop.permute.xlu1 %6700  ;;  %v8900_v48 = vld [vmem:[%s13683_s9] ss:$0 sm:$0xff] }
 0x5a0   : > { %v6406_v9 = vadd.f32 %v6349_v20, %v4464_v5  ;;  %v6350_v39 = vmax.f32 %v6285_v55, 0.0  ;;  %8509 = vmatmul.mubr.bf16.gmra.mrb[160].mxu1 %v7194_v51  ;;  %v6806_v44 = vsel %vm2304_vm7, %v6803_v15, %v6805_v1  ;;  %v6968_v53 = vrot.slane %v6648_v4, 5 }
 0x5a1   : > { %6860 = vrot.lane.b32.xlu1 %v6806_v44, %s8915_s20  ;;  %v6967_v52 = vrot.slane %v6652_v21, 4  ;;  %v6650_v61 = vrot.slane %v6648_v4, 1  ;;  %8512 = vmatprep.mubr.msk.bf16.mxu1 %vm8913_vm1, %v13804_v40  ;;  %v4466_v14 = vmax.f32 %v8640_v22, 0.0  ;;  %v7067_v5 = vsel %vm1496_vm5, %v12943_v0, %v6701_v30 }
 0x5a2   : > { %v6407_v62 = vadd.f32 %v6350_v39, %v4465_v54  ;;  %v6843_v15 = vpop.permute.xlu0 %6842  ;;  %v6759_v30 = vrot.slane %v12738_v34, 4 }
 0x5a3   : > { %v6289_v32 = vpop.f32.mrb[88].mxu0  ;;  %v6969_v7 = vor.u32 %v6968_v53, %v6967_v52  ;;  %v6651_v38 = vsel %vm622_vm0, %v6646_v27, %v6650_v61  ;;  %v7125_v18 = vsel %vm3271_vm10, %v7067_v5, %v6843_v15 }
 0x5a4   : > { %v13318_v56 = vpack.c.bf16 %v6407_v62, %v6406_v9  ;;  %v6290_v16 = vadd.f32 %v8900_v48, %v6289_v32  ;;  %v6291_v45 = vpop.f32.mrb[89].mxu0 }
 0x5a5   : > { %v6292_v35 = vpop.f32.mrb[90].mxu0  ;;  %v6970_v42 = vsel %vm2858_vm9, %v13268_v37, %v6969_v7  ;;  %6720 = vrot.lane.b32.xlu1 %v6651_v38, %s8916_s27  ;;  %v6454_v37 = vor.u32 %v6452_v19, %v13205_v49  ;;  %v6760_v38 = vsel %vm2304_vm7, %v6757_v3, %v6759_v30 }
 0x5a6   : > { %v6351_v20 = vmax.f32 %v6290_v16, 0.0  ;;  %v7011_v55 = vpop.permute.xlu1 %7010  ;;  %7028 = vrot.lane.b32.xlu0 %v6970_v42, %s8917_s30  ;;  %v6656_v28 = vshll.u32 %v13318_v56, 16  ;;  %v6660_v0 = vshrl.u32 %v13318_v56, 16  ;;  %v6293_v4 = vpop.f32.mrb[91].mxu0  ;;  %v6807_v44 = vrot.slane %v13318_v56, 4 }
 0x5a7   : > { %v7197_v54 = vsel %vm3330_vm11, %v7125_v18, %v7011_v55  ;;  %v6703_v9 = vpop.permute.xlu0 %6702  ;;  %v6459_v39 = vsel %vm622_vm0, %v6454_v37, %v13331_v17  ;;  %v6878_v37 = vsel %vm2858_vm9, %v13274_v31, %v12759_v47 }
 0x5a8   : > { %v6408_v8 = vadd.f32 %v6351_v20, %v4466_v14  ;;  %8513 = vmatmul.mubr.bf16.gmra.mrb[164].mxu1 %v7197_v54  ;;  %v6971_v60 = vrot.slane %v6660_v0, 4  ;;  %v6972_v51 = vrot.slane %v6656_v28, 5  ;;  %v7069_v19 = vsel %vm1496_vm5, %v12963_v57, %v6703_v9 }
 0x5a9   : > { %8516 = vmatprep.mubr.msk.bf16.mxu1 %vm8913_vm1, %v13804_v40  ;;  %v6808_v32 = vsel %vm2304_vm7, %v6805_v1, %v6807_v44  ;;  %v6658_v48 = vrot.slane %v6656_v28, 1 }
 0x5aa   : > { %v6437_v53 = vpack.c.bf16 %v6408_v8, %v6408_v8  ;;  %6672 = vrot.lane.b32.xlu0 %v6459_v39, %s8916_s27  ;;  %v6973_v22 = vor.u32 %v6972_v51, %v6971_v60  ;;  %v6845_v52 = vpop.permute.xlu1 %6844 }
 0x5ab   : > { %v7127_v16 = vsel %vm3271_vm10, %v7069_v19, %v6845_v52  ;;  %v6662_v54 = vor.u32 %v6660_v0, %v6658_v48 }
 0x5ac   : > { %v13348_v49 = vsel %vm2304_vm7, %v6437_v53, 0  ;;  %v6974_v62 = vsel %vm2858_vm9, %v6969_v7, %v6973_v22  ;;  %v6654_v7 = vor.u32 %v6652_v21, %v6650_v61 }
 0x5ad   : > { %v6663_v27 = vshll.u32 %v13348_v49, 16  ;;  %v6667_v15 = vshrl.u32 %v13348_v49, 16  ;;  %7030 = vrot.lane.b32.xlu1 %v6974_v62, %s8917_s30  ;;  %v6809_v5 = vrot.slane %v13348_v49, 4 }
 0x5ae   : > { %v7013_v45 = vpop.permute.xlu0 %7012  ;;  %6862 = vrot.lane.b32.xlu0 %v6808_v32, %s8915_s20  ;;  %v6659_v14 = vsel %vm622_vm0, %v6654_v7, %v6658_v48  ;;  %v6705_v35 = vpop.permute.xlu1 %6704 }
 0x5af   : > { %v7200_v57 = vsel %vm3330_vm11, %v7127_v16, %v7013_v45  ;;  %v6975_v34 = vrot.slane %v6667_v15, 4  ;;  %v6976_v1 = vrot.slane %v6663_v27, 5  ;;  %v7071_v3 = vsel %vm1496_vm5, %v12978_v59, %v6705_v35 }
 0x5b0   : > { %8517 = vmatmul.mubr.bf16.gmra.mrb[168].mxu1 %v7200_v57  ;;  %v6810_v18 = vsel %vm2304_vm7, %v6807_v44, %v6809_v5  ;;  %v6665_v20 = vrot.slane %v6663_v27, 1  ;;  %v6811_v47 = vsel %vm2304_vm7, %v6809_v5, %v13925_v50  ;;  %v13926_v44 = vshrl.u32 %v12731_v10, 16 }
 0x5b1   : > { %6814 = vrot.lane.b32.xlu1 %v6760_v38, %s8915_s20  ;;  %8520 = vmatprep.mubr.msk.bf16.mxu1 %vm8913_vm1, %v13804_v40  ;;  %v6977_v21 = vor.u32 %v6976_v1, %v6975_v34 }
 0x5b2   : > { %6722 = vrot.lane.b32.xlu0 %v6659_v14, %s8916_s27  ;;  %v6847_v61 = vpop.permute.xlu0 %6846  ;;  %v6666_v59 = vsel %vm622_vm0, %v6662_v54, %v6665_v20  ;;  %v6462_v53 = vor.u32 %v13926_v44, %v13331_v17 }
 0x5b3   : > { %v6978_v42 = vsel %vm2858_vm9, %v6973_v22, %v6977_v21  ;;  %v7129_v55 = vsel %vm3271_vm10, %v7071_v3, %v6847_v61  ;;  %v6979_v51 = vsel %vm2858_vm9, %v6977_v21, %v13920_v2  ;;  %v13927_v2 = vrot.slane %v12762_v41, 4 }
 0x5b4   : > { %v6467_v50 = vsel %vm622_vm0, %v6462_v53, %v12764_v58  ;;  %v6669_v22 = vor.u32 %v6667_v15, %v6665_v20 }
 0x5b5   : > { %7032 = vrot.lane.b32.xlu1 %v6978_v42, %s8917_s30 }
 0x5b6   : > { %v7015_v28 = vpop.permute.xlu1 %7014  ;;  %6864 = vrot.lane.b32.xlu0 %v6810_v18, %s8915_s20  ;;  %v6707_v8 = vpop.permute.xlu0 %6706 }
 0x5b7   : > { %v7203_v4 = vsel %vm3330_vm11, %v7129_v55, %v7015_v28  ;;  %v7073_v0 = vsel %vm1496_vm5, %v12993_v43, %v6707_v8  ;;  %v6762_v43 = vsel %vm2304_vm7, %v6759_v30, %v13927_v2 }
 0x5b8   : > { %8521 = vmatmul.mubr.bf16.gmra.mrb[172].mxu1 %v7203_v4 }
 0x5b9   : > { %6982 = vrot.lane.b32.xlu1 %v6878_v37, %s8917_s30  ;;  %8524 = vmatprep.mubr.msk.bf16.mxu1 %vm8913_vm1, %v13804_v40 }
 0x5ba   : > { %6724 = vrot.lane.b32.xlu0 %v6666_v59, %s8916_s27  ;;  %v6849_v60 = vpop.permute.xlu1 %6848 }
 0x5bb   : > { %v7131_v31 = vsel %vm3271_vm10, %v7073_v0, %v6849_v60 }
 0x5bd   : > { %7034 = vrot.lane.b32.xlu1 %v6979_v51, %s8917_s30  ;;  %v7017_v9 = vpop.permute.xlu0 %7016  ;;  %v13457_v51 = vld [vmem:[%s13685_s11] ss:$0 sm:$0xff] }
 0x5be   : > { %6866 = vrot.lane.b32.xlu0 %v6811_v47, %s8915_s20  ;;  %v7206_v39 = vsel %vm3330_vm11, %v7131_v31, %v7017_v9  ;;  %v6709_v52 = vpop.permute.xlu1 %6708 }
 0x5bf   : > { %v7075_v41 = vsel %vm1496_vm5, %v13008_v46, %v6709_v52 }
 0x5c0   : > { %8525 = vmatmul.mubr.bf16.gmra.mrb[176].mxu1 %v7206_v39 }
 0x5c1   : > { %6816 = vrot.lane.b32.xlu1 %v6762_v43, %s8915_s20  ;;  %8528 = vmatprep.mubr.msk.bf16.mxu1 %vm8913_vm1, %v13804_v40  ;;  %s8757_s20 = smul.u32 456, %s13929_s22 }
 0x5c2   : > { %6674 = vrot.lane.b32.xlu0 %v6467_v50, %s8916_s27 }
 0x5c3   : > { %s13465_s19 = scalar_lea.vmem %s13686_s12, %s8757_s20 }
 0x5c5   : > { %6984 = vrot.lane.b32.xlu1 %v12791_v33, %s8917_s30  ;;  %v6851_v17 = vpop.permute.xlu0 %6850 }
 0x5c6   : > { %6726 = vrot.lane.b32.xlu0 %v6669_v22, %s8916_s27  ;;  %v7133_v19 = vsel %vm3271_vm10, %v7075_v41, %v6851_v17 }
 0x5c9   : > { %v7019_v62 = vpop.permute.xlu1 %7018  ;;  %v6711_v30 = vpop.permute.xlu0 %6710 }
 0x5ca   : > { %v7209_v58 = vsel %vm3330_vm11, %v7133_v19, %v7019_v62  ;;  %v7077_v33 = vsel %vm1496_vm5, %v13021_v29, %v6711_v30 }
 0x5cb   : > { %8529 = vmatmul.mubr.bf16.gmra.mrb[180].mxu1 %v7209_v58 }
 0x5cc   : > { %8532 = vmatprep.mubr.msk.bf16.mxu1 %vm8913_vm1, %v13804_v40 }
 0x5d5   : > { %v6853_v27 = vpop.permute.xlu1 %6852 }
 0x5d6   : > { %v7135_v15 = vsel %vm3271_vm10, %v7077_v33, %v6853_v27 }
 0x5d9   : > { %v7021_v32 = vpop.permute.xlu0 %7020  ;;  %v6713_v46 = vpop.permute.xlu1 %6712 }
 0x5da   : > { %v7212_v48 = vsel %vm3330_vm11, %v7135_v15, %v7021_v32  ;;  %v7079_v45 = vsel %vm1496_vm5, %v13048_v25, %v6713_v46 }
 0x5db   : > { %8533 = vmatmul.mubr.bf16.gmra.mrb[184].mxu1 %v7212_v48 }
 0x5dc   : > { %8536 = vmatprep.mubr.msk.bf16.mxu1 %vm8913_vm1, %v13804_v40 }
 0x5e5   : > { %v6855_v16 = vpop.permute.xlu0 %6854 }
 0x5e6   : > { %v7137_v57 = vsel %vm3271_vm10, %v7079_v45, %v6855_v16 }
 0x5e9   : > { %v7023_v7 = vpop.permute.xlu1 %7022  ;;  %v6715_v29 = vpop.permute.xlu0 %6714 }
 0x5ea   : > { %v7215_v34 = vsel %vm3330_vm11, %v7137_v57, %v7023_v7  ;;  %v7081_v1 = vsel %vm1496_vm5, %v13086_v11, %v6715_v29 }
 0x5eb   : > { %8537 = vmatmul.mubr.bf16.gmra.mrb[188].mxu1 %v7215_v34 }
 0x5ec   : > { %8540 = vmatprep.mubr.msk.bf16.mxu1 %vm8913_vm1, %v13804_v40 }
 0x5f5   : > { %v6857_v38 = vpop.permute.xlu1 %6856 }
 0x5f6   : > { %v7139_v14 = vsel %vm3271_vm10, %v7081_v1, %v6857_v38 }
 0x5f9   : > { %v7025_v5 = vpop.permute.xlu0 %7024  ;;  %v6717_v25 = vpop.permute.xlu1 %6716 }
 0x5fa   : > { %v7218_v35 = vsel %vm3330_vm11, %v7139_v14, %v7025_v5  ;;  %v7083_v3 = vsel %vm1496_vm5, %v13130_v23, %v6717_v25 }
 0x5fb   : > { %8541 = vmatmul.mubr.bf16.gmra.mrb[192].mxu1 %v7218_v35 }
 0x5fc   : > { %8544 = vmatprep.mubr.msk.bf16.mxu1 %vm8913_vm1, %v13804_v40 }
 0x5fd   : > { %v6671_v21 = vpop.permute.xlu0 %6670  ;;  %v6813_v61 = vpop.permute.xlu1 %6812 }
 0x5fe   : > { %v7037_v11 = vsel %vm1496_vm5, %v12703_v36, %v6671_v21 }
 0x5ff   : > { %v7095_v28 = vsel %vm3271_vm10, %v7037_v11, %v6813_v61 }
 0x605   : > { %v6859_v42 = vpop.permute.xlu0 %6858 }
 0x606   : > { %v7141_v18 = vsel %vm3271_vm10, %v7083_v3, %v6859_v42 }
 0x609   : > { %v7027_v20 = vpop.permute.xlu1 %7026  ;;  %v6719_v23 = vpop.permute.xlu0 %6718 }
 0x60a   : > { %v7221_v55 = vsel %vm3330_vm11, %v7141_v18, %v7027_v20  ;;  %v7085_v36 = vsel %vm1496_vm5, %v13173_v26, %v6719_v23 }
 0x60b   : > { %8545 = vmatmul.mubr.bf16.gmra.mrb[196].mxu1 %v7221_v55 }
 0x60c   : > { %8548 = vmatprep.mubr.msk.bf16.mxu1 %vm8913_vm1, %v13804_v40 }
 0x60d   : > { %v6981_v4 = vpop.permute.xlu1 %6980 }
 0x60e   : > { %v7152_v54 = vsel %vm3330_vm11, %v7095_v28, %v6981_v4 }
 0x60f   : > { %8453 = vmatmul.mubr.bf16.vlgmr.msra.gmra.mrb[92].mxu0 %v7152_v54 }
 0x610   : > { %8456 = vmatprep.mubr.msk.bf16.mxu0 %vm8913_vm1, %v13804_v40 }
 0x613   : > { %v6861_v37 = vpop.permute.xlu1 %6860 }
 0x614   : > { %v7143_v59 = vsel %vm3271_vm10, %v7085_v36, %v6861_v37 }
 0x617   : > { %v6721_v0 = vpop.permute.xlu1 %6720 }
 0x618   : > { %v7029_v8 = vpop.permute.xlu0 %7028  ;;  %v7087_v50 = vsel %vm1496_vm5, %v13233_v24, %v6721_v0 }
 0x619   : > { %v7224_v60 = vsel %vm3330_vm11, %v7143_v59, %v7029_v8 }
 0x61a   : > { %8549 = vmatmul.mubr.bf16.gmra.mrb[200].mxu1 %v7224_v60 }
 0x61b   : > { %v7366_v47 = vpop.f32.mrb[116].mxu1  ;;  %8552 = vmatprep.mubr.msk.bf16.mxu1 %vm8913_vm1, %v13804_v40 }
 0x61c   : > { %v7367_v31 = vadd.f32 %v13457_v51, %v7366_v47  ;;  %v6673_v26 = vpop.permute.xlu0 %6672  ;;  %v8466_v9 = vpop.f32.mrb[117].mxu1 }
 0x61d   : > { %v7369_v39 = vpop.f32.mrb[118].mxu1  ;;  %v7039_v7 = vsel %vm1496_vm5, %v12720_v6, %v6673_v26 }
 0x61e   : > { %v7578_v44 = vmax.f32 %v7367_v31, 0.0  ;;  %v7370_v53 = vadd.f32 %v13457_v51, %v7369_v39  ;;  %v8467_v2 = vpop.f32.mrb[119].mxu1 }
 0x61f   : > { %v7031_v43 = vpop.permute.xlu1 %7030 }
 0x620   : > { %7636 = vst.msk [vmem:[%s13465_s19 + $0x30] sm:$0xff] %vm7629_vm12, %v7578_v44  ;;  %v7579_v22 = vmax.f32 %v7370_v53, 0.0  ;;  %v6863_v52 = vpop.permute.xlu0 %6862 }
 0x621   : > { %v7145_v17 = vsel %vm3271_vm10, %v7087_v50, %v6863_v52 }
 0x622   : > { %7637 = vst.msk [vmem:[%s13465_s19 + $0x38] sm:$0xff] %vm7629_vm12, %v7579_v22  ;;  %v7227_v41 = vsel %vm3330_vm11, %v7145_v17, %v7031_v43 }
 0x623   : > { %v7374_v19 = vpop.f32.mrb[120].mxu1  ;;  %8553 = vmatmul.mubr.bf16.gmra.mrb[204].mxu1 %v7227_v41  ;;  %v6815_v62 = vpop.permute.xlu1 %6814 }
 0x624   : > { %v7375_v58 = vadd.f32 %v13457_v51, %v7374_v19  ;;  %v6723_v30 = vpop.permute.xlu0 %6722  ;;  %v8470_v27 = vpop.f32.mrb[121].mxu1  ;;  %8556 = vmatprep.mubr.msk.bf16.mxu1 %vm8913_vm1, %v13804_v40  ;;  %v7097_v29 = vsel %vm3271_vm10, %v7039_v7, %v6815_v62 }
 0x625   : > { %v7377_v24 = vpop.f32.mrb[122].mxu1  ;;  %v7089_v46 = vsel %vm1496_vm5, %v13294_v13, %v6723_v30 }
 0x626   : > { %v7580_v33 = vmax.f32 %v7375_v58, 0.0  ;;  %v7378_v15 = vadd.f32 %v13457_v51, %v7377_v24  ;;  %v8471_v32 = vpop.f32.mrb[123].mxu1 }
 0x627   : > { %v7033_v48 = vpop.permute.xlu1 %7032 }
 0x628   : > { %7638 = vst.msk [vmem:[%s13465_s19 + $0x40] sm:$0xff] %vm7629_vm12, %v7580_v33  ;;  %v7581_v16 = vmax.f32 %v7378_v15, 0.0  ;;  %v6865_v45 = vpop.permute.xlu0 %6864 }
 0x629   : > { %v7147_v57 = vsel %vm3271_vm10, %v7089_v46, %v6865_v45 }
 0x62a   : > { %7639 = vst.msk [vmem:[%s13465_s19 + $0x48] sm:$0xff] %vm7629_vm12, %v7581_v16  ;;  %v7230_v34 = vsel %vm3330_vm11, %v7147_v57, %v7033_v48 }
 0x62b   : > { %v7382_v38 = vpop.f32.mrb[124].mxu1  ;;  %8557 = vmatmul.mubr.bf16.gmra.mrb[208].mxu1 %v7230_v34  ;;  %v6983_v1 = vpop.permute.xlu1 %6982 }
 0x62c   : > { %v7383_v14 = vadd.f32 %v13457_v51, %v7382_v38  ;;  %v7155_v13 = vsel %vm3330_vm11, %v7097_v29, %v6983_v1  ;;  %v6725_v5 = vpop.permute.xlu0 %6724  ;;  %v8474_v35 = vpop.f32.mrb[125].mxu1  ;;  %8560 = vmatprep.mubr.msk.bf16.mxu1 %vm8913_vm1, %v13804_v40 }
 0x62d   : > { %v7385_v6 = vpop.f32.mrb[126].mxu1  ;;  %8457 = vmatmul.mubr.bf16.gmra.mrb[96].mxu0 %v7155_v13  ;;  %v7091_v3 = vsel %vm1496_vm5, %v13318_v56, %v6725_v5 }
 0x62e   : > { %v7582_v25 = vmax.f32 %v7383_v14, 0.0  ;;  %v7386_v21 = vadd.f32 %v13457_v51, %v7385_v6  ;;  %v8475_v61 = vpop.f32.mrb[127].mxu1  ;;  %8460 = vmatprep.mubr.msk.bf16.mxu0 %vm8913_vm1, %v13804_v40 }
 0x62f   : > { %v7035_v42 = vpop.permute.xlu1 %7034 }
 0x630   : > { %7640 = vst.msk [vmem:[%s13465_s19 + $0x50] sm:$0xff] %vm7629_vm12, %v7582_v25  ;;  %v7583_v18 = vmax.f32 %v7386_v21, 0.0  ;;  %v6867_v20 = vpop.permute.xlu0 %6866 }
 0x631   : > { %v7149_v11 = vsel %vm3271_vm10, %v7091_v3, %v6867_v20 }
 0x632   : > { %7641 = vst.msk [vmem:[%s13465_s19 + $0x58] sm:$0xff] %vm7629_vm12, %v7583_v18  ;;  %v7233_v55 = vsel %vm3330_vm11, %v7149_v11, %v7035_v42 }
 0x633   : > { %v7390_v28 = vpop.f32.mrb[128].mxu1  ;;  %8561 = vmatmul.mubr.bf16.gmra.mrb[212].mxu1 %v7233_v55  ;;  %v6817_v4 = vpop.permute.xlu1 %6816 }
 0x634   : > { %v7391_v54 = vadd.f32 %v13457_v51, %v7390_v28  ;;  %v6675_v23 = vpop.permute.xlu0 %6674  ;;  %v8478_v37 = vpop.f32.mrb[129].mxu1  ;;  %8564 = vmatprep.mubr.msk.bf16.mxu1 %vm8913_vm1, %v13804_v40 }
 0x635   : > { %v7041_v56 = vsel %vm1496_vm5, %v12731_v10, %v6675_v23  ;;  %v7393_v36 = vpop.f32.mrb[130].mxu1 }
 0x636   : > { %v7584_v59 = vmax.f32 %v7391_v54, 0.0  ;;  %v7394_v8 = vadd.f32 %v13457_v51, %v7393_v36  ;;  %v8479_v60 = vpop.f32.mrb[131].mxu1  ;;  %v7099_v47 = vsel %vm3271_vm10, %v7041_v56, %v6817_v4 }
 0x637   : > { %v6985_v0 = vpop.permute.xlu1 %6984 }
 0x638   : > { %7642 = vst.msk [vmem:[%s13465_s19 + $0x60] sm:$0xff] %vm7629_vm12, %v7584_v59  ;;  %v7585_v31 = vmax.f32 %v7394_v8, 0.0  ;;  %v7158_v26 = vsel %vm3330_vm11, %v7099_v47, %v6985_v0  ;;  %v6727_v9 = vpop.permute.xlu0 %6726 }
 0x639   : > { %v7093_v40 = vsel %vm1496_vm5, %v13348_v49, %v6727_v9  ;;  %8461 = vmatmul.mubr.bf16.gmra.mrb[100].mxu0 %v7158_v26 }
 0x63a   : > { %7643 = vst.msk [vmem:[%s13465_s19 + $0x68] sm:$0xff] %vm7629_vm12, %v7585_v31  ;;  %v7150_v10 = vsel %vm3271_vm10, %v7093_v40, %v12112_v12 }
 0x63b   : > { %v7398_v39 = vpop.f32.mrb[132].mxu1  ;;  %v7235_v44 = vsel %vm3330_vm11, %v7150_v10, %v12125_v63 }
 0x63c   : > { %v7399_v53 = vadd.f32 %v13457_v51, %v7398_v39  ;;  %v8482_v2 = vpop.f32.mrb[133].mxu1  ;;  %8565 = vmatmul.mubr.bf16.gmra.mrb[216].mxu1 %v7235_v44 }
 0x63d   : > { %v7401_v43 = vpop.f32.mrb[134].mxu1 }
 0x63e   : > { %v7586_v50 = vmax.f32 %v7399_v53, 0.0  ;;  %v7402_v49 = vadd.f32 %v13457_v51, %v7401_v43  ;;  %v8483_v22 = vpop.f32.mrb[135].mxu1 }
 0x640   : > { %7644 = vst.msk [vmem:[%s13465_s19 + $0x70] sm:$0xff] %vm7629_vm12, %v7586_v50  ;;  %v7587_v52 = vmax.f32 %v7402_v49, 0.0 }
 0x642   : > { %7645 = vst.msk [vmem:[%s13465_s19 + $0x78] sm:$0xff] %vm7629_vm12, %v7587_v52 }
 0x643   : > { %v7406_v12 = vpop.f32.mrb[136].mxu1 }
 0x644   : > { %v7407_v17 = vadd.f32 %v13457_v51, %v7406_v12  ;;  %v8486_v63 = vpop.f32.mrb[137].mxu1 }
 0x645   : > { %v7409_v41 = vpop.f32.mrb[138].mxu1 }
 0x646   : > { %v7588_v19 = vmax.f32 %v7407_v17, 0.0  ;;  %v7410_v62 = vadd.f32 %v13457_v51, %v7409_v41  ;;  %v8487_v58 = vpop.f32.mrb[139].mxu1 }
 0x648   : > { %7646 = vst.msk [vmem:[%s13465_s19 + $0x80] sm:$0xff] %vm7629_vm12, %v7588_v19  ;;  %v7589_v30 = vmax.f32 %v7410_v62, 0.0 }
 0x64a   : > { %7647 = vst.msk [vmem:[%s13465_s19 + $0x88] sm:$0xff] %vm7629_vm12, %v7589_v30 }
 0x64b   : > { %v7414_v27 = vpop.f32.mrb[140].mxu1 }
 0x64c   : > { %v7415_v24 = vadd.f32 %v13457_v51, %v7414_v27  ;;  %v8490_v33 = vpop.f32.mrb[141].mxu1 }
 0x64d   : > { %v7417_v15 = vpop.f32.mrb[142].mxu1 }
 0x64e   : > { %v7590_v32 = vmax.f32 %v7415_v24, 0.0  ;;  %v7418_v48 = vadd.f32 %v13457_v51, %v7417_v15  ;;  %v8491_v46 = vpop.f32.mrb[143].mxu1 }
 0x650   : > { %7648 = vst.msk [vmem:[%s13465_s19 + $0x90] sm:$0xff] %vm7629_vm12, %v7590_v32  ;;  %v7591_v16 = vmax.f32 %v7418_v48, 0.0 }
 0x652   : > { %7649 = vst.msk [vmem:[%s13465_s19 + $0x98] sm:$0xff] %vm7629_vm12, %v7591_v16 }
 0x653   : > { %v7422_v45 = vpop.f32.mrb[144].mxu1 }
 0x654   : > { %v7423_v57 = vadd.f32 %v13457_v51, %v7422_v45  ;;  %v8494_v7 = vpop.f32.mrb[145].mxu1 }
 0x655   : > { %v7425_v34 = vpop.f32.mrb[146].mxu1 }
 0x656   : > { %v7592_v29 = vmax.f32 %v7423_v57, 0.0  ;;  %v7426_v38 = vadd.f32 %v13457_v51, %v7425_v34  ;;  %v8495_v1 = vpop.f32.mrb[147].mxu1 }
 0x658   : > { %7650 = vst.msk [vmem:[%s13465_s19 + $0xa0] sm:$0xff] %vm7629_vm12, %v7592_v29  ;;  %v7593_v14 = vmax.f32 %v7426_v38, 0.0 }
 0x65a   : > { %7651 = vst.msk [vmem:[%s13465_s19 + $0xa8] sm:$0xff] %vm7629_vm12, %v7593_v14 }
 0x65b   : > { %v7430_v13 = vpop.f32.mrb[148].mxu1 }
 0x65c   : > { %v7431_v5 = vadd.f32 %v13457_v51, %v7430_v13  ;;  %v8498_v35 = vpop.f32.mrb[149].mxu1 }
 0x65d   : > { %v7433_v6 = vpop.f32.mrb[150].mxu1 }
 0x65e   : > { %v7594_v25 = vmax.f32 %v7431_v5, 0.0  ;;  %v7434_v21 = vadd.f32 %v13457_v51, %v7433_v6  ;;  %v8499_v61 = vpop.f32.mrb[151].mxu1 }
 0x660   : > { %7652 = vst.msk [vmem:[%s13465_s19 + $0xb0] sm:$0xff] %vm7629_vm12, %v7594_v25  ;;  %v7595_v42 = vmax.f32 %v7434_v21, 0.0 }
 0x662   : > { %7653 = vst.msk [vmem:[%s13465_s19 + $0xb8] sm:$0xff] %vm7629_vm12, %v7595_v42 }
 0x663   : > { %v7438_v3 = vpop.f32.mrb[152].mxu1 }
 0x664   : > { %v7439_v18 = vadd.f32 %v13457_v51, %v7438_v3  ;;  %v8502_v20 = vpop.f32.mrb[153].mxu1 }
 0x665   : > { %v7441_v11 = vpop.f32.mrb[154].mxu1 }
 0x666   : > { %v7596_v55 = vmax.f32 %v7439_v18, 0.0  ;;  %v7442_v28 = vadd.f32 %v13457_v51, %v7441_v11  ;;  %v8503_v4 = vpop.f32.mrb[155].mxu1 }
 0x668   : > { %7654 = vst.msk [vmem:[%s13465_s19 + $0xc0] sm:$0xff] %vm7629_vm12, %v7596_v55  ;;  %v7597_v54 = vmax.f32 %v7442_v28, 0.0 }
 0x66a   : > { %7655 = vst.msk [vmem:[%s13465_s19 + $0xc8] sm:$0xff] %vm7629_vm12, %v7597_v54 }
 0x66b   : > { %v7446_v23 = vpop.f32.mrb[156].mxu1 }
 0x66c   : > { %v7447_v37 = vadd.f32 %v13457_v51, %v7446_v23  ;;  %v8506_v56 = vpop.f32.mrb[157].mxu1 }
 0x66d   : > { %v7449_v36 = vpop.f32.mrb[158].mxu1 }
 0x66e   : > { %v7598_v59 = vmax.f32 %v7447_v37, 0.0  ;;  %v7450_v8 = vadd.f32 %v13457_v51, %v7449_v36  ;;  %v8507_v60 = vpop.f32.mrb[159].mxu1 }
 0x670   : > { %7656 = vst.msk [vmem:[%s13465_s19 + $0xd0] sm:$0xff] %vm7629_vm12, %v7598_v59  ;;  %v7599_v0 = vmax.f32 %v7450_v8, 0.0 }
 0x672   : > { %7657 = vst.msk [vmem:[%s13465_s19 + $0xd8] sm:$0xff] %vm7629_vm12, %v7599_v0 }
 0x673   : > { %v7454_v47 = vpop.f32.mrb[160].mxu1 }
 0x674   : > { %v7455_v31 = vadd.f32 %v13457_v51, %v7454_v47  ;;  %v8510_v26 = vpop.f32.mrb[161].mxu1 }
 0x675   : > { %v7457_v9 = vpop.f32.mrb[162].mxu1 }
 0x676   : > { %v7600_v40 = vmax.f32 %v7455_v31, 0.0  ;;  %v7458_v10 = vadd.f32 %v13457_v51, %v7457_v9  ;;  %v8511_v39 = vpop.f32.mrb[163].mxu1 }
 0x678   : > { %7658 = vst.msk [vmem:[%s13465_s19 + $0xe0] sm:$0xff] %vm7629_vm12, %v7600_v40  ;;  %v7601_v44 = vmax.f32 %v7458_v10, 0.0 }
 0x67a   : > { %7659 = vst.msk [vmem:[%s13465_s19 + $0xe8] sm:$0xff] %vm7629_vm12, %v7601_v44 }
 0x67b   : > { %v7462_v53 = vpop.f32.mrb[164].mxu1 }
 0x67c   : > { %v7463_v2 = vadd.f32 %v13457_v51, %v7462_v53  ;;  %v8514_v43 = vpop.f32.mrb[165].mxu1 }
 0x67d   : > { %v7465_v50 = vpop.f32.mrb[166].mxu1 }
 0x67e   : > { %v7602_v49 = vmax.f32 %v7463_v2, 0.0  ;;  %v7466_v22 = vadd.f32 %v13457_v51, %v7465_v50  ;;  %v8515_v52 = vpop.f32.mrb[167].mxu1 }
 0x680   : > { %7660 = vst.msk [vmem:[%s13465_s19 + $0xf0] sm:$0xff] %vm7629_vm12, %v7602_v49  ;;  %v7603_v12 = vmax.f32 %v7466_v22, 0.0 }
 0x682   : > { %7661 = vst.msk [vmem:[%s13465_s19 + $0xf8] sm:$0xff] %vm7629_vm12, %v7603_v12 }
 0x683   : > { %v7470_v17 = vpop.f32.mrb[168].mxu1 }
 0x684   : > { %v7471_v63 = vadd.f32 %v13457_v51, %v7470_v17  ;;  %v8518_v41 = vpop.f32.mrb[169].mxu1 }
 0x685   : > { %v7473_v19 = vpop.f32.mrb[170].mxu1 }
 0x686   : > { %v7604_v62 = vmax.f32 %v7471_v63, 0.0  ;;  %v7474_v58 = vadd.f32 %v13457_v51, %v7473_v19  ;;  %v8519_v30 = vpop.f32.mrb[171].mxu1 }
 0x688   : > { %7662 = vst.msk [vmem:[%s13465_s19 + $0x100] sm:$0xff] %vm7629_vm12, %v7604_v62  ;;  %v7605_v27 = vmax.f32 %v7474_v58, 0.0 }
 0x68a   : > { %7663 = vst.msk [vmem:[%s13465_s19 + $0x108] sm:$0xff] %vm7629_vm12, %v7605_v27 }
 0x68b   : > { %v7478_v24 = vpop.f32.mrb[172].mxu1 }
 0x68c   : > { %v7479_v33 = vadd.f32 %v13457_v51, %v7478_v24  ;;  %v8522_v15 = vpop.f32.mrb[173].mxu1 }
 0x68d   : > { %v7481_v32 = vpop.f32.mrb[174].mxu1 }
 0x68e   : > { %v7606_v48 = vmax.f32 %v7479_v33, 0.0  ;;  %v7482_v46 = vadd.f32 %v13457_v51, %v7481_v32  ;;  %v8523_v16 = vpop.f32.mrb[175].mxu1 }
 0x690   : > { %7664 = vst.msk [vmem:[%s13465_s19 + $0x110] sm:$0xff] %vm7629_vm12, %v7606_v48  ;;  %v7607_v45 = vmax.f32 %v7482_v46, 0.0 }
 0x692   : > { %7665 = vst.msk [vmem:[%s13465_s19 + $0x118] sm:$0xff] %vm7629_vm12, %v7607_v45 }
 0x693   : > { %v7486_v57 = vpop.f32.mrb[176].mxu1 }
 0x694   : > { %v7487_v7 = vadd.f32 %v13457_v51, %v7486_v57  ;;  %v8526_v34 = vpop.f32.mrb[177].mxu1 }
 0x695   : > { %v7489_v29 = vpop.f32.mrb[178].mxu1 }
 0x696   : > { %v7608_v38 = vmax.f32 %v7487_v7, 0.0  ;;  %v7490_v1 = vadd.f32 %v13457_v51, %v7489_v29  ;;  %v8527_v14 = vpop.f32.mrb[179].mxu1 }
 0x698   : > { %7666 = vst.msk [vmem:[%s13465_s19 + $0x120] sm:$0xff] %vm7629_vm12, %v7608_v38  ;;  %v7609_v13 = vmax.f32 %v7490_v1, 0.0 }
 0x69a   : > { %7667 = vst.msk [vmem:[%s13465_s19 + $0x128] sm:$0xff] %vm7629_vm12, %v7609_v13 }
 0x69e   : > { %v7494_v5 = vpop.f32.mrb[180].mxu1 }
 0x69f   : > { %v7495_v35 = vadd.f32 %v13457_v51, %v7494_v5  ;;  %v8530_v6 = vpop.f32.mrb[181].mxu1 }
 0x6a0   : > { %v7497_v25 = vpop.f32.mrb[182].mxu1 }
 0x6a1   : > { %v7610_v21 = vmax.f32 %v7495_v35, 0.0  ;;  %v7498_v61 = vadd.f32 %v13457_v51, %v7497_v25  ;;  %v8531_v42 = vpop.f32.mrb[183].mxu1 }
 0x6a3   : > { %7668 = vst.msk [vmem:[%s13465_s19 + $0x130] sm:$0xff] %vm7629_vm12, %v7610_v21  ;;  %v7611_v3 = vmax.f32 %v7498_v61, 0.0 }
 0x6a5   : > { %7669 = vst.msk [vmem:[%s13465_s19 + $0x138] sm:$0xff] %vm7629_vm12, %v7611_v3 }
 0x6ae   : > { %v7502_v18 = vpop.f32.mrb[184].mxu1 }
 0x6af   : > { %v7503_v20 = vadd.f32 %v13457_v51, %v7502_v18  ;;  %v8534_v11 = vpop.f32.mrb[185].mxu1 }
 0x6b0   : > { %v7505_v55 = vpop.f32.mrb[186].mxu1 }
 0x6b1   : > { %v7612_v28 = vmax.f32 %v7503_v20, 0.0  ;;  %v7506_v4 = vadd.f32 %v13457_v51, %v7505_v55  ;;  %v8535_v54 = vpop.f32.mrb[187].mxu1 }
 0x6b3   : > { %7670 = vst.msk [vmem:[%s13465_s19 + $0x140] sm:$0xff] %vm7629_vm12, %v7612_v28  ;;  %v7613_v23 = vmax.f32 %v7506_v4, 0.0 }
 0x6b5   : > { %7671 = vst.msk [vmem:[%s13465_s19 + $0x148] sm:$0xff] %vm7629_vm12, %v7613_v23 }
 0x6be   : > { %v7510_v37 = vpop.f32.mrb[188].mxu1 }
 0x6bf   : > { %v7511_v56 = vadd.f32 %v13457_v51, %v7510_v37  ;;  %v8538_v36 = vpop.f32.mrb[189].mxu1 }
 0x6c0   : > { %v7513_v59 = vpop.f32.mrb[190].mxu1 }
 0x6c1   : > { %v7614_v8 = vmax.f32 %v7511_v56, 0.0  ;;  %v7514_v60 = vadd.f32 %v13457_v51, %v7513_v59  ;;  %v8539_v0 = vpop.f32.mrb[191].mxu1 }
 0x6c3   : > { %7672 = vst.msk [vmem:[%s13465_s19 + $0x150] sm:$0xff] %vm7629_vm12, %v7614_v8  ;;  %v7615_v47 = vmax.f32 %v7514_v60, 0.0 }
 0x6c5   : > { %7673 = vst.msk [vmem:[%s13465_s19 + $0x158] sm:$0xff] %vm7629_vm12, %v7615_v47 }
 0x6ce   : > { %v7518_v31 = vpop.f32.mrb[192].mxu1 }
 0x6cf   : > { %v7519_v26 = vadd.f32 %v13457_v51, %v7518_v31  ;;  %v8542_v9 = vpop.f32.mrb[193].mxu1 }
 0x6d0   : > { %v7521_v40 = vpop.f32.mrb[194].mxu1 }
 0x6d1   : > { %v7616_v10 = vmax.f32 %v7519_v26, 0.0  ;;  %v7522_v39 = vadd.f32 %v13457_v51, %v7521_v40  ;;  %v8543_v44 = vpop.f32.mrb[195].mxu1 }
 0x6d3   : > { %7674 = vst.msk [vmem:[%s13465_s19 + $0x160] sm:$0xff] %vm7629_vm12, %v7616_v10  ;;  %v7617_v53 = vmax.f32 %v7522_v39, 0.0 }
 0x6d5   : > { %7675 = vst.msk [vmem:[%s13465_s19 + $0x168] sm:$0xff] %vm7629_vm12, %v7617_v53 }
 0x6de   : > { %v7526_v2 = vpop.f32.mrb[196].mxu1 }
 0x6df   : > { %v7527_v43 = vadd.f32 %v13457_v51, %v7526_v2  ;;  %v8546_v50 = vpop.f32.mrb[197].mxu1 }
 0x6e0   : > { %v7529_v49 = vpop.f32.mrb[198].mxu1 }
 0x6e1   : > { %v7618_v22 = vmax.f32 %v7527_v43, 0.0  ;;  %v7530_v52 = vadd.f32 %v13457_v51, %v7529_v49  ;;  %v8547_v12 = vpop.f32.mrb[199].mxu1 }
 0x6e2   : > { %v7342_v17 = vpop.f32.mrb[92].mxu0 }
 0x6e3   : > { %7676 = vst.msk [vmem:[%s13465_s19 + $0x170] sm:$0xff] %vm7629_vm12, %v7618_v22  ;;  %v7619_v63 = vmax.f32 %v7530_v52, 0.0  ;;  %v7343_v41 = vadd.f32 %v13457_v51, %v7342_v17  ;;  %v8454_v19 = vpop.f32.mrb[93].mxu0 }
 0x6e4   : > { %v7345_v62 = vpop.f32.mrb[94].mxu0 }
 0x6e5   : > { %7677 = vst.msk [vmem:[%s13465_s19 + $0x178] sm:$0xff] %vm7629_vm12, %v7619_v63  ;;  %v7572_v58 = vmax.f32 %v7343_v41, 0.0  ;;  %v7346_v30 = vadd.f32 %v13457_v51, %v7345_v62  ;;  %v8455_v27 = vpop.f32.mrb[95].mxu0 }
 0x6e7   : > { %7630 = vst.msk [vmem:[%s13465_s19] sm:$0xff] %vm7629_vm12, %v7572_v58  ;;  %v7573_v24 = vmax.f32 %v7346_v30, 0.0 }
 0x6e9   : > { %7631 = vst.msk [vmem:[%s13465_s19 + $0x8] sm:$0xff] %vm7629_vm12, %v7573_v24 }
 0x6ed   : > { %v7534_v33 = vpop.f32.mrb[200].mxu1 }
 0x6ee   : > { %v7535_v15 = vadd.f32 %v13457_v51, %v7534_v33  ;;  %v8550_v32 = vpop.f32.mrb[201].mxu1 }
 0x6ef   : > { %v7537_v48 = vpop.f32.mrb[202].mxu1 }
 0x6f0   : > { %v7620_v46 = vmax.f32 %v7535_v15, 0.0  ;;  %v7538_v16 = vadd.f32 %v13457_v51, %v7537_v48  ;;  %v8551_v45 = vpop.f32.mrb[203].mxu1 }
 0x6f2   : > { %7678 = vst.msk [vmem:[%s13465_s19 + $0x180] sm:$0xff] %vm7629_vm12, %v7620_v46  ;;  %v7621_v57 = vmax.f32 %v7538_v16, 0.0 }
 0x6f4   : > { %7679 = vst.msk [vmem:[%s13465_s19 + $0x188] sm:$0xff] %vm7629_vm12, %v7621_v57 }
 0x6f6   : > { %v7542_v7 = vpop.f32.mrb[204].mxu1 }
 0x6f7   : > { %v7543_v34 = vadd.f32 %v13457_v51, %v7542_v7  ;;  %v8554_v29 = vpop.f32.mrb[205].mxu1 }
 0x6f8   : > { %v7545_v38 = vpop.f32.mrb[206].mxu1 }
 0x6f9   : > { %v7622_v1 = vmax.f32 %v7543_v34, 0.0  ;;  %v7546_v14 = vadd.f32 %v13457_v51, %v7545_v38  ;;  %v8555_v13 = vpop.f32.mrb[207].mxu1 }
 0x6fb   : > { %7680 = vst.msk [vmem:[%s13465_s19 + $0x190] sm:$0xff] %vm7629_vm12, %v7622_v1  ;;  %v7623_v5 = vmax.f32 %v7546_v14, 0.0 }
 0x6fd   : > { %7681 = vst.msk [vmem:[%s13465_s19 + $0x198] sm:$0xff] %vm7629_vm12, %v7623_v5 }
 0x6fe   : > { %v7550_v35 = vpop.f32.mrb[208].mxu1 }
 0x6ff   : > { %v7551_v6 = vadd.f32 %v13457_v51, %v7550_v35  ;;  %v8558_v25 = vpop.f32.mrb[209].mxu1 }
 0x700   : > { %v7553_v21 = vpop.f32.mrb[210].mxu1  ;;  %v7350_v61 = vpop.f32.mrb[96].mxu0 }
 0x701   : > { %v7624_v42 = vmax.f32 %v7551_v6, 0.0  ;;  %v7554_v3 = vadd.f32 %v13457_v51, %v7553_v21  ;;  %v7351_v18 = vadd.f32 %v13457_v51, %v7350_v61  ;;  %v8559_v20 = vpop.f32.mrb[211].mxu1  ;;  %v8458_v11 = vpop.f32.mrb[97].mxu0 }
 0x702   : > { %v7353_v55 = vpop.f32.mrb[98].mxu0 }
 0x703   : > { %7682 = vst.msk [vmem:[%s13465_s19 + $0x1a0] sm:$0xff] %vm7629_vm12, %v7624_v42  ;;  %v7625_v28 = vmax.f32 %v7554_v3, 0.0  ;;  %v7574_v4 = vmax.f32 %v7351_v18, 0.0  ;;  %v7354_v54 = vadd.f32 %v13457_v51, %v7353_v55  ;;  %v8459_v23 = vpop.f32.mrb[99].mxu0 }
 0x705   : > { %7683 = vst.msk [vmem:[%s13465_s19 + $0x1a8] sm:$0xff] %vm7629_vm12, %v7625_v28  ;;  %7632 = vst.msk [vmem:[%s13465_s19 + $0x10] sm:$0xff] %vm7629_vm12, %v7574_v4  ;;  %v7575_v37 = vmax.f32 %v7354_v54, 0.0 }
 0x706   : > { %v7558_v56 = vpop.f32.mrb[212].mxu1 }
 0x707   : > { %7633 = vst.msk [vmem:[%s13465_s19 + $0x18] sm:$0xff] %vm7629_vm12, %v7575_v37  ;;  %v7559_v36 = vadd.f32 %v13457_v51, %v7558_v56  ;;  %v8562_v59 = vpop.f32.mrb[213].mxu1 }
 0x708   : > { %v7561_v8 = vpop.f32.mrb[214].mxu1 }
 0x709   : > { %v7626_v60 = vmax.f32 %v7559_v36, 0.0  ;;  %v7562_v0 = vadd.f32 %v13457_v51, %v7561_v8  ;;  %v8563_v47 = vpop.f32.mrb[215].mxu1 }
 0x70b   : > { %7684 = vst.msk [vmem:[%s13465_s19 + $0x1b0] sm:$0xff] %vm7629_vm12, %v7626_v60  ;;  %v7627_v31 = vmax.f32 %v7562_v0, 0.0 }
 0x70c   : > { %v7358_v26 = vpop.f32.mrb[100].mxu0 }
 0x70d   : > { %7685 = vst.msk [vmem:[%s13465_s19 + $0x1b8] sm:$0xff] %vm7629_vm12, %v7627_v31  ;;  %v7359_v9 = vadd.f32 %v13457_v51, %v7358_v26  ;;  %v8462_v40 = vpop.f32.mrb[101].mxu0 }
 0x70e   : > { %v7361_v10 = vpop.f32.mrb[102].mxu0 }
 0x70f   : > { %v7576_v39 = vmax.f32 %v7359_v9, 0.0  ;;  %v7362_v44 = vadd.f32 %v13457_v51, %v7361_v10  ;;  %v7566_v53 = vpop.f32.mrb[216].mxu1  ;;  %v8463_v2 = vpop.f32.mrb[103].mxu0 }
 0x710   : > { %v7567_v43 = vadd.f32 %v13457_v51, %v7566_v53  ;;  %v8566_v50 = vpop.f32.mrb[217].mxu1 }
 0x711   : > { %7634 = vst.msk [vmem:[%s13465_s19 + $0x20] sm:$0xff] %vm7629_vm12, %v7576_v39  ;;  %v7577_v49 = vmax.f32 %v7362_v44, 0.0  ;;  %v7569_v22 = vpop.f32.mrb[218].mxu1 }
 0x712   : > { %v7628_v52 = vmax.f32 %v7567_v43, 0.0  ;;  %v8567_v12 = vpop.f32.mrb[219].mxu1 }
 0x713   : > { %7635 = vst.msk [vmem:[%s13465_s19 + $0x28] sm:$0xff] %vm7629_vm12, %v7577_v49 }
 0x714   : > { %7686 = vst.msk [vmem:[%s13465_s19 + $0x1c0] sm:$0xff] %vm7629_vm12, %v7628_v52 }
 0x715 PF: > { %s22_s21 = sadd.s32 1, %s8907_s21  }
 0x716   : > { %p19_p4 = scmp.ge.s32.totalorder %s22_s21, 4  }
 0x718   :  { %21 = sbr.rel (!%p19_p4) target bundleno = 1 (0x1), region = 98 }

</bundles_post_ra>
